<compile_context>
chip_gen: v7x
topology: tpu7x:2x2x1
jax: 0.10.0
libtpu: 0.0.40
codegen_flags: <defaults>
</compile_context>

<pallas_src>
import functools

import jax
import jax.numpy as jnp
from jax.experimental import pallas as pl
from jax.experimental.pallas import tpu as pltpu

# Small, lane-friendly synthetic sizes.
B = 256    # number of sentences (batch)
L = 16     # tokens per sentence
V = 256    # vocabulary size
D = 128    # Doc2Vec vector_size


def _tensorcores_per_chip() -> int:
    """Best-effort TensorCores-per-chip (2 on v7x, 1 on v5e/v6e).

    Safe fallback is 1 (single block): a wrong guess only forgoes the v7x
    megacore split, it never breaks compilation or correctness.
    """
    try:
        info = pltpu.get_tpu_info()
        for name in ("num_cores", "core_count", "tensorcores_per_chip",
                     "num_tensorcores"):
            n = getattr(info, name, None)
            if isinstance(n, int) and 1 <= n <= 8:
                return n
    except Exception:
        pass
    return 1


def para2vec_kernel(tok_ref, embp_ref, out_ref):
    """One grid step processes TB sentences.

    tok_ref  : [TB, L] int32    token ids for this block of sentences
    embp_ref : [V, D]  bfloat16 pre-projected, pre-scaled table ((emb @ W)/L)
    out_ref  : [TB, D] float32  inferred doc vectors for this block
    """
    tok = tok_ref[...]                                   # [TB, L] int32
    _, Lk = tok_ref.shape
    Vk = embp_ref.shape[0]

    # Pooled token counts: counts[b, v] = #occurrences of v in sentence b
    # (the 1/L mean is folded into embp). Built as L vector compares on
    # [TB, V] (pure VPU); the vocab iota is a single [1, V] row broadcast over
    # sublanes, so it costs 2 vregs instead of a full [TB, V] tensor.
    vio = jax.lax.broadcasted_iota(jnp.int32, (1, Vk), 1)         # [1, V]
    counts = (vio == tok[:, 0:1]).astype(jnp.float32)             # [TB, V]
    for t in range(1, Lk):  # L is a small compile-time constant; unrolled
        counts = counts + (vio == tok[:, t:t + 1]).astype(jnp.float32)

    # Single bf16 MXU matmul against the resident table (f32 accumulator),
    # then the nonlinearity. counts values are integers <= L, exact in bf16.
    out_ref[...] = jnp.tanh(
        jnp.dot(counts.astype(jnp.bfloat16), embp_ref[...],
                preferred_element_type=jnp.float32))


@functools.partial(jax.jit, static_argnames=("num_blocks",))
def para2vec_forward(tokens, emb, w, *, num_blocks=None):
    """tokens: [B, L] int32 -> [B, D] float32 doc vectors."""
    Bn, Ln = tokens.shape
    Vn, _ = emb.shape
    Dn = w.shape[1]

    # Grid: 1 block on single-TC chips (v5e/v6e), one block per TensorCore on
    # v7x so the "parallel" axis shards across cores.
    if num_blocks is None:
        num_blocks = _tensorcores_per_chip()
    if Bn % num_blocks != 0 or (Bn // num_blocks) % 8 != 0:
        num_blocks = 1
    tb = Bn // num_blocks

    # Frozen weights: fold the projection AND the 1/L mean into the table once
    # (all linear, commutes), then cast to bf16 for a native-rate MXU matmul.
    emb_proj = (jnp.dot(emb, w, preferred_element_type=jnp.float32)
                * (1.0 / Ln)).astype(jnp.bfloat16)               # [V, D]

    return pl.pallas_call(
        para2vec_kernel,
        out_shape=jax.ShapeDtypeStruct((Bn, Dn), jnp.float32),
        grid_spec=pltpu.PrefetchScalarGridSpec(
            num_scalar_prefetch=0,
            grid=(num_blocks,),
            in_specs=[
                pl.BlockSpec((tb, Ln), lambda i: (i, 0)),   # per-block tokens
                pl.BlockSpec((Vn, Dn), lambda i: (0, 0)),   # resident table
            ],
            out_specs=pl.BlockSpec((tb, Dn), lambda i: (i, 0)),
        ),
        compiler_params=pltpu.CompilerParams(
            dimension_semantics=("parallel",)),
    )(tokens, emb_proj)


def reference_forward(tokens, emb, w):
    """Pure-JAX f32 reference mirroring the PyTorch-style semantics."""
    word_vecs = emb[tokens]                      # [B, L, D] gather
    pooled = word_vecs.mean(axis=1)              # [B, D]
    return jnp.tanh(pooled @ w)                  # [B, D]


if __name__ == "__main__":
    key = jax.random.PRNGKey(0)
    k_tok, k_emb, k_w = jax.random.split(key, 3)

    # Deterministic synthetic "model" parameters (gensim-style small uniform init).
    emb = jax.random.uniform(k_emb, (V, D), jnp.float32,
                             minval=-0.5 / D, maxval=0.5 / D)
    w = jax.random.uniform(k_w, (D, D), jnp.float32,
                           minval=-0.1, maxval=0.1)

    # Deterministic "sentences": token-id sequences.
    tokens = jax.random.randint(k_tok, (B, L), 0, V, dtype=jnp.int32)

    out = jax.block_until_ready(para2vec_forward(tokens, emb, w))

    ref = reference_forward(tokens, emb, w)
    assert out.shape == (B, D) and out.dtype == jnp.float32
    # Tolerance covers (a) f32 summation-order differences of the algebraically
    # identical counts@(emb@W/L) form and (b) the bf16 rounding of the frozen
    # table (~0.2% relative, ~1e-6 absolute at these magnitudes).
    assert jnp.allclose(out, ref, atol=3e-5, rtol=2e-2)

    print("KERNEL_OK")
</pallas_src>

<mosaic_0001>
module attributes {stable_mosaic.version = 11 : i64} {
  func.func @para2vec_kernel(%arg0: i32, %arg1: memref<256x16xi32, #tpu.memory_space<vmem>>, %arg2: memref<256x128xbf16, #tpu.memory_space<vmem>>, %arg3: memref<256x128xf32, #tpu.memory_space<vmem>>) attributes {dimension_semantics = [#tpu.dimension_semantics<parallel>], iteration_bounds = array<i64: 1>, scalar_prefetch = 0 : i64, scratch_operands = 0 : i64, tpu.core_type = #tpu.core_type<tc>, window_params = [{transform_indices = @transform_0, window_bounds = array<i64: 256, 16>}, {pipeline_mode = #tpu.pipeline_mode<synchronous>, transform_indices = @transform_1, window_bounds = array<i64: 256, 128>}, {transform_indices = @transform_2, window_bounds = array<i64: 256, 128>}]} {
    %c0 = arith.constant 0 : index
    %c0_0 = arith.constant 0 : index
    %0 = vector.load %arg1[%c0, %c0_0] : memref<256x16xi32, #tpu.memory_space<vmem>>, vector<256x16xi32>
    %1 = tpu.iota {dimensions = array<i32: 1>} : vector<1x256xi32>
    %2 = vector.extract_strided_slice %0 {offsets = [0, 0], sizes = [256, 1], strides = [1, 1]} : vector<256x16xi32> to vector<256x1xi32>
    %3 = vector.broadcast %1 : vector<1x256xi32> to vector<256x256xi32>
    %4 = vector.broadcast %2 : vector<256x1xi32> to vector<256x256xi32>
    %5 = arith.cmpi eq, %3, %4 : vector<256x256xi32>
    %6 = arith.extui %5 : vector<256x256xi1> to vector<256x256xi32>
    %7 = arith.sitofp %6 : vector<256x256xi32> to vector<256x256xf32>
    %8 = vector.extract_strided_slice %0 {offsets = [0, 1], sizes = [256, 1], strides = [1, 1]} : vector<256x16xi32> to vector<256x1xi32>
    %9 = vector.broadcast %1 : vector<1x256xi32> to vector<256x256xi32>
    %10 = vector.broadcast %8 : vector<256x1xi32> to vector<256x256xi32>
    %11 = arith.cmpi eq, %9, %10 : vector<256x256xi32>
    %12 = arith.extui %11 : vector<256x256xi1> to vector<256x256xi32>
    %13 = arith.sitofp %12 : vector<256x256xi32> to vector<256x256xf32>
    %14 = arith.addf %7, %13 : vector<256x256xf32>
    %15 = vector.extract_strided_slice %0 {offsets = [0, 2], sizes = [256, 1], strides = [1, 1]} : vector<256x16xi32> to vector<256x1xi32>
    %16 = vector.broadcast %1 : vector<1x256xi32> to vector<256x256xi32>
    %17 = vector.broadcast %15 : vector<256x1xi32> to vector<256x256xi32>
    %18 = arith.cmpi eq, %16, %17 : vector<256x256xi32>
    %19 = arith.extui %18 : vector<256x256xi1> to vector<256x256xi32>
    %20 = arith.sitofp %19 : vector<256x256xi32> to vector<256x256xf32>
    %21 = arith.addf %14, %20 : vector<256x256xf32>
    %22 = vector.extract_strided_slice %0 {offsets = [0, 3], sizes = [256, 1], strides = [1, 1]} : vector<256x16xi32> to vector<256x1xi32>
    %23 = vector.broadcast %1 : vector<1x256xi32> to vector<256x256xi32>
    %24 = vector.broadcast %22 : vector<256x1xi32> to vector<256x256xi32>
    %25 = arith.cmpi eq, %23, %24 : vector<256x256xi32>
    %26 = arith.extui %25 : vector<256x256xi1> to vector<256x256xi32>
    %27 = arith.sitofp %26 : vector<256x256xi32> to vector<256x256xf32>
    %28 = arith.addf %21, %27 : vector<256x256xf32>
    %29 = vector.extract_strided_slice %0 {offsets = [0, 4], sizes = [256, 1], strides = [1, 1]} : vector<256x16xi32> to vector<256x1xi32>
    %30 = vector.broadcast %1 : vector<1x256xi32> to vector<256x256xi32>
    %31 = vector.broadcast %29 : vector<256x1xi32> to vector<256x256xi32>
    %32 = arith.cmpi eq, %30, %31 : vector<256x256xi32>
    %33 = arith.extui %32 : vector<256x256xi1> to vector<256x256xi32>
    %34 = arith.sitofp %33 : vector<256x256xi32> to vector<256x256xf32>
    %35 = arith.addf %28, %34 : vector<256x256xf32>
    %36 = vector.extract_strided_slice %0 {offsets = [0, 5], sizes = [256, 1], strides = [1, 1]} : vector<256x16xi32> to vector<256x1xi32>
    %37 = vector.broadcast %1 : vector<1x256xi32> to vector<256x256xi32>
    %38 = vector.broadcast %36 : vector<256x1xi32> to vector<256x256xi32>
    %39 = arith.cmpi eq, %37, %38 : vector<256x256xi32>
    %40 = arith.extui %39 : vector<256x256xi1> to vector<256x256xi32>
    %41 = arith.sitofp %40 : vector<256x256xi32> to vector<256x256xf32>
    %42 = arith.addf %35, %41 : vector<256x256xf32>
    %43 = vector.extract_strided_slice %0 {offsets = [0, 6], sizes = [256, 1], strides = [1, 1]} : vector<256x16xi32> to vector<256x1xi32>
    %44 = vector.broadcast %1 : vector<1x256xi32> to vector<256x256xi32>
    %45 = vector.broadcast %43 : vector<256x1xi32> to vector<256x256xi32>
    %46 = arith.cmpi eq, %44, %45 : vector<256x256xi32>
    %47 = arith.extui %46 : vector<256x256xi1> to vector<256x256xi32>
    %48 = arith.sitofp %47 : vector<256x256xi32> to vector<256x256xf32>
    %49 = arith.addf %42, %48 : vector<256x256xf32>
    %50 = vector.extract_strided_slice %0 {offsets = [0, 7], sizes = [256, 1], strides = [1, 1]} : vector<256x16xi32> to vector<256x1xi32>
    %51 = vector.broadcast %1 : vector<1x256xi32> to vector<256x256xi32>
    %52 = vector.broadcast %50 : vector<256x1xi32> to vector<256x256xi32>
    %53 = arith.cmpi eq, %51, %52 : vector<256x256xi32>
    %54 = arith.extui %53 : vector<256x256xi1> to vector<256x256xi32>
    %55 = arith.sitofp %54 : vector<256x256xi32> to vector<256x256xf32>
    %56 = arith.addf %49, %55 : vector<256x256xf32>
    %57 = vector.extract_strided_slice %0 {offsets = [0, 8], sizes = [256, 1], strides = [1, 1]} : vector<256x16xi32> to vector<256x1xi32>
    %58 = vector.broadcast %1 : vector<1x256xi32> to vector<256x256xi32>
    %59 = vector.broadcast %57 : vector<256x1xi32> to vector<256x256xi32>
    %60 = arith.cmpi eq, %58, %59 : vector<256x256xi32>
    %61 = arith.extui %60 : vector<256x256xi1> to vector<256x256xi32>
    %62 = arith.sitofp %61 : vector<256x256xi32> to vector<256x256xf32>
    %63 = arith.addf %56, %62 : vector<256x256xf32>
    %64 = vector.extract_strided_slice %0 {offsets = [0, 9], sizes = [256, 1], strides = [1, 1]} : vector<256x16xi32> to vector<256x1xi32>
    %65 = vector.broadcast %1 : vector<1x256xi32> to vector<256x256xi32>
    %66 = vector.broadcast %64 : vector<256x1xi32> to vector<256x256xi32>
    %67 = arith.cmpi eq, %65, %66 : vector<256x256xi32>
    %68 = arith.extui %67 : vector<256x256xi1> to vector<256x256xi32>
    %69 = arith.sitofp %68 : vector<256x256xi32> to vector<256x256xf32>
    %70 = arith.addf %63, %69 : vector<256x256xf32>
    %71 = vector.extract_strided_slice %0 {offsets = [0, 10], sizes = [256, 1], strides = [1, 1]} : vector<256x16xi32> to vector<256x1xi32>
    %72 = vector.broadcast %1 : vector<1x256xi32> to vector<256x256xi32>
    %73 = vector.broadcast %71 : vector<256x1xi32> to vector<256x256xi32>
    %74 = arith.cmpi eq, %72, %73 : vector<256x256xi32>
    %75 = arith.extui %74 : vector<256x256xi1> to vector<256x256xi32>
    %76 = arith.sitofp %75 : vector<256x256xi32> to vector<256x256xf32>
    %77 = arith.addf %70, %76 : vector<256x256xf32>
    %78 = vector.extract_strided_slice %0 {offsets = [0, 11], sizes = [256, 1], strides = [1, 1]} : vector<256x16xi32> to vector<256x1xi32>
    %79 = vector.broadcast %1 : vector<1x256xi32> to vector<256x256xi32>
    %80 = vector.broadcast %78 : vector<256x1xi32> to vector<256x256xi32>
    %81 = arith.cmpi eq, %79, %80 : vector<256x256xi32>
    %82 = arith.extui %81 : vector<256x256xi1> to vector<256x256xi32>
    %83 = arith.sitofp %82 : vector<256x256xi32> to vector<256x256xf32>
    %84 = arith.addf %77, %83 : vector<256x256xf32>
    %85 = vector.extract_strided_slice %0 {offsets = [0, 12], sizes = [256, 1], strides = [1, 1]} : vector<256x16xi32> to vector<256x1xi32>
    %86 = vector.broadcast %1 : vector<1x256xi32> to vector<256x256xi32>
    %87 = vector.broadcast %85 : vector<256x1xi32> to vector<256x256xi32>
    %88 = arith.cmpi eq, %86, %87 : vector<256x256xi32>
    %89 = arith.extui %88 : vector<256x256xi1> to vector<256x256xi32>
    %90 = arith.sitofp %89 : vector<256x256xi32> to vector<256x256xf32>
    %91 = arith.addf %84, %90 : vector<256x256xf32>
    %92 = vector.extract_strided_slice %0 {offsets = [0, 13], sizes = [256, 1], strides = [1, 1]} : vector<256x16xi32> to vector<256x1xi32>
    %93 = vector.broadcast %1 : vector<1x256xi32> to vector<256x256xi32>
    %94 = vector.broadcast %92 : vector<256x1xi32> to vector<256x256xi32>
    %95 = arith.cmpi eq, %93, %94 : vector<256x256xi32>
    %96 = arith.extui %95 : vector<256x256xi1> to vector<256x256xi32>
    %97 = arith.sitofp %96 : vector<256x256xi32> to vector<256x256xf32>
    %98 = arith.addf %91, %97 : vector<256x256xf32>
    %99 = vector.extract_strided_slice %0 {offsets = [0, 14], sizes = [256, 1], strides = [1, 1]} : vector<256x16xi32> to vector<256x1xi32>
    %100 = vector.broadcast %1 : vector<1x256xi32> to vector<256x256xi32>
    %101 = vector.broadcast %99 : vector<256x1xi32> to vector<256x256xi32>
    %102 = arith.cmpi eq, %100, %101 : vector<256x256xi32>
    %103 = arith.extui %102 : vector<256x256xi1> to vector<256x256xi32>
    %104 = arith.sitofp %103 : vector<256x256xi32> to vector<256x256xf32>
    %105 = arith.addf %98, %104 : vector<256x256xf32>
    %106 = vector.extract_strided_slice %0 {offsets = [0, 15], sizes = [256, 1], strides = [1, 1]} : vector<256x16xi32> to vector<256x1xi32>
    %107 = vector.broadcast %1 : vector<1x256xi32> to vector<256x256xi32>
    %108 = vector.broadcast %106 : vector<256x1xi32> to vector<256x256xi32>
    %109 = arith.cmpi eq, %107, %108 : vector<256x256xi32>
    %110 = arith.extui %109 : vector<256x256xi1> to vector<256x256xi32>
    %111 = arith.sitofp %110 : vector<256x256xi32> to vector<256x256xf32>
    %112 = arith.addf %105, %111 : vector<256x256xf32>
    %113 = arith.truncf %112 : vector<256x256xf32> to vector<256x256xbf16>
    %c0_1 = arith.constant 0 : index
    %c0_2 = arith.constant 0 : index
    %114 = vector.load %arg2[%c0_1, %c0_2] : memref<256x128xbf16, #tpu.memory_space<vmem>>, vector<256x128xbf16>
    %cst = arith.constant dense<0.000000e+00> : vector<256x128xf32>
    %115 = tpu.matmul %113, %114, %cst {dimension_numbers = #tpu.dot_dimension_numbers<[1], [0], [0], [1], [0, 0, 1, 1], [], []>} : vector<256x256xbf16>, vector<256x128xbf16>, vector<256x128xf32> -> vector<256x128xf32>
    %116 = math.tanh %115 : vector<256x128xf32>
    %c0_3 = arith.constant 0 : index
    %c0_4 = arith.constant 0 : index
    %117 = vector.load %arg3[%c0_3, %c0_4] : memref<256x128xf32, #tpu.memory_space<vmem>>, vector<256x128xf32>
    tpu.vector_store %arg3[%c0_3, %c0_4], %116 {strides = array<i32>} : memref<256x128xf32, #tpu.memory_space<vmem>>, vector<256x128xf32>,
    return
  }
  func.func @transform_0(%arg0: i32) -> (i32, i32) {
    %c0_i32 = arith.constant 0 : i32
    %c0_i32_0 = arith.constant 0 : i32
    return %arg0, %c0_i32 : i32, i32
  }
  func.func @transform_1(%arg0: i32) -> (i32, i32) {
    %c0_i32 = arith.constant 0 : i32
    %c0_i32_0 = arith.constant 0 : i32
    %c0_i32_1 = arith.constant 0 : i32
    return %c0_i32, %c0_i32_0 : i32, i32
  }
  func.func @transform_2(%arg0: i32) -> (i32, i32) {
    %c0_i32 = arith.constant 0 : i32
    %c0_i32_0 = arith.constant 0 : i32
    return %arg0, %c0_i32 : i32, i32
  }
}

</mosaic_0001>

<bundles_post_ra>
// kernel: para2vec_forward.1
= control target key start
LH: loop header
LB: loop body
LE: loop exit
PB: predicated region body
PF: predicated region fallthrough
CT: control target
= control target key end

     0   :  { %v7498_v2 = vmov 0   ;;  %s15998_s0 = inlined_call_operand.vmem [shape: s32[256,16], index: 0, kind: input, shape index: {}]   ;;  %s15999_s1 = inlined_call_operand.vmem [shape: bf16[256,128], index: 1, kind: input, shape index: {}]   ;;  %s16000_s2 = inlined_call_operand.hbm [shape: f32[256,128], index: 2, kind: output, shape index: {}]  }
   0x1   :  { %v7536_v0 = vld [vmem:[%s15998_s0 + $0x10] sm:$0xff]  ;;  %v7541_v1 = vld [vmem:[%s15998_s0] sm:$0xff]  ;;  %7206 = vset.pattern.permute.xlu1 %v7498_v2  ;;  %7205 = vset.pattern.permute.xlu0 %v7498_v2  ;;  %v7548_v3 = vld [vmem:[%s15998_s0 + $0x18] sm:$0xff] }
   0x2   :  { %55 = vperm.xlu1 %7206, %v7536_v0   ;;  %49 = vperm.xlu0 %7205, %v7541_v1   ;;  %v7553_v4 = vld [vmem:[%s15998_s0 + $0x8] sm:$0xff]  ;;  %v7565_v6 = vld [vmem:[%s15998_s0 + $0x20] sm:$0xff]  ;;  %v7572_v7 = vld [vmem:[%s15998_s0 + $0x38] sm:$0xff] }
   0x3   :  { %v7560_v5 = vld [vmem:[%s15998_s0 + $0x28] sm:$0xff]  ;;  %v7577_v8 = vld [vmem:[%s15998_s0 + $0x30] sm:$0xff]  ;;  %v7587_v10 = vld [vmem:[%s15998_s0 + $0x40] sm:$0xff] }
   0x4   :  { %v7582_v9 = vld [vmem:[%s15998_s0 + $0x48] sm:$0xff]  ;;  %v7594_v11 = vld [vmem:[%s15998_s0 + $0x58] sm:$0xff]  ;;  %v7599_v12 = vld [vmem:[%s15998_s0 + $0x50] sm:$0xff] }
   0x6   :  { %58 = vperm.xlu1 %7206, %v7548_v3   ;;  %52 = vperm.xlu0 %7205, %v7553_v4  }
   0xa   :  { %64 = vperm.xlu1 %7206, %v7560_v5   ;;  %61 = vperm.xlu0 %7205, %v7565_v6  }
   0xe   :  { %70 = vperm.xlu1 %7206, %v7572_v7   ;;  %67 = vperm.xlu0 %7205, %v7577_v8  }
  0x12   :  { %76 = vperm.xlu1 %7206, %v7582_v9   ;;  %73 = vperm.xlu0 %7205, %v7587_v10  }
  0x13   :  { %7 = vsyncpa [#allocation3], 0  ;;  %v7608_v13 = vld [vmem:[%s15998_s0 + $0x68] sm:$0xff]  ;;  %v7613_v14 = vld [vmem:[%s15998_s0 + $0x60] sm:$0xff]  ;;  %v7499_v33 = vmov 1   ;;  %v7500_v36 = vmov 2  }
  0x14   :  { %v7620_v15 = vld [vmem:[%s15998_s0 + $0x78] sm:$0xff]  ;;  %v7625_v16 = vld [vmem:[%s15998_s0 + $0x70] sm:$0xff]  ;;  %v7632_v17 = vld [vmem:[%s15998_s0 + $0x88] sm:$0xff] }
  0x15   :  { %v7637_v18 = vld [vmem:[%s15998_s0 + $0x80] sm:$0xff]  ;;  %v7644_v19 = vld [vmem:[%s15998_s0 + $0x98] sm:$0xff]  ;;  %v7649_v20 = vld [vmem:[%s15998_s0 + $0x90] sm:$0xff] }
  0x16   :  { %82 = vperm.xlu1 %7206, %v7594_v11   ;;  %79 = vperm.xlu0 %7205, %v7599_v12   ;;  %v7656_v21 = vld [vmem:[%s15998_s0 + $0xa8] sm:$0xff]  ;;  %v7661_v22 = vld [vmem:[%s15998_s0 + $0xa0] sm:$0xff]  ;;  %v7668_v23 = vld [vmem:[%s15998_s0 + $0xb8] sm:$0xff] }
  0x17   :  { %v7673_v24 = vld [vmem:[%s15998_s0 + $0xb0] sm:$0xff]  ;;  %v7680_v25 = vld [vmem:[%s15998_s0 + $0xc8] sm:$0xff]  ;;  %v7685_v26 = vld [vmem:[%s15998_s0 + $0xc0] sm:$0xff] }
  0x18   :  { %v7692_v27 = vld [vmem:[%s15998_s0 + $0xd8] sm:$0xff]  ;;  %v7697_v28 = vld [vmem:[%s15998_s0 + $0xd0] sm:$0xff]  ;;  %v7704_v29 = vld [vmem:[%s15998_s0 + $0xe8] sm:$0xff] }
  0x19   :  { %v7709_v30 = vld [vmem:[%s15998_s0 + $0xe0] sm:$0xff]  ;;  %v7716_v31 = vld [vmem:[%s15998_s0 + $0xf8] sm:$0xff]  ;;  %v7721_v32 = vld [vmem:[%s15998_s0 + $0xf0] sm:$0xff] }
  0x1a   :  { %88 = vperm.xlu1 %7206, %v7608_v13   ;;  %85 = vperm.xlu0 %7205, %v7613_v14  }
  0x1e   :  { %94 = vperm.xlu1 %7206, %v7620_v15   ;;  %91 = vperm.xlu0 %7205, %v7625_v16  }
  0x22   :  { %100 = vperm.xlu1 %7206, %v7632_v17   ;;  %97 = vperm.xlu0 %7205, %v7637_v18  }
  0x26   :  { %106 = vperm.xlu1 %7206, %v7644_v19   ;;  %103 = vperm.xlu0 %7205, %v7649_v20  }
  0x2a   :  { %112 = vperm.xlu1 %7206, %v7656_v21   ;;  %109 = vperm.xlu0 %7205, %v7661_v22  }
  0x2e   :  { %118 = vperm.xlu1 %7206, %v7668_v23   ;;  %115 = vperm.xlu0 %7205, %v7673_v24  }
  0x32   :  { %124 = vperm.xlu1 %7206, %v7680_v25   ;;  %121 = vperm.xlu0 %7205, %v7685_v26  }
  0x36   :  { %130 = vperm.xlu1 %7206, %v7692_v27   ;;  %127 = vperm.xlu0 %7205, %v7697_v28  }
  0x3a   :  { %136 = vperm.xlu1 %7206, %v7704_v29   ;;  %133 = vperm.xlu0 %7205, %v7709_v30  }
  0x3e   :  { %142 = vperm.xlu1 %7206, %v7716_v31   ;;  %139 = vperm.xlu0 %7205, %v7721_v32  }
  0x42   :  { %7208 = vset.pattern.permute.xlu1 %v7499_v33  ;;  %7207 = vset.pattern.permute.xlu0 %v7499_v33 }
  0x43   :  { %340 = vperm.xlu1 %7208, %v7553_v4   ;;  %337 = vperm.xlu0 %7207, %v7541_v1  }
  0x47   :  { %343 = vperm.xlu1 %7208, %v7536_v0   ;;  %346 = vperm.xlu0 %7207, %v7548_v3  }
  0x4b   :  { %349 = vperm.xlu1 %7208, %v7565_v6   ;;  %352 = vperm.xlu0 %7207, %v7560_v5  }
  0x4f   :  { %355 = vperm.xlu1 %7208, %v7577_v8   ;;  %358 = vperm.xlu0 %7207, %v7572_v7  }
  0x53   :  { %361 = vperm.xlu1 %7208, %v7587_v10   ;;  %364 = vperm.xlu0 %7207, %v7582_v9  }
  0x57   :  { %367 = vperm.xlu1 %7208, %v7599_v12   ;;  %370 = vperm.xlu0 %7207, %v7594_v11  }
  0x5b   :  { %373 = vperm.xlu1 %7208, %v7613_v14   ;;  %376 = vperm.xlu0 %7207, %v7608_v13  }
  0x5f   :  { %379 = vperm.xlu1 %7208, %v7625_v16   ;;  %382 = vperm.xlu0 %7207, %v7620_v15  }
  0x63   :  { %385 = vperm.xlu1 %7208, %v7637_v18   ;;  %388 = vperm.xlu0 %7207, %v7632_v17  }
  0x67   :  { %391 = vperm.xlu1 %7208, %v7649_v20   ;;  %394 = vperm.xlu0 %7207, %v7644_v19  }
  0x6b   :  { %397 = vperm.xlu1 %7208, %v7661_v22   ;;  %400 = vperm.xlu0 %7207, %v7656_v21  }
  0x6f   :  { %403 = vperm.xlu1 %7208, %v7673_v24   ;;  %406 = vperm.xlu0 %7207, %v7668_v23  }
  0x73   :  { %409 = vperm.xlu1 %7208, %v7685_v26   ;;  %412 = vperm.xlu0 %7207, %v7680_v25  }
  0x77   :  { %415 = vperm.xlu1 %7208, %v7697_v28   ;;  %418 = vperm.xlu0 %7207, %v7692_v27  }
  0x7b   :  { %421 = vperm.xlu1 %7208, %v7709_v30   ;;  %424 = vperm.xlu0 %7207, %v7704_v29  }
  0x7f   :  { %427 = vperm.xlu1 %7208, %v7721_v32   ;;  %430 = vperm.xlu0 %7207, %v7716_v31  }
  0x81   :  { %v7757_v34 = vpop.permute.xlu1 %55  ;;  %v7759_v35 = vpop.permute.xlu0 %49 }
  0x83   :  { %7209 = vset.pattern.permute.xlu1 %v7500_v36  ;;  %7210 = vset.pattern.permute.xlu0 %v7500_v36 }
  0x84   :  { %689 = vperm.xlu1 %7209, %v7541_v1   ;;  %692 = vperm.xlu0 %7210, %v7553_v4  }
  0x85   :  { %v7763_v37 = vpop.permute.xlu1 %58  ;;  %v7765_v38 = vpop.permute.xlu0 %52 }
  0x88   :  { %695 = vperm.xlu1 %7209, %v7536_v0   ;;  %701 = vperm.xlu0 %7210, %v7565_v6  }
  0x89   :  { %v7769_v39 = vpop.permute.xlu1 %64  ;;  %v7771_v40 = vpop.permute.xlu0 %61 }
  0x8c   :  { %698 = vperm.xlu1 %7209, %v7548_v3   ;;  %707 = vperm.xlu0 %7210, %v7577_v8  }
  0x8d   :  { %v7775_v41 = vpop.permute.xlu1 %70  ;;  %v7777_v42 = vpop.permute.xlu0 %67 }
  0x90   :  { %704 = vperm.xlu1 %7209, %v7560_v5   ;;  %713 = vperm.xlu0 %7210, %v7587_v10  }
  0x91   :  { %v7781_v43 = vpop.permute.xlu1 %76  ;;  %v7783_v44 = vpop.permute.xlu0 %73 }
  0x94   :  { %710 = vperm.xlu1 %7209, %v7572_v7   ;;  %719 = vperm.xlu0 %7210, %v7599_v12  }
  0x95   :  { %v7787_v45 = vpop.permute.xlu1 %82  ;;  %v7789_v46 = vpop.permute.xlu0 %79 }
  0x98   :  { %716 = vperm.xlu1 %7209, %v7582_v9   ;;  %725 = vperm.xlu0 %7210, %v7613_v14  }
  0x99   :  { %v7793_v47 = vpop.permute.xlu1 %88  ;;  %v7795_v48 = vpop.permute.xlu0 %85 }
  0x9c   :  { %722 = vperm.xlu1 %7209, %v7594_v11   ;;  %731 = vperm.xlu0 %7210, %v7625_v16  }
  0x9d   :  { %v7799_v49 = vpop.permute.xlu1 %94  ;;  %v7801_v50 = vpop.permute.xlu0 %91 }
  0xa0   :  { %728 = vperm.xlu1 %7209, %v7608_v13   ;;  %737 = vperm.xlu0 %7210, %v7637_v18  }
  0xa1   :  { %v7805_v51 = vpop.permute.xlu1 %100  ;;  %v7807_v52 = vpop.permute.xlu0 %97 }
  0xa4   :  { %734 = vperm.xlu1 %7209, %v7620_v15   ;;  %743 = vperm.xlu0 %7210, %v7649_v20  }
  0xa5   :  { %v7811_v53 = vpop.permute.xlu1 %106  ;;  %v7813_v54 = vpop.permute.xlu0 %103 }
  0xa8   :  { %740 = vperm.xlu1 %7209, %v7632_v17   ;;  %749 = vperm.xlu0 %7210, %v7661_v22  }
  0xa9   :  { %v7817_v55 = vpop.permute.xlu1 %112  ;;  %v7819_v56 = vpop.permute.xlu0 %109 }
  0xac   :  { %746 = vperm.xlu1 %7209, %v7644_v19   ;;  %755 = vperm.xlu0 %7210, %v7673_v24  }
  0xad   :  { %v7823_v57 = vpop.permute.xlu1 %118  ;;  %v7825_v58 = vpop.permute.xlu0 %115 }
  0xb0   :  { %752 = vperm.xlu1 %7209, %v7656_v21   ;;  %761 = vperm.xlu0 %7210, %v7685_v26  }
  0xb1   :  { %v7829_v59 = vpop.permute.xlu1 %124  ;;  %v7831_v60 = vpop.permute.xlu0 %121 }
  0xb2   :  { %16435 = vst [vmem:[#allocation5_spill] sm:$0xff] %v7831_v60 }
  0xb4   :  { %758 = vperm.xlu1 %7209, %v7668_v23   ;;  %767 = vperm.xlu0 %7210, %v7697_v28  }
  0xb5   :  { %v7835_v61 = vpop.permute.xlu1 %130  ;;  %v7837_v62 = vpop.permute.xlu0 %127 }
  0xb6   :  { %16436 = vst [vmem:[#allocation6_spill] sm:$0xff] %v7835_v61  ;;  %16437 = vst [vmem:[#allocation7_spill] sm:$0xff] %v7837_v62  ;;  %v7501_v61 = vmov 3  }
  0xb8   :  { %764 = vperm.xlu1 %7209, %v7680_v25   ;;  %773 = vperm.xlu0 %7210, %v7709_v30  }
  0xb9   :  { %v7841_v63 = vpop.permute.xlu1 %136  ;;  %v7843_v2 = vpop.permute.xlu0 %133 }
  0xba   :  { %16438 = vst [vmem:[#allocation8_spill] sm:$0xff] %v7841_v63  ;;  %16439 = vst [vmem:[#allocation9_spill] sm:$0xff] %v7843_v2 }
  0xbc   :  { %770 = vperm.xlu1 %7209, %v7692_v27   ;;  %779 = vperm.xlu0 %7210, %v7721_v32  }
  0xbd   :  { %v7847_v33 = vpop.permute.xlu1 %142  ;;  %v7849_v36 = vpop.permute.xlu0 %139 }
  0xbe   :  { %16440 = vst [vmem:[#allocation10_spill] sm:$0xff] %v7847_v33  ;;  %16441 = vst [vmem:[#allocation11_spill] sm:$0xff] %v7849_v36 }
  0xc0   :  { %776 = vperm.xlu1 %7209, %v7704_v29   ;;  %7211 = vset.pattern.permute.xlu0 %v7501_v61 }
  0xc1   :  { %1041 = vperm.xlu0 %7211, %v7541_v1  }
  0xc2   :  { %v7853_v62 = vpop.permute.xlu1 %340  ;;  %v7855_v60 = vpop.permute.xlu0 %337 }
  0xc3   :  { %16442 = vst [vmem:[#allocation12_spill] sm:$0xff] %v7853_v62  ;;  %16443 = vst [vmem:[#allocation13_spill] sm:$0xff] %v7855_v60 }
  0xc4   :  { %782 = vperm.xlu1 %7209, %v7716_v31  }
  0xc5   :  { %1050 = vperm.xlu0 %7211, %v7548_v3  }
  0xc6   :  { %v7859_v2 = vpop.permute.xlu1 %343  ;;  %v7861_v63 = vpop.permute.xlu0 %346 }
  0xc7   :  { %16444 = vst [vmem:[#allocation14_spill] sm:$0xff] %v7859_v2  ;;  %16445 = vst [vmem:[#allocation15_spill] sm:$0xff] %v7861_v63 }
  0xc8   :  { %7212 = vset.pattern.permute.xlu1 %v7501_v61 }
  0xc9   :  { %1044 = vperm.xlu1 %7212, %v7553_v4   ;;  %1056 = vperm.xlu0 %7211, %v7560_v5  }
  0xca   :  { %v7865_v36 = vpop.permute.xlu1 %349  ;;  %v7867_v33 = vpop.permute.xlu0 %352 }
  0xcb   :  { %16446 = vst [vmem:[#allocation16_spill] sm:$0xff] %v7865_v36  ;;  %16447 = vst [vmem:[#allocation17_spill] sm:$0xff] %v7867_v33 }
  0xcd   :  { %1047 = vperm.xlu1 %7212, %v7536_v0   ;;  %1062 = vperm.xlu0 %7211, %v7572_v7  }
  0xce   :  { %v7871_v60 = vpop.permute.xlu1 %355  ;;  %v7873_v62 = vpop.permute.xlu0 %358 }
  0xcf   :  { %16448 = vst [vmem:[#allocation18_spill] sm:$0xff] %v7871_v60  ;;  %16449 = vst [vmem:[#allocation19_spill] sm:$0xff] %v7873_v62 }
  0xd1   :  { %1053 = vperm.xlu1 %7212, %v7565_v6   ;;  %1068 = vperm.xlu0 %7211, %v7582_v9  }
  0xd2   :  { %v7877_v61 = vpop.permute.xlu1 %361  ;;  %v7879_v63 = vpop.permute.xlu0 %364 }
  0xd3   :  { %16450 = vst [vmem:[#allocation20_spill] sm:$0xff] %v7877_v61  ;;  %16451 = vst [vmem:[#allocation21_spill] sm:$0xff] %v7879_v63 }
  0xd5   :  { %1059 = vperm.xlu1 %7212, %v7577_v8   ;;  %1074 = vperm.xlu0 %7211, %v7594_v11  }
  0xd6   :  { %v7883_v33 = vpop.permute.xlu1 %367  ;;  %v7885_v36 = vpop.permute.xlu0 %370 }
  0xd7   :  { %16452 = vst [vmem:[#allocation22_spill] sm:$0xff] %v7883_v33  ;;  %16453 = vst [vmem:[#allocation23_spill] sm:$0xff] %v7885_v36 }
  0xd9   :  { %1065 = vperm.xlu1 %7212, %v7587_v10   ;;  %1080 = vperm.xlu0 %7211, %v7608_v13  }
  0xda   :  { %v7889_v62 = vpop.permute.xlu1 %373  ;;  %v7891_v60 = vpop.permute.xlu0 %376 }
  0xdb   :  { %16454 = vst [vmem:[#allocation24_spill] sm:$0xff] %v7889_v62  ;;  %16455 = vst [vmem:[#allocation25_spill] sm:$0xff] %v7891_v60 }
  0xdd   :  { %1071 = vperm.xlu1 %7212, %v7599_v12   ;;  %1086 = vperm.xlu0 %7211, %v7620_v15  }
  0xde   :  { %v7895_v63 = vpop.permute.xlu1 %379  ;;  %v7897_v61 = vpop.permute.xlu0 %382 }
  0xdf   :  { %16456 = vst [vmem:[#allocation26_spill] sm:$0xff] %v7895_v63  ;;  %16457 = vst [vmem:[#allocation27_spill] sm:$0xff] %v7897_v61 }
  0xe1   :  { %1077 = vperm.xlu1 %7212, %v7613_v14   ;;  %1092 = vperm.xlu0 %7211, %v7632_v17  }
  0xe2   :  { %v7901_v36 = vpop.permute.xlu1 %385  ;;  %v7903_v33 = vpop.permute.xlu0 %388 }
  0xe3   :  { %16458 = vst [vmem:[#allocation28_spill] sm:$0xff] %v7901_v36  ;;  %16459 = vst [vmem:[#allocation29_spill] sm:$0xff] %v7903_v33 }
  0xe5   :  { %1083 = vperm.xlu1 %7212, %v7625_v16   ;;  %1098 = vperm.xlu0 %7211, %v7644_v19  }
  0xe6   :  { %v7907_v60 = vpop.permute.xlu1 %391  ;;  %v7909_v62 = vpop.permute.xlu0 %394 }
  0xe7   :  { %16460 = vst [vmem:[#allocation30_spill] sm:$0xff] %v7907_v60  ;;  %16461 = vst [vmem:[#allocation31_spill] sm:$0xff] %v7909_v62 }
  0xe9   :  { %1089 = vperm.xlu1 %7212, %v7637_v18   ;;  %1104 = vperm.xlu0 %7211, %v7656_v21  }
  0xea   :  { %v7913_v61 = vpop.permute.xlu1 %397  ;;  %v7915_v63 = vpop.permute.xlu0 %400 }
  0xeb   :  { %16462 = vst [vmem:[#allocation32_spill] sm:$0xff] %v7913_v61  ;;  %16463 = vst [vmem:[#allocation33_spill] sm:$0xff] %v7915_v63 }
  0xed   :  { %1095 = vperm.xlu1 %7212, %v7649_v20   ;;  %1110 = vperm.xlu0 %7211, %v7668_v23  }
  0xee   :  { %v7919_v33 = vpop.permute.xlu1 %403  ;;  %v7921_v36 = vpop.permute.xlu0 %406 }
  0xef   :  { %16464 = vst [vmem:[#allocation34_spill] sm:$0xff] %v7919_v33  ;;  %16465 = vst [vmem:[#allocation35_spill] sm:$0xff] %v7921_v36 }
  0xf1   :  { %1101 = vperm.xlu1 %7212, %v7661_v22   ;;  %1116 = vperm.xlu0 %7211, %v7680_v25  }
  0xf2   :  { %v7925_v62 = vpop.permute.xlu1 %409  ;;  %v7927_v60 = vpop.permute.xlu0 %412 }
  0xf3   :  { %16466 = vst [vmem:[#allocation36_spill] sm:$0xff] %v7925_v62  ;;  %16467 = vst [vmem:[#allocation37_spill] sm:$0xff] %v7927_v60 }
  0xf5   :  { %1107 = vperm.xlu1 %7212, %v7673_v24   ;;  %1122 = vperm.xlu0 %7211, %v7692_v27  }
  0xf6   :  { %v7931_v63 = vpop.permute.xlu1 %415  ;;  %v7933_v61 = vpop.permute.xlu0 %418 }
  0xf7   :  { %16468 = vst [vmem:[#allocation38_spill] sm:$0xff] %v7931_v63  ;;  %16469 = vst [vmem:[#allocation39_spill] sm:$0xff] %v7933_v61  ;;  %v7502_v63 = vmov 4  }
  0xf9   :  { %1113 = vperm.xlu1 %7212, %v7685_v26   ;;  %1128 = vperm.xlu0 %7211, %v7704_v29  }
  0xfa   :  { %v7937_v36 = vpop.permute.xlu1 %421  ;;  %v7939_v33 = vpop.permute.xlu0 %424 }
  0xfb   :  { %16470 = vst [vmem:[#allocation40_spill] sm:$0xff] %v7937_v36  ;;  %16471 = vst [vmem:[#allocation41_spill] sm:$0xff] %v7939_v33 }
  0xfd   :  { %1119 = vperm.xlu1 %7212, %v7697_v28   ;;  %1134 = vperm.xlu0 %7211, %v7716_v31  }
  0xfe   :  { %v7943_v60 = vpop.permute.xlu1 %427  ;;  %v7945_v62 = vpop.permute.xlu0 %430 }
  0xff   :  { %16472 = vst [vmem:[#allocation42_spill] sm:$0xff] %v7943_v60  ;;  %16473 = vst [vmem:[#allocation43_spill] sm:$0xff] %v7945_v62 }
 0x101   :  { %1125 = vperm.xlu1 %7212, %v7709_v30   ;;  %7214 = vset.pattern.permute.xlu0 %v7502_v63 }
 0x102   :  { %1396 = vperm.xlu0 %7214, %v7553_v4  }
 0x103   :  { %v7949_v61 = vpop.permute.xlu1 %689  ;;  %v7951_v2 = vpop.permute.xlu0 %692 }
 0x104   :  { %16474 = vst [vmem:[#allocation44_spill] sm:$0xff] %v7949_v61  ;;  %16475 = vst [vmem:[#allocation45_spill] sm:$0xff] %v7951_v2 }
 0x105   :  { %1131 = vperm.xlu1 %7212, %v7721_v32  }
 0x106   :  { %1405 = vperm.xlu0 %7214, %v7565_v6  }
 0x107   :  { %v7955_v33 = vpop.permute.xlu1 %695  ;;  %v7957_v36 = vpop.permute.xlu0 %701 }
 0x108   :  { %16476 = vst [vmem:[#allocation46_spill] sm:$0xff] %v7955_v33  ;;  %16477 = vst [vmem:[#allocation47_spill] sm:$0xff] %v7957_v36 }
 0x109   :  { %7213 = vset.pattern.permute.xlu1 %v7502_v63 }
 0x10a   :  { %1393 = vperm.xlu1 %7213, %v7541_v1   ;;  %1411 = vperm.xlu0 %7214, %v7577_v8  }
 0x10b   :  { %v7961_v62 = vpop.permute.xlu1 %698  ;;  %v7963_v60 = vpop.permute.xlu0 %707 }
 0x10c   :  { %16478 = vst [vmem:[#allocation48_spill] sm:$0xff] %v7961_v62  ;;  %16479 = vst [vmem:[#allocation49_spill] sm:$0xff] %v7963_v60 }
 0x10e   :  { %1399 = vperm.xlu1 %7213, %v7536_v0   ;;  %1417 = vperm.xlu0 %7214, %v7587_v10  }
 0x10f   :  { %v7967_v2 = vpop.permute.xlu1 %704  ;;  %v7969_v61 = vpop.permute.xlu0 %713 }
 0x110   :  { %16480 = vst [vmem:[#allocation50_spill] sm:$0xff] %v7967_v2  ;;  %16481 = vst [vmem:[#allocation51_spill] sm:$0xff] %v7969_v61 }
 0x112   :  { %1402 = vperm.xlu1 %7213, %v7548_v3   ;;  %1423 = vperm.xlu0 %7214, %v7599_v12  }
 0x113   :  { %v7973_v63 = vpop.permute.xlu1 %710  ;;  %v7975_v36 = vpop.permute.xlu0 %719 }
 0x114   :  { %16482 = vst [vmem:[#allocation52_spill] sm:$0xff] %v7973_v63  ;;  %16483 = vst [vmem:[#allocation53_spill] sm:$0xff] %v7975_v36 }
 0x116   :  { %1408 = vperm.xlu1 %7213, %v7560_v5   ;;  %1429 = vperm.xlu0 %7214, %v7613_v14  }
 0x117   :  { %v7979_v60 = vpop.permute.xlu1 %716  ;;  %v7981_v62 = vpop.permute.xlu0 %725 }
 0x118   :  { %16484 = vst [vmem:[#allocation54_spill] sm:$0xff] %v7979_v60  ;;  %16485 = vst [vmem:[#allocation55_spill] sm:$0xff] %v7981_v62 }
 0x11a   :  { %1414 = vperm.xlu1 %7213, %v7572_v7   ;;  %1435 = vperm.xlu0 %7214, %v7625_v16  }
 0x11b   :  { %v7985_v61 = vpop.permute.xlu1 %722  ;;  %v7987_v2 = vpop.permute.xlu0 %731 }
 0x11c   :  { %16486 = vst [vmem:[#allocation56_spill] sm:$0xff] %v7985_v61  ;;  %16487 = vst [vmem:[#allocation57_spill] sm:$0xff] %v7987_v2 }
 0x11e   :  { %1420 = vperm.xlu1 %7213, %v7582_v9   ;;  %1441 = vperm.xlu0 %7214, %v7637_v18  }
 0x11f   :  { %v7991_v36 = vpop.permute.xlu1 %728  ;;  %v7993_v63 = vpop.permute.xlu0 %737 }
 0x120   :  { %16488 = vst [vmem:[#allocation58_spill] sm:$0xff] %v7991_v36  ;;  %16489 = vst [vmem:[#allocation59_spill] sm:$0xff] %v7993_v63 }
 0x122   :  { %1426 = vperm.xlu1 %7213, %v7594_v11   ;;  %1447 = vperm.xlu0 %7214, %v7649_v20  }
 0x123   :  { %v7997_v62 = vpop.permute.xlu1 %734  ;;  %v7999_v60 = vpop.permute.xlu0 %743 }
 0x124   :  { %16490 = vst [vmem:[#allocation60_spill] sm:$0xff] %v7997_v62  ;;  %16491 = vst [vmem:[#allocation61_spill] sm:$0xff] %v7999_v60 }
 0x126   :  { %1432 = vperm.xlu1 %7213, %v7608_v13   ;;  %1453 = vperm.xlu0 %7214, %v7661_v22  }
 0x127   :  { %v8003_v2 = vpop.permute.xlu1 %740  ;;  %v8005_v61 = vpop.permute.xlu0 %749 }
 0x128   :  { %16492 = vst [vmem:[#allocation62_spill] sm:$0xff] %v8003_v2  ;;  %16493 = vst [vmem:[#allocation63_spill] sm:$0xff] %v8005_v61 }
 0x12a   :  { %1438 = vperm.xlu1 %7213, %v7620_v15   ;;  %1459 = vperm.xlu0 %7214, %v7673_v24  }
 0x12b   :  { %v8009_v63 = vpop.permute.xlu1 %746  ;;  %v8011_v36 = vpop.permute.xlu0 %755 }
 0x12c   :  { %16494 = vst [vmem:[#allocation64_spill] sm:$0xff] %v8009_v63  ;;  %16495 = vst [vmem:[#allocation65_spill] sm:$0xff] %v8011_v36 }
 0x12e   :  { %1444 = vperm.xlu1 %7213, %v7632_v17   ;;  %1465 = vperm.xlu0 %7214, %v7685_v26  }
 0x12f   :  { %v8015_v60 = vpop.permute.xlu1 %752  ;;  %v8017_v62 = vpop.permute.xlu0 %761 }
 0x130   :  { %16496 = vst [vmem:[#allocation66_spill] sm:$0xff] %v8015_v60  ;;  %16497 = vst [vmem:[#allocation67_spill] sm:$0xff] %v8017_v62 }
 0x132   :  { %1450 = vperm.xlu1 %7213, %v7644_v19   ;;  %1471 = vperm.xlu0 %7214, %v7697_v28  }
 0x133   :  { %v8021_v61 = vpop.permute.xlu1 %758  ;;  %v8023_v2 = vpop.permute.xlu0 %767 }
 0x134   :  { %16498 = vst [vmem:[#allocation68_spill] sm:$0xff] %v8021_v61  ;;  %16499 = vst [vmem:[#allocation69_spill] sm:$0xff] %v8023_v2  ;;  %v7503_v61 = vmov 5  }
 0x136   :  { %1456 = vperm.xlu1 %7213, %v7656_v21   ;;  %1477 = vperm.xlu0 %7214, %v7709_v30  }
 0x137   :  { %v8027_v36 = vpop.permute.xlu1 %764  ;;  %v8029_v63 = vpop.permute.xlu0 %773 }
 0x138   :  { %16500 = vst [vmem:[#allocation70_spill] sm:$0xff] %v8027_v36  ;;  %16501 = vst [vmem:[#allocation71_spill] sm:$0xff] %v8029_v63 }
 0x13a   :  { %1462 = vperm.xlu1 %7213, %v7668_v23   ;;  %1483 = vperm.xlu0 %7214, %v7721_v32  }
 0x13b   :  { %v8033_v62 = vpop.permute.xlu1 %770  ;;  %v8035_v60 = vpop.permute.xlu0 %779 }
 0x13c   :  { %16502 = vst [vmem:[#allocation72_spill] sm:$0xff] %v8033_v62  ;;  %16503 = vst [vmem:[#allocation73_spill] sm:$0xff] %v8035_v60 }
 0x13e   :  { %1468 = vperm.xlu1 %7213, %v7680_v25   ;;  %7215 = vset.pattern.permute.xlu0 %v7503_v61 }
 0x13f   :  { %v8038_v2 = vpop.permute.xlu1 %776  ;;  %1745 = vperm.xlu0 %7215, %v7541_v1  }
 0x140   :  { %16504 = vst [vmem:[#allocation74_spill] sm:$0xff] %v8038_v2  ;;  %v8041_v33 = vpop.permute.xlu0 %1041 }
 0x141   :  { %16505 = vst [vmem:[#allocation75_spill] sm:$0xff] %v8041_v33 }
 0x142   :  { %1474 = vperm.xlu1 %7213, %v7692_v27  }
 0x143   :  { %v8044_v63 = vpop.permute.xlu1 %782  ;;  %1754 = vperm.xlu0 %7215, %v7548_v3  }
 0x144   :  { %16506 = vst [vmem:[#allocation76_spill] sm:$0xff] %v8044_v63  ;;  %v8047_v36 = vpop.permute.xlu0 %1050 }
 0x145   :  { %16507 = vst [vmem:[#allocation77_spill] sm:$0xff] %v8047_v36 }
 0x146   :  { %1480 = vperm.xlu1 %7213, %v7704_v29  }
 0x147   :  { %1760 = vperm.xlu0 %7215, %v7560_v5  }
 0x148   :  { %v8051_v60 = vpop.permute.xlu1 %1044  ;;  %v8053_v62 = vpop.permute.xlu0 %1056 }
 0x149   :  { %16508 = vst [vmem:[#allocation78_spill] sm:$0xff] %v8051_v60  ;;  %16509 = vst [vmem:[#allocation79_spill] sm:$0xff] %v8053_v62 }
 0x14a   :  { %1486 = vperm.xlu1 %7213, %v7716_v31  }
 0x14b   :  { %1766 = vperm.xlu0 %7215, %v7572_v7  }
 0x14c   :  { %v8057_v33 = vpop.permute.xlu1 %1047  ;;  %v8059_v2 = vpop.permute.xlu0 %1062 }
 0x14d   :  { %16510 = vst [vmem:[#allocation80_spill] sm:$0xff] %v8057_v33  ;;  %16511 = vst [vmem:[#allocation81_spill] sm:$0xff] %v8059_v2 }
 0x14e   :  { %7216 = vset.pattern.permute.xlu1 %v7503_v61 }
 0x14f   :  { %1748 = vperm.xlu1 %7216, %v7553_v4   ;;  %1772 = vperm.xlu0 %7215, %v7582_v9  }
 0x150   :  { %v8063_v36 = vpop.permute.xlu1 %1053  ;;  %v8065_v63 = vpop.permute.xlu0 %1068 }
 0x151   :  { %16512 = vst [vmem:[#allocation82_spill] sm:$0xff] %v8063_v36  ;;  %16513 = vst [vmem:[#allocation83_spill] sm:$0xff] %v8065_v63 }
 0x153   :  { %1751 = vperm.xlu1 %7216, %v7536_v0   ;;  %1778 = vperm.xlu0 %7215, %v7594_v11  }
 0x154   :  { %v8069_v62 = vpop.permute.xlu1 %1059  ;;  %v8071_v60 = vpop.permute.xlu0 %1074 }
 0x155   :  { %16514 = vst [vmem:[#allocation84_spill] sm:$0xff] %v8069_v62  ;;  %16515 = vst [vmem:[#allocation85_spill] sm:$0xff] %v8071_v60 }
 0x157   :  { %1757 = vperm.xlu1 %7216, %v7565_v6   ;;  %1784 = vperm.xlu0 %7215, %v7608_v13  }
 0x158   :  { %v8075_v61 = vpop.permute.xlu1 %1065  ;;  %v8077_v2 = vpop.permute.xlu0 %1080 }
 0x159   :  { %16516 = vst [vmem:[#allocation86_spill] sm:$0xff] %v8075_v61  ;;  %16517 = vst [vmem:[#allocation87_spill] sm:$0xff] %v8077_v2 }
 0x15b   :  { %1763 = vperm.xlu1 %7216, %v7577_v8   ;;  %1790 = vperm.xlu0 %7215, %v7620_v15  }
 0x15c   :  { %v8081_v63 = vpop.permute.xlu1 %1071  ;;  %v8083_v36 = vpop.permute.xlu0 %1086 }
 0x15d   :  { %16518 = vst [vmem:[#allocation88_spill] sm:$0xff] %v8081_v63  ;;  %16519 = vst [vmem:[#allocation89_spill] sm:$0xff] %v8083_v36 }
 0x15f   :  { %1769 = vperm.xlu1 %7216, %v7587_v10   ;;  %1796 = vperm.xlu0 %7215, %v7632_v17  }
 0x160   :  { %v8087_v60 = vpop.permute.xlu1 %1077  ;;  %v8089_v62 = vpop.permute.xlu0 %1092 }
 0x161   :  { %16520 = vst [vmem:[#allocation90_spill] sm:$0xff] %v8087_v60  ;;  %16521 = vst [vmem:[#allocation91_spill] sm:$0xff] %v8089_v62 }
 0x163   :  { %1775 = vperm.xlu1 %7216, %v7599_v12   ;;  %1802 = vperm.xlu0 %7215, %v7644_v19  }
 0x164   :  { %v8093_v2 = vpop.permute.xlu1 %1083  ;;  %v8095_v61 = vpop.permute.xlu0 %1098 }
 0x165   :  { %16522 = vst [vmem:[#allocation92_spill] sm:$0xff] %v8093_v2  ;;  %16523 = vst [vmem:[#allocation93_spill] sm:$0xff] %v8095_v61 }
 0x167   :  { %1781 = vperm.xlu1 %7216, %v7613_v14   ;;  %1808 = vperm.xlu0 %7215, %v7656_v21  }
 0x168   :  { %v8099_v36 = vpop.permute.xlu1 %1089  ;;  %v8101_v63 = vpop.permute.xlu0 %1104 }
 0x169   :  { %16524 = vst [vmem:[#allocation94_spill] sm:$0xff] %v8099_v36  ;;  %16525 = vst [vmem:[#allocation95_spill] sm:$0xff] %v8101_v63 }
 0x16b   :  { %1787 = vperm.xlu1 %7216, %v7625_v16   ;;  %1814 = vperm.xlu0 %7215, %v7668_v23  }
 0x16c   :  { %v8105_v62 = vpop.permute.xlu1 %1095  ;;  %v8107_v60 = vpop.permute.xlu0 %1110 }
 0x16d   :  { %16526 = vst [vmem:[#allocation96_spill] sm:$0xff] %v8105_v62  ;;  %16527 = vst [vmem:[#allocation97_spill] sm:$0xff] %v8107_v60 }
 0x16f   :  { %1793 = vperm.xlu1 %7216, %v7637_v18   ;;  %1820 = vperm.xlu0 %7215, %v7680_v25  }
 0x170   :  { %v8111_v61 = vpop.permute.xlu1 %1101  ;;  %v8113_v2 = vpop.permute.xlu0 %1116 }
 0x171   :  { %16528 = vst [vmem:[#allocation98_spill] sm:$0xff] %v8111_v61  ;;  %16529 = vst [vmem:[#allocation99_spill] sm:$0xff] %v8113_v2 }
 0x173   :  { %1799 = vperm.xlu1 %7216, %v7649_v20   ;;  %1826 = vperm.xlu0 %7215, %v7692_v27  }
 0x174   :  { %v8117_v63 = vpop.permute.xlu1 %1107  ;;  %v8119_v36 = vpop.permute.xlu0 %1122 }
 0x175   :  { %16530 = vst [vmem:[#allocation100_spill] sm:$0xff] %v8117_v63  ;;  %16531 = vst [vmem:[#allocation101_spill] sm:$0xff] %v8119_v36  ;;  %v7504_v63 = vmov 6  }
 0x177   :  { %1805 = vperm.xlu1 %7216, %v7661_v22   ;;  %1832 = vperm.xlu0 %7215, %v7704_v29  }
 0x178   :  { %v8123_v60 = vpop.permute.xlu1 %1113  ;;  %v8125_v62 = vpop.permute.xlu0 %1128 }
 0x179   :  { %16532 = vst [vmem:[#allocation102_spill] sm:$0xff] %v8123_v60  ;;  %16533 = vst [vmem:[#allocation103_spill] sm:$0xff] %v8125_v62 }
 0x17b   :  { %1811 = vperm.xlu1 %7216, %v7673_v24   ;;  %1838 = vperm.xlu0 %7215, %v7716_v31  }
 0x17c   :  { %v8129_v2 = vpop.permute.xlu1 %1119  ;;  %v8131_v61 = vpop.permute.xlu0 %1134 }
 0x17d   :  { %16534 = vst [vmem:[#allocation104_spill] sm:$0xff] %v8129_v2  ;;  %16535 = vst [vmem:[#allocation105_spill] sm:$0xff] %v8131_v61 }
 0x17f   :  { %1817 = vperm.xlu1 %7216, %v7685_v26   ;;  %7218 = vset.pattern.permute.xlu0 %v7504_v63 }
 0x180   :  { %v8134_v36 = vpop.permute.xlu1 %1125  ;;  %2100 = vperm.xlu0 %7218, %v7553_v4  }
 0x181   :  { %16536 = vst [vmem:[#allocation106_spill] sm:$0xff] %v8134_v36  ;;  %v8137_v33 = vpop.permute.xlu0 %1396 }
 0x182   :  { %16537 = vst [vmem:[#allocation107_spill] sm:$0xff] %v8137_v33 }
 0x183   :  { %1823 = vperm.xlu1 %7216, %v7697_v28  }
 0x184   :  { %v8140_v62 = vpop.permute.xlu1 %1131  ;;  %2109 = vperm.xlu0 %7218, %v7565_v6  }
 0x185   :  { %16538 = vst [vmem:[#allocation108_spill] sm:$0xff] %v8140_v62  ;;  %v8143_v60 = vpop.permute.xlu0 %1405 }
 0x186   :  { %16539 = vst [vmem:[#allocation109_spill] sm:$0xff] %v8143_v60 }
 0x187   :  { %1829 = vperm.xlu1 %7216, %v7709_v30  }
 0x188   :  { %2115 = vperm.xlu0 %7218, %v7577_v8  }
 0x189   :  { %v8147_v61 = vpop.permute.xlu1 %1393  ;;  %v8149_v2 = vpop.permute.xlu0 %1411 }
 0x18a   :  { %16540 = vst [vmem:[#allocation110_spill] sm:$0xff] %v8147_v61  ;;  %16541 = vst [vmem:[#allocation111_spill] sm:$0xff] %v8149_v2 }
 0x18b   :  { %1835 = vperm.xlu1 %7216, %v7721_v32  }
 0x18c   :  { %2121 = vperm.xlu0 %7218, %v7587_v10  }
 0x18d   :  { %v8153_v33 = vpop.permute.xlu1 %1399  ;;  %v8155_v36 = vpop.permute.xlu0 %1417 }
 0x18e   :  { %16542 = vst [vmem:[#allocation112_spill] sm:$0xff] %v8153_v33  ;;  %16543 = vst [vmem:[#allocation113_spill] sm:$0xff] %v8155_v36  ;;  %v16624_v33 = vld [vmem:[#allocation7_spill] sm:$0xff] }
 0x18f   :  { %7217 = vset.pattern.permute.xlu1 %v7504_v63 }
 0x190   :  { %2097 = vperm.xlu1 %7217, %v7541_v1   ;;  %2127 = vperm.xlu0 %7218, %v7599_v12  }
 0x191   :  { %v8159_v60 = vpop.permute.xlu1 %1402  ;;  %v8161_v62 = vpop.permute.xlu0 %1423 }
 0x192   :  { %16544 = vst [vmem:[#allocation114_spill] sm:$0xff] %v8159_v60  ;;  %16545 = vst [vmem:[#allocation115_spill] sm:$0xff] %v8161_v62 }
 0x194   :  { %2103 = vperm.xlu1 %7217, %v7536_v0   ;;  %2133 = vperm.xlu0 %7218, %v7613_v14  }
 0x195   :  { %v8165_v2 = vpop.permute.xlu1 %1408  ;;  %v8167_v61 = vpop.permute.xlu0 %1429 }
 0x196   :  { %16546 = vst [vmem:[#allocation116_spill] sm:$0xff] %v8165_v2  ;;  %16547 = vst [vmem:[#allocation117_spill] sm:$0xff] %v8167_v61 }
 0x198   :  { %2106 = vperm.xlu1 %7217, %v7548_v3   ;;  %2139 = vperm.xlu0 %7218, %v7625_v16  }
 0x199   :  { %v8171_v63 = vpop.permute.xlu1 %1414  ;;  %v8173_v36 = vpop.permute.xlu0 %1435 }
 0x19a   :  { %16548 = vst [vmem:[#allocation118_spill] sm:$0xff] %v8171_v63  ;;  %16549 = vst [vmem:[#allocation119_spill] sm:$0xff] %v8173_v36 }
 0x19c   :  { %2112 = vperm.xlu1 %7217, %v7560_v5   ;;  %2145 = vperm.xlu0 %7218, %v7637_v18  }
 0x19d   :  { %v8177_v62 = vpop.permute.xlu1 %1420  ;;  %v8179_v60 = vpop.permute.xlu0 %1441 }
 0x19e   :  { %16550 = vst [vmem:[#allocation120_spill] sm:$0xff] %v8177_v62  ;;  %16551 = vst [vmem:[#allocation121_spill] sm:$0xff] %v8179_v60 }
 0x1a0   :  { %2118 = vperm.xlu1 %7217, %v7572_v7   ;;  %2151 = vperm.xlu0 %7218, %v7649_v20  }
 0x1a1   :  { %v8183_v61 = vpop.permute.xlu1 %1426  ;;  %v8185_v2 = vpop.permute.xlu0 %1447 }
 0x1a2   :  { %16552 = vst [vmem:[#allocation122_spill] sm:$0xff] %v8183_v61  ;;  %16553 = vst [vmem:[#allocation123_spill] sm:$0xff] %v8185_v2 }
 0x1a4   :  { %2124 = vperm.xlu1 %7217, %v7582_v9   ;;  %2157 = vperm.xlu0 %7218, %v7661_v22  }
 0x1a5   :  { %v8189_v36 = vpop.permute.xlu1 %1432  ;;  %v8191_v63 = vpop.permute.xlu0 %1453 }
 0x1a6   :  { %16554 = vst [vmem:[#allocation124_spill] sm:$0xff] %v8189_v36  ;;  %16555 = vst [vmem:[#allocation125_spill] sm:$0xff] %v8191_v63 }
 0x1a8   :  { %2130 = vperm.xlu1 %7217, %v7594_v11   ;;  %2163 = vperm.xlu0 %7218, %v7673_v24  }
 0x1a9   :  { %v8195_v60 = vpop.permute.xlu1 %1438  ;;  %v8197_v62 = vpop.permute.xlu0 %1459 }
 0x1aa   :  { %16556 = vst [vmem:[#allocation126_spill] sm:$0xff] %v8195_v60  ;;  %16557 = vst [vmem:[#allocation127_spill] sm:$0xff] %v8197_v62  ;;  %v16623_v60 = vld [vmem:[#allocation6_spill] sm:$0xff] }
 0x1ac   :  { %2136 = vperm.xlu1 %7217, %v7608_v13   ;;  %2169 = vperm.xlu0 %7218, %v7685_v26  }
 0x1ad   :  { %v8201_v2 = vpop.permute.xlu1 %1444  ;;  %v8203_v61 = vpop.permute.xlu0 %1465 }
 0x1ae   :  { %16558 = vst [vmem:[#allocation128_spill] sm:$0xff] %v8201_v2  ;;  %16559 = vst [vmem:[#allocation129_spill] sm:$0xff] %v8203_v61 }
 0x1b0   :  { %2142 = vperm.xlu1 %7217, %v7620_v15   ;;  %2175 = vperm.xlu0 %7218, %v7697_v28   ;;  %v7505_v28 = vmov 7  }
 0x1b1   :  { %v8207_v63 = vpop.permute.xlu1 %1450  ;;  %v8209_v36 = vpop.permute.xlu0 %1471 }
 0x1b2   :  { %16560 = vst [vmem:[#allocation130_spill] sm:$0xff] %v8207_v63  ;;  %16561 = vst [vmem:[#allocation131_spill] sm:$0xff] %v8209_v36 }
 0x1b4   :  { %2148 = vperm.xlu1 %7217, %v7632_v17   ;;  %2181 = vperm.xlu0 %7218, %v7709_v30  }
 0x1b5   :  { %v8213_v24 = vpop.permute.xlu1 %1456  ;;  %v8215_v62 = vpop.permute.xlu0 %1477 }
 0x1b6   :  { %16562 = vst [vmem:[#allocation132_spill] sm:$0xff] %v8213_v24  ;;  %16563 = vst [vmem:[#allocation133_spill] sm:$0xff] %v8215_v62 }
 0x1b8   :  { %2154 = vperm.xlu1 %7217, %v7644_v19   ;;  %2187 = vperm.xlu0 %7218, %v7721_v32  }
 0x1b9   :  { %v8219_v26 = vpop.permute.xlu1 %1462  ;;  %v8221_v61 = vpop.permute.xlu0 %1483 }
 0x1ba   :  { %16564 = vst [vmem:[#allocation134_spill] sm:$0xff] %v8219_v26  ;;  %16565 = vst [vmem:[#allocation135_spill] sm:$0xff] %v8221_v61 }
 0x1bc   :  { %2160 = vperm.xlu1 %7217, %v7656_v21   ;;  %7219 = vset.pattern.permute.xlu0 %v7505_v28 }
 0x1bd   :  { %v8224_v36 = vpop.permute.xlu1 %1468  ;;  %2449 = vperm.xlu0 %7219, %v7541_v1  }
 0x1be   :  { %16566 = vst [vmem:[#allocation136_spill] sm:$0xff] %v8224_v36  ;;  %v8227_v30 = vpop.permute.xlu0 %1745 }
 0x1bf   :  { %16567 = vst [vmem:[#allocation137_spill] sm:$0xff] %v8227_v30 }
 0x1c0   :  { %2166 = vperm.xlu1 %7217, %v7668_v23  }
 0x1c1   :  { %v8230_v62 = vpop.permute.xlu1 %1474  ;;  %2458 = vperm.xlu0 %7219, %v7548_v3  }
 0x1c2   :  { %16568 = vst [vmem:[#allocation138_spill] sm:$0xff] %v8230_v62  ;;  %v8233_v32 = vpop.permute.xlu0 %1754  ;;  %v8647_v62 = vld [vmem:[%s15998_s0 + $0xd0] sm:$0xff] }
 0x1c3   :  { %16569 = vst [vmem:[#allocation139_spill] sm:$0xff] %v8233_v32 }
 0x1c4   :  { %2172 = vperm.xlu1 %7217, %v7680_v25  }
 0x1c5   :  { %v8236_v61 = vpop.permute.xlu1 %1480  ;;  %2464 = vperm.xlu0 %7219, %v7560_v5  }
 0x1c6   :  { %16570 = vst [vmem:[#allocation140_spill] sm:$0xff] %v8236_v61  ;;  %v8239_v26 = vpop.permute.xlu0 %1760  ;;  %v16612_v61 = vld [vmem:[#allocation5_spill] sm:$0xff] }
 0x1c7   :  { %16571 = vst [vmem:[#allocation141_spill] sm:$0xff] %v8239_v26 }
 0x1c8   :  { %2178 = vperm.xlu1 %7217, %v7692_v27  }
 0x1c9   :  { %v8242_v1 = vpop.permute.xlu1 %1486  ;;  %2470 = vperm.xlu0 %7219, %v7572_v7  }
 0x1ca   :  { %16572 = vst [vmem:[#allocation142_spill] sm:$0xff] %v8242_v1  ;;  %v8245_v30 = vpop.permute.xlu0 %1766 }
 0x1cb   :  { %16573 = vst [vmem:[#allocation143_spill] sm:$0xff] %v8245_v30 }
 0x1cc   :  { %2184 = vperm.xlu1 %7217, %v7704_v29  }
 0x1cd   :  { %2476 = vperm.xlu0 %7219, %v7582_v9  }
 0x1ce   :  { %v8249_v3 = vpop.permute.xlu1 %1748  ;;  %v8251_v32 = vpop.permute.xlu0 %1772 }
 0x1cf   :  { %16574 = vst [vmem:[#allocation144_spill] sm:$0xff] %v8249_v3  ;;  %16575 = vst [vmem:[#allocation145_spill] sm:$0xff] %v8251_v32 }
 0x1d0   :  { %2190 = vperm.xlu1 %7217, %v7716_v31  }
 0x1d1   :  { %2482 = vperm.xlu0 %7219, %v7594_v11  }
 0x1d2   :  { %v8255_v5 = vpop.permute.xlu1 %1751  ;;  %v8257_v26 = vpop.permute.xlu0 %1778 }
 0x1d3   :  { %16576 = vst [vmem:[#allocation146_spill] sm:$0xff] %v8255_v5  ;;  %16577 = vst [vmem:[#allocation147_spill] sm:$0xff] %v8257_v26 }
 0x1d4   :  { %7220 = vset.pattern.permute.xlu1 %v7505_v28 }
 0x1d5   :  { %2452 = vperm.xlu1 %7220, %v7553_v4   ;;  %2488 = vperm.xlu0 %7219, %v7608_v13  }
 0x1d6   :  { %v8261_v7 = vpop.permute.xlu1 %1757  ;;  %v8263_v9 = vpop.permute.xlu0 %1784 }
 0x1d7   :  { %16578 = vst [vmem:[#allocation148_spill] sm:$0xff] %v8261_v7  ;;  %16579 = vst [vmem:[#allocation149_spill] sm:$0xff] %v8263_v9 }
 0x1d9   :  { %2455 = vperm.xlu1 %7220, %v7536_v0   ;;  %2494 = vperm.xlu0 %7219, %v7620_v15   ;;  %v45_v15 = vlaneseq }
 0x1da   :  { %v8267_v32 = vpop.permute.xlu1 %1763  ;;  %v8269_v11 = vpop.permute.xlu0 %1790 }
 0x1db   :  { %16580 = vst [vmem:[#allocation150_spill] sm:$0xff] %v8267_v32  ;;  %16581 = vst [vmem:[#allocation151_spill] sm:$0xff] %v8269_v11  ;;  %v8542_v11 = vld [vmem:[%s15998_s0 + $0x20] sm:$0xff] }
 0x1dc   :  { %16603 = vst [vmem:[#allocation172_spill] sm:$0xff] %v8542_v11 }
 0x1dd   :  { %2461 = vperm.xlu1 %7220, %v7565_v6   ;;  %2500 = vperm.xlu0 %7219, %v7632_v17  }
 0x1de   :  { %v8273_v28 = vpop.permute.xlu1 %1769  ;;  %v8275_v4 = vpop.permute.xlu0 %1796 }
 0x1df   :  { %16582 = vst [vmem:[#allocation152_spill] sm:$0xff] %v8273_v28  ;;  %16583 = vst [vmem:[#allocation153_spill] sm:$0xff] %v8275_v4  ;;  %v8289_v28 = vand.u32 127, %v45_v15 }
 0x1e1   :  { %2467 = vperm.xlu1 %7220, %v7577_v8   ;;  %2506 = vperm.xlu0 %7219, %v7644_v19   ;;  %vm148_vm0 = vcmp.eq.s32.totalorder %v8289_v28, %v7757_v34  ;;  %vm144_vm2 = vcmp.eq.s32.totalorder %v8289_v28, %v7759_v35  ;;  %vm150_vm4 = vcmp.eq.s32.totalorder %v8289_v28, %v7763_v37 }
 0x1e2   :  { %v8279_v13 = vpop.permute.xlu1 %1775  ;;  %v8281_v0 = vpop.permute.xlu0 %1802  ;;  %vm146_vm6 = vcmp.eq.s32.totalorder %v8289_v28, %v7765_v38  ;;  %vm154_vm8 = vcmp.eq.s32.totalorder %v8289_v28, %v7769_v39  ;;  %vm152_vm10 = vcmp.eq.s32.totalorder %v8289_v28, %v7771_v40  ;;  %vm158_vm12 = vcmp.eq.s32.totalorder %v8289_v28, %v7775_v41 }
 0x1e3   :  { %16584 = vst [vmem:[#allocation154_spill] sm:$0xff] %v8279_v13  ;;  %16585 = vst [vmem:[#allocation155_spill] sm:$0xff] %v8281_v0  ;;  %v8298_v0 = vadd.s32 128, %v8289_v28  ;;  %vm156_vm14 = vcmp.eq.s32.totalorder %v8289_v28, %v7777_v42 }
 0x1e5   :  { %2473 = vperm.xlu1 %7220, %v7587_v10   ;;  %2512 = vperm.xlu0 %7219, %v7656_v21   ;;  %vm149_vm1 = vcmp.eq.s32.totalorder %v8298_v0, %v7757_v34  ;;  %vm145_vm3 = vcmp.eq.s32.totalorder %v8298_v0, %v7759_v35  ;;  %vm151_vm5 = vcmp.eq.s32.totalorder %v8298_v0, %v7763_v37 }
 0x1e6   :  { %v8285_v6 = vpop.permute.xlu1 %1781  ;;  %v8287_v17 = vpop.permute.xlu0 %1808  ;;  %vm147_vm7 = vcmp.eq.s32.totalorder %v8298_v0, %v7765_v38  ;;  %vm155_vm9 = vcmp.eq.s32.totalorder %v8298_v0, %v7769_v39  ;;  %vm153_vm11 = vcmp.eq.s32.totalorder %v8298_v0, %v7771_v40  ;;  %vm159_vm13 = vcmp.eq.s32.totalorder %v8298_v0, %v7775_v41 }
 0x1e7   :  { %16586 = vst [vmem:[#allocation156_spill] sm:$0xff] %v8285_v6  ;;  %16587 = vst [vmem:[#allocation157_spill] sm:$0xff] %v8287_v17  ;;  %vm157_vm15 = vcmp.eq.s32.totalorder %v8298_v0, %v7777_v42 }
 0x1e9   :  { %2479 = vperm.xlu1 %7220, %v7599_v12   ;;  %2518 = vperm.xlu0 %7219, %v7668_v23  }
 0x1ea   :  { %v8293_v8 = vpop.permute.xlu1 %1787  ;;  %v8295_v19 = vpop.permute.xlu0 %1814 }
 0x1eb   :  { %16588 = vst [vmem:[#allocation158_spill] sm:$0xff] %v8293_v8  ;;  %16589 = vst [vmem:[#allocation159_spill] sm:$0xff] %v8295_v19 }
 0x1ed   :  { %2485 = vperm.xlu1 %7220, %v7613_v14   ;;  %2524 = vperm.xlu0 %7219, %v7680_v25   ;;  %v16146_v14 = vmov 0.0  }
 0x1ee   :  { %v8302_v10 = vpop.permute.xlu1 %1793  ;;  %v8304_v21 = vpop.permute.xlu0 %1820  ;;  %v8319_v23 = vsel %vm148_vm0, 1.0, %v16146_v14  ;;  %v8322_v25 = vsel %vm149_vm1, 1.0, %v16146_v14  ;;  %v8325_v34 = vsel %vm144_vm2, 1.0, %v16146_v14  ;;  %v8330_v35 = vsel %vm145_vm3, 1.0, %v16146_v14 }
 0x1ef   :  { %16590 = vst [vmem:[#allocation160_spill] sm:$0xff] %v8302_v10  ;;  %16591 = vst [vmem:[#allocation161_spill] sm:$0xff] %v8304_v21  ;;  %v8365_v37 = vsel %vm146_vm6, 1.0, %v16146_v14  ;;  %v8393_v42 = vsel %vm152_vm10, 1.0, %v16146_v14  ;;  %v8396_v38 = vsel %vm153_vm11, 1.0, %v16146_v14  ;;  %v8405_v21 = vsel %vm156_vm14, 1.0, %v16146_v14 }
 0x1f0   :  { %v8409_v39 = vsel %vm157_vm15, 1.0, %v16146_v14  ;;  %vm162_vm0 = vcmp.eq.s32.totalorder %v8289_v28, %v7781_v43  ;;  %vm163_vm1 = vcmp.eq.s32.totalorder %v8298_v0, %v7781_v43  ;;  %vm160_vm2 = vcmp.eq.s32.totalorder %v8289_v28, %v7783_v44 }
 0x1f1   :  { %2491 = vperm.xlu1 %7220, %v7625_v16   ;;  %2530 = vperm.xlu0 %7219, %v7692_v27   ;;  %v8359_v27 = vsel %vm150_vm4, 1.0, %v16146_v14  ;;  %vm161_vm3 = vcmp.eq.s32.totalorder %v8298_v0, %v7783_v44  ;;  %vm166_vm4 = vcmp.eq.s32.totalorder %v8289_v28, %v7787_v45  ;;  %vm164_vm6 = vcmp.eq.s32.totalorder %v8289_v28, %v7789_v46 }
 0x1f2   :  { %v8316_v12 = vpop.permute.xlu1 %1799  ;;  %v8327_v15 = vpop.permute.xlu0 %1826  ;;  %v8440_v43 = vsel %vm163_vm1, 1.0, %v16146_v14  ;;  %v8443_v44 = vsel %vm160_vm2, 1.0, %v16146_v14  ;;  %vm168_vm10 = vcmp.eq.s32.totalorder %v8289_v28, %v7795_v48  ;;  %vm169_vm11 = vcmp.eq.s32.totalorder %v8298_v0, %v7795_v48 }
 0x1f3   :  { %16592 = vst [vmem:[#allocation162_spill] sm:$0xff] %v8316_v12  ;;  %16593 = vst [vmem:[#allocation163_spill] sm:$0xff] %v8327_v15  ;;  %v8387_v15 = vsel %vm155_vm9, 1.0, %v16146_v14  ;;  %v8402_v12 = vsel %vm159_vm13, 1.0, %v16146_v14  ;;  %vm171_vm9 = vcmp.eq.s32.totalorder %v8298_v0, %v7793_v47  ;;  %v16143_v10 = vmov 8  }
 0x1f4   :  { %vm175_vm13 = vcmp.eq.s32.totalorder %v8298_v0, %v7799_v49  ;;  %vm172_vm14 = vcmp.eq.s32.totalorder %v8289_v28, %v7801_v50  ;;  %v8504_v17 = vsel %vm169_vm11, 1.0, %v16146_v14  ;;  %vm173_vm15 = vcmp.eq.s32.totalorder %v8298_v0, %v7801_v50 }
 0x1f5   :  { %2497 = vperm.xlu1 %7220, %v7637_v18   ;;  %2536 = vperm.xlu0 %7219, %v7704_v29   ;;  %v8362_v18 = vsel %vm151_vm5, 1.0, %v16146_v14  ;;  %v8375_v29 = vsel %vm147_vm7, 1.0, %v16146_v14  ;;  %vm167_vm5 = vcmp.eq.s32.totalorder %v8298_v0, %v7787_v45  ;;  %vm165_vm7 = vcmp.eq.s32.totalorder %v8298_v0, %v7789_v46 }
 0x1f6   :  { %v8356_v16 = vpop.permute.xlu1 %1805  ;;  %v8369_v41 = vpop.permute.xlu0 %1832  ;;  %v8449_v45 = vsel %vm161_vm3, 1.0, %v16146_v14  ;;  %v8472_v8 = vsel %vm165_vm7, 1.0, %v16146_v14  ;;  %v8493_v46 = vsel %vm168_vm10, 1.0, %v16146_v14  ;;  %vm179_vm1 = vcmp.eq.s32.totalorder %v8298_v0, %v7805_v51 }
 0x1f7   :  { %16594 = vst [vmem:[#allocation164_spill] sm:$0xff] %v8356_v16  ;;  %16595 = vst [vmem:[#allocation165_spill] sm:$0xff] %v8369_v41  ;;  %v8381_v16 = vsel %vm154_vm8, 1.0, %v16146_v14  ;;  %v8399_v41 = vsel %vm158_vm12, 1.0, %v16146_v14  ;;  %vm170_vm8 = vcmp.eq.s32.totalorder %v8289_v28, %v7793_v47  ;;  %vm174_vm12 = vcmp.eq.s32.totalorder %v8289_v28, %v7799_v49  ;;  %v8515_v49 = vld [vmem:[%s15998_s0 + $0xb0] sm:$0xff] }
 0x1f8   :  { %v8478_v48 = vsel %vm170_vm8, 1.0, %v16146_v14  ;;  %vm176_vm2 = vcmp.eq.s32.totalorder %v8289_v28, %v7807_v52  ;;  %vm177_vm3 = vcmp.eq.s32.totalorder %v8298_v0, %v7807_v52  ;;  %vm181_vm7 = vcmp.eq.s32.totalorder %v8298_v0, %v7813_v54 }
 0x1f9   :  { %2503 = vperm.xlu1 %7220, %v7649_v20   ;;  %2542 = vperm.xlu0 %7219, %v7716_v31   ;;  %v8437_v31 = vsel %vm162_vm0, 1.0, %v16146_v14  ;;  %vm178_vm0 = vcmp.eq.s32.totalorder %v8289_v28, %v7805_v51  ;;  %vm186_vm8 = vcmp.eq.s32.totalorder %v8289_v28, %v7817_v55  ;;  %vm184_vm10 = vcmp.eq.s32.totalorder %v8289_v28, %v7819_v56 }
 0x1fa   :  { %v8418_v40 = vpop.permute.xlu1 %1811  ;;  %v8426_v20 = vpop.permute.xlu0 %1838  ;;  %vm185_vm11 = vcmp.eq.s32.totalorder %v8298_v0, %v7819_v56 }
 0x1fb   :  { %16596 = vst [vmem:[#allocation166_spill] sm:$0xff] %v8418_v40  ;;  %16597 = vst [vmem:[#allocation167_spill] sm:$0xff] %v8426_v20  ;;  %v8452_v20 = vsel %vm166_vm4, 1.0, %v16146_v14  ;;  %v8455_v40 = vsel %vm167_vm5, 1.0, %v16146_v14  ;;  %vm182_vm4 = vcmp.eq.s32.totalorder %v8289_v28, %v7811_v53  ;;  %vm183_vm5 = vcmp.eq.s32.totalorder %v8298_v0, %v7811_v53 }
 0x1fd   :  { %2509 = vperm.xlu1 %7220, %v7661_v22   ;;  %7222 = vset.pattern.permute.xlu0 %v16143_v10  ;;  %v8466_v22 = vsel %vm164_vm6, 1.0, %v16146_v14  ;;  %v8484_v10 = vsel %vm171_vm9, 1.0, %v16146_v14  ;;  %vm180_vm6 = vcmp.eq.s32.totalorder %v8289_v28, %v7813_v54  ;;  %vm187_vm9 = vcmp.eq.s32.totalorder %v8298_v0, %v7817_v55  ;;  %v8620_v55 = vld [vmem:[%s15998_s0 + $0x30] sm:$0xff] }
 0x1fe   :  { %v8460_v19 = vpop.permute.xlu1 %1817  ;;  %16607 = vst [vmem:[#allocation176_spill] sm:$0xff] %v8620_v55 }
 0x1ff   :  { %16598 = vst [vmem:[#allocation168_spill] sm:$0xff] %v8460_v19  ;;  %v8489_v19 = vld [vmem:[%s15998_s0 + $0x8] sm:$0xff]  ;;  %v8501_v47 = vpop.permute.xlu0 %2100 }
 0x200   :  { %16599 = vst [vmem:[#allocation169_spill] sm:$0xff] %v8489_v19  ;;  %2804 = vperm.xlu0 %7222, %v8489_v19   ;;  %16600 = vst [vmem:[#allocation170_spill] sm:$0xff] %v8501_v47  ;;  %v16602_v47 = vmov 0.0  }
 0x201   :  { %2515 = vperm.xlu1 %7220, %v8515_v49   ;;  %v8529_v6 = vsel %vm174_vm12, 1.0, %v16602_v47  ;;  %v8532_v13 = vsel %vm175_vm13, 1.0, %v16602_v47  ;;  %v8535_v4 = vsel %vm172_vm14, 1.0, %v16602_v47  ;;  %v8555_v32 = vsel %vm178_vm0, 1.0, %v16602_v47 }
 0x202   :  { %v8526_v14 = vpop.permute.xlu1 %1823  ;;  %v8561_v9 = vsel %vm179_vm1, 1.0, %v16602_v47  ;;  %v8571_v50 = vsel %vm176_vm2, 1.0, %v16602_v47  ;;  %v8577_v26 = vsel %vm177_vm3, 1.0, %v16602_v47  ;;  %v8583_v51 = vsel %vm182_vm4, 1.0, %v16602_v47 }
 0x203   :  { %16601 = vst [vmem:[#allocation171_spill] sm:$0xff] %v8526_v14  ;;  %v8549_v14 = vsel %vm173_vm15, 1.0, %v16602_v47  ;;  %v8565_v7 = vpop.permute.xlu0 %2109  ;;  %v8589_v54 = vsel %vm183_vm5, 1.0, %v16602_v47  ;;  %v8598_v52 = vsel %vm180_vm6, 1.0, %v16602_v47  ;;  %v8609_v5 = vsel %vm181_vm7, 1.0, %v16602_v47 }
 0x204   :  { %2813 = vperm.xlu0 %7222, %v8542_v11   ;;  %16604 = vst [vmem:[#allocation173_spill] sm:$0xff] %v8565_v7  ;;  %16605 = vst [vmem:[#allocation174_spill] sm:$0xff] %v8589_v54  ;;  %v8594_v7 = vld [vmem:[%s15998_s0 + $0xc0] sm:$0xff]  ;;  %vm190_vm12 = vcmp.eq.s32.totalorder %v8289_v28, %v7823_v57  ;;  %vm191_vm13 = vcmp.eq.s32.totalorder %v8298_v0, %v7823_v57  ;;  %vm188_vm14 = vcmp.eq.s32.totalorder %v8289_v28, %v7825_v58  ;;  %v16629_v11 = vld [vmem:[#allocation10_spill] sm:$0xff] }
 0x205   :  { %2521 = vperm.xlu1 %7220, %v8594_v7   ;;  %vm189_vm15 = vcmp.eq.s32.totalorder %v8298_v0, %v7825_v58  ;;  %vm194_vm0 = vcmp.eq.s32.totalorder %v8289_v28, %v7829_v59  ;;  %vm195_vm1 = vcmp.eq.s32.totalorder %v8298_v0, %v7829_v59  ;;  %v8634_v3 = vsel %vm186_vm8, 1.0, %v16602_v47 }
 0x206   :  { %v8606_v53 = vpop.permute.xlu1 %1829  ;;  %16609 = vst [vmem:[#allocation178_spill] sm:$0xff] %v8634_v3  ;;  %v8637_v30 = vsel %vm187_vm9, 1.0, %v16602_v47  ;;  %v8640_v1 = vsel %vm184_vm10, 1.0, %v16602_v47  ;;  %vm192_vm2 = vcmp.eq.s32.totalorder %v8289_v28, %v16612_v61  ;;  %v8660_v36 = vsel %vm190_vm12, 1.0, %v16602_v47 }
 0x207   :  { %16606 = vst [vmem:[#allocation175_spill] sm:$0xff] %v8606_v53  ;;  %v8631_v53 = vpop.permute.xlu0 %2115  ;;  %16610 = vst [vmem:[#allocation179_spill] sm:$0xff] %v8637_v30  ;;  %v8666_v24 = vsel %vm191_vm13, 1.0, %v16602_v47  ;;  %vm193_vm3 = vcmp.eq.s32.totalorder %v8298_v0, %v16612_v61  ;;  %v8676_v56 = vsel %vm188_vm14, 1.0, %v16602_v47  ;;  %v8682_v2 = vsel %vm189_vm15, 1.0, %v16602_v47  ;;  %v8888_v30 = vld [vmem:[%s15998_s0 + $0x70] sm:$0xff] }
 0x208   :  { %2819 = vperm.xlu0 %7222, %v8620_v55   ;;  %16608 = vst [vmem:[#allocation177_spill] sm:$0xff] %v8631_v53  ;;  %16611 = vst [vmem:[#allocation180_spill] sm:$0xff] %v8640_v1  ;;  %v8654_v53 = vsel %vm185_vm11, 1.0, %v16602_v47  ;;  %v8688_v57 = vsel %vm194_vm0, 1.0, %v16602_v47  ;;  %v8694_v61 = vsel %vm195_vm1, 1.0, %v16602_v47  ;;  %v8703_v58 = vsel %vm192_vm2, 1.0, %v16602_v47 }
 0x209   :  { %2527 = vperm.xlu1 %7220, %v8647_v62   ;;  %16613 = vst [vmem:[#allocation5_spill] sm:$0xff] %v8654_v53  ;;  %16614 = vst [vmem:[#allocation181_spill] sm:$0xff] %v8660_v36  ;;  %vm198_vm4 = vcmp.eq.s32.totalorder %v8289_v28, %v16623_v60  ;;  %vm199_vm5 = vcmp.eq.s32.totalorder %v8298_v0, %v16623_v60  ;;  %vm196_vm6 = vcmp.eq.s32.totalorder %v8289_v28, %v16624_v33  ;;  %v8725_v60 = vld [vmem:[%s15998_s0 + $0xe0] sm:$0xff] }
 0x20a   :  { %16615 = vst [vmem:[#allocation182_spill] sm:$0xff] %v8666_v24  ;;  %v8670_v63 = vpop.permute.xlu1 %1835  ;;  %16617 = vst [vmem:[#allocation184_spill] sm:$0xff] %v8676_v56  ;;  %v8714_v55 = vsel %vm193_vm3, 1.0, %v16602_v47  ;;  %vm197_vm7 = vcmp.eq.s32.totalorder %v8298_v0, %v16624_v33  ;;  %vm206_vm12 = vcmp.eq.s32.totalorder %v8289_v28, %v16629_v11  ;;  %vm207_vm13 = vcmp.eq.s32.totalorder %v8298_v0, %v16629_v11 }
 0x20b   :  { %16616 = vst [vmem:[#allocation183_spill] sm:$0xff] %v8670_v63  ;;  %16618 = vst [vmem:[#allocation185_spill] sm:$0xff] %v8682_v2  ;;  %v8699_v63 = vld [vmem:[%s15998_s0 + $0x40] sm:$0xff]  ;;  %v8711_v59 = vpop.permute.xlu0 %2121  ;;  %v8737_v19 = vsel %vm198_vm4, 1.0, %v16602_v47 }
 0x20c   :  { %16619 = vst [vmem:[#allocation186_spill] sm:$0xff] %v8688_v57  ;;  %16620 = vst [vmem:[#allocation187_spill] sm:$0xff] %v8694_v61  ;;  %2825 = vperm.xlu0 %7222, %v8699_v63   ;;  %v8740_v61 = vsel %vm199_vm5, 1.0, %v16602_v47  ;;  %v8743_v57 = vsel %vm196_vm6, 1.0, %v16602_v47 }
 0x20d   :  { %16621 = vst [vmem:[#allocation188_spill] sm:$0xff] %v8699_v63  ;;  %16622 = vst [vmem:[#allocation189_spill] sm:$0xff] %v8703_v58  ;;  %v16627_v63 = vld [vmem:[#allocation8_spill] sm:$0xff]  ;;  %2533 = vperm.xlu1 %7220, %v8725_v60   ;;  %v8750_v58 = vld [vmem:[%s15998_s0 + $0x50] sm:$0xff] }
 0x20e   :  { %16625 = vst [vmem:[#allocation6_spill] sm:$0xff] %v8711_v59  ;;  %16626 = vst [vmem:[#allocation7_spill] sm:$0xff] %v8714_v55  ;;  %vm202_vm8 = vcmp.eq.s32.totalorder %v8289_v28, %v16627_v63  ;;  %vm203_vm9 = vcmp.eq.s32.totalorder %v8298_v0, %v16627_v63  ;;  %v16628_v59 = vld [vmem:[#allocation9_spill] sm:$0xff]  ;;  %v16633_v55 = vld [vmem:[#allocation11_spill] sm:$0xff]  ;;  %v8793_v63 = vsel %vm206_vm12, 1.0, %v16602_v47 }
 0x20f   :  { %vm200_vm10 = vcmp.eq.s32.totalorder %v8289_v28, %v16628_v59  ;;  %vm201_vm11 = vcmp.eq.s32.totalorder %v8298_v0, %v16628_v59  ;;  %16630 = vst [vmem:[#allocation8_spill] sm:$0xff] %v8737_v19  ;;  %16631 = vst [vmem:[#allocation9_spill] sm:$0xff] %v8740_v61  ;;  %vm204_vm14 = vcmp.eq.s32.totalorder %v8289_v28, %v16633_v55  ;;  %v8753_v24 = vpop.permute.xlu1 %2097  ;;  %v8759_v61 = vsel %vm197_vm7, 1.0, %v16602_v47 }
 0x210   :  { %16632 = vst [vmem:[#allocation10_spill] sm:$0xff] %v8743_v57  ;;  %16634 = vst [vmem:[#allocation11_spill] sm:$0xff] %v8750_v58  ;;  %2831 = vperm.xlu0 %7222, %v8750_v58   ;;  %v8765_v19 = vsel %vm202_vm8, 1.0, %v16602_v47  ;;  %v8771_v57 = vsel %vm203_vm9, 1.0, %v16602_v47  ;;  %vm205_vm15 = vcmp.eq.s32.totalorder %v8298_v0, %v16633_v55  ;;  %v8781_v33 = vsel %vm200_vm10, 1.0, %v16602_v47 }
 0x211   :  { %16635 = vst [vmem:[#allocation190_spill] sm:$0xff] %v8753_v24  ;;  %16636 = vst [vmem:[#allocation191_spill] sm:$0xff] %v8759_v61  ;;  %v8775_v24 = vpop.permute.xlu0 %2127  ;;  %v8787_v58 = vsel %vm201_vm11, 1.0, %v16602_v47  ;;  %v8799_v55 = vsel %vm207_vm13, 1.0, %v16602_v47  ;;  %v8808_v59 = vsel %vm204_vm14, 1.0, %v16602_v47  ;;  %v8817_v11 = vsel %vm205_vm15, 1.0, %v16602_v47 }
 0x212   :  { %16637 = vst [vmem:[#allocation192_spill] sm:$0xff] %v8765_v19  ;;  %16638 = vst [vmem:[#allocation193_spill] sm:$0xff] %v8771_v57  ;;  %v16646_v57 = vld [vmem:[#allocation12_spill] sm:$0xff]  ;;  %v16652_v19 = vld [vmem:[#allocation15_spill] sm:$0xff] }
 0x213   :  { %16639 = vst [vmem:[#allocation194_spill] sm:$0xff] %v8775_v24  ;;  %16640 = vst [vmem:[#allocation195_spill] sm:$0xff] %v8781_v33  ;;  %v8804_v24 = vld [vmem:[%s15998_s0 + $0xf0] sm:$0xff]  ;;  %vm434_vm0 = vcmp.eq.s32.totalorder %v8289_v28, %v16646_v57  ;;  %vm435_vm1 = vcmp.eq.s32.totalorder %v8298_v0, %v16646_v57  ;;  %v8831_v57 = vpop.permute.xlu1 %2103  ;;  %vm438_vm6 = vcmp.eq.s32.totalorder %v8289_v28, %v16652_v19  ;;  %v16655_v61 = vld [vmem:[#allocation17_spill] sm:$0xff] }
 0x214   :  { %16641 = vst [vmem:[#allocation196_spill] sm:$0xff] %v8787_v58  ;;  %16642 = vst [vmem:[#allocation197_spill] sm:$0xff] %v8793_v63  ;;  %2539 = vperm.xlu1 %7220, %v8804_v24   ;;  %v16647_v63 = vld [vmem:[#allocation13_spill] sm:$0xff]  ;;  %vm439_vm7 = vcmp.eq.s32.totalorder %v8298_v0, %v16652_v19  ;;  %v6083_v33 = vsel %vm434_vm0, 1.0, %v16602_v47  ;;  %vm442_vm10 = vcmp.eq.s32.totalorder %v8289_v28, %v16655_v61 }
 0x215   :  { %16643 = vst [vmem:[#allocation198_spill] sm:$0xff] %v8799_v55  ;;  %16644 = vst [vmem:[#allocation199_spill] sm:$0xff] %v8804_v24  ;;  %vm432_vm2 = vcmp.eq.s32.totalorder %v8289_v28, %v16647_v63  ;;  %vm433_vm3 = vcmp.eq.s32.totalorder %v8298_v0, %v16647_v63  ;;  %v16649_v55 = vld [vmem:[#allocation14_spill] sm:$0xff]  ;;  %v8841_v58 = vpop.permute.xlu0 %2133  ;;  %v16656_v24 = vmov 8   ;;  %vm443_vm11 = vcmp.eq.s32.totalorder %v8298_v0, %v16655_v61  ;;  %v16669_v61 = vld [vmem:[#allocation21_spill] sm:$0xff] }
 0x216   :  { %16645 = vst [vmem:[#allocation200_spill] sm:$0xff] %v8808_v59  ;;  %16648 = vst [vmem:[#allocation12_spill] sm:$0xff] %v8817_v11  ;;  %vm436_vm4 = vcmp.eq.s32.totalorder %v8289_v28, %v16649_v55  ;;  %vm437_vm5 = vcmp.eq.s32.totalorder %v8298_v0, %v16649_v55  ;;  %v8828_v59 = vld [vmem:[%s15998_s0 + $0x60] sm:$0xff]  ;;  %v16653_v11 = vld [vmem:[#allocation16_spill] sm:$0xff]  ;;  %v6082_v36 = vsel %vm433_vm3, 1.0, %v16602_v47  ;;  %v6087_v63 = vsel %vm438_vm6, 1.0, %v16602_v47 }
 0x217   :  { %16650 = vst [vmem:[#allocation13_spill] sm:$0xff] %v8828_v59  ;;  %2837 = vperm.xlu0 %7222, %v8828_v59   ;;  %16651 = vst [vmem:[#allocation14_spill] sm:$0xff] %v8831_v57  ;;  %vm440_vm8 = vcmp.eq.s32.totalorder %v8289_v28, %v16653_v11  ;;  %vm441_vm9 = vcmp.eq.s32.totalorder %v8298_v0, %v16653_v11  ;;  %v6084_v59 = vsel %vm435_vm1, 1.0, %v16602_v47  ;;  %v6081_v57 = vsel %vm432_vm2, 1.0, %v16602_v47  ;;  %v8891_v3 = vpop.permute.xlu1 %2106 }
 0x218   :  { %16654 = vst [vmem:[#allocation15_spill] sm:$0xff] %v8841_v58  ;;  %7221 = vset.pattern.permute.xlu1 %v16656_v24  ;;  %v6085_v58 = vsel %vm436_vm4, 1.0, %v16602_v47  ;;  %v6086_v2 = vsel %vm437_vm5, 1.0, %v16602_v47  ;;  %v8866_v24 = vld [vmem:[%s15998_s0] sm:$0xff]  ;;  %v6088_v55 = vsel %vm439_vm7, 1.0, %v16602_v47  ;;  %v6089_v56 = vsel %vm440_vm8, 1.0, %v16602_v47 }
 0x219   :  { %16657 = vst [vmem:[#allocation16_spill] sm:$0xff] %v8866_v24  ;;  %2801 = vperm.xlu1 %7221, %v8866_v24   ;;  %v6090_v24 = vsel %vm441_vm9, 1.0, %v16602_v47  ;;  %16658 = vst [vmem:[#allocation17_spill] sm:$0xff] %v8888_v30  ;;  %v8894_v19 = vadd.f32 %v6083_v33, %v8365_v37  ;;  %v8897_v53 = vadd.f32 %v6084_v59, %v8375_v29  ;;  %v6091_v11 = vsel %vm442_vm10, 1.0, %v16602_v47  ;;  %v8906_v54 = vpop.permute.xlu0 %2139 }
 0x21a   :  { %16659 = vst [vmem:[#allocation201_spill] sm:$0xff] %v8891_v3  ;;  %v8900_v1 = vadd.f32 %v6081_v57, %v8325_v34  ;;  %16660 = vst [vmem:[#allocation202_spill] sm:$0xff] %v8906_v54  ;;  %v8912_v3 = vadd.f32 %v6085_v58, %v8319_v23  ;;  %v8915_v37 = vadd.f32 %v6086_v2, %v8322_v25  ;;  %v6092_v34 = vsel %vm443_vm11, 1.0, %v16602_v47  ;;  %v8936_v2 = vld [vmem:[%s15998_s0 + $0x10] sm:$0xff]  ;;  %v16670_v58 = vld [vmem:[#allocation22_spill] sm:$0xff] }
 0x21b   :  { %2843 = vperm.xlu0 %7222, %v8888_v30   ;;  %v8909_v30 = vadd.f32 %v6082_v36, %v8330_v35  ;;  %v8922_v29 = vadd.f32 %v6087_v63, %v8359_v27  ;;  %v8925_v33 = vadd.f32 %v6088_v55, %v8362_v18  ;;  %v8928_v36 = vadd.f32 %v6089_v56, %v8393_v42  ;;  %v16662_v35 = vld [vmem:[#allocation18_spill] sm:$0xff]  ;;  %v16663_v27 = vld [vmem:[#allocation19_spill] sm:$0xff]  ;;  %v8951_v18 = vld [vmem:[%s15998_s0 + $0x80] sm:$0xff]  ;;  %v8954_v42 = vpop.permute.xlu1 %2112 }
 0x21c   :  { %v8931_v23 = vadd.f32 %v6090_v24, %v8396_v38  ;;  %16661 = vst [vmem:[#allocation203_spill] sm:$0xff] %v8936_v2  ;;  %v8940_v25 = vadd.f32 %v6091_v11, %v8381_v16  ;;  %vm444_vm12 = vcmp.eq.s32.totalorder %v8289_v28, %v16662_v35  ;;  %vm445_vm13 = vcmp.eq.s32.totalorder %v8298_v0, %v16662_v35  ;;  %v16667_v38 = vld [vmem:[#allocation20_spill] sm:$0xff]  ;;  %v16671_v24 = vld [vmem:[#allocation23_spill] sm:$0xff] }
 0x21d   :  { %2807 = vperm.xlu1 %7221, %v8936_v2   ;;  %vm446_vm14 = vcmp.eq.s32.totalorder %v8289_v28, %v16663_v27  ;;  %16664 = vst [vmem:[#allocation18_spill] sm:$0xff] %v8951_v18  ;;  %16665 = vst [vmem:[#allocation19_spill] sm:$0xff] %v8954_v42  ;;  %v8957_v16 = vadd.f32 %v6092_v34, %v8387_v15  ;;  %vm447_vm15 = vcmp.eq.s32.totalorder %v8298_v0, %v16663_v27  ;;  %v8965_v56 = vpop.permute.xlu0 %2145  ;;  %v8983_v63 = vld [vmem:[%s15998_s0 + $0x18] sm:$0xff]  ;;  %v8994_v35 = vld [vmem:[%s15998_s0 + $0x90] sm:$0xff] }
 0x21e   :  { %vm448_vm0 = vcmp.eq.s32.totalorder %v8289_v28, %v16667_v38  ;;  %vm449_vm1 = vcmp.eq.s32.totalorder %v8298_v0, %v16667_v38  ;;  %16668 = vst [vmem:[#allocation20_spill] sm:$0xff] %v8965_v56  ;;  %vm450_vm2 = vcmp.eq.s32.totalorder %v8289_v28, %v16669_v61  ;;  %vm451_vm3 = vcmp.eq.s32.totalorder %v8298_v0, %v16669_v61 }
 0x21f   :  { %2849 = vperm.xlu0 %7222, %v8951_v18   ;;  %16666 = vst [vmem:[#allocation204_spill] sm:$0xff] %v8957_v16  ;;  %vm452_vm4 = vcmp.eq.s32.totalorder %v8289_v28, %v16670_v58  ;;  %vm453_vm5 = vcmp.eq.s32.totalorder %v8298_v0, %v16670_v58  ;;  %v6093_v15 = vsel %vm444_vm12, 1.0, %v16602_v47  ;;  %v6094_v59 = vsel %vm445_vm13, 1.0, %v16602_v47  ;;  %16672 = vst [vmem:[#allocation21_spill] sm:$0xff] %v8994_v35  ;;  %v8997_v27 = vpop.permute.xlu1 %2118 }
 0x220   :  { %v6095_v57 = vsel %vm446_vm14, 1.0, %v16602_v47  ;;  %vm454_vm6 = vcmp.eq.s32.totalorder %v8289_v28, %v16671_v24  ;;  %v6096_v55 = vsel %vm447_vm15, 1.0, %v16602_v47  ;;  %v6097_v11 = vsel %vm448_vm0, 1.0, %v16602_v47  ;;  %16673 = vst [vmem:[#allocation22_spill] sm:$0xff] %v8997_v27 }
 0x221   :  { %2810 = vperm.xlu1 %7221, %v8983_v63   ;;  %v6098_v34 = vsel %vm449_vm1, 1.0, %v16602_v47  ;;  %vm455_vm7 = vcmp.eq.s32.totalorder %v8298_v0, %v16671_v24  ;;  %v6099_v38 = vsel %vm450_vm2, 1.0, %v16602_v47  ;;  %v6100_v56 = vsel %vm451_vm3, 1.0, %v16602_v47  ;;  %v9015_v54 = vpop.permute.xlu0 %2151 }
 0x222   :  { %v6101_v42 = vsel %vm452_vm4, 1.0, %v16602_v47  ;;  %v6102_v27 = vsel %vm453_vm5, 1.0, %v16602_v47  ;;  %16674 = vst [vmem:[#allocation23_spill] sm:$0xff] %v9015_v54  ;;  %v9021_v18 = vadd.f32 %v6094_v59, %v8409_v39  ;;  %v9024_v61 = vadd.f32 %v6095_v57, %v8399_v41  ;;  %v9046_v39 = vld [vmem:[%s15998_s0 + $0x28] sm:$0xff]  ;;  %v9064_v59 = vld [vmem:[%s15998_s0 + $0xa0] sm:$0xff] }
 0x223   :  { %2855 = vperm.xlu0 %7222, %v8994_v35   ;;  %v9018_v35 = vadd.f32 %v6093_v15, %v8405_v21  ;;  %v6103_v2 = vsel %vm454_vm6, 1.0, %v16602_v47  ;;  %v9031_v16 = vadd.f32 %v6096_v55, %v8402_v12  ;;  %v9034_v58 = vadd.f32 %v6097_v11, %v8443_v44  ;;  %16675 = vst [vmem:[#allocation205_spill] sm:$0xff] %v9064_v59  ;;  %v9067_v57 = vpop.permute.xlu1 %2124  ;;  %v9147_v54 = vld [vmem:[%s15998_s0 + $0x48] sm:$0xff] }
 0x224   :  { %v9037_v21 = vadd.f32 %v6098_v34, %v8449_v45  ;;  %v6104_v41 = vsel %vm455_vm7, 1.0, %v16602_v47  ;;  %v9050_v12 = vadd.f32 %v6099_v38, %v8437_v31  ;;  %v9053_v44 = vadd.f32 %v6100_v56, %v8440_v43  ;;  %16676 = vst [vmem:[#allocation206_spill] sm:$0xff] %v9067_v57  ;;  %v16677_v43 = vld [vmem:[#allocation24_spill] sm:$0xff]  ;;  %v16680_v56 = vld [vmem:[#allocation26_spill] sm:$0xff]  ;;  %v16683_v34 = vld [vmem:[#allocation29_spill] sm:$0xff] }
 0x225   :  { %2816 = vperm.xlu1 %7221, %v9046_v39   ;;  %v9056_v45 = vadd.f32 %v6101_v42, %v8466_v22  ;;  %v9059_v15 = vadd.f32 %v6102_v27, %v8472_v8  ;;  %v9070_v31 = vadd.f32 %v6103_v2, %v8452_v20  ;;  %vm456_vm8 = vcmp.eq.s32.totalorder %v8289_v28, %v16677_v43  ;;  %v16678_v8 = vld [vmem:[#allocation25_spill] sm:$0xff]  ;;  %v9078_v22 = vpop.permute.xlu0 %2157  ;;  %v16681_v20 = vld [vmem:[#allocation27_spill] sm:$0xff]  ;;  %v16682_v2 = vld [vmem:[#allocation28_spill] sm:$0xff] }
 0x226   :  { %vm457_vm9 = vcmp.eq.s32.totalorder %v8298_v0, %v16677_v43  ;;  %vm458_vm10 = vcmp.eq.s32.totalorder %v8289_v28, %v16678_v8  ;;  %16679 = vst [vmem:[#allocation24_spill] sm:$0xff] %v9078_v22  ;;  %v9081_v42 = vadd.f32 %v6104_v41, %v8455_v40  ;;  %vm459_vm11 = vcmp.eq.s32.totalorder %v8298_v0, %v16678_v8  ;;  %v9100_v40 = vld [vmem:[%s15998_s0 + $0x38] sm:$0xff] }
 0x227   :  { %2861 = vperm.xlu0 %7222, %v9064_v59   ;;  %vm460_vm12 = vcmp.eq.s32.totalorder %v8289_v28, %v16680_v56  ;;  %vm461_vm13 = vcmp.eq.s32.totalorder %v8298_v0, %v16680_v56  ;;  %vm462_vm14 = vcmp.eq.s32.totalorder %v8289_v28, %v16681_v20  ;;  %vm463_vm15 = vcmp.eq.s32.totalorder %v8298_v0, %v16681_v20  ;;  %v9109_v27 = vpop.permute.xlu1 %2130 }
 0x228   :  { %vm464_vm0 = vcmp.eq.s32.totalorder %v8289_v28, %v16682_v2  ;;  %vm465_vm1 = vcmp.eq.s32.totalorder %v8298_v0, %v16682_v2  ;;  %v6105_v24 = vsel %vm456_vm8, 1.0, %v16602_v47  ;;  %v6106_v55 = vsel %vm457_vm9, 1.0, %v16602_v47  ;;  %16684 = vst [vmem:[#allocation25_spill] sm:$0xff] %v9109_v27 }
 0x229   :  { %2822 = vperm.xlu1 %7221, %v9100_v40   ;;  %v6107_v11 = vsel %vm458_vm10, 1.0, %v16602_v47  ;;  %vm466_vm2 = vcmp.eq.s32.totalorder %v8289_v28, %v16683_v34  ;;  %v6108_v38 = vsel %vm459_vm11, 1.0, %v16602_v47  ;;  %v6109_v41 = vsel %vm460_vm12, 1.0, %v16602_v47  ;;  %v9116_v8 = vpop.permute.xlu0 %2163 }
 0x22a   :  { %v6110_v43 = vsel %vm461_vm13, 1.0, %v16602_v47  ;;  %vm467_vm3 = vcmp.eq.s32.totalorder %v8298_v0, %v16683_v34  ;;  %16685 = vst [vmem:[#allocation26_spill] sm:$0xff] %v9116_v8  ;;  %v6111_v56 = vsel %vm462_vm14, 1.0, %v16602_v47  ;;  %v6113_v27 = vsel %vm464_vm0, 1.0, %v16602_v47 }
 0x22b   :  { %2867 = vperm.xlu0 %7222, %v8515_v49   ;;  %v6112_v49 = vsel %vm463_vm15, 1.0, %v16602_v47  ;;  %v6114_v34 = vsel %vm465_vm1, 1.0, %v16602_v47  ;;  %v9135_v8 = vadd.f32 %v6105_v24, %v8493_v46  ;;  %v9138_v22 = vadd.f32 %v6106_v55, %v8504_v17  ;;  %v9161_v24 = vpop.permute.xlu1 %2136 }
 0x22c   :  { %v9141_v57 = vadd.f32 %v6107_v11, %v8478_v48  ;;  %v6115_v20 = vsel %vm466_vm2, 1.0, %v16602_v47  ;;  %v9151_v2 = vadd.f32 %v6108_v38, %v8484_v10  ;;  %v9154_v46 = vadd.f32 %v6109_v41, %v8535_v4  ;;  %16686 = vst [vmem:[#allocation27_spill] sm:$0xff] %v9161_v24 }
 0x22d   :  { %2828 = vperm.xlu1 %7221, %v9147_v54   ;;  %v9157_v17 = vadd.f32 %v6110_v43, %v8549_v14  ;;  %v6116_v48 = vsel %vm467_vm3, 1.0, %v16602_v47  ;;  %v9164_v55 = vadd.f32 %v6111_v56, %v8529_v6  ;;  %v9167_v11 = vadd.f32 %v6112_v49, %v8532_v13  ;;  %v9175_v14 = vpop.permute.xlu0 %2169  ;;  %v16692_v6 = vld [vmem:[#allocation31_spill] sm:$0xff] }
 0x22e   :  { %v9170_v10 = vadd.f32 %v6113_v27, %v8571_v50  ;;  %v9173_v4 = vadd.f32 %v6114_v34, %v8577_v26  ;;  %16689 = vst [vmem:[#allocation207_spill] sm:$0xff] %v9175_v14  ;;  %v9178_v38 = vadd.f32 %v6115_v20, %v8555_v32  ;;  %vm470_vm6 = vcmp.eq.s32.totalorder %v8289_v28, %v16692_v6  ;;  %v16694_v26 = vld [vmem:[#allocation32_spill] sm:$0xff]  ;;  %v16695_v50 = vld [vmem:[#allocation33_spill] sm:$0xff]  ;;  %v16698_v49 = vld [vmem:[#allocation35_spill] sm:$0xff] }
 0x22f   :  { %2873 = vperm.xlu0 %7222, %v8594_v7   ;;  %16687 = vst [vmem:[#allocation28_spill] sm:$0xff] %v9164_v55  ;;  %16688 = vst [vmem:[#allocation29_spill] sm:$0xff] %v9167_v11  ;;  %v16691_v7 = vld [vmem:[#allocation30_spill] sm:$0xff]  ;;  %v9187_v13 = vadd.f32 %v6116_v48, %v8561_v9  ;;  %vm471_vm7 = vcmp.eq.s32.totalorder %v8298_v0, %v16692_v6  ;;  %vm472_vm8 = vcmp.eq.s32.totalorder %v8289_v28, %v16694_v26  ;;  %v9198_v32 = vld [vmem:[%s15998_s0 + $0x58] sm:$0xff]  ;;  %v9210_v27 = vpop.permute.xlu1 %2142 }
 0x230   :  { %16690 = vst [vmem:[#allocation208_spill] sm:$0xff] %v9178_v38  ;;  %vm468_vm4 = vcmp.eq.s32.totalorder %v8289_v28, %v16691_v7  ;;  %vm469_vm5 = vcmp.eq.s32.totalorder %v8298_v0, %v16691_v7  ;;  %vm473_vm9 = vcmp.eq.s32.totalorder %v8298_v0, %v16694_v26  ;;  %vm474_vm10 = vcmp.eq.s32.totalorder %v8289_v28, %v16695_v50  ;;  %v16696_v9 = vld [vmem:[#allocation34_spill] sm:$0xff]  ;;  %v16706_v11 = vld [vmem:[#allocation180_spill] sm:$0xff] }
 0x231   :  { %16693 = vst [vmem:[#allocation30_spill] sm:$0xff] %v9187_v13  ;;  %2834 = vperm.xlu1 %7221, %v9198_v32   ;;  %vm475_vm11 = vcmp.eq.s32.totalorder %v8298_v0, %v16695_v50  ;;  %vm476_vm12 = vcmp.eq.s32.totalorder %v8289_v28, %v16696_v9  ;;  %vm477_vm13 = vcmp.eq.s32.totalorder %v8298_v0, %v16696_v9  ;;  %16697 = vst [vmem:[#allocation31_spill] sm:$0xff] %v9210_v27  ;;  %v9217_v34 = vpop.permute.xlu0 %2175  ;;  %v16704_v13 = vld [vmem:[#allocation174_spill] sm:$0xff] }
 0x232   :  { %v6117_v41 = vsel %vm468_vm4, 1.0, %v16602_v47  ;;  %v6118_v43 = vsel %vm469_vm5, 1.0, %v16602_v47  ;;  %v6119_v56 = vsel %vm470_vm6, 1.0, %v16602_v47  ;;  %vm478_vm14 = vcmp.eq.s32.totalorder %v8289_v28, %v16698_v49  ;;  %16699 = vst [vmem:[#allocation32_spill] sm:$0xff] %v9217_v34  ;;  %v9240_v34 = vld [vmem:[%s15998_s0 + $0x68] sm:$0xff] }
 0x233   :  { %2879 = vperm.xlu0 %7222, %v8647_v62   ;;  %v6120_v20 = vsel %vm471_vm7, 1.0, %v16602_v47  ;;  %v6121_v62 = vsel %vm472_vm8, 1.0, %v16602_v47  ;;  %v6122_v48 = vsel %vm473_vm9, 1.0, %v16602_v47  ;;  %vm479_vm15 = vcmp.eq.s32.totalorder %v8298_v0, %v16698_v49  ;;  %v9254_v59 = vpop.permute.xlu1 %2148  ;;  %v16722_v49 = vld [vmem:[#allocation37_spill] sm:$0xff] }
 0x234   :  { %v6123_v7 = vsel %vm474_vm10, 1.0, %v16602_v47  ;;  %v6124_v50 = vsel %vm475_vm11, 1.0, %v16602_v47  ;;  %v6125_v6 = vsel %vm476_vm12, 1.0, %v16602_v47  ;;  %v6126_v9 = vsel %vm477_vm13, 1.0, %v16602_v47  ;;  %16703 = vst [vmem:[#allocation209_spill] sm:$0xff] %v9254_v59 }
 0x235   :  { %2840 = vperm.xlu1 %7221, %v9240_v34   ;;  %v9244_v26 = vadd.f32 %v6117_v41, %v8598_v52  ;;  %v9247_v27 = vadd.f32 %v6118_v43, %v8609_v5  ;;  %v9250_v14 = vadd.f32 %v6119_v56, %v8583_v51  ;;  %v6127_v24 = vsel %vm478_vm14, 1.0, %v16602_v47  ;;  %v16708_v52 = vld [vmem:[#allocation5_spill] sm:$0xff]  ;;  %v9269_v51 = vpop.permute.xlu0 %2181  ;;  %v16711_v43 = vld [vmem:[#allocation178_spill] sm:$0xff]  ;;  %v16713_v56 = vld [vmem:[#allocation179_spill] sm:$0xff] }
 0x236   :  { %v9257_v38 = vadd.f32 %v6120_v20, %v16704_v13  ;;  %v9260_v55 = vadd.f32 %v6121_v62, %v16706_v11  ;;  %v9263_v41 = vadd.f32 %v6122_v48, %v16708_v52  ;;  %v6128_v5 = vsel %vm479_vm15, 1.0, %v16602_v47  ;;  %16710 = vst [vmem:[#allocation210_spill] sm:$0xff] %v9269_v51  ;;  %v16715_v13 = vld [vmem:[#allocation184_spill] sm:$0xff]  ;;  %v16717_v11 = vld [vmem:[#allocation185_spill] sm:$0xff] }
 0x237   :  { %16700 = vst [vmem:[#allocation33_spill] sm:$0xff] %v9244_v26  ;;  %16701 = vst [vmem:[#allocation34_spill] sm:$0xff] %v9247_v27  ;;  %2885 = vperm.xlu0 %7222, %v8725_v60   ;;  %v9272_v60 = vadd.f32 %v6123_v7, %v16711_v43  ;;  %v9275_v59 = vadd.f32 %v6124_v50, %v16713_v56  ;;  %v9278_v20 = vadd.f32 %v6125_v6, %v16715_v13  ;;  %v16719_v48 = vld [vmem:[#allocation181_spill] sm:$0xff]  ;;  %v9295_v7 = vld [vmem:[%s15998_s0 + $0x78] sm:$0xff] }
 0x238   :  { %16702 = vst [vmem:[#allocation35_spill] sm:$0xff] %v9250_v14  ;;  %16705 = vst [vmem:[#allocation174_spill] sm:$0xff] %v9257_v38  ;;  %v9281_v62 = vadd.f32 %v6126_v9, %v16717_v11  ;;  %v9284_v52 = vadd.f32 %v6127_v24, %v16719_v48  ;;  %v16721_v38 = vld [vmem:[#allocation36_spill] sm:$0xff]  ;;  %vm482_vm2 = vcmp.eq.s32.totalorder %v8289_v28, %v16722_v49  ;;  %v16723_v50 = vld [vmem:[#allocation182_spill] sm:$0xff]  ;;  %v9308_v9 = vpop.permute.xlu1 %2154 }
 0x239   :  { %16707 = vst [vmem:[#allocation180_spill] sm:$0xff] %v9260_v55  ;;  %16709 = vst [vmem:[#allocation5_spill] sm:$0xff] %v9263_v41  ;;  %vm480_vm0 = vcmp.eq.s32.totalorder %v8289_v28, %v16721_v38  ;;  %vm481_vm1 = vcmp.eq.s32.totalorder %v8298_v0, %v16721_v38  ;;  %2846 = vperm.xlu1 %7221, %v9295_v7   ;;  %v9299_v6 = vadd.f32 %v6128_v5, %v16723_v50  ;;  %v16725_v24 = vld [vmem:[#allocation38_spill] sm:$0xff]  ;;  %v16726_v38 = vld [vmem:[#allocation199_spill] sm:$0xff]  ;;  %v9316_v56 = vpop.permute.xlu0 %2187 }
 0x23a   :  { %16712 = vst [vmem:[#allocation178_spill] sm:$0xff] %v9272_v60  ;;  %16714 = vst [vmem:[#allocation179_spill] sm:$0xff] %v9275_v59  ;;  %vm483_vm3 = vcmp.eq.s32.totalorder %v8298_v0, %v16722_v49  ;;  %vm484_vm4 = vcmp.eq.s32.totalorder %v8289_v28, %v16725_v24  ;;  %vm485_vm5 = vcmp.eq.s32.totalorder %v8298_v0, %v16725_v24  ;;  %v16728_v43 = vld [vmem:[#allocation39_spill] sm:$0xff]  ;;  %v16729_v5 = vld [vmem:[#allocation40_spill] sm:$0xff]  ;;  %v6129_v13 = vsel %vm480_vm0, 1.0, %v16602_v47 }
 0x23b   :  { %16716 = vst [vmem:[#allocation184_spill] sm:$0xff] %v9278_v20  ;;  %16718 = vst [vmem:[#allocation185_spill] sm:$0xff] %v9281_v62  ;;  %2891 = vperm.xlu0 %7222, %v16726_v38   ;;  %vm486_vm6 = vcmp.eq.s32.totalorder %v8289_v28, %v16728_v43  ;;  %vm487_vm7 = vcmp.eq.s32.totalorder %v8298_v0, %v16728_v43  ;;  %vm488_vm8 = vcmp.eq.s32.totalorder %v8289_v28, %v16729_v5  ;;  %v16731_v38 = vld [vmem:[#allocation41_spill] sm:$0xff]  ;;  %v9332_v43 = vld [vmem:[%s15998_s0 + $0x88] sm:$0xff] }
 0x23c   :  { %16720 = vst [vmem:[#allocation181_spill] sm:$0xff] %v9284_v52  ;;  %16724 = vst [vmem:[#allocation36_spill] sm:$0xff] %v9299_v6  ;;  %v6130_v11 = vsel %vm481_vm1, 1.0, %v16602_v47  ;;  %v6131_v48 = vsel %vm482_vm2, 1.0, %v16602_v47  ;;  %vm489_vm9 = vcmp.eq.s32.totalorder %v8298_v0, %v16729_v5  ;;  %v6132_v49 = vsel %vm483_vm3, 1.0, %v16602_v47  ;;  %v9343_v59 = vpop.permute.xlu1 %2160  ;;  %v16734_v60 = vld [vmem:[#allocation189_spill] sm:$0xff] }
 0x23d   :  { %16727 = vst [vmem:[#allocation37_spill] sm:$0xff] %v9308_v9  ;;  %16730 = vst [vmem:[#allocation182_spill] sm:$0xff] %v9316_v56  ;;  %v6133_v50 = vsel %vm484_vm4, 1.0, %v16602_v47  ;;  %vm490_vm10 = vcmp.eq.s32.totalorder %v8289_v28, %v16731_v38  ;;  %vm491_vm11 = vcmp.eq.s32.totalorder %v8298_v0, %v16731_v38  ;;  %2852 = vperm.xlu1 %7221, %v9332_v43   ;;  %v6134_v56 = vsel %vm485_vm5, 1.0, %v16602_v47  ;;  %v16735_v20 = vld [vmem:[#allocation7_spill] sm:$0xff]  ;;  %v16736_v41 = vld [vmem:[#allocation186_spill] sm:$0xff] }
 0x23e   :  { %16732 = vst [vmem:[#allocation38_spill] sm:$0xff] %v9332_v43  ;;  %v6135_v9 = vsel %vm486_vm6, 1.0, %v16602_v47  ;;  %v6136_v51 = vsel %vm487_vm7, 1.0, %v16602_v47  ;;  %v6137_v6 = vsel %vm488_vm8, 1.0, %v16602_v47  ;;  %v16210_v52 = vmov 9   ;;  %16733 = vst [vmem:[#allocation199_spill] sm:$0xff] %v9343_v59 }
 0x23f   :  { %7223 = vset.pattern.permute.xlu0 %v16210_v52  ;;  %v9346_v62 = vadd.f32 %v6129_v13, %v16734_v60  ;;  %v9349_v14 = vadd.f32 %v6130_v11, %v16735_v20  ;;  %v9352_v24 = vadd.f32 %v6131_v48, %v16736_v41  ;;  %v6138_v55 = vsel %vm489_vm9, 1.0, %v16602_v47  ;;  %v16738_v27 = vld [vmem:[#allocation16_spill] sm:$0xff]  ;;  %v16739_v26 = vld [vmem:[#allocation187_spill] sm:$0xff]  ;;  %v16741_v59 = vld [vmem:[#allocation10_spill] sm:$0xff]  ;;  %v9373_v20 = vpop.permute.xlu0 %2449 }
 0x240   :  { %3153 = vperm.xlu0 %7223, %v16738_v27   ;;  %v9360_v52 = vadd.f32 %v6132_v49, %v16739_v26  ;;  %v9363_v43 = vadd.f32 %v6133_v50, %v16741_v59  ;;  %v6139_v60 = vsel %vm490_vm10, 1.0, %v16602_v47  ;;  %v6140_v41 = vsel %vm491_vm11, 1.0, %v16602_v47  ;;  %16743 = vst [vmem:[#allocation189_spill] sm:$0xff] %v9373_v20  ;;  %v16744_v5 = vld [vmem:[#allocation191_spill] sm:$0xff]  ;;  %v16746_v26 = vld [vmem:[#allocation8_spill] sm:$0xff]  ;;  %v16748_v59 = vld [vmem:[#allocation9_spill] sm:$0xff] }
 0x241   :  { %16737 = vst [vmem:[#allocation39_spill] sm:$0xff] %v9352_v24  ;;  %v9376_v27 = vadd.f32 %v6134_v56, %v16744_v5  ;;  %v9379_v13 = vadd.f32 %v6135_v9, %v16746_v26  ;;  %v9382_v11 = vadd.f32 %v6136_v51, %v16748_v59  ;;  %v16750_v48 = vld [vmem:[#allocation195_spill] sm:$0xff]  ;;  %v9390_v50 = vld [vmem:[%s15998_s0 + $0x98] sm:$0xff]  ;;  %v16754_v56 = vld [vmem:[#allocation42_spill] sm:$0xff] }
 0x242   :  { %16740 = vst [vmem:[#allocation40_spill] sm:$0xff] %v9360_v52  ;;  %16742 = vst [vmem:[#allocation41_spill] sm:$0xff] %v9363_v43  ;;  %v9385_v49 = vadd.f32 %v6137_v6, %v16750_v48  ;;  %2858 = vperm.xlu1 %7221, %v9390_v50   ;;  %v16752_v38 = vld [vmem:[#allocation196_spill] sm:$0xff]  ;;  %vm492_vm12 = vcmp.eq.s32.totalorder %v8289_v28, %v16754_v56  ;;  %vm493_vm13 = vcmp.eq.s32.totalorder %v8298_v0, %v16754_v56  ;;  %v16755_v51 = vld [vmem:[#allocation43_spill] sm:$0xff]  ;;  %v9402_v6 = vpop.permute.xlu1 %2166 }
 0x243   :  { %16745 = vst [vmem:[#allocation7_spill] sm:$0xff] %v9376_v27  ;;  %16747 = vst [vmem:[#allocation186_spill] sm:$0xff] %v9379_v13  ;;  %v9394_v20 = vadd.f32 %v6138_v55, %v16752_v38  ;;  %vm494_vm14 = vcmp.eq.s32.totalorder %v8289_v28, %v16755_v51  ;;  %v16757_v9 = vld [vmem:[#allocation192_spill] sm:$0xff]  ;;  %v16759_v26 = vld [vmem:[#allocation193_spill] sm:$0xff]  ;;  %vm495_vm15 = vcmp.eq.s32.totalorder %v8298_v0, %v16755_v51  ;;  %v6141_v38 = vsel %vm492_vm12, 1.0, %v16602_v47 }
 0x244   :  { %16749 = vst [vmem:[#allocation16_spill] sm:$0xff] %v9382_v11  ;;  %16751 = vst [vmem:[#allocation187_spill] sm:$0xff] %v9385_v49  ;;  %v9405_v5 = vadd.f32 %v6139_v60, %v16757_v9  ;;  %v9408_v59 = vadd.f32 %v6140_v41, %v16759_v26  ;;  %v16761_v55 = vld [vmem:[#allocation44_spill] sm:$0xff]  ;;  %3162 = vperm.xlu0 %7223, %v8983_v63   ;;  %v16762_v48 = vld [vmem:[#allocation45_spill] sm:$0xff]  ;;  %v9423_v41 = vpop.permute.xlu0 %2458  ;;  %v6142_v56 = vsel %vm493_vm13, 1.0, %v16602_v47  ;;  %v6143_v63 = vsel %vm494_vm14, 1.0, %v16602_v47 }
 0x245   :  { %16753 = vst [vmem:[#allocation10_spill] sm:$0xff] %v9394_v20  ;;  %16756 = vst [vmem:[#allocation191_spill] sm:$0xff] %v9402_v6  ;;  %vm784_vm0 = vcmp.eq.s32.totalorder %v8289_v28, %v16761_v55  ;;  %vm785_vm1 = vcmp.eq.s32.totalorder %v8298_v0, %v16761_v55  ;;  %vm786_vm2 = vcmp.eq.s32.totalorder %v8289_v28, %v16762_v48  ;;  %v16763_v60 = vld [vmem:[#allocation46_spill] sm:$0xff]  ;;  %v6144_v9 = vsel %vm495_vm15, 1.0, %v16602_v47  ;;  %v16768_v13 = vld [vmem:[#allocation12_spill] sm:$0xff] }
 0x246   :  { %16758 = vst [vmem:[#allocation8_spill] sm:$0xff] %v9405_v5  ;;  %16760 = vst [vmem:[#allocation9_spill] sm:$0xff] %v9408_v59  ;;  %vm787_vm3 = vcmp.eq.s32.totalorder %v8298_v0, %v16762_v48  ;;  %vm788_vm4 = vcmp.eq.s32.totalorder %v8289_v28, %v16763_v60  ;;  %vm789_vm5 = vcmp.eq.s32.totalorder %v8298_v0, %v16763_v60  ;;  %v9433_v51 = vld [vmem:[%s15998_s0 + $0xa8] sm:$0xff]  ;;  %v6145_v26 = vsel %vm784_vm0, 1.0, %v16602_v47  ;;  %v9442_v6 = vpop.permute.xlu1 %2172  ;;  %v16769_v49 = vld [vmem:[#allocation197_spill] sm:$0xff] }
 0x247   :  { %16764 = vst [vmem:[#allocation195_spill] sm:$0xff] %v9423_v41  ;;  %2864 = vperm.xlu1 %7221, %v9433_v51   ;;  %v16765_v41 = vld [vmem:[#allocation47_spill] sm:$0xff]  ;;  %16766 = vst [vmem:[#allocation196_spill] sm:$0xff] %v9442_v6  ;;  %v6146_v59 = vsel %vm785_vm1, 1.0, %v16602_v47  ;;  %v6147_v5 = vsel %vm786_vm2, 1.0, %v16602_v47  ;;  %v6148_v11 = vsel %vm787_vm3, 1.0, %v16602_v47  ;;  %v9465_v20 = vadd.f32 %v6142_v56, %v16768_v13 }
 0x248   :  { %vm792_vm6 = vcmp.eq.s32.totalorder %v8289_v28, %v16765_v41  ;;  %vm793_vm7 = vcmp.eq.s32.totalorder %v8298_v0, %v16765_v41  ;;  %v6149_v41 = vsel %vm788_vm4, 1.0, %v16602_v47  ;;  %3168 = vperm.xlu0 %7223, %v9046_v39   ;;  %v16767_v6 = vld [vmem:[#allocation200_spill] sm:$0xff]  ;;  %v9468_v52 = vadd.f32 %v6143_v63, %v16769_v49  ;;  %v9474_v24 = vpop.permute.xlu0 %2464  ;;  %v16771_v27 = vld [vmem:[#allocation198_spill] sm:$0xff] }
 0x249   :  { %v9462_v55 = vadd.f32 %v6141_v38, %v16767_v6  ;;  %v6150_v48 = vsel %vm789_vm5, 1.0, %v16602_v47  ;;  %16770 = vst [vmem:[#allocation42_spill] sm:$0xff] %v9474_v24  ;;  %v9477_v43 = vadd.f32 %v6144_v9, %v16771_v27  ;;  %v9480_v39 = vadd.f32 %v6145_v26, %v8900_v1  ;;  %v9487_v49 = vld [vmem:[%s15998_s0 + $0xb8] sm:$0xff] }
 0x24a   :  { %v6153_v6 = vsel %vm792_vm6, 1.0, %v16602_v47  ;;  %v6154_v13 = vsel %vm793_vm7, 1.0, %v16602_v47  ;;  %v9491_v60 = vadd.f32 %v6146_v59, %v8909_v30  ;;  %v9494_v27 = vadd.f32 %v6147_v5, %v8894_v19  ;;  %v9502_v56 = vpop.permute.xlu1 %2178  ;;  %v16773_v9 = vld [vmem:[#allocation48_spill] sm:$0xff]  ;;  %v16774_v30 = vld [vmem:[#allocation49_spill] sm:$0xff]  ;;  %v16775_v19 = vld [vmem:[#allocation50_spill] sm:$0xff] }
 0x24b   :  { %2870 = vperm.xlu1 %7221, %v9487_v49   ;;  %v9497_v1 = vadd.f32 %v6148_v11, %v8897_v53  ;;  %v9500_v38 = vadd.f32 %v6149_v41, %v8912_v3  ;;  %16772 = vst [vmem:[#allocation43_spill] sm:$0xff] %v9502_v56  ;;  %v9505_v63 = vadd.f32 %v6150_v48, %v8915_v37  ;;  %v16777_v11 = vld [vmem:[#allocation51_spill] sm:$0xff] }
 0x24c   :  { %vm790_vm8 = vcmp.eq.s32.totalorder %v8289_v28, %v16773_v9  ;;  %vm791_vm9 = vcmp.eq.s32.totalorder %v8298_v0, %v16773_v9  ;;  %vm796_vm10 = vcmp.eq.s32.totalorder %v8289_v28, %v16774_v30  ;;  %3174 = vperm.xlu0 %7223, %v9100_v40   ;;  %v9515_v53 = vadd.f32 %v6153_v6, %v8928_v36  ;;  %v9524_v37 = vpop.permute.xlu0 %2470  ;;  %v16778_v36 = vld [vmem:[#allocation52_spill] sm:$0xff]  ;;  %v16780_v6 = vld [vmem:[#allocation53_spill] sm:$0xff] }
 0x24d   :  { %v9518_v3 = vadd.f32 %v6154_v13, %v8931_v23  ;;  %vm797_vm11 = vcmp.eq.s32.totalorder %v8298_v0, %v16774_v30  ;;  %vm794_vm12 = vcmp.eq.s32.totalorder %v8289_v28, %v16775_v19  ;;  %16776 = vst [vmem:[#allocation192_spill] sm:$0xff] %v9524_v37  ;;  %vm795_vm13 = vcmp.eq.s32.totalorder %v8298_v0, %v16775_v19  ;;  %v9537_v23 = vld [vmem:[%s15998_s0 + $0xc8] sm:$0xff] }
 0x24e   :  { %vm800_vm14 = vcmp.eq.s32.totalorder %v8289_v28, %v16777_v11  ;;  %vm801_vm15 = vcmp.eq.s32.totalorder %v8298_v0, %v16777_v11  ;;  %vm798_vm0 = vcmp.eq.s32.totalorder %v8289_v28, %v16778_v36  ;;  %v6151_v40 = vsel %vm790_vm8, 1.0, %v16602_v47  ;;  %v9545_v26 = vpop.permute.xlu1 %2184  ;;  %v9585_v11 = vld [vmem:[%s15998_s0 + $0xd8] sm:$0xff] }
 0x24f   :  { %2876 = vperm.xlu1 %7221, %v9537_v23   ;;  %v6152_v5 = vsel %vm791_vm9, 1.0, %v16602_v47  ;;  %v6157_v59 = vsel %vm796_vm10, 1.0, %v16602_v47  ;;  %vm799_vm1 = vcmp.eq.s32.totalorder %v8298_v0, %v16778_v36  ;;  %16779 = vst [vmem:[#allocation193_spill] sm:$0xff] %v9545_v26  ;;  %v6158_v41 = vsel %vm797_vm11, 1.0, %v16602_v47 }
 0x250   :  { %v6155_v48 = vsel %vm794_vm12, 1.0, %v16602_v47  ;;  %vm804_vm2 = vcmp.eq.s32.totalorder %v8289_v28, %v16780_v6  ;;  %vm805_vm3 = vcmp.eq.s32.totalorder %v8298_v0, %v16780_v6  ;;  %3180 = vperm.xlu0 %7223, %v9147_v54   ;;  %v6156_v13 = vsel %vm795_vm13, 1.0, %v16602_v47  ;;  %v9570_v26 = vpop.permute.xlu0 %2476  ;;  %v16784_v6 = vld [vmem:[#allocation54_spill] sm:$0xff] }
 0x251   :  { %v6161_v9 = vsel %vm800_vm14, 1.0, %v16602_v47  ;;  %v6162_v30 = vsel %vm801_vm15, 1.0, %v16602_v47  ;;  %v6159_v54 = vsel %vm798_vm0, 1.0, %v16602_v47  ;;  %16781 = vst [vmem:[#allocation44_spill] sm:$0xff] %v9570_v26  ;;  %v9573_v19 = vadd.f32 %v6151_v40, %v8922_v29 }
 0x252   :  { %v9576_v37 = vadd.f32 %v6152_v5, %v8925_v33  ;;  %v9579_v56 = vadd.f32 %v6157_v59, %v9018_v35  ;;  %v6160_v24 = vsel %vm799_vm1, 1.0, %v16602_v47  ;;  %v9589_v36 = vadd.f32 %v6158_v41, %v9021_v18  ;;  %v9602_v40 = vpop.permute.xlu1 %2190  ;;  %v16783_v5 = vld [vmem:[#allocation204_spill] sm:$0xff] }
 0x253   :  { %2882 = vperm.xlu1 %7221, %v9585_v11   ;;  %v9592_v29 = vadd.f32 %v6155_v48, %v8940_v25  ;;  %v6165_v33 = vsel %vm804_vm2, 1.0, %v16602_v47  ;;  %v6166_v35 = vsel %vm805_vm3, 1.0, %v16602_v47  ;;  %16782 = vst [vmem:[#allocation45_spill] sm:$0xff] %v9602_v40  ;;  %v9605_v59 = vadd.f32 %v6156_v13, %v16783_v5  ;;  %v16785_v13 = vld [vmem:[#allocation55_spill] sm:$0xff] }
 0x254   :  { %v9608_v18 = vadd.f32 %v6161_v9, %v9034_v58  ;;  %v9611_v25 = vadd.f32 %v6162_v30, %v9037_v21  ;;  %v9614_v41 = vadd.f32 %v6159_v54, %v9024_v61  ;;  %3186 = vperm.xlu0 %7223, %v9198_v32   ;;  %v9618_v48 = vadd.f32 %v6160_v24, %v9031_v16  ;;  %v9626_v58 = vpop.permute.xlu0 %2482  ;;  %v16788_v16 = vld [vmem:[#allocation56_spill] sm:$0xff]  ;;  %v9641_v32 = vld [vmem:[%s15998_s0 + $0xe8] sm:$0xff]  ;;  %v16792_v5 = vld [vmem:[#allocation59_spill] sm:$0xff] }
 0x255   :  { %vm802_vm4 = vcmp.eq.s32.totalorder %v8289_v28, %v16784_v6  ;;  %vm803_vm5 = vcmp.eq.s32.totalorder %v8298_v0, %v16784_v6  ;;  %vm808_vm6 = vcmp.eq.s32.totalorder %v8289_v28, %v16785_v13  ;;  %16786 = vst [vmem:[#allocation46_spill] sm:$0xff] %v9626_v58  ;;  %v9629_v21 = vadd.f32 %v6165_v33, %v9056_v45  ;;  %v16789_v45 = vld [vmem:[#allocation57_spill] sm:$0xff] }
 0x256   :  { %v9632_v61 = vadd.f32 %v6166_v35, %v9059_v15  ;;  %vm809_vm7 = vcmp.eq.s32.totalorder %v8298_v0, %v16785_v13  ;;  %vm806_vm8 = vcmp.eq.s32.totalorder %v8289_v28, %v16788_v16  ;;  %vm807_vm9 = vcmp.eq.s32.totalorder %v8298_v0, %v16788_v16  ;;  %v16790_v15 = vld [vmem:[#allocation58_spill] sm:$0xff]  ;;  %v9658_v54 = vpop.permute.xlu1 %2452 }
 0x257   :  { %2888 = vperm.xlu1 %7221, %v9641_v32   ;;  %vm812_vm10 = vcmp.eq.s32.totalorder %v8289_v28, %v16789_v45  ;;  %vm813_vm11 = vcmp.eq.s32.totalorder %v8298_v0, %v16789_v45  ;;  %vm810_vm12 = vcmp.eq.s32.totalorder %v8289_v28, %v16790_v15  ;;  %v6163_v24 = vsel %vm802_vm4, 1.0, %v16602_v47  ;;  %16791 = vst [vmem:[#allocation200_spill] sm:$0xff] %v9658_v54  ;;  %v9675_v54 = vld [vmem:[%s15998_s0 + $0xf8] sm:$0xff] }
 0x258   :  { %16787 = vst [vmem:[#allocation47_spill] sm:$0xff] %v9632_v61  ;;  %v6164_v9 = vsel %vm803_vm5, 1.0, %v16602_v47  ;;  %v6169_v30 = vsel %vm808_vm6, 1.0, %v16602_v47  ;;  %vm811_vm13 = vcmp.eq.s32.totalorder %v8298_v0, %v16790_v15  ;;  %3192 = vperm.xlu0 %7223, %v9240_v34   ;;  %v6170_v33 = vsel %vm809_vm7, 1.0, %v16602_v47  ;;  %v9666_v6 = vpop.permute.xlu0 %2488 }
 0x259   :  { %v6167_v35 = vsel %vm806_vm8, 1.0, %v16602_v47  ;;  %vm816_vm14 = vcmp.eq.s32.totalorder %v8289_v28, %v16792_v5  ;;  %vm817_vm15 = vcmp.eq.s32.totalorder %v8298_v0, %v16792_v5  ;;  %16793 = vst [vmem:[#allocation12_spill] sm:$0xff] %v9666_v6  ;;  %v6168_v13 = vsel %vm807_vm9, 1.0, %v16602_v47 }
 0x25a   :  { %v6173_v16 = vsel %vm812_vm10, 1.0, %v16602_v47  ;;  %v6174_v34 = vsel %vm813_vm11, 1.0, %v16602_v47  ;;  %v6171_v45 = vsel %vm810_vm12, 1.0, %v16602_v47  ;;  %v9679_v58 = vadd.f32 %v6163_v24, %v9050_v12 }
 0x25b   :  { %2894 = vperm.xlu1 %7221, %v9675_v54   ;;  %v9682_v5 = vadd.f32 %v6164_v9, %v9053_v44  ;;  %v9685_v6 = vadd.f32 %v6169_v30, %v9135_v8  ;;  %v6172_v40 = vsel %vm811_vm13, 1.0, %v16602_v47  ;;  %v9692_v26 = vadd.f32 %v6170_v33, %v9138_v22  ;;  %v9700_v44 = vpop.permute.xlu1 %2455  ;;  %v16805_v33 = vld [vmem:[#allocation63_spill] sm:$0xff] }
 0x25c   :  { %v9695_v61 = vadd.f32 %v6167_v35, %v9070_v31  ;;  %v6177_v12 = vsel %vm816_vm14, 1.0, %v16602_v47  ;;  %v6178_v24 = vsel %vm817_vm15, 1.0, %v16602_v47  ;;  %3198 = vperm.xlu0 %7223, %v9295_v7   ;;  %16794 = vst [vmem:[#allocation197_spill] sm:$0xff] %v9700_v44  ;;  %v9703_v8 = vadd.f32 %v6168_v13, %v9081_v42  ;;  %v9714_v9 = vpop.permute.xlu0 %2494  ;;  %v16798_v7 = vld [vmem:[#allocation60_spill] sm:$0xff]  ;;  %v16799_v42 = vld [vmem:[#allocation61_spill] sm:$0xff] }
 0x25d   :  { %v9706_v15 = vadd.f32 %v6173_v16, %v9154_v46  ;;  %v9709_v22 = vadd.f32 %v6174_v34, %v9157_v17  ;;  %v9712_v31 = vadd.f32 %v6171_v45, %v9141_v57  ;;  %16797 = vst [vmem:[#allocation49_spill] sm:$0xff] %v9714_v9  ;;  %v9717_v30 = vadd.f32 %v6172_v40, %v9151_v2  ;;  %v16803_v2 = vld [vmem:[#allocation62_spill] sm:$0xff]  ;;  %v16804_v40 = vld [vmem:[#allocation169_spill] sm:$0xff] }
 0x25e   :  { %vm814_vm0 = vcmp.eq.s32.totalorder %v8289_v28, %v16798_v7  ;;  %vm815_vm1 = vcmp.eq.s32.totalorder %v8298_v0, %v16798_v7  ;;  %vm820_vm2 = vcmp.eq.s32.totalorder %v8289_v28, %v16799_v42  ;;  %v16800_v46 = vmov 9   ;;  %v16810_v7 = vld [vmem:[#allocation65_spill] sm:$0xff] }
 0x25f   :  { %16795 = vst [vmem:[#allocation198_spill] sm:$0xff] %v9706_v15  ;;  %16796 = vst [vmem:[#allocation48_spill] sm:$0xff] %v9709_v22  ;;  %7224 = vset.pattern.permute.xlu1 %v16800_v46  ;;  %v9727_v17 = vadd.f32 %v6177_v12, %v9170_v10  ;;  %v9730_v57 = vadd.f32 %v6178_v24, %v9173_v4  ;;  %vm821_vm3 = vcmp.eq.s32.totalorder %v8298_v0, %v16799_v42  ;;  %v16806_v10 = vld [vmem:[#allocation64_spill] sm:$0xff]  ;;  %v16807_v4 = vld [vmem:[#allocation38_spill] sm:$0xff]  ;;  %v9746_v35 = vpop.permute.xlu1 %2461 }
 0x260   :  { %vm818_vm4 = vcmp.eq.s32.totalorder %v8289_v28, %v16803_v2  ;;  %3156 = vperm.xlu1 %7224, %v16804_v40   ;;  %vm819_vm5 = vcmp.eq.s32.totalorder %v8298_v0, %v16803_v2  ;;  %vm824_vm6 = vcmp.eq.s32.totalorder %v8289_v28, %v16805_v33  ;;  %vm825_vm7 = vcmp.eq.s32.totalorder %v8298_v0, %v16805_v33  ;;  %v9753_v45 = vpop.permute.xlu0 %2500  ;;  %v16811_v33 = vld [vmem:[#allocation203_spill] sm:$0xff]  ;;  %v16814_v9 = vld [vmem:[#allocation33_spill] sm:$0xff]  ;;  %v16819_v15 = vld [vmem:[#allocation208_spill] sm:$0xff] }
 0x261   :  { %16801 = vst [vmem:[#allocation50_spill] sm:$0xff] %v9727_v17  ;;  %16802 = vst [vmem:[#allocation51_spill] sm:$0xff] %v9730_v57  ;;  %vm822_vm8 = vcmp.eq.s32.totalorder %v8289_v28, %v16806_v10  ;;  %3204 = vperm.xlu0 %7223, %v16807_v4   ;;  %v6175_v13 = vsel %vm814_vm0, 1.0, %v16602_v47  ;;  %v6176_v16 = vsel %vm815_vm1, 1.0, %v16602_v47  ;;  %v6181_v34 = vsel %vm820_vm2, 1.0, %v16602_v47  ;;  %v16817_v17 = vld [vmem:[#allocation34_spill] sm:$0xff] }
 0x262   :  { %16808 = vst [vmem:[#allocation52_spill] sm:$0xff] %v9746_v35  ;;  %vm823_vm9 = vcmp.eq.s32.totalorder %v8298_v0, %v16806_v10  ;;  %16809 = vst [vmem:[#allocation53_spill] sm:$0xff] %v9753_v45  ;;  %v6182_v12 = vsel %vm821_vm3, 1.0, %v16602_v47  ;;  %v6179_v24 = vsel %vm818_vm4, 1.0, %v16602_v47  ;;  %vm828_vm10 = vcmp.eq.s32.totalorder %v8289_v28, %v16810_v7  ;;  %v16812_v10 = vld [vmem:[#allocation28_spill] sm:$0xff]  ;;  %v16813_v45 = vld [vmem:[#allocation29_spill] sm:$0xff] }
 0x263   :  { %vm829_vm11 = vcmp.eq.s32.totalorder %v8298_v0, %v16810_v7  ;;  %v6180_v42 = vsel %vm819_vm5, 1.0, %v16602_v47  ;;  %v6185_v46 = vsel %vm824_vm6, 1.0, %v16602_v47  ;;  %v6186_v2 = vsel %vm825_vm7, 1.0, %v16602_v47  ;;  %v9777_v57 = vpop.permute.xlu1 %2467 }
 0x264   :  { %v6183_v40 = vsel %vm822_vm8, 1.0, %v16602_v47  ;;  %3159 = vperm.xlu1 %7224, %v16811_v33   ;;  %v9767_v4 = vadd.f32 %v6175_v13, %v16812_v10  ;;  %v9770_v35 = vadd.f32 %v6176_v16, %v16813_v45  ;;  %v9773_v44 = vadd.f32 %v6181_v34, %v16814_v9  ;;  %16816 = vst [vmem:[#allocation54_spill] sm:$0xff] %v9777_v57  ;;  %v9787_v45 = vpop.permute.xlu0 %2506  ;;  %v16821_v9 = vld [vmem:[#allocation30_spill] sm:$0xff]  ;;  %v16823_v10 = vld [vmem:[#allocation180_spill] sm:$0xff] }
 0x265   :  { %v6184_v7 = vsel %vm823_vm9, 1.0, %v16602_v47  ;;  %3210 = vperm.xlu0 %7223, %v9390_v50   ;;  %v9780_v22 = vadd.f32 %v6182_v12, %v16817_v17  ;;  %v9783_v33 = vadd.f32 %v6179_v24, %v16819_v15  ;;  %v6189_v13 = vsel %vm828_vm10, 1.0, %v16602_v47  ;;  %16820 = vst [vmem:[#allocation56_spill] sm:$0xff] %v9787_v45  ;;  %v16825_v50 = vld [vmem:[#allocation5_spill] sm:$0xff]  ;;  %v16827_v17 = vld [vmem:[#allocation35_spill] sm:$0xff]  ;;  %v16829_v15 = vld [vmem:[#allocation174_spill] sm:$0xff] }
 0x266   :  { %16815 = vst [vmem:[#allocation204_spill] sm:$0xff] %v9773_v44  ;;  %v6190_v16 = vsel %vm829_vm11, 1.0, %v16602_v47  ;;  %v9790_v34 = vadd.f32 %v6180_v42, %v16821_v9  ;;  %v9793_v44 = vadd.f32 %v6185_v46, %v16823_v10  ;;  %v9796_v57 = vadd.f32 %v6186_v2, %v16825_v50  ;;  %v16832_v42 = vld [vmem:[#allocation67_spill] sm:$0xff]  ;;  %v16833_v46 = vld [vmem:[#allocation172_spill] sm:$0xff]  ;;  %v16836_v10 = vld [vmem:[#allocation185_spill] sm:$0xff] }
 0x267   :  { %16818 = vst [vmem:[#allocation55_spill] sm:$0xff] %v9780_v22  ;;  %v9799_v12 = vadd.f32 %v6183_v40, %v16827_v17  ;;  %v9802_v24 = vadd.f32 %v6184_v7, %v16829_v15  ;;  %v16831_v22 = vld [vmem:[#allocation66_spill] sm:$0xff]  ;;  %vm832_vm14 = vcmp.eq.s32.totalorder %v8289_v28, %v16832_v42  ;;  %v16834_v9 = vld [vmem:[#allocation184_spill] sm:$0xff]  ;;  %v9815_v40 = vadd.f32 %v6190_v16, %v16836_v10  ;;  %v16840_v50 = vld [vmem:[#allocation69_spill] sm:$0xff] }
 0x268   :  { %16822 = vst [vmem:[#allocation57_spill] sm:$0xff] %v9790_v34  ;;  %16824 = vst [vmem:[#allocation58_spill] sm:$0xff] %v9793_v44  ;;  %vm826_vm12 = vcmp.eq.s32.totalorder %v8289_v28, %v16831_v22  ;;  %vm827_vm13 = vcmp.eq.s32.totalorder %v8298_v0, %v16831_v22  ;;  %3165 = vperm.xlu1 %7224, %v16833_v46   ;;  %v9812_v2 = vadd.f32 %v6189_v13, %v16834_v9  ;;  %v16838_v7 = vld [vmem:[#allocation68_spill] sm:$0xff]  ;;  %v9822_v22 = vpop.permute.xlu1 %2473  ;;  %v16841_v13 = vld [vmem:[#allocation70_spill] sm:$0xff]  ;;  %v9832_v16 = vpop.permute.xlu0 %2512 }
 0x269   :  { %16826 = vst [vmem:[#allocation59_spill] sm:$0xff] %v9796_v57  ;;  %16828 = vst [vmem:[#allocation60_spill] sm:$0xff] %v9799_v12  ;;  %vm833_vm15 = vcmp.eq.s32.totalorder %v8298_v0, %v16832_v42  ;;  %vm830_vm0 = vcmp.eq.s32.totalorder %v8289_v28, %v16838_v7  ;;  %3216 = vperm.xlu0 %7223, %v9433_v51   ;;  %vm831_vm1 = vcmp.eq.s32.totalorder %v8298_v0, %v16838_v7  ;;  %v16843_v9 = vld [vmem:[#allocation71_spill] sm:$0xff]  ;;  %v16844_v10 = vld [vmem:[#allocation176_spill] sm:$0xff] }
 0x26a   :  { %16830 = vst [vmem:[#allocation61_spill] sm:$0xff] %v9802_v24  ;;  %16835 = vst [vmem:[#allocation62_spill] sm:$0xff] %v9812_v2  ;;  %vm836_vm2 = vcmp.eq.s32.totalorder %v8289_v28, %v16840_v50  ;;  %vm837_vm3 = vcmp.eq.s32.totalorder %v8298_v0, %v16840_v50  ;;  %vm834_vm4 = vcmp.eq.s32.totalorder %v8289_v28, %v16841_v13  ;;  %v6187_v17 = vsel %vm826_vm12, 1.0, %v16602_v47  ;;  %v16846_v45 = vld [vmem:[#allocation178_spill] sm:$0xff]  ;;  %v16847_v2 = vld [vmem:[#allocation179_spill] sm:$0xff] }
 0x26b   :  { %16837 = vst [vmem:[#allocation169_spill] sm:$0xff] %v9815_v40  ;;  %16839 = vst [vmem:[#allocation63_spill] sm:$0xff] %v9822_v22  ;;  %v6188_v51 = vsel %vm827_vm13, 1.0, %v16602_v47  ;;  %v6193_v15 = vsel %vm832_vm14, 1.0, %v16602_v47  ;;  %vm835_vm5 = vcmp.eq.s32.totalorder %v8298_v0, %v16841_v13  ;;  %v6194_v42 = vsel %vm833_vm15, 1.0, %v16602_v47  ;;  %v16851_v34 = vld [vmem:[#allocation181_spill] sm:$0xff] }
 0x26c   :  { %16842 = vst [vmem:[#allocation64_spill] sm:$0xff] %v9832_v16  ;;  %v6191_v46 = vsel %vm830_vm0, 1.0, %v16602_v47  ;;  %vm840_vm6 = vcmp.eq.s32.totalorder %v8289_v28, %v16843_v9  ;;  %vm841_vm7 = vcmp.eq.s32.totalorder %v8298_v0, %v16843_v9  ;;  %3171 = vperm.xlu1 %7224, %v16844_v10   ;;  %v6192_v7 = vsel %vm831_vm1, 1.0, %v16602_v47  ;;  %v9851_v22 = vpop.permute.xlu1 %2479  ;;  %v9863_v24 = vpop.permute.xlu0 %2518  ;;  %v16862_v9 = vld [vmem:[#allocation73_spill] sm:$0xff] }
 0x26d   :  { %v6197_v50 = vsel %vm836_vm2, 1.0, %v16602_v47  ;;  %v6198_v16 = vsel %vm837_vm3, 1.0, %v16602_v47  ;;  %v6195_v13 = vsel %vm834_vm4, 1.0, %v16602_v47  ;;  %3222 = vperm.xlu0 %7223, %v9487_v49   ;;  %16845 = vst [vmem:[#allocation38_spill] sm:$0xff] %v9851_v22  ;;  %v9854_v40 = vadd.f32 %v6187_v17, %v16846_v45  ;;  %16849 = vst [vmem:[#allocation203_spill] sm:$0xff] %v9863_v24  ;;  %v16858_v24 = vld [vmem:[#allocation188_spill] sm:$0xff] }
 0x26e   :  { %v9857_v57 = vadd.f32 %v6188_v51, %v16847_v2  ;;  %v9860_v10 = vadd.f32 %v6193_v15, %v9346_v62  ;;  %v6196_v44 = vsel %vm835_vm5, 1.0, %v16602_v47  ;;  %v9866_v12 = vadd.f32 %v6194_v42, %v9349_v14  ;;  %v16852_v2 = vld [vmem:[#allocation36_spill] sm:$0xff]  ;;  %v16853_v51 = vld [vmem:[#allocation41_spill] sm:$0xff]  ;;  %v16855_v14 = vld [vmem:[#allocation7_spill] sm:$0xff] }
 0x26f   :  { %v9869_v49 = vadd.f32 %v6191_v46, %v16851_v34  ;;  %v6201_v45 = vsel %vm840_vm6, 1.0, %v16602_v47  ;;  %v6202_v62 = vsel %vm841_vm7, 1.0, %v16602_v47  ;;  %v9880_v17 = vadd.f32 %v6192_v7, %v16852_v2  ;;  %v16857_v34 = vld [vmem:[#allocation39_spill] sm:$0xff]  ;;  %v16859_v22 = vld [vmem:[#allocation40_spill] sm:$0xff] }
 0x270   :  { %16848 = vst [vmem:[#allocation65_spill] sm:$0xff] %v9860_v10  ;;  %16850 = vst [vmem:[#allocation28_spill] sm:$0xff] %v9866_v12  ;;  %v9883_v15 = vadd.f32 %v6197_v50, %v16853_v51  ;;  %v9886_v42 = vadd.f32 %v6198_v16, %v16855_v14  ;;  %v9889_v46 = vadd.f32 %v6195_v13, %v16857_v34  ;;  %3177 = vperm.xlu1 %7224, %v16858_v24   ;;  %v16861_v10 = vld [vmem:[#allocation72_spill] sm:$0xff]  ;;  %v9902_v16 = vpop.permute.xlu1 %2485  ;;  %v16864_v7 = vld [vmem:[#allocation187_spill] sm:$0xff] }
 0x271   :  { %v9893_v12 = vadd.f32 %v6196_v44, %v16859_v22  ;;  %vm838_vm8 = vcmp.eq.s32.totalorder %v8289_v28, %v16861_v10  ;;  %vm839_vm9 = vcmp.eq.s32.totalorder %v8298_v0, %v16861_v10  ;;  %vm844_vm10 = vcmp.eq.s32.totalorder %v8289_v28, %v16862_v9  ;;  %3228 = vperm.xlu0 %7223, %v9537_v23   ;;  %v16866_v24 = vld [vmem:[#allocation10_spill] sm:$0xff]  ;;  %v9914_v22 = vpop.permute.xlu0 %2524  ;;  %v16870_v23 = vld [vmem:[#allocation75_spill] sm:$0xff]  ;;  %v16871_v10 = vld [vmem:[#allocation76_spill] sm:$0xff] }
 0x272   :  { %16854 = vst [vmem:[#allocation29_spill] sm:$0xff] %v9883_v15  ;;  %16856 = vst [vmem:[#allocation33_spill] sm:$0xff] %v9886_v42  ;;  %v9905_v50 = vadd.f32 %v6201_v45, %v16864_v7  ;;  %v9908_v13 = vadd.f32 %v6202_v62, %v16866_v24  ;;  %vm845_vm11 = vcmp.eq.s32.totalorder %v8298_v0, %v16862_v9  ;;  %v16868_v44 = vld [vmem:[#allocation74_spill] sm:$0xff]  ;;  %v6199_v45 = vsel %vm838_vm8, 1.0, %v16602_v47  ;;  %v16872_v51 = vld [vmem:[#allocation11_spill] sm:$0xff] }
 0x273   :  { %16860 = vst [vmem:[#allocation34_spill] sm:$0xff] %v9893_v12  ;;  %16863 = vst [vmem:[#allocation208_spill] sm:$0xff] %v9902_v16  ;;  %vm842_vm12 = vcmp.eq.s32.totalorder %v8289_v28, %v16868_v44  ;;  %vm843_vm13 = vcmp.eq.s32.totalorder %v8298_v0, %v16868_v44  ;;  %vm1136_vm14 = vcmp.eq.s32.totalorder %v8289_v28, %v16870_v23  ;;  %v6200_v62 = vsel %vm839_vm9, 1.0, %v16602_v47  ;;  %v16873_v9 = vld [vmem:[#allocation77_spill] sm:$0xff]  ;;  %v16876_v16 = vld [vmem:[#allocation186_spill] sm:$0xff] }
 0x274   :  { %16865 = vst [vmem:[#allocation30_spill] sm:$0xff] %v9905_v50  ;;  %16867 = vst [vmem:[#allocation180_spill] sm:$0xff] %v9908_v13  ;;  %vm1137_vm15 = vcmp.eq.s32.totalorder %v8298_v0, %v16870_v23  ;;  %vm846_vm0 = vcmp.eq.s32.totalorder %v8289_v28, %v16871_v10  ;;  %v6205_v2 = vsel %vm844_vm10, 1.0, %v16602_v47  ;;  %vm847_vm1 = vcmp.eq.s32.totalorder %v8298_v0, %v16871_v10  ;;  %v9937_v7 = vpop.permute.xlu1 %2491  ;;  %v16877_v50 = vld [vmem:[#allocation16_spill] sm:$0xff] }
 0x275   :  { %16869 = vst [vmem:[#allocation5_spill] sm:$0xff] %v9914_v22  ;;  %3183 = vperm.xlu1 %7224, %v16872_v51   ;;  %v6206_v14 = vsel %vm845_vm11, 1.0, %v16602_v47  ;;  %v6203_v34 = vsel %vm842_vm12, 1.0, %v16602_v47  ;;  %vm1142_vm2 = vcmp.eq.s32.totalorder %v8289_v28, %v16873_v9  ;;  %vm1143_vm3 = vcmp.eq.s32.totalorder %v8298_v0, %v16873_v9  ;;  %3234 = vperm.xlu0 %7223, %v9585_v11   ;;  %v9943_v22 = vpop.permute.xlu0 %2530  ;;  %v16878_v15 = vld [vmem:[#allocation8_spill] sm:$0xff] }
 0x276   :  { %16874 = vst [vmem:[#allocation35_spill] sm:$0xff] %v9937_v7  ;;  %v6204_v24 = vsel %vm843_vm13, 1.0, %v16602_v47  ;;  %v6209_v44 = vsel %vm1136_vm14, 1.0, %v16602_v47  ;;  %v6210_v23 = vsel %vm1137_vm15, 1.0, %v16602_v47  ;;  %v6207_v51 = vsel %vm846_vm0, 1.0, %v16602_v47  ;;  %16875 = vst [vmem:[#allocation174_spill] sm:$0xff] %v9943_v22 }
 0x277   :  { %v9946_v13 = vadd.f32 %v6199_v45, %v16876_v16  ;;  %v9949_v42 = vadd.f32 %v6200_v62, %v16877_v50  ;;  %v9952_v11 = vadd.f32 %v6205_v2, %v9462_v55  ;;  %v6208_v9 = vsel %vm847_vm1, 1.0, %v16602_v47  ;;  %v16879_v50 = vld [vmem:[#allocation13_spill] sm:$0xff] }
 0x278   :  { %v9959_v7 = vadd.f32 %v6206_v14, %v9465_v20  ;;  %v9962_v12 = vadd.f32 %v6203_v34, %v16878_v15  ;;  %v6215_v16 = vsel %vm1142_vm2, 1.0, %v16602_v47  ;;  %v6216_v45 = vsel %vm1143_vm3, 1.0, %v16602_v47  ;;  %v16880_v62 = vld [vmem:[#allocation9_spill] sm:$0xff]  ;;  %v9980_v15 = vpop.permute.xlu1 %2497  ;;  %v16882_v34 = vld [vmem:[#allocation78_spill] sm:$0xff] }
 0x279   :  { %3189 = vperm.xlu1 %7224, %v16879_v50   ;;  %v9968_v55 = vadd.f32 %v6204_v24, %v16880_v62  ;;  %v9971_v2 = vadd.f32 %v6209_v44, %v9480_v39  ;;  %v9974_v10 = vadd.f32 %v6210_v23, %v9491_v60  ;;  %v9977_v20 = vadd.f32 %v6207_v51, %v9468_v52  ;;  %v16883_v39 = vld [vmem:[#allocation79_spill] sm:$0xff]  ;;  %v9991_v60 = vpop.permute.xlu0 %2536  ;;  %v16886_v24 = vld [vmem:[#allocation81_spill] sm:$0xff] }
 0x27a   :  { %3240 = vperm.xlu0 %7223, %v9641_v32   ;;  %16881 = vst [vmem:[#allocation66_spill] sm:$0xff] %v9980_v15  ;;  %v9983_v14 = vadd.f32 %v6208_v9, %v9477_v43  ;;  %vm1138_vm4 = vcmp.eq.s32.totalorder %v8289_v28, %v16882_v34  ;;  %vm1139_vm5 = vcmp.eq.s32.totalorder %v8298_v0, %v16882_v34  ;;  %16884 = vst [vmem:[#allocation67_spill] sm:$0xff] %v9991_v60  ;;  %v16885_v43 = vld [vmem:[#allocation80_spill] sm:$0xff]  ;;  %v16890_v50 = vld [vmem:[#allocation83_spill] sm:$0xff] }
 0x27b   :  { %vm1146_vm6 = vcmp.eq.s32.totalorder %v8289_v28, %v16883_v39  ;;  %v9994_v52 = vadd.f32 %v6215_v16, %v9573_v19  ;;  %v9997_v32 = vadd.f32 %v6216_v45, %v9576_v37  ;;  %vm1147_vm7 = vcmp.eq.s32.totalorder %v8298_v0, %v16883_v39  ;;  %v16887_v19 = vld [vmem:[#allocation82_spill] sm:$0xff]  ;;  %v16888_v37 = vld [vmem:[#allocation17_spill] sm:$0xff] }
 0x27c   :  { %vm1140_vm8 = vcmp.eq.s32.totalorder %v8289_v28, %v16885_v43  ;;  %vm1141_vm9 = vcmp.eq.s32.totalorder %v8298_v0, %v16885_v43  ;;  %vm1150_vm10 = vcmp.eq.s32.totalorder %v8289_v28, %v16886_v24  ;;  %vm1151_vm11 = vcmp.eq.s32.totalorder %v8298_v0, %v16886_v24  ;;  %v10018_v9 = vpop.permute.xlu1 %2503 }
 0x27d   :  { %vm1144_vm12 = vcmp.eq.s32.totalorder %v8289_v28, %v16887_v19  ;;  %3195 = vperm.xlu1 %7224, %v16888_v37   ;;  %v6211_v44 = vsel %vm1138_vm4, 1.0, %v16602_v47  ;;  %v6212_v23 = vsel %vm1139_vm5, 1.0, %v16602_v47  ;;  %v6219_v51 = vsel %vm1146_vm6, 1.0, %v16602_v47  ;;  %16889 = vst [vmem:[#allocation172_spill] sm:$0xff] %v10018_v9  ;;  %v10024_v62 = vpop.permute.xlu0 %2542 }
 0x27e   :  { %vm1145_vm13 = vcmp.eq.s32.totalorder %v8298_v0, %v16887_v19  ;;  %3246 = vperm.xlu0 %7223, %v9675_v54   ;;  %v6220_v16 = vsel %vm1147_vm7, 1.0, %v16602_v47  ;;  %v6213_v45 = vsel %vm1140_vm8, 1.0, %v16602_v47  ;;  %vm1154_vm14 = vcmp.eq.s32.totalorder %v8289_v28, %v16890_v50  ;;  %16891 = vst [vmem:[#allocation184_spill] sm:$0xff] %v10024_v62  ;;  %v16892_v62 = vld [vmem:[#allocation18_spill] sm:$0xff] }
 0x27f   :  { %v6214_v34 = vsel %vm1141_vm9, 1.0, %v16602_v47  ;;  %v6223_v39 = vsel %vm1150_vm10, 1.0, %v16602_v47  ;;  %v6224_v43 = vsel %vm1151_vm11, 1.0, %v16602_v47  ;;  %v6217_v24 = vsel %vm1144_vm12, 1.0, %v16602_v47 }
 0x280   :  { %v10031_v54 = vadd.f32 %v6211_v44, %v9494_v27  ;;  %v10034_v19 = vadd.f32 %v6212_v23, %v9497_v1  ;;  %v10037_v37 = vadd.f32 %v6219_v51, %v9592_v29  ;;  %v6218_v9 = vsel %vm1145_vm13, 1.0, %v16602_v47  ;;  %v10051_v29 = vpop.permute.xlu1 %2509  ;;  %v10068_v51 = vld [vmem:[%s15998_s0 + $0x8] sm:$0xff] }
 0x281   :  { %3201 = vperm.xlu1 %7224, %v16892_v62   ;;  %v10042_v60 = vadd.f32 %v6220_v16, %v9605_v59  ;;  %v10045_v15 = vadd.f32 %v6213_v45, %v9500_v38  ;;  %vm1155_vm15 = vcmp.eq.s32.totalorder %v8298_v0, %v16890_v50  ;;  %v6227_v27 = vsel %vm1154_vm14, 1.0, %v16602_v47  ;;  %16893 = vst [vmem:[#allocation185_spill] sm:$0xff] %v10051_v29  ;;  %v16900_v62 = vld [vmem:[#allocation87_spill] sm:$0xff]  ;;  %v16901_v50 = vld [vmem:[#allocation88_spill] sm:$0xff] }
 0x282   :  { %v16243_v1 = vmov 10   ;;  %v10054_v44 = vadd.f32 %v6214_v34, %v9505_v63  ;;  %v10057_v23 = vadd.f32 %v6223_v39, %v9614_v41  ;;  %v10060_v59 = vadd.f32 %v6224_v43, %v9618_v48  ;;  %16894 = vst [vmem:[#allocation68_spill] sm:$0xff] %v10068_v51  ;;  %v16895_v63 = vld [vmem:[#allocation84_spill] sm:$0xff]  ;;  %v16896_v41 = vld [vmem:[#allocation85_spill] sm:$0xff] }
 0x283   :  { %7226 = vset.pattern.permute.xlu0 %v16243_v1  ;;  %v10063_v38 = vadd.f32 %v6217_v24, %v9515_v53  ;;  %v10072_v16 = vadd.f32 %v6218_v9, %v9518_v3  ;;  %vm1148_vm0 = vcmp.eq.s32.totalorder %v8289_v28, %v16895_v63  ;;  %vm1149_vm1 = vcmp.eq.s32.totalorder %v8298_v0, %v16895_v63  ;;  %v10080_v53 = vpop.permute.xlu0 %2804  ;;  %v16898_v3 = vld [vmem:[#allocation86_spill] sm:$0xff]  ;;  %v16899_v9 = vld [vmem:[#allocation21_spill] sm:$0xff] }
 0x284   :  { %3508 = vperm.xlu0 %7226, %v10068_v51   ;;  %vm1158_vm2 = vcmp.eq.s32.totalorder %v8289_v28, %v16896_v41  ;;  %16897 = vst [vmem:[#allocation69_spill] sm:$0xff] %v10080_v53  ;;  %v6228_v48 = vsel %vm1155_vm15, 1.0, %v16602_v47  ;;  %v10087_v45 = vadd.f32 %v6227_v27, %v9679_v58  ;;  %vm1159_vm3 = vcmp.eq.s32.totalorder %v8298_v0, %v16896_v41  ;;  %v10102_v58 = vpop.permute.xlu1 %2515  ;;  %v7373_v24 = vld [vmem:[%s15998_s0 + $0x20] sm:$0xff] }
 0x285   :  { %vm1152_vm4 = vcmp.eq.s32.totalorder %v8289_v28, %v16898_v3  ;;  %3207 = vperm.xlu1 %7224, %v16899_v9   ;;  %vm1153_vm5 = vcmp.eq.s32.totalorder %v8298_v0, %v16898_v3  ;;  %vm1162_vm6 = vcmp.eq.s32.totalorder %v8289_v28, %v16900_v62  ;;  %vm1163_vm7 = vcmp.eq.s32.totalorder %v8298_v0, %v16900_v62  ;;  %v16904_v9 = vld [vmem:[#allocation89_spill] sm:$0xff] }
 0x286   :  { %vm1156_vm8 = vcmp.eq.s32.totalorder %v8289_v28, %v16901_v50  ;;  %16902 = vst [vmem:[#allocation70_spill] sm:$0xff] %v10102_v58  ;;  %v6221_v34 = vsel %vm1148_vm0, 1.0, %v16602_v47  ;;  %v6222_v39 = vsel %vm1149_vm1, 1.0, %v16602_v47  ;;  %v6231_v43 = vsel %vm1158_vm2, 1.0, %v16602_v47 }
 0x287   :  { %vm1157_vm9 = vcmp.eq.s32.totalorder %v8298_v0, %v16901_v50  ;;  %v10113_v27 = vadd.f32 %v6228_v48, %v9682_v5  ;;  %v6232_v63 = vsel %vm1159_vm3, 1.0, %v16602_v47  ;;  %v6225_v41 = vsel %vm1152_vm4, 1.0, %v16602_v47  ;;  %v10119_v1 = vpop.permute.xlu0 %2813 }
 0x288   :  { %3517 = vperm.xlu0 %7226, %v7373_v24   ;;  %vm1166_vm10 = vcmp.eq.s32.totalorder %v8289_v28, %v16904_v9  ;;  %16905 = vst [vmem:[#allocation176_spill] sm:$0xff] %v10119_v1  ;;  %v6226_v58 = vsel %vm1153_vm5, 1.0, %v16602_v47  ;;  %v6235_v5 = vsel %vm1162_vm6, 1.0, %v16602_v47  ;;  %v6236_v48 = vsel %vm1163_vm7, 1.0, %v16602_v47  ;;  %v16906_v1 = vld [vmem:[#allocation205_spill] sm:$0xff]  ;;  %v10151_v22 = vpop.permute.xlu1 %2521 }
 0x289   :  { %16903 = vst [vmem:[#allocation71_spill] sm:$0xff] %v10113_v27  ;;  %v6229_v24 = vsel %vm1156_vm8, 1.0, %v16602_v47  ;;  %3213 = vperm.xlu1 %7224, %v16906_v1   ;;  %v10139_v3 = vadd.f32 %v6221_v34, %v9579_v56  ;;  %v10142_v53 = vadd.f32 %v6222_v39, %v9589_v36  ;;  %v10145_v29 = vadd.f32 %v6231_v43, %v9695_v61  ;;  %v7374_v36 = vld [vmem:[%s15998_s0 + $0x30] sm:$0xff] }
 0x28a   :  { %v6230_v62 = vsel %vm1157_vm9, 1.0, %v16602_v47  ;;  %16908 = vst [vmem:[#allocation179_spill] sm:$0xff] %v10151_v22  ;;  %v10154_v51 = vadd.f32 %v6232_v63, %v9703_v8  ;;  %v10157_v1 = vadd.f32 %v6225_v41, %v9608_v18  ;;  %vm1167_vm11 = vcmp.eq.s32.totalorder %v8298_v0, %v16904_v9  ;;  %v16913_v39 = vld [vmem:[#allocation47_spill] sm:$0xff]  ;;  %v16914_v63 = vld [vmem:[#allocation90_spill] sm:$0xff]  ;;  %v16919_v9 = vld [vmem:[#allocation93_spill] sm:$0xff] }
 0x28b   :  { %16907 = vst [vmem:[#allocation178_spill] sm:$0xff] %v10145_v29  ;;  %v6239_v56 = vsel %vm1166_vm10, 1.0, %v16602_v47  ;;  %v10166_v61 = vadd.f32 %v6226_v58, %v9611_v25  ;;  %v10169_v50 = vadd.f32 %v6235_v5, %v9712_v31  ;;  %v10172_v8 = vadd.f32 %v6236_v48, %v9717_v30  ;;  %v10177_v34 = vpop.permute.xlu0 %2819  ;;  %v16915_v25 = vld [vmem:[#allocation91_spill] sm:$0xff]  ;;  %v16917_v58 = vld [vmem:[#allocation92_spill] sm:$0xff]  ;;  %v16920_v5 = vld [vmem:[#allocation94_spill] sm:$0xff] }
 0x28c   :  { %16909 = vst [vmem:[#allocation181_spill] sm:$0xff] %v10154_v51  ;;  %3523 = vperm.xlu0 %7226, %v7374_v36   ;;  %v10175_v18 = vadd.f32 %v6229_v24, %v9629_v21  ;;  %16912 = vst [vmem:[#allocation7_spill] sm:$0xff] %v10177_v34  ;;  %v10180_v43 = vadd.f32 %v6230_v62, %v16913_v39  ;;  %vm1160_vm12 = vcmp.eq.s32.totalorder %v8289_v28, %v16914_v63  ;;  %v10191_v31 = vld [vmem:[%s15998_s0 + $0xb0] sm:$0xff]  ;;  %v10202_v41 = vpop.permute.xlu1 %2527 }
 0x28d   :  { %16910 = vst [vmem:[#allocation36_spill] sm:$0xff] %v10169_v50  ;;  %16911 = vst [vmem:[#allocation41_spill] sm:$0xff] %v10172_v8  ;;  %vm1161_vm13 = vcmp.eq.s32.totalorder %v8298_v0, %v16914_v63  ;;  %vm1170_vm14 = vcmp.eq.s32.totalorder %v8289_v28, %v16915_v25  ;;  %3219 = vperm.xlu1 %7224, %v10191_v31   ;;  %v6240_v21 = vsel %vm1167_vm11, 1.0, %v16602_v47  ;;  %v6233_v48 = vsel %vm1160_vm12, 1.0, %v16602_v47  ;;  %v10241_v63 = vld [vmem:[%s15998_s0 + $0xc0] sm:$0xff]  ;;  %v16951_v50 = vld [vmem:[#allocation55_spill] sm:$0xff] }
 0x28e   :  { %v10196_v30 = vadd.f32 %v6239_v56, %v9767_v4  ;;  %vm1171_vm15 = vcmp.eq.s32.totalorder %v8298_v0, %v16915_v25  ;;  %vm1164_vm0 = vcmp.eq.s32.totalorder %v8289_v28, %v16917_v58  ;;  %16918 = vst [vmem:[#allocation188_spill] sm:$0xff] %v10202_v41  ;;  %vm1165_vm1 = vcmp.eq.s32.totalorder %v8298_v0, %v16917_v58  ;;  %v7376_v4 = vld [vmem:[%s15998_s0 + $0x40] sm:$0xff]  ;;  %v16923_v41 = vld [vmem:[#allocation95_spill] sm:$0xff] }
 0x28f   :  { %vm1174_vm2 = vcmp.eq.s32.totalorder %v8289_v28, %v16919_v9  ;;  %vm1175_vm3 = vcmp.eq.s32.totalorder %v8298_v0, %v16919_v9  ;;  %vm1168_vm4 = vcmp.eq.s32.totalorder %v8289_v28, %v16920_v5  ;;  %v6234_v24 = vsel %vm1161_vm13, 1.0, %v16602_v47  ;;  %v10229_v56 = vpop.permute.xlu0 %2825 }
 0x290   :  { %16916 = vst [vmem:[#allocation39_spill] sm:$0xff] %v10196_v30  ;;  %3529 = vperm.xlu0 %7226, %v7376_v4   ;;  %v6243_v62 = vsel %vm1170_vm14, 1.0, %v16602_v47  ;;  %vm1169_vm5 = vcmp.eq.s32.totalorder %v8298_v0, %v16920_v5  ;;  %16921 = vst [vmem:[#allocation40_spill] sm:$0xff] %v10229_v56  ;;  %v10232_v36 = vadd.f32 %v6240_v21, %v9770_v35  ;;  %v6244_v39 = vsel %vm1171_vm15, 1.0, %v16602_v47  ;;  %v10260_v34 = vpop.permute.xlu1 %2533  ;;  %v7378_v30 = vld [vmem:[%s15998_s0 + $0x50] sm:$0xff]  ;;  %v16930_v5 = vld [vmem:[#allocation48_spill] sm:$0xff] }
 0x291   :  { %v6237_v4 = vsel %vm1164_vm0, 1.0, %v16602_v47  ;;  %vm1178_vm6 = vcmp.eq.s32.totalorder %v8289_v28, %v16923_v41  ;;  %3225 = vperm.xlu1 %7224, %v10241_v63   ;;  %v6238_v35 = vsel %vm1165_vm1, 1.0, %v16602_v47  ;;  %v6247_v25 = vsel %vm1174_vm2, 1.0, %v16602_v47  ;;  %16924 = vst [vmem:[#allocation73_spill] sm:$0xff] %v10260_v34  ;;  %v16926_v34 = vld [vmem:[#allocation57_spill] sm:$0xff] }
 0x292   :  { %16922 = vst [vmem:[#allocation72_spill] sm:$0xff] %v10232_v36  ;;  %v6248_v21 = vsel %vm1175_vm3, 1.0, %v16602_v47  ;;  %v6241_v56 = vsel %vm1168_vm4, 1.0, %v16602_v47  ;;  %v10263_v58 = vadd.f32 %v6233_v48, %v9685_v6  ;;  %v10266_v22 = vadd.f32 %v6234_v24, %v9692_v26  ;;  %v16928_v6 = vld [vmem:[#allocation198_spill] sm:$0xff] }
 0x293   :  { %v10269_v36 = vadd.f32 %v6243_v62, %v9783_v33  ;;  %v6242_v9 = vsel %vm1169_vm5, 1.0, %v16602_v47  ;;  %v10279_v8 = vadd.f32 %v6244_v39, %v16926_v34  ;;  %v10282_v48 = vadd.f32 %v6237_v4, %v16928_v6  ;;  %v10290_v33 = vpop.permute.xlu0 %2831  ;;  %v16933_v34 = vld [vmem:[#allocation61_spill] sm:$0xff]  ;;  %v16935_v4 = vld [vmem:[#allocation50_spill] sm:$0xff] }
 0x294   :  { %3535 = vperm.xlu0 %7226, %v7378_v30   ;;  %vm1179_vm7 = vcmp.eq.s32.totalorder %v8298_v0, %v16923_v41  ;;  %v6251_v26 = vsel %vm1178_vm6, 1.0, %v16602_v47  ;;  %16929 = vst [vmem:[#allocation74_spill] sm:$0xff] %v10290_v33  ;;  %v10293_v24 = vadd.f32 %v6238_v35, %v16930_v5  ;;  %v16931_v30 = vld [vmem:[#allocation60_spill] sm:$0xff]  ;;  %v10299_v39 = vadd.f32 %v6248_v21, %v16933_v34  ;;  %v16937_v41 = vld [vmem:[#allocation51_spill] sm:$0xff] }
 0x295   :  { %16925 = vst [vmem:[#allocation187_spill] sm:$0xff] %v10269_v36  ;;  %16927 = vst [vmem:[#allocation10_spill] sm:$0xff] %v10279_v8  ;;  %v10296_v62 = vadd.f32 %v6247_v25, %v16931_v30  ;;  %v10302_v6 = vadd.f32 %v6241_v56, %v16935_v4  ;;  %v10307_v8 = vld [vmem:[%s15998_s0 + $0xd0] sm:$0xff]  ;;  %v10311_v33 = vadd.f32 %v6242_v9, %v16937_v41  ;;  %v16939_v35 = vld [vmem:[#allocation96_spill] sm:$0xff]  ;;  %v10319_v56 = vpop.permute.xlu1 %2539  ;;  %v6252_v21 = vsel %vm1179_vm7, 1.0, %v16602_v47 }
 0x296   :  { %16934 = vst [vmem:[#allocation76_spill] sm:$0xff] %v10299_v39  ;;  %3231 = vperm.xlu1 %7224, %v10307_v8   ;;  %vm1172_vm8 = vcmp.eq.s32.totalorder %v8289_v28, %v16939_v35  ;;  %vm1173_vm9 = vcmp.eq.s32.totalorder %v8298_v0, %v16939_v35  ;;  %v16940_v25 = vld [vmem:[#allocation97_spill] sm:$0xff]  ;;  %16941 = vst [vmem:[#allocation186_spill] sm:$0xff] %v10319_v56  ;;  %v10323_v5 = vadd.f32 %v6251_v26, %v9854_v40  ;;  %v16943_v9 = vld [vmem:[#allocation98_spill] sm:$0xff] }
 0x297   :  { %16932 = vst [vmem:[#allocation75_spill] sm:$0xff] %v10296_v62  ;;  %16936 = vst [vmem:[#allocation11_spill] sm:$0xff] %v10302_v6  ;;  %vm1182_vm10 = vcmp.eq.s32.totalorder %v8289_v28, %v16940_v25  ;;  %vm1183_vm11 = vcmp.eq.s32.totalorder %v8298_v0, %v16940_v25  ;;  %vm1176_vm12 = vcmp.eq.s32.totalorder %v8289_v28, %v16943_v9  ;;  %v7380_v30 = vld [vmem:[%s15998_s0 + $0x60] sm:$0xff]  ;;  %v16944_v34 = vld [vmem:[#allocation99_spill] sm:$0xff]  ;;  %v10340_v26 = vpop.permute.xlu0 %2837  ;;  %v6245_v4 = vsel %vm1172_vm8, 1.0, %v16602_v47 }
 0x298   :  { %16938 = vst [vmem:[#allocation77_spill] sm:$0xff] %v10311_v33  ;;  %16942 = vst [vmem:[#allocation16_spill] sm:$0xff] %v10323_v5  ;;  %3541 = vperm.xlu0 %7226, %v7380_v30   ;;  %vm1177_vm13 = vcmp.eq.s32.totalorder %v8298_v0, %v16943_v9  ;;  %vm1186_vm14 = vcmp.eq.s32.totalorder %v8289_v28, %v16944_v34  ;;  %vm1187_vm15 = vcmp.eq.s32.totalorder %v8298_v0, %v16944_v34  ;;  %v16945_v40 = vld [vmem:[#allocation100_spill] sm:$0xff]  ;;  %v10350_v30 = vld [vmem:[%s15998_s0 + $0xe0] sm:$0xff] }
 0x299   :  { %vm1180_vm0 = vcmp.eq.s32.totalorder %v8289_v28, %v16945_v40  ;;  %16946 = vst [vmem:[#allocation8_spill] sm:$0xff] %v10340_v26  ;;  %v6246_v41 = vsel %vm1173_vm9, 1.0, %v16602_v47  ;;  %v6255_v35 = vsel %vm1182_vm10, 1.0, %v16602_v47  ;;  %vm1181_vm1 = vcmp.eq.s32.totalorder %v8298_v0, %v16945_v40  ;;  %v16948_v5 = vld [vmem:[#allocation101_spill] sm:$0xff]  ;;  %v7382_v25 = vld [vmem:[%s15998_s0 + $0x70] sm:$0xff]  ;;  %v16950_v9 = vld [vmem:[#allocation204_spill] sm:$0xff] }
 0x29a   :  { %3237 = vperm.xlu1 %7224, %v10350_v30   ;;  %v10354_v34 = vadd.f32 %v6252_v21, %v9857_v57  ;;  %v6256_v26 = vsel %vm1183_vm11, 1.0, %v16602_v47  ;;  %v6249_v56 = vsel %vm1176_vm12, 1.0, %v16602_v47  ;;  %vm1190_vm2 = vcmp.eq.s32.totalorder %v8289_v28, %v16948_v5 }
 0x29b   :  { %v6250_v39 = vsel %vm1177_vm13, 1.0, %v16602_v47  ;;  %v6259_v62 = vsel %vm1186_vm14, 1.0, %v16602_v47  ;;  %v6260_v57 = vsel %vm1187_vm15, 1.0, %v16602_v47  ;;  %v6253_v21 = vsel %vm1180_vm0, 1.0, %v16602_v47  ;;  %v10388_v6 = vpop.permute.xlu0 %2843 }
 0x29c   :  { %16947 = vst [vmem:[#allocation13_spill] sm:$0xff] %v10354_v34  ;;  %3547 = vperm.xlu0 %7226, %v7382_v25   ;;  %v10373_v34 = vpop.permute.xlu1 %2801  ;;  %v10376_v36 = vadd.f32 %v6245_v4, %v16950_v9  ;;  %v10379_v51 = vadd.f32 %v6246_v41, %v16951_v50  ;;  %v10382_v29 = vadd.f32 %v6255_v35, %v9869_v49  ;;  %v6254_v33 = vsel %vm1181_vm1, 1.0, %v16602_v47  ;;  %v10405_v50 = vld [vmem:[%s15998_s0 + $0xf0] sm:$0xff]  ;;  %v16961_v41 = vld [vmem:[#allocation62_spill] sm:$0xff] }
 0x29d   :  { %16949 = vst [vmem:[#allocation9_spill] sm:$0xff] %v10373_v34  ;;  %16953 = vst [vmem:[#allocation79_spill] sm:$0xff] %v10388_v6  ;;  %v10391_v25 = vadd.f32 %v6256_v26, %v9880_v17  ;;  %v16955_v34 = vld [vmem:[#allocation58_spill] sm:$0xff]  ;;  %vm1191_vm3 = vcmp.eq.s32.totalorder %v8298_v0, %v16948_v5  ;;  %v6263_v49 = vsel %vm1190_vm2, 1.0, %v16602_v47  ;;  %v16956_v17 = vld [vmem:[#allocation59_spill] sm:$0xff]  ;;  %v10418_v35 = vadd.f32 %v6253_v21, %v16961_v41 }
 0x29e   :  { %16952 = vst [vmem:[#allocation78_spill] sm:$0xff] %v10382_v29  ;;  %v10394_v27 = vadd.f32 %v6249_v56, %v16955_v34  ;;  %3243 = vperm.xlu1 %7224, %v10405_v50   ;;  %v10409_v40 = vadd.f32 %v6250_v39, %v16956_v17  ;;  %v10412_v56 = vadd.f32 %v6259_v62, %v9889_v46  ;;  %v16959_v26 = vld [vmem:[#allocation34_spill] sm:$0xff]  ;;  %v16963_v5 = vld [vmem:[#allocation169_spill] sm:$0xff]  ;;  %v16966_v39 = vld [vmem:[#allocation103_spill] sm:$0xff] }
 0x29f   :  { %16954 = vst [vmem:[#allocation80_spill] sm:$0xff] %v10391_v25  ;;  %v10415_v4 = vadd.f32 %v6260_v57, %v16959_v26  ;;  %16962 = vst [vmem:[#allocation83_spill] sm:$0xff] %v10418_v35  ;;  %v10421_v34 = vadd.f32 %v6254_v33, %v16963_v5  ;;  %v16965_v9 = vld [vmem:[#allocation102_spill] sm:$0xff]  ;;  %vm1194_vm6 = vcmp.eq.s32.totalorder %v8289_v28, %v16966_v39  ;;  %v7384_v46 = vld [vmem:[%s15998_s0 + $0x80] sm:$0xff]  ;;  %v6264_v57 = vsel %vm1191_vm3, 1.0, %v16602_v47  ;;  %v10442_v17 = vpop.permute.xlu0 %2849 }
 0x2a0   :  { %16957 = vst [vmem:[#allocation81_spill] sm:$0xff] %v10409_v40  ;;  %16958 = vst [vmem:[#allocation82_spill] sm:$0xff] %v10412_v56  ;;  %vm1184_vm4 = vcmp.eq.s32.totalorder %v8289_v28, %v16965_v9  ;;  %vm1185_vm5 = vcmp.eq.s32.totalorder %v8298_v0, %v16965_v9  ;;  %3553 = vperm.xlu0 %7226, %v7384_v46   ;;  %v10432_v62 = vpop.permute.xlu1 %2807  ;;  %v10436_v33 = vadd.f32 %v6263_v49, %v9946_v13  ;;  %v16969_v21 = vld [vmem:[#allocation104_spill] sm:$0xff]  ;;  %v16971_v26 = vld [vmem:[#allocation105_spill] sm:$0xff]  ;;  %v16973_v13 = vmov 10  }
 0x2a1   :  { %16960 = vst [vmem:[#allocation17_spill] sm:$0xff] %v10415_v4  ;;  %16964 = vst [vmem:[#allocation18_spill] sm:$0xff] %v10421_v34  ;;  %vm1195_vm7 = vcmp.eq.s32.totalorder %v8298_v0, %v16966_v39  ;;  %vm1188_vm8 = vcmp.eq.s32.totalorder %v8289_v28, %v16969_v21  ;;  %vm1189_vm9 = vcmp.eq.s32.totalorder %v8298_v0, %v16969_v21  ;;  %v16972_v41 = vld [vmem:[#allocation106_spill] sm:$0xff]  ;;  %v6257_v49 = vsel %vm1184_vm4, 1.0, %v16602_v47  ;;  %v16975_v6 = vld [vmem:[#allocation107_spill] sm:$0xff] }
 0x2a2   :  { %16967 = vst [vmem:[#allocation84_spill] sm:$0xff] %v10432_v62  ;;  %16968 = vst [vmem:[#allocation85_spill] sm:$0xff] %v10436_v33  ;;  %vm1198_vm10 = vcmp.eq.s32.totalorder %v8289_v28, %v16971_v26  ;;  %vm1199_vm11 = vcmp.eq.s32.totalorder %v8298_v0, %v16971_v26  ;;  %vm1192_vm12 = vcmp.eq.s32.totalorder %v8289_v28, %v16972_v41  ;;  %7225 = vset.pattern.permute.xlu1 %v16973_v13  ;;  %v10470_v13 = vld [vmem:[%s15998_s0] sm:$0xff]  ;;  %v7386_v39 = vld [vmem:[%s15998_s0 + $0x90] sm:$0xff] }
 0x2a3   :  { %16970 = vst [vmem:[#allocation86_spill] sm:$0xff] %v10442_v17  ;;  %v6258_v5 = vsel %vm1185_vm5, 1.0, %v16602_v47  ;;  %v6267_v46 = vsel %vm1194_vm6, 1.0, %v16602_v47  ;;  %vm1193_vm13 = vcmp.eq.s32.totalorder %v8298_v0, %v16972_v41  ;;  %3505 = vperm.xlu1 %7225, %v10470_v13   ;;  %v10474_v17 = vadd.f32 %v6264_v57, %v9949_v42  ;;  %v16978_v4 = vld [vmem:[#allocation65_spill] sm:$0xff]  ;;  %v16979_v56 = vld [vmem:[#allocation28_spill] sm:$0xff]  ;;  %v16983_v41 = vld [vmem:[#allocation30_spill] sm:$0xff] }
 0x2a4   :  { %v6268_v9 = vsel %vm1195_vm7, 1.0, %v16602_v47  ;;  %v6261_v62 = vsel %vm1188_vm8, 1.0, %v16602_v47  ;;  %vm1490_vm14 = vcmp.eq.s32.totalorder %v8289_v28, %v16975_v6  ;;  %3559 = vperm.xlu0 %7226, %v7386_v39   ;;  %v10483_v33 = vpop.permute.xlu1 %2810  ;;  %v6262_v42 = vsel %vm1189_vm9, 1.0, %v16602_v47  ;;  %v16980_v35 = vld [vmem:[#allocation29_spill] sm:$0xff] }
 0x2a5   :  { %16974 = vst [vmem:[#allocation21_spill] sm:$0xff] %v10474_v17  ;;  %16976 = vst [vmem:[#allocation87_spill] sm:$0xff] %v10483_v33  ;;  %v6271_v57 = vsel %vm1198_vm10, 1.0, %v16602_v47  ;;  %v6272_v17 = vsel %vm1199_vm11, 1.0, %v16602_v47  ;;  %v6265_v39 = vsel %vm1192_vm12, 1.0, %v16602_v47  ;;  %v10501_v33 = vpop.permute.xlu0 %2855  ;;  %v10504_v21 = vadd.f32 %v6257_v49, %v16978_v4 }
 0x2a6   :  { %16977 = vst [vmem:[#allocation88_spill] sm:$0xff] %v10501_v33  ;;  %v10507_v25 = vadd.f32 %v6258_v5, %v16979_v56  ;;  %v10510_v29 = vadd.f32 %v6267_v46, %v9962_v12  ;;  %v6266_v26 = vsel %vm1193_vm13, 1.0, %v16602_v47  ;;  %v10517_v34 = vadd.f32 %v6268_v9, %v9968_v55  ;;  %v10531_v56 = vld [vmem:[%s15998_s0 + $0x10] sm:$0xff]  ;;  %v16982_v55 = vld [vmem:[#allocation33_spill] sm:$0xff]  ;;  %v16985_v9 = vld [vmem:[#allocation180_spill] sm:$0xff] }
 0x2a7   :  { %v10520_v40 = vadd.f32 %v6261_v62, %v16980_v35  ;;  %vm1491_vm15 = vcmp.eq.s32.totalorder %v8298_v0, %v16975_v6  ;;  %v6275_v12 = vsel %vm1490_vm14, 1.0, %v16602_v47  ;;  %16981 = vst [vmem:[#allocation89_spill] sm:$0xff] %v10531_v56  ;;  %3511 = vperm.xlu1 %7225, %v10531_v56   ;;  %v10535_v4 = vadd.f32 %v6262_v42, %v16982_v55  ;;  %v7388_v5 = vld [vmem:[%s15998_s0 + $0xa0] sm:$0xff]  ;;  %v16986_v42 = vld [vmem:[#allocation108_spill] sm:$0xff] }
 0x2a8   :  { %v10538_v35 = vadd.f32 %v6271_v57, %v9977_v20  ;;  %v10541_v62 = vadd.f32 %v6272_v17, %v9983_v14  ;;  %v10544_v49 = vadd.f32 %v6265_v39, %v16983_v41  ;;  %3565 = vperm.xlu0 %7226, %v7388_v5   ;;  %v10549_v46 = vpop.permute.xlu1 %2816  ;;  %v10552_v33 = vadd.f32 %v6266_v26, %v16985_v9  ;;  %v16987_v20 = vld [vmem:[#allocation109_spill] sm:$0xff]  ;;  %v16989_v39 = vld [vmem:[#allocation110_spill] sm:$0xff]  ;;  %v16990_v26 = vld [vmem:[#allocation111_spill] sm:$0xff] }
 0x2a9   :  { %16984 = vst [vmem:[#allocation205_spill] sm:$0xff] %v10549_v46  ;;  %vm1196_vm0 = vcmp.eq.s32.totalorder %v8289_v28, %v16986_v42  ;;  %vm1197_vm1 = vcmp.eq.s32.totalorder %v8298_v0, %v16986_v42  ;;  %vm1496_vm2 = vcmp.eq.s32.totalorder %v8289_v28, %v16987_v20  ;;  %v10560_v14 = vpop.permute.xlu0 %2861  ;;  %v6276_v17 = vsel %vm1491_vm15, 1.0, %v16602_v47  ;;  %v16991_v6 = vld [vmem:[#allocation112_spill] sm:$0xff] }
 0x2aa   :  { %16988 = vst [vmem:[#allocation47_spill] sm:$0xff] %v10560_v14  ;;  %v10567_v57 = vadd.f32 %v6275_v12, %v10031_v54  ;;  %vm1497_vm3 = vcmp.eq.s32.totalorder %v8298_v0, %v16987_v20  ;;  %vm1488_vm4 = vcmp.eq.s32.totalorder %v8289_v28, %v16989_v39  ;;  %vm1489_vm5 = vcmp.eq.s32.totalorder %v8298_v0, %v16989_v39  ;;  %v10584_v54 = vld [vmem:[%s15998_s0 + $0x18] sm:$0xff]  ;;  %v16994_v14 = vld [vmem:[#allocation113_spill] sm:$0xff] }
 0x2ab   :  { %vm1500_vm6 = vcmp.eq.s32.totalorder %v8289_v28, %v16990_v26  ;;  %vm1501_vm7 = vcmp.eq.s32.totalorder %v8298_v0, %v16990_v26  ;;  %vm1492_vm8 = vcmp.eq.s32.totalorder %v8289_v28, %v16991_v6  ;;  %3514 = vperm.xlu1 %7225, %v10584_v54   ;;  %v6269_v12 = vsel %vm1196_vm0, 1.0, %v16602_v47  ;;  %v10633_v26 = vld [vmem:[%s15998_s0 + $0x28] sm:$0xff] }
 0x2ac   :  { %v6270_v55 = vsel %vm1197_vm1, 1.0, %v16602_v47  ;;  %v6281_v41 = vsel %vm1496_vm2, 1.0, %v16602_v47  ;;  %vm1493_vm9 = vcmp.eq.s32.totalorder %v8298_v0, %v16991_v6  ;;  %3571 = vperm.xlu0 %7226, %v10191_v31   ;;  %v10593_v5 = vpop.permute.xlu1 %2822  ;;  %v10596_v9 = vadd.f32 %v6276_v17, %v10034_v19 }
 0x2ad   :  { %16992 = vst [vmem:[#allocation90_spill] sm:$0xff] %v10593_v5  ;;  %v6282_v42 = vsel %vm1497_vm3, 1.0, %v16602_v47  ;;  %v6273_v20 = vsel %vm1488_vm4, 1.0, %v16602_v47  ;;  %vm1504_vm10 = vcmp.eq.s32.totalorder %v8289_v28, %v16994_v14  ;;  %v10602_v46 = vpop.permute.xlu0 %2867  ;;  %v6274_v56 = vsel %vm1489_vm5, 1.0, %v16602_v47 }
 0x2ae   :  { %16993 = vst [vmem:[#allocation91_spill] sm:$0xff] %v10596_v9  ;;  %16995 = vst [vmem:[#allocation92_spill] sm:$0xff] %v10602_v46  ;;  %v6285_v19 = vsel %vm1500_vm6, 1.0, %v16602_v47  ;;  %v6286_v31 = vsel %vm1501_vm7, 1.0, %v16602_v47  ;;  %v6277_v17 = vsel %vm1492_vm8, 1.0, %v16602_v47  ;;  %v10621_v46 = vadd.f32 %v6269_v12, %v9952_v11 }
 0x2af   :  { %v10624_v39 = vadd.f32 %v6270_v55, %v9959_v7  ;;  %v10627_v5 = vadd.f32 %v6281_v41, %v10063_v38  ;;  %v6278_v9 = vsel %vm1493_vm9, 1.0, %v16602_v47  ;;  %3520 = vperm.xlu1 %7225, %v10633_v26   ;;  %v10637_v6 = vadd.f32 %v6282_v42, %v10072_v16 }
 0x2b0   :  { %v10640_v11 = vadd.f32 %v6273_v20, %v9971_v2  ;;  %vm1505_vm11 = vcmp.eq.s32.totalorder %v8298_v0, %v16994_v14  ;;  %v6289_v7 = vsel %vm1504_vm10, 1.0, %v16602_v47  ;;  %3577 = vperm.xlu0 %7226, %v10241_v63   ;;  %v10646_v38 = vpop.permute.xlu1 %2828  ;;  %v10649_v12 = vadd.f32 %v6274_v56, %v9974_v10  ;;  %v16998_v63 = vld [vmem:[#allocation114_spill] sm:$0xff]  ;;  %v16999_v10 = vld [vmem:[#allocation115_spill] sm:$0xff]  ;;  %v17002_v56 = vld [vmem:[#allocation117_spill] sm:$0xff] }
 0x2b1   :  { %16996 = vst [vmem:[#allocation93_spill] sm:$0xff] %v10646_v38  ;;  %v10652_v55 = vadd.f32 %v6285_v19, %v10139_v3  ;;  %v10655_v16 = vadd.f32 %v6286_v31, %v10142_v53  ;;  %v10658_v2 = vadd.f32 %v6277_v17, %v10045_v15  ;;  %v10660_v41 = vpop.permute.xlu0 %2873  ;;  %v10663_v14 = vadd.f32 %v6278_v9, %v10054_v44  ;;  %v17001_v15 = vld [vmem:[#allocation116_spill] sm:$0xff] }
 0x2b2   :  { %16997 = vst [vmem:[#allocation94_spill] sm:$0xff] %v10660_v41  ;;  %vm1494_vm12 = vcmp.eq.s32.totalorder %v8289_v28, %v16998_v63  ;;  %vm1495_vm13 = vcmp.eq.s32.totalorder %v8298_v0, %v16998_v63  ;;  %vm1508_vm14 = vcmp.eq.s32.totalorder %v8289_v28, %v16999_v10  ;;  %v6290_v53 = vsel %vm1505_vm11, 1.0, %v16602_v47  ;;  %v10682_v44 = vld [vmem:[%s15998_s0 + $0x38] sm:$0xff]  ;;  %v17007_v63 = vld [vmem:[#allocation119_spill] sm:$0xff] }
 0x2b3   :  { %v10673_v3 = vadd.f32 %v6289_v7, %v10157_v1  ;;  %vm1509_vm15 = vcmp.eq.s32.totalorder %v8298_v0, %v16999_v10  ;;  %vm1498_vm0 = vcmp.eq.s32.totalorder %v8289_v28, %v17001_v15  ;;  %3526 = vperm.xlu1 %7225, %v10682_v44   ;;  %vm1499_vm1 = vcmp.eq.s32.totalorder %v8298_v0, %v17001_v15  ;;  %v17003_v1 = vld [vmem:[#allocation118_spill] sm:$0xff] }
 0x2b4   :  { %vm1512_vm2 = vcmp.eq.s32.totalorder %v8289_v28, %v17002_v56  ;;  %vm1513_vm3 = vcmp.eq.s32.totalorder %v8298_v0, %v17002_v56  ;;  %vm1502_vm4 = vcmp.eq.s32.totalorder %v8289_v28, %v17003_v1  ;;  %3583 = vperm.xlu0 %7226, %v10307_v8   ;;  %v10694_v9 = vpop.permute.xlu1 %2834  ;;  %v6279_v42 = vsel %vm1494_vm12, 1.0, %v16602_v47  ;;  %v10723_v10 = vld [vmem:[%s15998_s0 + $0x48] sm:$0xff] }
 0x2b5   :  { %17000 = vst [vmem:[#allocation95_spill] sm:$0xff] %v10673_v3  ;;  %17004 = vst [vmem:[#allocation57_spill] sm:$0xff] %v10694_v9  ;;  %v6280_v20 = vsel %vm1495_vm13, 1.0, %v16602_v47  ;;  %v6293_v19 = vsel %vm1508_vm14, 1.0, %v16602_v47  ;;  %vm1503_vm5 = vcmp.eq.s32.totalorder %v8298_v0, %v17003_v1  ;;  %v10701_v31 = vpop.permute.xlu0 %2879  ;;  %v10704_v17 = vadd.f32 %v6290_v53, %v10166_v61 }
 0x2b6   :  { %17005 = vst [vmem:[#allocation198_spill] sm:$0xff] %v10701_v31  ;;  %v6294_v8 = vsel %vm1509_vm15, 1.0, %v16602_v47  ;;  %v6283_v7 = vsel %vm1498_vm0, 1.0, %v16602_v47  ;;  %vm1516_vm6 = vcmp.eq.s32.totalorder %v8289_v28, %v17007_v63  ;;  %v6284_v56 = vsel %vm1499_vm1, 1.0, %v16602_v47 }
 0x2b7   :  { %17006 = vst [vmem:[#allocation48_spill] sm:$0xff] %v10704_v17  ;;  %v6297_v1 = vsel %vm1512_vm2, 1.0, %v16602_v47  ;;  %v6298_v61 = vsel %vm1513_vm3, 1.0, %v16602_v47  ;;  %v6287_v53 = vsel %vm1502_vm4, 1.0, %v16602_v47  ;;  %3532 = vperm.xlu1 %7225, %v10723_v10   ;;  %v10727_v15 = vadd.f32 %v6279_v42, %v9994_v52 }
 0x2b8   :  { %v10730_v31 = vadd.f32 %v6280_v20, %v9997_v32  ;;  %v10733_v9 = vadd.f32 %v6293_v19, %v10175_v18  ;;  %v6288_v41 = vsel %vm1503_vm5, 1.0, %v16602_v47  ;;  %3589 = vperm.xlu0 %7226, %v10350_v30   ;;  %v10737_v38 = vpop.permute.xlu1 %2840  ;;  %v10740_v17 = vadd.f32 %v6294_v8, %v10180_v43  ;;  %v17014_v20 = vld [vmem:[#allocation120_spill] sm:$0xff]  ;;  %v17019_v19 = vld [vmem:[#allocation123_spill] sm:$0xff] }
 0x2b9   :  { %17009 = vst [vmem:[#allocation61_spill] sm:$0xff] %v10737_v38  ;;  %v10743_v3 = vadd.f32 %v6283_v7, %v10037_v37  ;;  %vm1517_vm7 = vcmp.eq.s32.totalorder %v8298_v0, %v17007_v63  ;;  %v6301_v52 = vsel %vm1516_vm6, 1.0, %v16602_v47  ;;  %v10751_v32 = vpop.permute.xlu0 %2885  ;;  %v10754_v18 = vadd.f32 %v6284_v56, %v10042_v60  ;;  %v17015_v60 = vld [vmem:[#allocation121_spill] sm:$0xff] }
 0x2ba   :  { %17008 = vst [vmem:[#allocation60_spill] sm:$0xff] %v10733_v9  ;;  %17010 = vst [vmem:[#allocation50_spill] sm:$0xff] %v10740_v17  ;;  %v10757_v30 = vadd.f32 %v6297_v1, %v10263_v58  ;;  %v10760_v43 = vadd.f32 %v6298_v61, %v10266_v22  ;;  %v10763_v37 = vadd.f32 %v6287_v53, %v10057_v23  ;;  %v10777_v22 = vld [vmem:[%s15998_s0 + $0x58] sm:$0xff]  ;;  %v6302_v23 = vsel %vm1517_vm7, 1.0, %v16602_v47  ;;  %v17017_v58 = vld [vmem:[#allocation122_spill] sm:$0xff] }
 0x2bb   :  { %17011 = vst [vmem:[#allocation51_spill] sm:$0xff] %v10751_v32  ;;  %v10766_v42 = vadd.f32 %v6288_v41, %v10060_v59  ;;  %vm1506_vm8 = vcmp.eq.s32.totalorder %v8289_v28, %v17014_v20  ;;  %vm1507_vm9 = vcmp.eq.s32.totalorder %v8298_v0, %v17014_v20  ;;  %vm1520_vm10 = vcmp.eq.s32.totalorder %v8289_v28, %v17015_v60  ;;  %v10814_v53 = vld [vmem:[%s15998_s0 + $0x68] sm:$0xff]  ;;  %v17026_v32 = vld [vmem:[#allocation11_spill] sm:$0xff] }
 0x2bc   :  { %17012 = vst [vmem:[#allocation96_spill] sm:$0xff] %v10757_v30  ;;  %17013 = vst [vmem:[#allocation97_spill] sm:$0xff] %v10760_v43  ;;  %3538 = vperm.xlu1 %7225, %v10777_v22   ;;  %v10782_v59 = vadd.f32 %v6301_v52, %v10282_v48  ;;  %vm1521_vm11 = vcmp.eq.s32.totalorder %v8298_v0, %v17015_v60  ;;  %vm1510_vm12 = vcmp.eq.s32.totalorder %v8289_v28, %v17017_v58  ;;  %v10789_v41 = vpop.permute.xlu1 %2846  ;;  %v17023_v60 = vld [vmem:[#allocation125_spill] sm:$0xff]  ;;  %v17054_v30 = vld [vmem:[#allocation18_spill] sm:$0xff] }
 0x2bd   :  { %3595 = vperm.xlu0 %7226, %v10405_v50   ;;  %17018 = vst [vmem:[#allocation99_spill] sm:$0xff] %v10789_v41  ;;  %vm1511_vm13 = vcmp.eq.s32.totalorder %v8298_v0, %v17017_v58  ;;  %vm1524_vm14 = vcmp.eq.s32.totalorder %v8289_v28, %v17019_v19  ;;  %vm1525_vm15 = vcmp.eq.s32.totalorder %v8298_v0, %v17019_v19  ;;  %v10797_v48 = vpop.permute.xlu0 %2891  ;;  %v6291_v8 = vsel %vm1506_vm8, 1.0, %v16602_v47  ;;  %v17021_v50 = vld [vmem:[#allocation124_spill] sm:$0xff] }
 0x2be   :  { %17016 = vst [vmem:[#allocation98_spill] sm:$0xff] %v10782_v59  ;;  %17020 = vst [vmem:[#allocation100_spill] sm:$0xff] %v10797_v48  ;;  %v6292_v7 = vsel %vm1507_vm9, 1.0, %v16602_v47  ;;  %v6305_v63 = vsel %vm1520_vm10, 1.0, %v16602_v47  ;;  %vm1514_vm0 = vcmp.eq.s32.totalorder %v8289_v28, %v17021_v50  ;;  %v10805_v56 = vadd.f32 %v6302_v23, %v10293_v24  ;;  %v17025_v48 = vld [vmem:[#allocation71_spill] sm:$0xff]  ;;  %v17028_v59 = vld [vmem:[#allocation77_spill] sm:$0xff] }
 0x2bf   :  { %v6306_v1 = vsel %vm1521_vm11, 1.0, %v16602_v47  ;;  %v6295_v61 = vsel %vm1510_vm12, 1.0, %v16602_v47  ;;  %vm1515_vm1 = vcmp.eq.s32.totalorder %v8298_v0, %v17021_v50  ;;  %v6296_v52 = vsel %vm1511_vm13, 1.0, %v16602_v47  ;;  %v17035_v50 = vld [vmem:[#allocation36_spill] sm:$0xff] }
 0x2c0   :  { %17022 = vst [vmem:[#allocation101_spill] sm:$0xff] %v10805_v56  ;;  %3544 = vperm.xlu1 %7225, %v10814_v53   ;;  %v6309_v20 = vsel %vm1524_vm14, 1.0, %v16602_v47  ;;  %v6310_v24 = vsel %vm1525_vm15, 1.0, %v16602_v47  ;;  %vm1528_vm2 = vcmp.eq.s32.totalorder %v8289_v28, %v17023_v60  ;;  %v16277_v23 = vmov 11   ;;  %v10823_v58 = vpop.permute.xlu1 %2852 }
 0x2c1   :  { %7227 = vset.pattern.permute.xlu0 %v16277_v23  ;;  %17024 = vst [vmem:[#allocation204_spill] sm:$0xff] %v10823_v58  ;;  %v10826_v19 = vadd.f32 %v6291_v8, %v10087_v45  ;;  %v10829_v41 = vadd.f32 %v6292_v7, %v17025_v48  ;;  %v10832_v38 = vadd.f32 %v6305_v63, %v17026_v32  ;;  %v6299_v56 = vsel %vm1514_vm0, 1.0, %v16602_v47  ;;  %v17030_v58 = vld [vmem:[#allocation178_spill] sm:$0xff]  ;;  %v10851_v32 = vpop.permute.xlu0 %3153  ;;  %v17032_v48 = vld [vmem:[#allocation181_spill] sm:$0xff]  ;;  %v10869_v63 = vld [vmem:[%s15998_s0 + $0x78] sm:$0xff] }
 0x2c2   :  { %3857 = vperm.xlu0 %7227, %v10470_v13   ;;  %v10840_v23 = vadd.f32 %v6306_v1, %v17028_v59  ;;  %v10843_v43 = vadd.f32 %v6295_v61, %v17030_v58  ;;  %v6300_v45 = vsel %vm1515_vm1, 1.0, %v16602_v47  ;;  %vm1529_vm3 = vcmp.eq.s32.totalorder %v8298_v0, %v17023_v60  ;;  %17031 = vst [vmem:[#allocation59_spill] sm:$0xff] %v10851_v32  ;;  %v17042_v58 = vld [vmem:[#allocation129_spill] sm:$0xff] }
 0x2c3   :  { %17027 = vst [vmem:[#allocation55_spill] sm:$0xff] %v10832_v38  ;;  %v10854_v8 = vadd.f32 %v6296_v52, %v17032_v48  ;;  %v10857_v13 = vadd.f32 %v6309_v20, %v10376_v36  ;;  %v10860_v59 = vadd.f32 %v6310_v24, %v10379_v51  ;;  %v6313_v7 = vsel %vm1528_vm2, 1.0, %v16602_v47  ;;  %v17036_v36 = vld [vmem:[#allocation126_spill] sm:$0xff]  ;;  %v17037_v51 = vld [vmem:[#allocation127_spill] sm:$0xff]  ;;  %v17039_v52 = vld [vmem:[#allocation41_spill] sm:$0xff] }
 0x2c4   :  { %17029 = vst [vmem:[#allocation58_spill] sm:$0xff] %v10840_v23  ;;  %3550 = vperm.xlu1 %7225, %v10869_v63   ;;  %v10873_v1 = vadd.f32 %v6299_v56, %v17035_v50  ;;  %vm1518_vm4 = vcmp.eq.s32.totalorder %v8289_v28, %v17036_v36  ;;  %vm1519_vm5 = vcmp.eq.s32.totalorder %v8298_v0, %v17036_v36  ;;  %v10881_v61 = vpop.permute.xlu1 %2858  ;;  %v6314_v24 = vsel %vm1529_vm3, 1.0, %v16602_v47  ;;  %v17040_v56 = vld [vmem:[#allocation128_spill] sm:$0xff]  ;;  %v17044_v36 = vld [vmem:[#allocation130_spill] sm:$0xff] }
 0x2c5   :  { %17033 = vst [vmem:[#allocation34_spill] sm:$0xff] %v10857_v13  ;;  %17034 = vst [vmem:[#allocation62_spill] sm:$0xff] %v10860_v59  ;;  %vm1532_vm6 = vcmp.eq.s32.totalorder %v8289_v28, %v17037_v51  ;;  %v10884_v20 = vadd.f32 %v6300_v45, %v17039_v52  ;;  %vm1533_vm7 = vcmp.eq.s32.totalorder %v8298_v0, %v17037_v51  ;;  %v10901_v45 = vpop.permute.xlu0 %3162  ;;  %v6303_v48 = vsel %vm1518_vm4, 1.0, %v16602_v47  ;;  %v17051_v13 = vld [vmem:[#allocation83_spill] sm:$0xff] }
 0x2c6   :  { %17038 = vst [vmem:[#allocation169_spill] sm:$0xff] %v10881_v61  ;;  %vm1522_vm8 = vcmp.eq.s32.totalorder %v8289_v28, %v17040_v56  ;;  %3866 = vperm.xlu0 %7227, %v10584_v54   ;;  %v10893_v60 = vadd.f32 %v6313_v7, %v10394_v27  ;;  %vm1523_vm9 = vcmp.eq.s32.totalorder %v8298_v0, %v17040_v56  ;;  %17043 = vst [vmem:[#allocation103_spill] sm:$0xff] %v10901_v45  ;;  %v10911_v27 = vld [vmem:[%s15998_s0 + $0x88] sm:$0xff]  ;;  %v17045_v7 = vld [vmem:[#allocation81_spill] sm:$0xff] }
 0x2c7   :  { %vm1536_vm10 = vcmp.eq.s32.totalorder %v8289_v28, %v17042_v58  ;;  %vm1537_vm11 = vcmp.eq.s32.totalorder %v8298_v0, %v17042_v58  ;;  %v6304_v50 = vsel %vm1519_vm5, 1.0, %v16602_v47  ;;  %v6317_v54 = vsel %vm1532_vm6, 1.0, %v16602_v47 }
 0x2c8   :  { %17041 = vst [vmem:[#allocation102_spill] sm:$0xff] %v10893_v60  ;;  %vm1526_vm12 = vcmp.eq.s32.totalorder %v8289_v28, %v17044_v36  ;;  %3556 = vperm.xlu1 %7225, %v10911_v27   ;;  %v10915_v51 = vadd.f32 %v6314_v24, %v17045_v7  ;;  %v6318_v52 = vsel %vm1533_vm7, 1.0, %v16602_v47  ;;  %v6307_v56 = vsel %vm1522_vm8, 1.0, %v16602_v47  ;;  %v10921_v58 = vpop.permute.xlu1 %2864  ;;  %v17048_v60 = vld [vmem:[#allocation131_spill] sm:$0xff] }
 0x2c9   :  { %vm1527_vm13 = vcmp.eq.s32.totalorder %v8298_v0, %v17044_v36  ;;  %17047 = vst [vmem:[#allocation105_spill] sm:$0xff] %v10921_v58  ;;  %v6308_v45 = vsel %vm1523_vm9, 1.0, %v16602_v47  ;;  %v6321_v61 = vsel %vm1536_vm10, 1.0, %v16602_v47  ;;  %v6322_v32 = vsel %vm1537_vm11, 1.0, %v16602_v47  ;;  %v17049_v24 = vld [vmem:[#allocation39_spill] sm:$0xff]  ;;  %v10942_v38 = vpop.permute.xlu0 %3168 }
 0x2ca   :  { %17046 = vst [vmem:[#allocation104_spill] sm:$0xff] %v10915_v51  ;;  %vm1540_vm14 = vcmp.eq.s32.totalorder %v8289_v28, %v17048_v60  ;;  %3872 = vperm.xlu0 %7227, %v10633_v26   ;;  %v10930_v7 = vadd.f32 %v6303_v48, %v17049_v24  ;;  %v17050_v51 = vld [vmem:[#allocation72_spill] sm:$0xff]  ;;  %v10936_v23 = vadd.f32 %v6317_v54, %v17051_v13  ;;  %v6311_v58 = vsel %vm1526_vm12, 1.0, %v16602_v47  ;;  %v17056_v26 = vld [vmem:[#allocation187_spill] sm:$0xff] }
 0x2cb   :  { %v10933_v59 = vadd.f32 %v6304_v50, %v17050_v51  ;;  %17053 = vst [vmem:[#allocation107_spill] sm:$0xff] %v10942_v38  ;;  %v10945_v17 = vadd.f32 %v6318_v52, %v17054_v30  ;;  %v10948_v9 = vadd.f32 %v6307_v56, %v17056_v26  ;;  %v6312_v48 = vsel %vm1527_vm13, 1.0, %v16602_v47  ;;  %v10956_v13 = vld [vmem:[%s15998_s0 + $0x98] sm:$0xff]  ;;  %v17057_v50 = vld [vmem:[#allocation10_spill] sm:$0xff]  ;;  %v17061_v56 = vld [vmem:[#allocation75_spill] sm:$0xff] }
 0x2cc   :  { %17052 = vst [vmem:[#allocation106_spill] sm:$0xff] %v10936_v23  ;;  %vm1541_vm15 = vcmp.eq.s32.totalorder %v8298_v0, %v17048_v60  ;;  %3562 = vperm.xlu1 %7225, %v10956_v13   ;;  %v10960_v54 = vadd.f32 %v6308_v45, %v17057_v50  ;;  %v10963_v30 = vadd.f32 %v6321_v61, %v10504_v21  ;;  %v6325_v51 = vsel %vm1540_vm14, 1.0, %v16602_v47  ;;  %v10972_v52 = vpop.permute.xlu1 %2870  ;;  %v17062_v26 = vld [vmem:[#allocation132_spill] sm:$0xff]  ;;  %v17063_v21 = vld [vmem:[#allocation133_spill] sm:$0xff]  ;;  %v17065_v60 = vld [vmem:[#allocation134_spill] sm:$0xff] }
 0x2cd   :  { %17055 = vst [vmem:[#allocation65_spill] sm:$0xff] %v10945_v17  ;;  %v10966_v36 = vadd.f32 %v6322_v32, %v10507_v25  ;;  %17060 = vst [vmem:[#allocation33_spill] sm:$0xff] %v10972_v52  ;;  %v10975_v24 = vadd.f32 %v6311_v58, %v17061_v56  ;;  %vm1530_vm0 = vcmp.eq.s32.totalorder %v8289_v28, %v17062_v26  ;;  %v17064_v25 = vld [vmem:[#allocation76_spill] sm:$0xff]  ;;  %v6326_v61 = vsel %vm1541_vm15, 1.0, %v16602_v47  ;;  %v10992_v45 = vpop.permute.xlu0 %3174  ;;  %v17072_v38 = vld [vmem:[#allocation137_spill] sm:$0xff] }
 0x2ce   :  { %17058 = vst [vmem:[#allocation28_spill] sm:$0xff] %v10963_v30  ;;  %vm1531_vm1 = vcmp.eq.s32.totalorder %v8298_v0, %v17062_v26  ;;  %vm1544_vm2 = vcmp.eq.s32.totalorder %v8289_v28, %v17063_v21  ;;  %3878 = vperm.xlu0 %7227, %v10682_v44   ;;  %v10985_v32 = vadd.f32 %v6312_v48, %v17064_v25  ;;  %17066 = vst [vmem:[#allocation30_spill] sm:$0xff] %v10992_v45  ;;  %v17068_v44 = vld [vmem:[#allocation135_spill] sm:$0xff]  ;;  %v11006_v48 = vld [vmem:[%s15998_s0 + $0xa8] sm:$0xff] }
 0x2cf   :  { %17059 = vst [vmem:[#allocation29_spill] sm:$0xff] %v10966_v36  ;;  %vm1545_vm3 = vcmp.eq.s32.totalorder %v8298_v0, %v17063_v21  ;;  %vm1534_vm4 = vcmp.eq.s32.totalorder %v8289_v28, %v17065_v60  ;;  %v10995_v58 = vadd.f32 %v6325_v51, %v10520_v40  ;;  %vm1535_vm5 = vcmp.eq.s32.totalorder %v8298_v0, %v17065_v60  ;;  %v17069_v56 = vld [vmem:[#allocation136_spill] sm:$0xff] }
 0x2d0   :  { %vm1548_vm6 = vcmp.eq.s32.totalorder %v8289_v28, %v17068_v44  ;;  %vm1549_vm7 = vcmp.eq.s32.totalorder %v8298_v0, %v17068_v44  ;;  %3568 = vperm.xlu1 %7225, %v11006_v48   ;;  %v6315_v50 = vsel %vm1530_vm0, 1.0, %v16602_v47  ;;  %v6316_v40 = vsel %vm1531_vm1, 1.0, %v16602_v47  ;;  %v11014_v26 = vpop.permute.xlu1 %2876  ;;  %v11044_v36 = vld [vmem:[%s15998_s0 + $0xb8] sm:$0xff] }
 0x2d1   :  { %17067 = vst [vmem:[#allocation180_spill] sm:$0xff] %v10995_v58  ;;  %v6329_v51 = vsel %vm1544_vm2, 1.0, %v16602_v47  ;;  %vm1538_vm8 = vcmp.eq.s32.totalorder %v8289_v28, %v17069_v56  ;;  %17070 = vst [vmem:[#allocation108_spill] sm:$0xff] %v11014_v26  ;;  %v11017_v21 = vadd.f32 %v6326_v61, %v10535_v4  ;;  %v6330_v25 = vsel %vm1545_vm3, 1.0, %v16602_v47  ;;  %v11029_v4 = vpop.permute.xlu0 %3180  ;;  %v17074_v61 = vld [vmem:[#allocation16_spill] sm:$0xff] }
 0x2d2   :  { %v6319_v60 = vsel %vm1534_vm4, 1.0, %v16602_v47  ;;  %vm1539_vm9 = vcmp.eq.s32.totalorder %v8298_v0, %v17069_v56  ;;  %3884 = vperm.xlu0 %7227, %v10723_v10   ;;  %v6320_v44 = vsel %vm1535_vm5, 1.0, %v16602_v47  ;;  %v6333_v45 = vsel %vm1548_vm6, 1.0, %v16602_v47  ;;  %17073 = vst [vmem:[#allocation110_spill] sm:$0xff] %v11029_v4 }
 0x2d3   :  { %17071 = vst [vmem:[#allocation109_spill] sm:$0xff] %v11017_v21  ;;  %v6334_v52 = vsel %vm1549_vm7, 1.0, %v16602_v47  ;;  %vm1840_vm10 = vcmp.eq.s32.totalorder %v8289_v28, %v17072_v38  ;;  %v11032_v26 = vadd.f32 %v6315_v50, %v17074_v61  ;;  %v17075_v21 = vld [vmem:[#allocation13_spill] sm:$0xff]  ;;  %v11038_v56 = vadd.f32 %v6329_v51, %v10544_v49  ;;  %v17078_v50 = vld [vmem:[#allocation78_spill] sm:$0xff]  ;;  %v17080_v51 = vld [vmem:[#allocation80_spill] sm:$0xff] }
 0x2d4   :  { %v11035_v58 = vadd.f32 %v6316_v40, %v17075_v21  ;;  %v6323_v10 = vsel %vm1538_vm8, 1.0, %v16602_v47  ;;  %3574 = vperm.xlu1 %7225, %v11044_v36   ;;  %v11048_v4 = vadd.f32 %v6330_v25, %v10552_v33  ;;  %v11051_v61 = vadd.f32 %v6319_v60, %v17078_v50  ;;  %v11056_v49 = vpop.permute.xlu1 %2882  ;;  %v17083_v25 = vld [vmem:[#allocation82_spill] sm:$0xff] }
 0x2d5   :  { %17076 = vst [vmem:[#allocation111_spill] sm:$0xff] %v11038_v56  ;;  %v6324_v40 = vsel %vm1539_vm9, 1.0, %v16602_v47  ;;  %vm1841_vm11 = vcmp.eq.s32.totalorder %v8298_v0, %v17072_v38  ;;  %17079 = vst [vmem:[#allocation113_spill] sm:$0xff] %v11056_v49  ;;  %v11059_v21 = vadd.f32 %v6320_v44, %v17080_v51  ;;  %v11062_v56 = vadd.f32 %v6333_v45, %v10621_v46  ;;  %v17084_v50 = vld [vmem:[#allocation138_spill] sm:$0xff]  ;;  %v17085_v46 = vld [vmem:[#allocation139_spill] sm:$0xff] }
 0x2d6   :  { %17077 = vst [vmem:[#allocation112_spill] sm:$0xff] %v11048_v4  ;;  %v11065_v30 = vadd.f32 %v6334_v52, %v10624_v39  ;;  %v6337_v33 = vsel %vm1840_vm10, 1.0, %v16602_v47  ;;  %3890 = vperm.xlu0 %7227, %v10777_v22   ;;  %v11073_v60 = vadd.f32 %v6323_v10, %v17083_v25  ;;  %vm1542_vm12 = vcmp.eq.s32.totalorder %v8289_v28, %v17084_v50  ;;  %v11081_v39 = vpop.permute.xlu0 %3186  ;;  %v17087_v52 = vld [vmem:[#allocation17_spill] sm:$0xff]  ;;  %v17088_v22 = vld [vmem:[#allocation140_spill] sm:$0xff]  ;;  %v11094_v44 = vld [vmem:[%s15998_s0 + $0xc8] sm:$0xff] }
 0x2d7   :  { %17081 = vst [vmem:[#allocation114_spill] sm:$0xff] %v11062_v56  ;;  %vm1543_vm13 = vcmp.eq.s32.totalorder %v8298_v0, %v17084_v50  ;;  %vm1846_vm14 = vcmp.eq.s32.totalorder %v8289_v28, %v17085_v46  ;;  %17086 = vst [vmem:[#allocation116_spill] sm:$0xff] %v11081_v39  ;;  %v11084_v45 = vadd.f32 %v6324_v40, %v17087_v52  ;;  %v6338_v38 = vsel %vm1841_vm11, 1.0, %v16602_v47  ;;  %v17090_v40 = vld [vmem:[#allocation141_spill] sm:$0xff]  ;;  %v17092_v52 = vld [vmem:[#allocation142_spill] sm:$0xff] }
 0x2d8   :  { %17082 = vst [vmem:[#allocation115_spill] sm:$0xff] %v11065_v30  ;;  %vm1847_vm15 = vcmp.eq.s32.totalorder %v8298_v0, %v17085_v46  ;;  %vm1546_vm0 = vcmp.eq.s32.totalorder %v8289_v28, %v17088_v22  ;;  %3580 = vperm.xlu1 %7225, %v11094_v44   ;;  %v11098_v10 = vadd.f32 %v6337_v33, %v10640_v11  ;;  %v11106_v51 = vpop.permute.xlu1 %2888  ;;  %v6327_v25 = vsel %vm1542_vm12, 1.0, %v16602_v47 }
 0x2d9   :  { %vm1547_vm1 = vcmp.eq.s32.totalorder %v8298_v0, %v17088_v22  ;;  %vm1850_vm2 = vcmp.eq.s32.totalorder %v8289_v28, %v17090_v40  ;;  %vm1851_vm3 = vcmp.eq.s32.totalorder %v8298_v0, %v17090_v40  ;;  %17091 = vst [vmem:[#allocation118_spill] sm:$0xff] %v11106_v51  ;;  %v6328_v50 = vsel %vm1543_vm13, 1.0, %v16602_v47 }
 0x2da   :  { %17089 = vst [vmem:[#allocation117_spill] sm:$0xff] %v11098_v10  ;;  %v6343_v46 = vsel %vm1846_vm14, 1.0, %v16602_v47  ;;  %vm1550_vm4 = vcmp.eq.s32.totalorder %v8289_v28, %v17092_v52  ;;  %3896 = vperm.xlu0 %7227, %v10814_v53   ;;  %v11115_v11 = vadd.f32 %v6338_v38, %v10649_v12  ;;  %v6344_v33 = vsel %vm1847_vm15, 1.0, %v16602_v47  ;;  %v11121_v40 = vpop.permute.xlu0 %3192  ;;  %v17095_v10 = vld [vmem:[#allocation143_spill] sm:$0xff]  ;;  %v11131_v12 = vld [vmem:[%s15998_s0 + $0xd8] sm:$0xff]  ;;  %v17096_v53 = vld [vmem:[#allocation85_spill] sm:$0xff] }
 0x2db   :  { %v6331_v22 = vsel %vm1546_vm0, 1.0, %v16602_v47  ;;  %vm1551_vm5 = vcmp.eq.s32.totalorder %v8298_v0, %v17092_v52  ;;  %17094 = vst [vmem:[#allocation120_spill] sm:$0xff] %v11121_v40  ;;  %v6332_v51 = vsel %vm1547_vm1, 1.0, %v16602_v47  ;;  %v6347_v39 = vsel %vm1850_vm2, 1.0, %v16602_v47  ;;  %v17097_v40 = vld [vmem:[#allocation21_spill] sm:$0xff] }
 0x2dc   :  { %17093 = vst [vmem:[#allocation119_spill] sm:$0xff] %v11115_v11  ;;  %v6348_v49 = vsel %vm1851_vm3, 1.0, %v16602_v47  ;;  %vm1854_vm6 = vcmp.eq.s32.totalorder %v8289_v28, %v17095_v10  ;;  %3586 = vperm.xlu1 %7225, %v11131_v12   ;;  %v11135_v38 = vadd.f32 %v6327_v25, %v17096_v53  ;;  %v11138_v11 = vadd.f32 %v6328_v50, %v17097_v40  ;;  %v11147_v4 = vpop.permute.xlu1 %2894 }
 0x2dd   :  { %v11141_v30 = vadd.f32 %v6343_v46, %v10727_v15  ;;  %v6335_v56 = vsel %vm1550_vm4, 1.0, %v16602_v47  ;;  %17098 = vst [vmem:[#allocation121_spill] sm:$0xff] %v11147_v4  ;;  %v11150_v17 = vadd.f32 %v6344_v33, %v10730_v31  ;;  %v11153_v23 = vadd.f32 %v6331_v22, %v10510_v29  ;;  %v17105_v33 = vld [vmem:[#allocation148_spill] sm:$0xff] }
 0x2de   :  { %v6336_v25 = vsel %vm1551_vm5, 1.0, %v16602_v47  ;;  %vm1855_vm7 = vcmp.eq.s32.totalorder %v8298_v0, %v17095_v10  ;;  %3902 = vperm.xlu0 %7227, %v10869_v63   ;;  %v11160_v15 = vadd.f32 %v6332_v51, %v10517_v34  ;;  %v11163_v50 = vadd.f32 %v6347_v39, %v10743_v3  ;;  %v11172_v31 = vpop.permute.xlu0 %3198  ;;  %v17100_v63 = vld [vmem:[#allocation144_spill] sm:$0xff]  ;;  %v17101_v34 = vld [vmem:[#allocation145_spill] sm:$0xff]  ;;  %v11186_v3 = vld [vmem:[%s15998_s0 + $0xe8] sm:$0xff] }
 0x2df   :  { %v11166_v46 = vadd.f32 %v6348_v49, %v10754_v18  ;;  %v6351_v29 = vsel %vm1854_vm6, 1.0, %v16602_v47  ;;  %17099 = vst [vmem:[#allocation122_spill] sm:$0xff] %v11172_v31  ;;  %v11175_v52 = vadd.f32 %v6335_v56, %v10538_v35  ;;  %vm1842_vm8 = vcmp.eq.s32.totalorder %v8289_v28, %v17100_v63  ;;  %v17102_v56 = vld [vmem:[#allocation146_spill] sm:$0xff]  ;;  %v17103_v39 = vld [vmem:[#allocation147_spill] sm:$0xff] }
 0x2e0   :  { %vm1843_vm9 = vcmp.eq.s32.totalorder %v8298_v0, %v17100_v63  ;;  %vm1858_vm10 = vcmp.eq.s32.totalorder %v8289_v28, %v17101_v34  ;;  %3592 = vperm.xlu1 %7225, %v11186_v3   ;;  %v11190_v18 = vadd.f32 %v6336_v25, %v10541_v62  ;;  %v6352_v35 = vsel %vm1855_vm7, 1.0, %v16602_v47  ;;  %v11207_v62 = vpop.permute.xlu1 %3156  ;;  %v11226_v25 = vld [vmem:[%s15998_s0 + $0xf8] sm:$0xff] }
 0x2e1   :  { %vm1859_vm11 = vcmp.eq.s32.totalorder %v8298_v0, %v17101_v34  ;;  %vm1844_vm12 = vcmp.eq.s32.totalorder %v8289_v28, %v17102_v56  ;;  %v11198_v49 = vadd.f32 %v6351_v29, %v10763_v37  ;;  %vm1845_vm13 = vcmp.eq.s32.totalorder %v8298_v0, %v17102_v56  ;;  %17104 = vst [vmem:[#allocation123_spill] sm:$0xff] %v11207_v62  ;;  %v17107_v34 = vld [vmem:[#allocation149_spill] sm:$0xff] }
 0x2e2   :  { %vm1862_vm14 = vcmp.eq.s32.totalorder %v8289_v28, %v17103_v39  ;;  %vm1863_vm15 = vcmp.eq.s32.totalorder %v8298_v0, %v17103_v39  ;;  %3908 = vperm.xlu0 %7227, %v10911_v27   ;;  %v6339_v10 = vsel %vm1842_vm8, 1.0, %v16602_v47  ;;  %v6340_v51 = vsel %vm1843_vm9, 1.0, %v16602_v47  ;;  %v11214_v22 = vpop.permute.xlu0 %3204 }
 0x2e3   :  { %v6355_v37 = vsel %vm1858_vm10, 1.0, %v16602_v47  ;;  %vm1848_vm0 = vcmp.eq.s32.totalorder %v8289_v28, %v17105_v33  ;;  %17106 = vst [vmem:[#allocation124_spill] sm:$0xff] %v11214_v22  ;;  %v11217_v40 = vadd.f32 %v6352_v35, %v10766_v42  ;;  %v6356_v53 = vsel %vm1859_vm11, 1.0, %v16602_v47 }
 0x2e4   :  { %v6341_v27 = vsel %vm1844_vm12, 1.0, %v16602_v47  ;;  %vm1849_vm1 = vcmp.eq.s32.totalorder %v8298_v0, %v17105_v33  ;;  %3598 = vperm.xlu1 %7225, %v11226_v25   ;;  %v6342_v42 = vsel %vm1845_vm13, 1.0, %v16602_v47  ;;  %v6359_v29 = vsel %vm1862_vm14, 1.0, %v16602_v47  ;;  %v17108_v33 = vld [vmem:[#allocation91_spill] sm:$0xff]  ;;  %v11254_v31 = vpop.permute.xlu1 %3159 }
 0x2e5   :  { %v6360_v63 = vsel %vm1863_vm15, 1.0, %v16602_v47  ;;  %vm1866_vm2 = vcmp.eq.s32.totalorder %v8289_v28, %v17107_v34  ;;  %v11244_v35 = vadd.f32 %v6339_v10, %v10567_v57  ;;  %v11247_v22 = vadd.f32 %v6340_v51, %v17108_v33  ;;  %17109 = vst [vmem:[#allocation125_spill] sm:$0xff] %v11254_v31  ;;  %v17119_v33 = vld [vmem:[#allocation154_spill] sm:$0xff] }
 0x2e6   :  { %v11250_v56 = vadd.f32 %v6355_v37, %v10826_v19  ;;  %v6345_v62 = vsel %vm1848_vm0, 1.0, %v16602_v47  ;;  %3914 = vperm.xlu0 %7227, %v10956_v13   ;;  %v11257_v39 = vadd.f32 %v6356_v53, %v10829_v41  ;;  %v11260_v4 = vadd.f32 %v6341_v27, %v10658_v2  ;;  %v11265_v10 = vpop.permute.xlu0 %3210  ;;  %v17112_v53 = vld [vmem:[#allocation150_spill] sm:$0xff] }
 0x2e7   :  { %v6346_v57 = vsel %vm1849_vm1, 1.0, %v16602_v47  ;;  %vm1867_vm3 = vcmp.eq.s32.totalorder %v8298_v0, %v17107_v34  ;;  %17110 = vst [vmem:[#allocation71_spill] sm:$0xff] %v11265_v10  ;;  %v11268_v19 = vadd.f32 %v6342_v42, %v10663_v14  ;;  %v11271_v13 = vadd.f32 %v6359_v29, %v10843_v43  ;;  %v17113_v14 = vld [vmem:[#allocation151_spill] sm:$0xff]  ;;  %v17114_v43 = vld [vmem:[#allocation68_spill] sm:$0xff] }
 0x2e8   :  { %v11274_v51 = vadd.f32 %v6360_v63, %v10854_v8  ;;  %v6363_v41 = vsel %vm1866_vm2, 1.0, %v16602_v47  ;;  %v17111_v2 = vmov 11   ;;  %v11279_v37 = vadd.f32 %v6345_v62, %v10627_v5  ;;  %v17115_v5 = vld [vmem:[#allocation152_spill] sm:$0xff]  ;;  %v11297_v62 = vpop.permute.xlu1 %3165  ;;  %v17127_v10 = vld [vmem:[#allocation95_spill] sm:$0xff] }
 0x2e9   :  { %7228 = vset.pattern.permute.xlu1 %v17111_v2  ;;  %vm1852_vm4 = vcmp.eq.s32.totalorder %v8289_v28, %v17112_v53  ;;  %vm1853_vm5 = vcmp.eq.s32.totalorder %v8298_v0, %v17112_v53  ;;  %vm1870_vm6 = vcmp.eq.s32.totalorder %v8289_v28, %v17113_v14  ;;  %v11289_v8 = vadd.f32 %v6346_v57, %v10637_v6  ;;  %v17117_v6 = vld [vmem:[#allocation153_spill] sm:$0xff] }
 0x2ea   :  { %3860 = vperm.xlu1 %7228, %v17114_v43   ;;  %v6364_v27 = vsel %vm1867_vm3, 1.0, %v16602_v47  ;;  %vm1871_vm7 = vcmp.eq.s32.totalorder %v8298_v0, %v17113_v14  ;;  %vm1856_vm8 = vcmp.eq.s32.totalorder %v8289_v28, %v17115_v5  ;;  %3920 = vperm.xlu0 %7227, %v11006_v48   ;;  %17116 = vst [vmem:[#allocation11_spill] sm:$0xff] %v11297_v62  ;;  %v11308_v29 = vpop.permute.xlu0 %3216  ;;  %v6349_v63 = vsel %vm1852_vm4, 1.0, %v16602_v47  ;;  %v17121_v2 = vld [vmem:[#allocation89_spill] sm:$0xff] }
 0x2eb   :  { %v11300_v42 = vadd.f32 %v6363_v41, %v10873_v1  ;;  %vm1857_vm9 = vcmp.eq.s32.totalorder %v8298_v0, %v17115_v5  ;;  %vm1874_vm10 = vcmp.eq.s32.totalorder %v8289_v28, %v17117_v6  ;;  %vm1875_vm11 = vcmp.eq.s32.totalorder %v8298_v0, %v17117_v6  ;;  %17118 = vst [vmem:[#allocation77_spill] sm:$0xff] %v11308_v29  ;;  %v17122_v5 = vld [vmem:[#allocation155_spill] sm:$0xff] }
 0x2ec   :  { %v6350_v48 = vsel %vm1853_vm5, 1.0, %v16602_v47  ;;  %v6367_v34 = vsel %vm1870_vm6, 1.0, %v16602_v47  ;;  %vm1860_vm12 = vcmp.eq.s32.totalorder %v8289_v28, %v17119_v33  ;;  %v11316_v1 = vadd.f32 %v6364_v27, %v10884_v20  ;;  %v11329_v20 = vpop.permute.xlu1 %3171 }
 0x2ed   :  { %v6368_v57 = vsel %vm1871_vm7, 1.0, %v16602_v47  ;;  %v6353_v41 = vsel %vm1856_vm8, 1.0, %v16602_v47  ;;  %vm1861_vm13 = vcmp.eq.s32.totalorder %v8298_v0, %v17119_v33  ;;  %v6354_v53 = vsel %vm1857_vm9, 1.0, %v16602_v47  ;;  %17123 = vst [vmem:[#allocation181_spill] sm:$0xff] %v11329_v20 }
 0x2ee   :  { %17120 = vst [vmem:[#allocation178_spill] sm:$0xff] %v11316_v1  ;;  %3863 = vperm.xlu1 %7228, %v17121_v2   ;;  %v6371_v14 = vsel %vm1874_vm10, 1.0, %v16602_v47  ;;  %v6372_v43 = vsel %vm1875_vm11, 1.0, %v16602_v47  ;;  %vm1878_vm14 = vcmp.eq.s32.totalorder %v8289_v28, %v17122_v5  ;;  %3926 = vperm.xlu0 %7227, %v11044_v36   ;;  %v11332_v27 = vadd.f32 %v6349_v63, %v10652_v55  ;;  %v11341_v29 = vpop.permute.xlu0 %3222  ;;  %v17128_v55 = vld [vmem:[#allocation48_spill] sm:$0xff] }
 0x2ef   :  { %v11335_v6 = vadd.f32 %v6350_v48, %v10655_v16  ;;  %v11338_v33 = vadd.f32 %v6367_v34, %v10930_v7  ;;  %v6357_v2 = vsel %vm1860_vm12, 1.0, %v16602_v47  ;;  %17125 = vst [vmem:[#allocation126_spill] sm:$0xff] %v11341_v29  ;;  %v11344_v62 = vadd.f32 %v6368_v57, %v10933_v59  ;;  %v17131_v48 = vld [vmem:[#allocation60_spill] sm:$0xff]  ;;  %v17144_v29 = vld [vmem:[#allocation161_spill] sm:$0xff] }
 0x2f0   :  { %v11347_v36 = vadd.f32 %v6353_v41, %v17127_v10  ;;  %v6358_v20 = vsel %vm1861_vm13, 1.0, %v16602_v47  ;;  %vm1879_vm15 = vcmp.eq.s32.totalorder %v8298_v0, %v17122_v5  ;;  %v11353_v16 = vadd.f32 %v6354_v53, %v17128_v55  ;;  %v11365_v10 = vld [vmem:[%s15998_s0 + $0x20] sm:$0xff]  ;;  %v17132_v57 = vld [vmem:[#allocation156_spill] sm:$0xff]  ;;  %v17135_v41 = vld [vmem:[#allocation50_spill] sm:$0xff] }
 0x2f1   :  { %17124 = vst [vmem:[#allocation36_spill] sm:$0xff] %v11338_v33  ;;  %17126 = vst [vmem:[#allocation127_spill] sm:$0xff] %v11344_v62  ;;  %v11356_v7 = vadd.f32 %v6371_v14, %v10948_v9  ;;  %v11359_v63 = vadd.f32 %v6372_v43, %v10960_v54  ;;  %v6375_v59 = vsel %vm1878_vm14, 1.0, %v16602_v47  ;;  %v11369_v34 = vadd.f32 %v6357_v2, %v17131_v48  ;;  %v17133_v9 = vld [vmem:[#allocation157_spill] sm:$0xff]  ;;  %v11378_v54 = vpop.permute.xlu1 %3177  ;;  %v17136_v43 = vld [vmem:[#allocation158_spill] sm:$0xff] }
 0x2f2   :  { %3869 = vperm.xlu1 %7228, %v11365_v10   ;;  %vm1864_vm0 = vcmp.eq.s32.totalorder %v8289_v28, %v17132_v57  ;;  %vm1865_vm1 = vcmp.eq.s32.totalorder %v8298_v0, %v17132_v57  ;;  %vm1882_vm2 = vcmp.eq.s32.totalorder %v8289_v28, %v17133_v9  ;;  %3932 = vperm.xlu0 %7227, %v11094_v44   ;;  %v6376_v14 = vsel %vm1879_vm15, 1.0, %v16602_v47  ;;  %v11388_v5 = vpop.permute.xlu0 %3228  ;;  %v17139_v44 = vld [vmem:[#allocation159_spill] sm:$0xff]  ;;  %v17140_v57 = vld [vmem:[#allocation160_spill] sm:$0xff] }
 0x2f3   :  { %17129 = vst [vmem:[#allocation41_spill] sm:$0xff] %v11356_v7  ;;  %17130 = vst [vmem:[#allocation128_spill] sm:$0xff] %v11359_v63  ;;  %v11381_v53 = vadd.f32 %v6358_v20, %v17135_v41  ;;  %vm1883_vm3 = vcmp.eq.s32.totalorder %v8298_v0, %v17133_v9  ;;  %vm1868_vm4 = vcmp.eq.s32.totalorder %v8289_v28, %v17136_v43  ;;  %v6361_v20 = vsel %vm1864_vm0, 1.0, %v16602_v47  ;;  %v17150_v7 = vld [vmem:[#allocation98_spill] sm:$0xff] }
 0x2f4   :  { %17134 = vst [vmem:[#allocation129_spill] sm:$0xff] %v11378_v54  ;;  %17137 = vst [vmem:[#allocation130_spill] sm:$0xff] %v11388_v5  ;;  %v11391_v2 = vadd.f32 %v6375_v59, %v10975_v24  ;;  %vm1869_vm5 = vcmp.eq.s32.totalorder %v8298_v0, %v17136_v43  ;;  %vm1886_vm6 = vcmp.eq.s32.totalorder %v8289_v28, %v17139_v44  ;;  %v6362_v55 = vsel %vm1865_vm1, 1.0, %v16602_v47  ;;  %v11407_v24 = vld [vmem:[%s15998_s0 + $0x30] sm:$0xff] }
 0x2f5   :  { %vm1887_vm7 = vcmp.eq.s32.totalorder %v8298_v0, %v17139_v44  ;;  %v6379_v48 = vsel %vm1882_vm2, 1.0, %v16602_v47  ;;  %vm1872_vm8 = vcmp.eq.s32.totalorder %v8289_v28, %v17140_v57  ;;  %17141 = vst [vmem:[#allocation131_spill] sm:$0xff] %v11407_v24  ;;  %v11411_v59 = vadd.f32 %v6376_v14, %v10985_v32  ;;  %v11418_v43 = vpop.permute.xlu1 %3183  ;;  %v17146_v14 = vld [vmem:[#allocation96_spill] sm:$0xff] }
 0x2f6   :  { %17138 = vst [vmem:[#allocation81_spill] sm:$0xff] %v11391_v2  ;;  %3875 = vperm.xlu1 %7228, %v11407_v24   ;;  %v6380_v9 = vsel %vm1883_vm3, 1.0, %v16602_v47  ;;  %v6365_v41 = vsel %vm1868_vm4, 1.0, %v16602_v47  ;;  %vm1873_vm9 = vcmp.eq.s32.totalorder %v8298_v0, %v17140_v57  ;;  %3938 = vperm.xlu0 %7227, %v11131_v12   ;;  %17143 = vst [vmem:[#allocation72_spill] sm:$0xff] %v11418_v43  ;;  %v6366_v44 = vsel %vm1869_vm5, 1.0, %v16602_v47  ;;  %v11425_v32 = vpop.permute.xlu0 %3234 }
 0x2f7   :  { %17142 = vst [vmem:[#allocation39_spill] sm:$0xff] %v11411_v59  ;;  %v6383_v5 = vsel %vm1886_vm6, 1.0, %v16602_v47  ;;  %v6384_v54 = vsel %vm1887_vm7, 1.0, %v16602_v47  ;;  %vm1890_vm10 = vcmp.eq.s32.totalorder %v8289_v28, %v17144_v29  ;;  %17145 = vst [vmem:[#allocation83_spill] sm:$0xff] %v11425_v32  ;;  %v11428_v31 = vadd.f32 %v6361_v20, %v17146_v14  ;;  %v17147_v59 = vld [vmem:[#allocation97_spill] sm:$0xff] }
 0x2f8   :  { %v11431_v2 = vadd.f32 %v6362_v55, %v17147_v59  ;;  %v11434_v12 = vadd.f32 %v6379_v48, %v11032_v26  ;;  %v6369_v43 = vsel %vm1872_vm8, 1.0, %v16602_v47  ;;  %v11441_v63 = vadd.f32 %v6380_v9, %v11035_v58  ;;  %v11452_v26 = vld [vmem:[%s15998_s0 + $0x40] sm:$0xff]  ;;  %v17155_v59 = vld [vmem:[#allocation55_spill] sm:$0xff] }
 0x2f9   :  { %v11444_v62 = vadd.f32 %v6365_v41, %v17150_v7  ;;  %v6370_v20 = vsel %vm1873_vm9, 1.0, %v16602_v47  ;;  %vm1891_vm11 = vcmp.eq.s32.totalorder %v8298_v0, %v17144_v29  ;;  %v17151_v55 = vld [vmem:[#allocation101_spill] sm:$0xff]  ;;  %v11459_v58 = vadd.f32 %v6383_v5, %v11051_v61  ;;  %v11466_v29 = vpop.permute.xlu1 %3189  ;;  %v17156_v41 = vld [vmem:[#allocation162_spill] sm:$0xff]  ;;  %v17157_v61 = vld [vmem:[#allocation163_spill] sm:$0xff] }
 0x2fa   :  { %17148 = vst [vmem:[#allocation18_spill] sm:$0xff] %v11434_v12  ;;  %17149 = vst [vmem:[#allocation187_spill] sm:$0xff] %v11441_v63  ;;  %3881 = vperm.xlu1 %7228, %v11452_v26   ;;  %v11456_v48 = vadd.f32 %v6366_v44, %v17151_v55  ;;  %v11462_v7 = vadd.f32 %v6384_v54, %v11059_v21  ;;  %v6387_v57 = vsel %vm1890_vm10, 1.0, %v16602_v47  ;;  %3944 = vperm.xlu0 %7227, %v11186_v3   ;;  %v11477_v21 = vpop.permute.xlu0 %3240  ;;  %v17159_v54 = vld [vmem:[#allocation58_spill] sm:$0xff]  ;;  %v17162_v14 = vld [vmem:[#allocation165_spill] sm:$0xff] }
 0x2fb   :  { %17152 = vst [vmem:[#allocation10_spill] sm:$0xff] %v11459_v58  ;;  %17154 = vst [vmem:[#allocation132_spill] sm:$0xff] %v11466_v29  ;;  %v11469_v9 = vadd.f32 %v6369_v43, %v17155_v59  ;;  %vm1876_vm12 = vcmp.eq.s32.totalorder %v8289_v28, %v17156_v41  ;;  %vm1877_vm13 = vcmp.eq.s32.totalorder %v8298_v0, %v17156_v41  ;;  %v6388_v3 = vsel %vm1891_vm11, 1.0, %v16602_v47  ;;  %v17160_v43 = vld [vmem:[#allocation164_spill] sm:$0xff]  ;;  %v17163_v59 = vld [vmem:[#allocation166_spill] sm:$0xff] }
 0x2fc   :  { %17153 = vst [vmem:[#allocation75_spill] sm:$0xff] %v11462_v7  ;;  %vm1894_vm14 = vcmp.eq.s32.totalorder %v8289_v28, %v17157_v61  ;;  %17158 = vst [vmem:[#allocation133_spill] sm:$0xff] %v11477_v21  ;;  %v11480_v5 = vadd.f32 %v6370_v20, %v17159_v54  ;;  %vm1895_vm15 = vcmp.eq.s32.totalorder %v8298_v0, %v17157_v61  ;;  %v11499_v20 = vld [vmem:[%s15998_s0 + $0x50] sm:$0xff]  ;;  %v6373_v55 = vsel %vm1876_vm12, 1.0, %v16602_v47  ;;  %v17174_v63 = vld [vmem:[#allocation104_spill] sm:$0xff] }
 0x2fd   :  { %vm1880_vm0 = vcmp.eq.s32.totalorder %v8289_v28, %v17160_v43  ;;  %v11488_v44 = vadd.f32 %v6387_v57, %v11073_v60  ;;  %vm1881_vm1 = vcmp.eq.s32.totalorder %v8298_v0, %v17160_v43  ;;  %vm1898_vm2 = vcmp.eq.s32.totalorder %v8289_v28, %v17162_v14  ;;  %v11508_v41 = vpop.permute.xlu1 %3195  ;;  %v17169_v43 = vld [vmem:[#allocation167_spill] sm:$0xff] }
 0x2fe   :  { %vm1899_vm3 = vcmp.eq.s32.totalorder %v8298_v0, %v17162_v14  ;;  %3887 = vperm.xlu1 %7228, %v11499_v20   ;;  %v6374_v60 = vsel %vm1877_vm13, 1.0, %v16602_v47  ;;  %v6391_v57 = vsel %vm1894_vm14, 1.0, %v16602_v47  ;;  %vm1884_vm4 = vcmp.eq.s32.totalorder %v8289_v28, %v17163_v59  ;;  %3950 = vperm.xlu0 %7227, %v11226_v25   ;;  %17164 = vst [vmem:[#allocation134_spill] sm:$0xff] %v11508_v41  ;;  %v11514_v21 = vpop.permute.xlu0 %3246  ;;  %v17167_v41 = vld [vmem:[#allocation34_spill] sm:$0xff] }
 0x2ff   :  { %17161 = vst [vmem:[#allocation76_spill] sm:$0xff] %v11488_v44  ;;  %v6392_v61 = vsel %vm1895_vm15, 1.0, %v16602_v47  ;;  %v6377_v54 = vsel %vm1880_vm0, 1.0, %v16602_v47  ;;  %vm1885_vm5 = vcmp.eq.s32.totalorder %v8298_v0, %v17163_v59  ;;  %17165 = vst [vmem:[#allocation135_spill] sm:$0xff] %v11514_v21  ;;  %v11517_v29 = vadd.f32 %v6388_v3, %v11084_v45  ;;  %v17168_v45 = vld [vmem:[#allocation62_spill] sm:$0xff]  ;;  %v11543_v44 = vld [vmem:[%s15998_s0 + $0x60] sm:$0xff] }
 0x300   :  { %v6378_v32 = vsel %vm1881_vm1, 1.0, %v16602_v47  ;;  %v6395_v25 = vsel %vm1898_vm2, 1.0, %v16602_v47  ;;  %v6396_v59 = vsel %vm1899_vm3, 1.0, %v16602_v47  ;;  %v11532_v21 = vadd.f32 %v6373_v55, %v17167_v41 }
 0x301   :  { %17166 = vst [vmem:[#allocation136_spill] sm:$0xff] %v11517_v29  ;;  %v11535_v3 = vadd.f32 %v6374_v60, %v17168_v45  ;;  %v6381_v29 = vsel %vm1884_vm4, 1.0, %v16602_v47  ;;  %vm1902_vm6 = vcmp.eq.s32.totalorder %v8289_v28, %v17169_v43  ;;  %v11547_v14 = vadd.f32 %v6391_v57, %v11135_v38  ;;  %v17172_v60 = vld [vmem:[#allocation102_spill] sm:$0xff]  ;;  %v11557_v58 = vpop.permute.xlu1 %3201 }
 0x302   :  { %3893 = vperm.xlu1 %7228, %v11543_v44   ;;  %v11550_v55 = vadd.f32 %v6392_v61, %v11138_v11  ;;  %v11553_v41 = vadd.f32 %v6377_v54, %v17172_v60  ;;  %v6382_v45 = vsel %vm1885_vm5, 1.0, %v16602_v47  ;;  %v16310_v7 = vmov 12   ;;  %17173 = vst [vmem:[#allocation13_spill] sm:$0xff] %v11557_v58  ;;  %v11573_v11 = vld [vmem:[%s15998_s0 + $0x8] sm:$0xff]  ;;  %v17184_v60 = vld [vmem:[#allocation173_spill] sm:$0xff] }
 0x303   :  { %17170 = vst [vmem:[#allocation137_spill] sm:$0xff] %v11547_v14  ;;  %7230 = vset.pattern.permute.xlu0 %v16310_v7  ;;  %v11560_v12 = vadd.f32 %v6378_v32, %v17174_v63  ;;  %v11563_v33 = vadd.f32 %v6395_v25, %v11153_v23  ;;  %v11566_v38 = vadd.f32 %v6396_v59, %v11160_v15  ;;  %17177 = vst [vmem:[#allocation82_spill] sm:$0xff] %v11573_v11  ;;  %v17178_v57 = vld [vmem:[#allocation106_spill] sm:$0xff]  ;;  %v17179_v15 = vld [vmem:[#allocation168_spill] sm:$0xff]  ;;  %v11587_v63 = vpop.permute.xlu0 %3508 }
 0x304   :  { %17171 = vst [vmem:[#allocation16_spill] sm:$0xff] %v11550_v55  ;;  %vm1903_vm7 = vcmp.eq.s32.totalorder %v8298_v0, %v17169_v43  ;;  %4212 = vperm.xlu0 %7230, %v11573_v11   ;;  %v11577_v61 = vadd.f32 %v6381_v29, %v17178_v57  ;;  %v6399_v23 = vsel %vm1902_vm6, 1.0, %v16602_v47  ;;  %vm1888_vm8 = vcmp.eq.s32.totalorder %v8289_v28, %v17179_v15  ;;  %v17181_v32 = vld [vmem:[#allocation65_spill] sm:$0xff]  ;;  %v17182_v25 = vld [vmem:[#allocation170_spill] sm:$0xff]  ;;  %v17183_v29 = vld [vmem:[#allocation171_spill] sm:$0xff] }
 0x305   :  { %17175 = vst [vmem:[#allocation78_spill] sm:$0xff] %v11563_v33  ;;  %17176 = vst [vmem:[#allocation80_spill] sm:$0xff] %v11566_v38  ;;  %vm1889_vm9 = vcmp.eq.s32.totalorder %v8298_v0, %v17179_v15  ;;  %v11590_v54 = vadd.f32 %v6382_v45, %v17181_v32  ;;  %vm2194_vm10 = vcmp.eq.s32.totalorder %v8289_v28, %v17182_v25  ;;  %v11601_v59 = vld [vmem:[%s15998_s0 + $0x70] sm:$0xff]  ;;  %v6400_v43 = vsel %vm1903_vm7, 1.0, %v16602_v47  ;;  %v11611_v45 = vpop.permute.xlu1 %3207  ;;  %v11637_v58 = vld [vmem:[%s15998_s0 + $0x80] sm:$0xff] }
 0x306   :  { %17180 = vst [vmem:[#allocation138_spill] sm:$0xff] %v11587_v63  ;;  %vm2195_vm11 = vcmp.eq.s32.totalorder %v8298_v0, %v17182_v25  ;;  %vm1892_vm12 = vcmp.eq.s32.totalorder %v8289_v28, %v17183_v29  ;;  %3899 = vperm.xlu1 %7228, %v11601_v59   ;;  %vm1893_vm13 = vcmp.eq.s32.totalorder %v8298_v0, %v17183_v29  ;;  %17185 = vst [vmem:[#allocation139_spill] sm:$0xff] %v11611_v45  ;;  %v17187_v25 = vld [vmem:[#allocation175_spill] sm:$0xff]  ;;  %v17195_v14 = vld [vmem:[#allocation180_spill] sm:$0xff] }
 0x307   :  { %vm2200_vm14 = vcmp.eq.s32.totalorder %v8289_v28, %v17184_v60  ;;  %vm2201_vm15 = vcmp.eq.s32.totalorder %v8298_v0, %v17184_v60  ;;  %v11614_v57 = vadd.f32 %v6399_v23, %v11175_v52  ;;  %v6385_v15 = vsel %vm1888_vm8, 1.0, %v16602_v47  ;;  %v11626_v52 = vpop.permute.xlu0 %3517 }
 0x308   :  { %v6386_v32 = vsel %vm1889_vm9, 1.0, %v16602_v47  ;;  %vm1896_vm0 = vcmp.eq.s32.totalorder %v8289_v28, %v17187_v25  ;;  %4221 = vperm.xlu0 %7230, %v11365_v10   ;;  %v6403_v29 = vsel %vm2194_vm10, 1.0, %v16602_v47  ;;  %v6404_v7 = vsel %vm2195_vm11, 1.0, %v16602_v47  ;;  %17188 = vst [vmem:[#allocation140_spill] sm:$0xff] %v11626_v52  ;;  %v17191_v52 = vld [vmem:[#allocation29_spill] sm:$0xff] }
 0x309   :  { %17186 = vst [vmem:[#allocation17_spill] sm:$0xff] %v11614_v57  ;;  %v6389_v60 = vsel %vm1892_vm12, 1.0, %v16602_v47  ;;  %vm1897_vm1 = vcmp.eq.s32.totalorder %v8298_v0, %v17187_v25  ;;  %v11629_v23 = vadd.f32 %v6400_v43, %v11190_v18  ;;  %v6390_v45 = vsel %vm1893_vm13, 1.0, %v16602_v47  ;;  %v17190_v57 = vld [vmem:[#allocation28_spill] sm:$0xff]  ;;  %v17192_v43 = vld [vmem:[#allocation177_spill] sm:$0xff] }
 0x30a   :  { %v6409_v63 = vsel %vm2200_vm14, 1.0, %v16602_v47  ;;  %v6410_v10 = vsel %vm2201_vm15, 1.0, %v16602_v47  ;;  %3905 = vperm.xlu1 %7228, %v11637_v58   ;;  %v11641_v38 = vadd.f32 %v6385_v15, %v17190_v57  ;;  %v11644_v33 = vadd.f32 %v6386_v32, %v17191_v52  ;;  %v17196_v15 = vld [vmem:[#allocation109_spill] sm:$0xff] }
 0x30b   :  { %17189 = vst [vmem:[#allocation141_spill] sm:$0xff] %v11629_v23  ;;  %v6393_v18 = vsel %vm1896_vm0, 1.0, %v16602_v47  ;;  %vm2204_vm2 = vcmp.eq.s32.totalorder %v8289_v28, %v17192_v43  ;;  %v11649_v23 = vpop.permute.xlu1 %3213  ;;  %v11652_v11 = vadd.f32 %v6403_v29, %v11244_v35  ;;  %v11655_v55 = vadd.f32 %v6404_v7, %v11247_v22  ;;  %v11676_v22 = vpop.permute.xlu0 %3523  ;;  %v17200_v7 = vld [vmem:[#allocation111_spill] sm:$0xff] }
 0x30c   :  { %17193 = vst [vmem:[#allocation142_spill] sm:$0xff] %v11649_v23  ;;  %v11658_v1 = vadd.f32 %v6389_v60, %v17195_v14  ;;  %v6394_v57 = vsel %vm1897_vm1, 1.0, %v16602_v47  ;;  %4227 = vperm.xlu0 %7230, %v11407_v24   ;;  %v11666_v32 = vadd.f32 %v6390_v45, %v17196_v15  ;;  %v11669_v52 = vadd.f32 %v6409_v63, %v11279_v37  ;;  %v17201_v29 = vld [vmem:[#allocation183_spill] sm:$0xff]  ;;  %v17203_v45 = vld [vmem:[#allocation6_spill] sm:$0xff] }
 0x30d   :  { %17194 = vst [vmem:[#allocation143_spill] sm:$0xff] %v11655_v55  ;;  %v11672_v35 = vadd.f32 %v6410_v10, %v11289_v8  ;;  %vm2205_vm3 = vcmp.eq.s32.totalorder %v8298_v0, %v17192_v43  ;;  %17199 = vst [vmem:[#allocation144_spill] sm:$0xff] %v11676_v22  ;;  %v11679_v14 = vadd.f32 %v6393_v18, %v17200_v7  ;;  %v6413_v25 = vsel %vm2204_vm2, 1.0, %v16602_v47  ;;  %v11689_v37 = vld [vmem:[%s15998_s0 + $0x90] sm:$0xff]  ;;  %v17202_v8 = vld [vmem:[#allocation112_spill] sm:$0xff] }
 0x30e   :  { %17197 = vst [vmem:[#allocation85_spill] sm:$0xff] %v11669_v52  ;;  %vm1900_vm4 = vcmp.eq.s32.totalorder %v8289_v28, %v17201_v29  ;;  %vm1901_vm5 = vcmp.eq.s32.totalorder %v8298_v0, %v17201_v29  ;;  %3911 = vperm.xlu1 %7228, %v11689_v37   ;;  %v11693_v63 = vadd.f32 %v6394_v57, %v17202_v8  ;;  %v17204_v60 = vld [vmem:[#allocation190_spill] sm:$0xff]  ;;  %v6414_v18 = vsel %vm2205_vm3, 1.0, %v16602_v47  ;;  %v17214_v52 = vld [vmem:[#allocation15_spill] sm:$0xff] }
 0x30f   :  { %17198 = vst [vmem:[#allocation21_spill] sm:$0xff] %v11672_v35  ;;  %vm2208_vm6 = vcmp.eq.s32.totalorder %v8289_v28, %v17203_v45  ;;  %vm2209_vm7 = vcmp.eq.s32.totalorder %v8298_v0, %v17203_v45  ;;  %vm2192_vm8 = vcmp.eq.s32.totalorder %v8289_v28, %v17204_v60  ;;  %v11701_v10 = vpop.permute.xlu1 %3219  ;;  %vm2193_vm9 = vcmp.eq.s32.totalorder %v8298_v0, %v17204_v60  ;;  %v17206_v43 = vld [vmem:[#allocation194_spill] sm:$0xff]  ;;  %v11718_v8 = vpop.permute.xlu0 %3529 }
 0x310   :  { %17205 = vst [vmem:[#allocation145_spill] sm:$0xff] %v11701_v10  ;;  %vm2212_vm10 = vcmp.eq.s32.totalorder %v8289_v28, %v17206_v43  ;;  %vm2213_vm11 = vcmp.eq.s32.totalorder %v8298_v0, %v17206_v43  ;;  %4233 = vperm.xlu0 %7230, %v11452_v26   ;;  %v11712_v57 = vadd.f32 %v6413_v25, %v11332_v27  ;;  %v6397_v15 = vsel %vm1900_vm4, 1.0, %v16602_v47  ;;  %v17208_v29 = vld [vmem:[#allocation14_spill] sm:$0xff]  ;;  %v11728_v27 = vld [vmem:[%s15998_s0 + $0xa0] sm:$0xff] }
 0x311   :  { %v6398_v7 = vsel %vm1901_vm5, 1.0, %v16602_v47  ;;  %vm2196_vm12 = vcmp.eq.s32.totalorder %v8289_v28, %v17208_v29  ;;  %17209 = vst [vmem:[#allocation147_spill] sm:$0xff] %v11718_v8  ;;  %v6417_v45 = vsel %vm2208_vm6, 1.0, %v16602_v47  ;;  %v6418_v10 = vsel %vm2209_vm7, 1.0, %v16602_v47  ;;  %v17212_v35 = vld [vmem:[#allocation114_spill] sm:$0xff] }
 0x312   :  { %17207 = vst [vmem:[#allocation146_spill] sm:$0xff] %v11712_v57  ;;  %v6401_v22 = vsel %vm2192_vm8, 1.0, %v16602_v47  ;;  %vm2197_vm13 = vcmp.eq.s32.totalorder %v8298_v0, %v17208_v29  ;;  %3917 = vperm.xlu1 %7228, %v11728_v27   ;;  %v11732_v26 = vadd.f32 %v6414_v18, %v11335_v6  ;;  %v6402_v25 = vsel %vm2193_vm9, 1.0, %v16602_v47  ;;  %v17213_v18 = vld [vmem:[#allocation115_spill] sm:$0xff]  ;;  %v17222_v29 = vld [vmem:[#allocation20_spill] sm:$0xff] }
 0x313   :  { %v6421_v8 = vsel %vm2212_vm10, 1.0, %v16602_v47  ;;  %v6422_v23 = vsel %vm2213_vm11, 1.0, %v16602_v47  ;;  %v11746_v57 = vpop.permute.xlu1 %3225  ;;  %v11749_v6 = vadd.f32 %v6397_v15, %v17212_v35  ;;  %v6405_v60 = vsel %vm2196_vm12, 1.0, %v16602_v47  ;;  %v11771_v15 = vpop.permute.xlu0 %3535 }
 0x314   :  { %17210 = vst [vmem:[#allocation148_spill] sm:$0xff] %v11732_v26  ;;  %17211 = vst [vmem:[#allocation149_spill] sm:$0xff] %v11746_v57  ;;  %v11752_v26 = vadd.f32 %v6398_v7, %v17213_v18  ;;  %vm2216_vm14 = vcmp.eq.s32.totalorder %v8289_v28, %v17214_v52  ;;  %4239 = vperm.xlu0 %7230, %v11499_v20   ;;  %v11759_v24 = vadd.f32 %v6417_v45, %v11347_v36  ;;  %v17215_v57 = vld [vmem:[#allocation117_spill] sm:$0xff]  ;;  %v17217_v7 = vld [vmem:[#allocation119_spill] sm:$0xff] }
 0x315   :  { %v11762_v43 = vadd.f32 %v6418_v10, %v11353_v16  ;;  %v11765_v55 = vadd.f32 %v6401_v22, %v17215_v57  ;;  %v6406_v35 = vsel %vm2197_vm13, 1.0, %v16602_v47  ;;  %17216 = vst [vmem:[#allocation91_spill] sm:$0xff] %v11771_v15  ;;  %v11774_v18 = vadd.f32 %v6402_v25, %v17217_v7  ;;  %v11787_v16 = vld [vmem:[%s15998_s0 + $0xb0] sm:$0xff]  ;;  %v17224_v25 = vld [vmem:[#allocation22_spill] sm:$0xff] }
 0x316   :  { %v11777_v20 = vadd.f32 %v6421_v8, %v11369_v34  ;;  %v11780_v36 = vadd.f32 %v6422_v23, %v11381_v53  ;;  %vm2217_vm15 = vcmp.eq.s32.totalorder %v8298_v0, %v17214_v52  ;;  %3923 = vperm.xlu1 %7228, %v11787_v16   ;;  %v11791_v22 = vadd.f32 %v6405_v60, %v11260_v4  ;;  %v17218_v34 = vld [vmem:[#allocation201_spill] sm:$0xff]  ;;  %v17220_v52 = vld [vmem:[#allocation202_spill] sm:$0xff]  ;;  %v17221_v4 = vld [vmem:[#allocation19_spill] sm:$0xff] }
 0x317   :  { %v6425_v10 = vsel %vm2216_vm14, 1.0, %v16602_v47  ;;  %vm2198_vm0 = vcmp.eq.s32.totalorder %v8289_v28, %v17218_v34  ;;  %vm2199_vm1 = vcmp.eq.s32.totalorder %v8298_v0, %v17218_v34  ;;  %v11798_v53 = vpop.permute.xlu1 %3231  ;;  %v11801_v23 = vadd.f32 %v6406_v35, %v11268_v19  ;;  %v11817_v19 = vpop.permute.xlu0 %3541  ;;  %v11829_v60 = vld [vmem:[%s15998_s0 + $0xc0] sm:$0xff] }
 0x318   :  { %17219 = vst [vmem:[#allocation150_spill] sm:$0xff] %v11798_v53  ;;  %vm2220_vm2 = vcmp.eq.s32.totalorder %v8289_v28, %v17220_v52  ;;  %vm2221_vm3 = vcmp.eq.s32.totalorder %v8298_v0, %v17220_v52  ;;  %vm2202_vm4 = vcmp.eq.s32.totalorder %v8289_v28, %v17221_v4  ;;  %4245 = vperm.xlu0 %7230, %v11543_v44   ;;  %v6426_v57 = vsel %vm2217_vm15, 1.0, %v16602_v47 }
 0x319   :  { %vm2203_vm5 = vcmp.eq.s32.totalorder %v8298_v0, %v17221_v4  ;;  %vm2224_vm6 = vcmp.eq.s32.totalorder %v8289_v28, %v17222_v29  ;;  %vm2225_vm7 = vcmp.eq.s32.totalorder %v8298_v0, %v17222_v29  ;;  %17223 = vst [vmem:[#allocation151_spill] sm:$0xff] %v11817_v19  ;;  %v11820_v8 = vadd.f32 %v6425_v10, %v11428_v31 }
 0x31a   :  { %v6407_v45 = vsel %vm2198_vm0, 1.0, %v16602_v47  ;;  %v6408_v44 = vsel %vm2199_vm1, 1.0, %v16602_v47  ;;  %vm2206_vm8 = vcmp.eq.s32.totalorder %v8289_v28, %v17224_v25  ;;  %3929 = vperm.xlu1 %7228, %v11829_v60   ;;  %v6429_v35 = vsel %vm2220_vm2, 1.0, %v16602_v47 }
 0x31b   :  { %v6430_v7 = vsel %vm2221_vm3, 1.0, %v16602_v47  ;;  %v6411_v31 = vsel %vm2202_vm4, 1.0, %v16602_v47  ;;  %vm2207_vm9 = vcmp.eq.s32.totalorder %v8298_v0, %v17224_v25  ;;  %v11837_v10 = vpop.permute.xlu1 %3237  ;;  %v11840_v34 = vadd.f32 %v6426_v57, %v11431_v2  ;;  %v11864_v53 = vpop.permute.xlu0 %3547 }
 0x31c   :  { %17225 = vst [vmem:[#allocation68_spill] sm:$0xff] %v11837_v10  ;;  %v6412_v52 = vsel %vm2203_vm5, 1.0, %v16602_v47  ;;  %v6433_v19 = vsel %vm2224_vm6, 1.0, %v16602_v47  ;;  %v6434_v25 = vsel %vm2225_vm7, 1.0, %v16602_v47  ;;  %4251 = vperm.xlu0 %7230, %v11601_v59   ;;  %v11856_v2 = vadd.f32 %v6407_v45, %v11141_v30  ;;  %v17226_v10 = vld [vmem:[#allocation23_spill] sm:$0xff]  ;;  %17227 = vst [vmem:[#allocation152_spill] sm:$0xff] %v11864_v53 }
 0x31d   :  { %v11859_v57 = vadd.f32 %v6408_v44, %v11150_v17  ;;  %v6415_v4 = vsel %vm2206_vm8, 1.0, %v16602_v47  ;;  %vm2228_vm10 = vcmp.eq.s32.totalorder %v8289_v28, %v17226_v10  ;;  %v11867_v15 = vadd.f32 %v6429_v35, %v11444_v62  ;;  %v11879_v17 = vld [vmem:[%s15998_s0 + $0xd0] sm:$0xff] }
 0x31e   :  { %v11870_v29 = vadd.f32 %v6430_v7, %v11456_v48  ;;  %v11873_v59 = vadd.f32 %v6411_v31, %v11163_v50  ;;  %v6416_v30 = vsel %vm2207_vm9, 1.0, %v16602_v47  ;;  %3935 = vperm.xlu1 %7228, %v11879_v17   ;;  %v11883_v45 = vadd.f32 %v6412_v52, %v11166_v46  ;;  %v17229_v7 = vld [vmem:[#allocation206_spill] sm:$0xff] }
 0x31f   :  { %v11886_v62 = vadd.f32 %v6433_v19, %v11469_v9  ;;  %v11889_v48 = vadd.f32 %v6434_v25, %v11480_v5  ;;  %vm2229_vm11 = vcmp.eq.s32.totalorder %v8298_v0, %v17226_v10  ;;  %v11893_v50 = vpop.permute.xlu1 %3243  ;;  %v11896_v44 = vadd.f32 %v6415_v4, %v11198_v49  ;;  %v17230_v9 = vld [vmem:[#allocation24_spill] sm:$0xff]  ;;  %v17231_v49 = vld [vmem:[#allocation25_spill] sm:$0xff]  ;;  %v11913_v5 = vpop.permute.xlu0 %3553  ;;  %v17234_v25 = vld [vmem:[#allocation27_spill] sm:$0xff] }
 0x320   :  { %17228 = vst [vmem:[#allocation153_spill] sm:$0xff] %v11893_v50  ;;  %v6437_v35 = vsel %vm2228_vm10, 1.0, %v16602_v47  ;;  %vm2210_vm12 = vcmp.eq.s32.totalorder %v8289_v28, %v17229_v7  ;;  %vm2211_vm13 = vcmp.eq.s32.totalorder %v8298_v0, %v17229_v7  ;;  %4257 = vperm.xlu0 %7230, %v11637_v58   ;;  %v11905_v46 = vadd.f32 %v6416_v30, %v11217_v40  ;;  %v17233_v58 = vld [vmem:[#allocation26_spill] sm:$0xff]  ;;  %v11925_v40 = vld [vmem:[%s15998_s0 + $0xe0] sm:$0xff] }
 0x321   :  { %vm2232_vm14 = vcmp.eq.s32.totalorder %v8289_v28, %v17230_v9  ;;  %vm2233_vm15 = vcmp.eq.s32.totalorder %v8298_v0, %v17230_v9  ;;  %vm2214_vm0 = vcmp.eq.s32.totalorder %v8289_v28, %v17231_v49  ;;  %17232 = vst [vmem:[#allocation154_spill] sm:$0xff] %v11913_v5  ;;  %v6438_v19 = vsel %vm2229_vm11, 1.0, %v16602_v47 }
 0x322   :  { %vm2215_vm1 = vcmp.eq.s32.totalorder %v8298_v0, %v17231_v49  ;;  %vm2236_vm2 = vcmp.eq.s32.totalorder %v8289_v28, %v17233_v58  ;;  %vm2237_vm3 = vcmp.eq.s32.totalorder %v8298_v0, %v17233_v58  ;;  %3941 = vperm.xlu1 %7228, %v11925_v40   ;;  %v11929_v31 = vadd.f32 %v6437_v35, %v11532_v21 }
 0x323   :  { %v6419_v10 = vsel %vm2210_vm12, 1.0, %v16602_v47  ;;  %v6420_v52 = vsel %vm2211_vm13, 1.0, %v16602_v47  ;;  %vm2218_vm4 = vcmp.eq.s32.totalorder %v8289_v28, %v17234_v25  ;;  %v6441_v4 = vsel %vm2232_vm14, 1.0, %v16602_v47  ;;  %v11941_v21 = vpop.permute.xlu1 %3505  ;;  %v11958_v53 = vpop.permute.xlu0 %3559 }
 0x324   :  { %v6442_v30 = vsel %vm2233_vm15, 1.0, %v16602_v47  ;;  %v6423_v7 = vsel %vm2214_vm0, 1.0, %v16602_v47  ;;  %vm2219_vm5 = vcmp.eq.s32.totalorder %v8298_v0, %v17234_v25  ;;  %4263 = vperm.xlu0 %7230, %v11689_v37   ;;  %17235 = vst [vmem:[#allocation89_spill] sm:$0xff] %v11941_v21  ;;  %v11944_v35 = vadd.f32 %v6438_v19, %v11535_v3  ;;  %17237 = vst [vmem:[#allocation95_spill] sm:$0xff] %v11958_v53  ;;  %v17238_v21 = vld [vmem:[#allocation207_spill] sm:$0xff] }
 0x325   :  { %v6424_v9 = vsel %vm2215_vm1, 1.0, %v16602_v47  ;;  %v6445_v5 = vsel %vm2236_vm2, 1.0, %v16602_v47  ;;  %v6446_v50 = vsel %vm2237_vm3, 1.0, %v16602_v47  ;;  %v11961_v3 = vadd.f32 %v6419_v10, %v11250_v56 }
 0x326   :  { %17236 = vst [vmem:[#allocation155_spill] sm:$0xff] %v11944_v35  ;;  %v11964_v19 = vadd.f32 %v6420_v52, %v11257_v39  ;;  %v6427_v49 = vsel %vm2218_vm4, 1.0, %v16602_v47  ;;  %vm2240_vm6 = vcmp.eq.s32.totalorder %v8289_v28, %v17238_v21  ;;  %v11972_v35 = vld [vmem:[%s15998_s0 + $0xf0] sm:$0xff]  ;;  %v11976_v58 = vadd.f32 %v6441_v4, %v11553_v41 }
 0x327   :  { %3947 = vperm.xlu1 %7228, %v11972_v35   ;;  %v11979_v56 = vadd.f32 %v6442_v30, %v11560_v12  ;;  %v11982_v39 = vadd.f32 %v6423_v7, %v11271_v13  ;;  %v6428_v10 = vsel %vm2219_vm5, 1.0, %v16602_v47  ;;  %v11989_v52 = vadd.f32 %v6424_v9, %v11274_v51  ;;  %v12000_v13 = vpop.permute.xlu1 %3511  ;;  %v17244_v51 = vld [vmem:[#allocation31_spill] sm:$0xff]  ;;  %v17250_v30 = vld [vmem:[#allocation210_spill] sm:$0xff]  ;;  %v12032_v7 = vld [vmem:[%s15998_s0] sm:$0xff] }
 0x328   :  { %17239 = vst [vmem:[#allocation48_spill] sm:$0xff] %v11976_v58  ;;  %v11992_v53 = vadd.f32 %v6445_v5, %v11577_v61  ;;  %v11995_v41 = vadd.f32 %v6446_v50, %v11590_v54  ;;  %vm2241_vm7 = vcmp.eq.s32.totalorder %v8298_v0, %v17238_v21  ;;  %4269 = vperm.xlu0 %7230, %v11728_v27   ;;  %17243 = vst [vmem:[#allocation50_spill] sm:$0xff] %v12000_v13  ;;  %v12010_v61 = vpop.permute.xlu0 %3565  ;;  %v17246_v54 = vld [vmem:[#allocation178_spill] sm:$0xff]  ;;  %v17247_v5 = vld [vmem:[#allocation32_spill] sm:$0xff]  ;;  %v17249_v27 = vmov 12  }
 0x329   :  { %17240 = vst [vmem:[#allocation60_spill] sm:$0xff] %v11979_v56  ;;  %v12003_v12 = vadd.f32 %v6427_v49, %v11300_v42  ;;  %v6449_v25 = vsel %vm2240_vm6, 1.0, %v16602_v47  ;;  %vm2222_vm8 = vcmp.eq.s32.totalorder %v8289_v28, %v17244_v51  ;;  %vm2223_vm9 = vcmp.eq.s32.totalorder %v8298_v0, %v17244_v51  ;;  %17245 = vst [vmem:[#allocation158_spill] sm:$0xff] %v12010_v61  ;;  %v17248_v42 = vld [vmem:[#allocation209_spill] sm:$0xff]  ;;  %v17256_v61 = vld [vmem:[#allocation36_spill] sm:$0xff] }
 0x32a   :  { %17241 = vst [vmem:[#allocation156_spill] sm:$0xff] %v11992_v53  ;;  %17242 = vst [vmem:[#allocation157_spill] sm:$0xff] %v11995_v41  ;;  %v12013_v50 = vadd.f32 %v6428_v10, %v17246_v54  ;;  %vm2244_vm10 = vcmp.eq.s32.totalorder %v8289_v28, %v17247_v5  ;;  %vm2245_vm11 = vcmp.eq.s32.totalorder %v8298_v0, %v17247_v5  ;;  %v6450_v4 = vsel %vm2241_vm7, 1.0, %v16602_v47  ;;  %v17252_v10 = vld [vmem:[#allocation37_spill] sm:$0xff]  ;;  %v17264_v41 = vld [vmem:[#allocation128_spill] sm:$0xff] }
 0x32b   :  { %vm2226_vm12 = vcmp.eq.s32.totalorder %v8289_v28, %v17248_v42  ;;  %7229 = vset.pattern.permute.xlu1 %v17249_v27  ;;  %vm2227_vm13 = vcmp.eq.s32.totalorder %v8298_v0, %v17248_v42  ;;  %vm2248_vm14 = vcmp.eq.s32.totalorder %v8289_v28, %v17250_v30  ;;  %vm2249_vm15 = vcmp.eq.s32.totalorder %v8298_v0, %v17250_v30  ;;  %v12043_v51 = vpop.permute.xlu1 %3514  ;;  %v17258_v42 = vld [vmem:[#allocation182_spill] sm:$0xff] }
 0x32c   :  { %4209 = vperm.xlu1 %7229, %v12032_v7   ;;  %v12036_v21 = vadd.f32 %v6449_v25, %v11641_v38  ;;  %v6431_v9 = vsel %vm2222_vm8, 1.0, %v16602_v47  ;;  %v6432_v49 = vsel %vm2223_vm9, 1.0, %v16602_v47  ;;  %vm2230_vm0 = vcmp.eq.s32.totalorder %v8289_v28, %v17252_v10  ;;  %4275 = vperm.xlu0 %7230, %v11787_v16   ;;  %17253 = vst [vmem:[#allocation160_spill] sm:$0xff] %v12043_v51  ;;  %v12059_v16 = vpop.permute.xlu0 %3571 }
 0x32d   :  { %v6453_v54 = vsel %vm2244_vm10, 1.0, %v16602_v47  ;;  %v6454_v38 = vsel %vm2245_vm11, 1.0, %v16602_v47  ;;  %v6435_v25 = vsel %vm2226_vm12, 1.0, %v16602_v47  ;;  %vm2231_vm1 = vcmp.eq.s32.totalorder %v8298_v0, %v17252_v10  ;;  %17254 = vst [vmem:[#allocation161_spill] sm:$0xff] %v12059_v16 }
 0x32e   :  { %17251 = vst [vmem:[#allocation159_spill] sm:$0xff] %v12036_v21  ;;  %v12062_v27 = vadd.f32 %v6450_v4, %v11644_v33  ;;  %v6436_v51 = vsel %vm2227_vm13, 1.0, %v16602_v47  ;;  %v6457_v5 = vsel %vm2248_vm14, 1.0, %v16602_v47  ;;  %v6458_v10 = vsel %vm2249_vm15, 1.0, %v16602_v47  ;;  %v17257_v33 = vld [vmem:[#allocation127_spill] sm:$0xff] }
 0x32f   :  { %v12077_v16 = vadd.f32 %v6431_v9, %v17256_v61  ;;  %v12080_v4 = vadd.f32 %v6432_v49, %v17257_v33  ;;  %v6439_v13 = vsel %vm2230_vm0, 1.0, %v16602_v47  ;;  %vm2252_vm2 = vcmp.eq.s32.totalorder %v8289_v28, %v17258_v42  ;;  %v17262_v9 = vld [vmem:[#allocation41_spill] sm:$0xff]  ;;  %v12102_v21 = vpop.permute.xlu1 %3520 }
 0x330   :  { %17255 = vst [vmem:[#allocation96_spill] sm:$0xff] %v12062_v27  ;;  %v12088_v27 = vld [vmem:[%s15998_s0 + $0x10] sm:$0xff]  ;;  %v12092_v30 = vadd.f32 %v6453_v54, %v11658_v1  ;;  %v12095_v61 = vadd.f32 %v6454_v38, %v11666_v32  ;;  %v12098_v49 = vadd.f32 %v6435_v25, %v17262_v9  ;;  %v6440_v33 = vsel %vm2231_vm1, 1.0, %v16602_v47  ;;  %4281 = vperm.xlu0 %7230, %v11829_v60   ;;  %v12115_v32 = vpop.permute.xlu0 %3577  ;;  %v17268_v54 = vld [vmem:[#allocation81_spill] sm:$0xff] }
 0x331   :  { %17259 = vst [vmem:[#allocation97_spill] sm:$0xff] %v12088_v27  ;;  %4215 = vperm.xlu1 %7229, %v12088_v27   ;;  %17263 = vst [vmem:[#allocation55_spill] sm:$0xff] %v12102_v21  ;;  %v12105_v53 = vadd.f32 %v6436_v51, %v17264_v41  ;;  %v12108_v27 = vadd.f32 %v6457_v5, %v11679_v14  ;;  %v12111_v1 = vadd.f32 %v6458_v10, %v11693_v63  ;;  %v17269_v25 = vld [vmem:[#allocation199_spill] sm:$0xff]  ;;  %v17271_v63 = vld [vmem:[#allocation189_spill] sm:$0xff] }
 0x332   :  { %17260 = vst [vmem:[#allocation98_spill] sm:$0xff] %v12092_v30  ;;  %17261 = vst [vmem:[#allocation101_spill] sm:$0xff] %v12095_v61  ;;  %vm2253_vm3 = vcmp.eq.s32.totalorder %v8298_v0, %v17258_v42  ;;  %v12118_v38 = vadd.f32 %v6439_v13, %v17268_v54  ;;  %v6461_v60 = vsel %vm2252_vm2, 1.0, %v16602_v47  ;;  %vm2234_vm4 = vcmp.eq.s32.totalorder %v8289_v28, %v17269_v25  ;;  %v17270_v14 = vld [vmem:[#allocation39_spill] sm:$0xff]  ;;  %v12137_v13 = vld [vmem:[%s15998_s0 + $0x18] sm:$0xff] }
 0x333   :  { %17265 = vst [vmem:[#allocation162_spill] sm:$0xff] %v12108_v27  ;;  %17266 = vst [vmem:[#allocation163_spill] sm:$0xff] %v12111_v1  ;;  %vm2235_vm5 = vcmp.eq.s32.totalorder %v8298_v0, %v17269_v25  ;;  %v12126_v41 = vadd.f32 %v6440_v33, %v17270_v14  ;;  %vm2544_vm6 = vcmp.eq.s32.totalorder %v8289_v28, %v17271_v63  ;;  %v17272_v51 = vld [vmem:[#allocation191_spill] sm:$0xff]  ;;  %v17274_v10 = vld [vmem:[#allocation196_spill] sm:$0xff]  ;;  %v12149_v9 = vpop.permute.xlu1 %3526  ;;  %v6462_v33 = vsel %vm2253_vm3, 1.0, %v16602_v47 }
 0x334   :  { %17267 = vst [vmem:[#allocation58_spill] sm:$0xff] %v12115_v32  ;;  %vm2545_vm7 = vcmp.eq.s32.totalorder %v8298_v0, %v17271_v63  ;;  %vm2238_vm8 = vcmp.eq.s32.totalorder %v8289_v28, %v17272_v51  ;;  %vm2239_vm9 = vcmp.eq.s32.totalorder %v8298_v0, %v17272_v51  ;;  %v17273_v5 = vld [vmem:[#allocation195_spill] sm:$0xff]  ;;  %vm2242_vm12 = vcmp.eq.s32.totalorder %v8289_v28, %v17274_v10  ;;  %v12189_v63 = vld [vmem:[%s15998_s0 + $0x28] sm:$0xff] }
 0x335   :  { %4218 = vperm.xlu1 %7229, %v12137_v13   ;;  %vm2550_vm10 = vcmp.eq.s32.totalorder %v8289_v28, %v17273_v5  ;;  %vm2551_vm11 = vcmp.eq.s32.totalorder %v8298_v0, %v17273_v5  ;;  %4287 = vperm.xlu0 %7230, %v11879_v17   ;;  %17275 = vst [vmem:[#allocation164_spill] sm:$0xff] %v12149_v9  ;;  %v6443_v14 = vsel %vm2234_vm4, 1.0, %v16602_v47  ;;  %v6444_v17 = vsel %vm2235_vm5, 1.0, %v16602_v47  ;;  %v12166_v5 = vpop.permute.xlu0 %3583  ;;  %v17278_v21 = vld [vmem:[#allocation18_spill] sm:$0xff]  ;;  %v17279_v1 = vld [vmem:[#allocation187_spill] sm:$0xff] }
 0x336   :  { %v12156_v54 = vadd.f32 %v6461_v60, %v11749_v6  ;;  %17277 = vst [vmem:[#allocation166_spill] sm:$0xff] %v12166_v5  ;;  %v6465_v42 = vsel %vm2544_vm6, 1.0, %v16602_v47  ;;  %v6466_v6 = vsel %vm2545_vm7, 1.0, %v16602_v47  ;;  %v6447_v60 = vsel %vm2238_vm8, 1.0, %v16602_v47  ;;  %v17280_v61 = vld [vmem:[#allocation42_spill] sm:$0xff] }
 0x337   :  { %vm2243_vm13 = vcmp.eq.s32.totalorder %v8298_v0, %v17274_v10  ;;  %v6448_v25 = vsel %vm2239_vm9, 1.0, %v16602_v47  ;;  %v6471_v5 = vsel %vm2550_vm10, 1.0, %v16602_v47  ;;  %v6472_v9 = vsel %vm2551_vm11, 1.0, %v16602_v47  ;;  %v12204_v30 = vpop.permute.xlu1 %3532 }
 0x338   :  { %17276 = vst [vmem:[#allocation165_spill] sm:$0xff] %v12156_v54  ;;  %v6451_v32 = vsel %vm2242_vm12, 1.0, %v16602_v47  ;;  %v12193_v51 = vadd.f32 %v6462_v33, %v11752_v26  ;;  %v12196_v54 = vadd.f32 %v6443_v14, %v17278_v21  ;;  %v12199_v27 = vadd.f32 %v6444_v17, %v17279_v1  ;;  %17281 = vst [vmem:[#allocation34_spill] sm:$0xff] %v12204_v30  ;;  %v17284_v26 = vld [vmem:[#allocation10_spill] sm:$0xff]  ;;  %v17286_v14 = vld [vmem:[#allocation75_spill] sm:$0xff] }
 0x339   :  { %4224 = vperm.xlu1 %7229, %v12189_v63   ;;  %vm2554_vm14 = vcmp.eq.s32.totalorder %v8289_v28, %v17280_v61  ;;  %4293 = vperm.xlu0 %7230, %v11925_v40   ;;  %v12207_v56 = vadd.f32 %v6465_v42, %v11765_v55  ;;  %v12210_v58 = vadd.f32 %v6466_v6, %v11774_v18  ;;  %v6452_v21 = vsel %vm2243_vm13, 1.0, %v16602_v47  ;;  %v12219_v1 = vpop.permute.xlu0 %3589  ;;  %v17289_v18 = vld [vmem:[#allocation76_spill] sm:$0xff]  ;;  %v17290_v6 = vld [vmem:[#allocation43_spill] sm:$0xff]  ;;  %v17300_v30 = vld [vmem:[#allocation137_spill] sm:$0xff] }
 0x33a   :  { %v12213_v33 = vadd.f32 %v6447_v60, %v17284_v26  ;;  %17285 = vst [vmem:[#allocation102_spill] sm:$0xff] %v12219_v1  ;;  %v12222_v40 = vadd.f32 %v6448_v25, %v17286_v14  ;;  %v12225_v17 = vadd.f32 %v6471_v5, %v11856_v2  ;;  %v12228_v55 = vadd.f32 %v6472_v9, %v11859_v57  ;;  %v12243_v2 = vld [vmem:[%s15998_s0 + $0x38] sm:$0xff]  ;;  %v17293_v5 = vld [vmem:[#allocation193_spill] sm:$0xff] }
 0x33b   :  { %17282 = vst [vmem:[#allocation62_spill] sm:$0xff] %v12207_v56  ;;  %17283 = vst [vmem:[#allocation167_spill] sm:$0xff] %v12210_v58  ;;  %v12231_v42 = vadd.f32 %v6451_v32, %v17289_v18  ;;  %vm2555_vm15 = vcmp.eq.s32.totalorder %v8298_v0, %v17280_v61  ;;  %v6475_v10 = vsel %vm2554_vm14, 1.0, %v16602_v47  ;;  %vm2246_vm0 = vcmp.eq.s32.totalorder %v8289_v28, %v17290_v6  ;;  %v17291_v57 = vld [vmem:[#allocation136_spill] sm:$0xff]  ;;  %v12256_v60 = vpop.permute.xlu1 %3538  ;;  %v17303_v58 = vld [vmem:[#allocation82_spill] sm:$0xff] }
 0x33c   :  { %17287 = vst [vmem:[#allocation104_spill] sm:$0xff] %v12225_v17  ;;  %17288 = vst [vmem:[#allocation106_spill] sm:$0xff] %v12228_v55  ;;  %vm2247_vm1 = vcmp.eq.s32.totalorder %v8298_v0, %v17290_v6  ;;  %v12247_v32 = vadd.f32 %v6452_v21, %v17291_v57  ;;  %v17292_v9 = vld [vmem:[#allocation192_spill] sm:$0xff]  ;;  %vm2250_vm4 = vcmp.eq.s32.totalorder %v8289_v28, %v17293_v5  ;;  %v6476_v21 = vsel %vm2555_vm15, 1.0, %v16602_v47  ;;  %v17302_v17 = vld [vmem:[#allocation46_spill] sm:$0xff] }
 0x33d   :  { %4230 = vperm.xlu1 %7229, %v12243_v2   ;;  %vm2558_vm2 = vcmp.eq.s32.totalorder %v8289_v28, %v17292_v9  ;;  %vm2559_vm3 = vcmp.eq.s32.totalorder %v8298_v0, %v17292_v9  ;;  %4299 = vperm.xlu0 %7230, %v11972_v35   ;;  %17294 = vst [vmem:[#allocation168_spill] sm:$0xff] %v12256_v60  ;;  %v17295_v25 = vld [vmem:[#allocation44_spill] sm:$0xff]  ;;  %v12264_v26 = vpop.permute.xlu0 %3595  ;;  %v6455_v14 = vsel %vm2246_vm0, 1.0, %v16602_v47  ;;  %v6456_v18 = vsel %vm2247_vm1, 1.0, %v16602_v47 }
 0x33e   :  { %vm2251_vm5 = vcmp.eq.s32.totalorder %v8298_v0, %v17293_v5  ;;  %vm2562_vm6 = vcmp.eq.s32.totalorder %v8289_v28, %v17295_v25  ;;  %vm2563_vm7 = vcmp.eq.s32.totalorder %v8298_v0, %v17295_v25  ;;  %17296 = vst [vmem:[#allocation65_spill] sm:$0xff] %v12264_v26  ;;  %v12271_v35 = vadd.f32 %v6475_v10, %v11873_v59  ;;  %v17298_v5 = vld [vmem:[#allocation45_spill] sm:$0xff]  ;;  %v7424_v59 = vld [vmem:[%s15998_s0 + $0x48] sm:$0xff] }
 0x33f   :  { %v6479_v57 = vsel %vm2558_vm2, 1.0, %v16602_v47  ;;  %v6480_v9 = vsel %vm2559_vm3, 1.0, %v16602_v47  ;;  %v6459_v61 = vsel %vm2250_vm4, 1.0, %v16602_v47  ;;  %vm2254_vm8 = vcmp.eq.s32.totalorder %v8289_v28, %v17298_v5  ;;  %v12295_v1 = vpop.permute.xlu1 %3544 }
 0x340   :  { %17297 = vst [vmem:[#allocation170_spill] sm:$0xff] %v12271_v35  ;;  %v6460_v10 = vsel %vm2251_vm5, 1.0, %v16602_v47  ;;  %v6483_v25 = vsel %vm2562_vm6, 1.0, %v16602_v47  ;;  %v6484_v6 = vsel %vm2563_vm7, 1.0, %v16602_v47  ;;  %vm2255_vm9 = vcmp.eq.s32.totalorder %v8298_v0, %v17298_v5  ;;  %17299 = vst [vmem:[#allocation171_spill] sm:$0xff] %v12295_v1  ;;  %v17305_v1 = vld [vmem:[#allocation78_spill] sm:$0xff] }
 0x341   :  { %4236 = vperm.xlu1 %7229, %v7424_v59   ;;  %v16344_v26 = vmov 14   ;;  %v12298_v60 = vadd.f32 %v6476_v21, %v11883_v45  ;;  %v12301_v35 = vadd.f32 %v6455_v14, %v17300_v30  ;;  %v17301_v59 = vld [vmem:[#allocation16_spill] sm:$0xff]  ;;  %vm2566_vm10 = vcmp.eq.s32.totalorder %v8289_v28, %v17302_v17  ;;  %v12322_v21 = vpop.permute.xlu0 %3857 }
 0x342   :  { %7233 = vset.pattern.permute.xlu0 %v16344_v26  ;;  %v12304_v55 = vadd.f32 %v6456_v18, %v17301_v59  ;;  %v12310_v56 = vadd.f32 %v6479_v57, %v11896_v44  ;;  %v12313_v26 = vadd.f32 %v6480_v9, %v11905_v46  ;;  %v12316_v45 = vadd.f32 %v6459_v61, %v17305_v1  ;;  %v17307_v14 = vld [vmem:[#allocation80_spill] sm:$0xff]  ;;  %v17312_v9 = vld [vmem:[#allocation17_spill] sm:$0xff] }
 0x343   :  { %4916 = vperm.xlu0 %7233, %v17303_v58   ;;  %v6463_v30 = vsel %vm2254_vm8, 1.0, %v16602_v47  ;;  %17306 = vst [vmem:[#allocation175_spill] sm:$0xff] %v12322_v21  ;;  %v12325_v18 = vadd.f32 %v6460_v10, %v17307_v14  ;;  %v12328_v58 = vadd.f32 %v6483_v25, %v11961_v3  ;;  %v12331_v44 = vadd.f32 %v6484_v6, %v11964_v19  ;;  %v12340_v1 = vld [vmem:[%s15998_s0 + $0x58] sm:$0xff]  ;;  %v12350_v19 = vpop.permute.xlu1 %3550  ;;  %v17315_v10 = vld [vmem:[#allocation141_spill] sm:$0xff]  ;;  %v17321_v21 = vld [vmem:[#allocation143_spill] sm:$0xff] }
 0x344   :  { %17304 = vst [vmem:[#allocation173_spill] sm:$0xff] %v12313_v26  ;;  %v6464_v46 = vsel %vm2255_vm9, 1.0, %v16602_v47  ;;  %vm2567_vm11 = vcmp.eq.s32.totalorder %v8298_v0, %v17302_v17  ;;  %v6487_v3 = vsel %vm2566_vm10, 1.0, %v16602_v47  ;;  %v17310_v57 = vld [vmem:[#allocation200_spill] sm:$0xff]  ;;  %17311 = vst [vmem:[#allocation177_spill] sm:$0xff] %v12350_v19  ;;  %v12353_v61 = vadd.f32 %v6463_v30, %v17312_v9  ;;  %v17314_v17 = vld [vmem:[#allocation197_spill] sm:$0xff] }
 0x345   :  { %17308 = vst [vmem:[#allocation28_spill] sm:$0xff] %v12328_v58  ;;  %17309 = vst [vmem:[#allocation29_spill] sm:$0xff] %v12331_v44  ;;  %4242 = vperm.xlu1 %7229, %v12340_v1   ;;  %vm2546_vm12 = vcmp.eq.s32.totalorder %v8289_v28, %v17310_v57  ;;  %vm2547_vm13 = vcmp.eq.s32.totalorder %v8298_v0, %v17310_v57  ;;  %v17313_v5 = vld [vmem:[#allocation12_spill] sm:$0xff]  ;;  %vm2548_vm0 = vcmp.eq.s32.totalorder %v8289_v28, %v17314_v17  ;;  %v17316_v6 = vld [vmem:[#allocation49_spill] sm:$0xff]  ;;  %v12371_v59 = vpop.permute.xlu0 %3866 }
 0x346   :  { %vm2570_vm14 = vcmp.eq.s32.totalorder %v8289_v28, %v17313_v5  ;;  %vm2571_vm15 = vcmp.eq.s32.totalorder %v8298_v0, %v17313_v5  ;;  %v12363_v25 = vadd.f32 %v6464_v46, %v17315_v10  ;;  %vm2549_vm1 = vcmp.eq.s32.totalorder %v8298_v0, %v17314_v17  ;;  %17317 = vst [vmem:[#allocation180_spill] sm:$0xff] %v12371_v59  ;;  %v7426_v57 = vld [vmem:[%s15998_s0 + $0x68] sm:$0xff]  ;;  %v17319_v10 = vld [vmem:[#allocation52_spill] sm:$0xff] }
 0x347   :  { %4967 = vperm.xlu0 %7233, %v11689_v37   ;;  %vm2574_vm2 = vcmp.eq.s32.totalorder %v8289_v28, %v17316_v6  ;;  %vm2575_vm3 = vcmp.eq.s32.totalorder %v8298_v0, %v17316_v6  ;;  %v6488_v30 = vsel %vm2567_vm11, 1.0, %v16602_v47  ;;  %v12375_v14 = vadd.f32 %v6487_v3, %v11982_v39  ;;  %v12387_v39 = vpop.permute.xlu1 %3556 }
 0x348   :  { %v6467_v37 = vsel %vm2546_vm12, 1.0, %v16602_v47  ;;  %v6468_v46 = vsel %vm2547_vm13, 1.0, %v16602_v47  ;;  %v6491_v9 = vsel %vm2570_vm14, 1.0, %v16602_v47  ;;  %v6492_v5 = vsel %vm2571_vm15, 1.0, %v16602_v47  ;;  %17320 = vst [vmem:[#allocation111_spill] sm:$0xff] %v12387_v39  ;;  %v17322_v39 = vld [vmem:[#allocation53_spill] sm:$0xff] }
 0x349   :  { %17318 = vst [vmem:[#allocation109_spill] sm:$0xff] %v12375_v14  ;;  %4248 = vperm.xlu1 %7229, %v7426_v57   ;;  %v6469_v17 = vsel %vm2548_vm0, 1.0, %v16602_v47  ;;  %vm2552_vm4 = vcmp.eq.s32.totalorder %v8289_v28, %v17319_v10  ;;  %v6470_v3 = vsel %vm2549_vm1, 1.0, %v16602_v47  ;;  %v6495_v6 = vsel %vm2574_vm2, 1.0, %v16602_v47  ;;  %v12406_v44 = vpop.permute.xlu0 %3872 }
 0x34a   :  { %v6496_v19 = vsel %vm2575_vm3, 1.0, %v16602_v47  ;;  %vm2553_vm5 = vcmp.eq.s32.totalorder %v8298_v0, %v17319_v10  ;;  %v12396_v57 = vadd.f32 %v6488_v30, %v11989_v52  ;;  %v12399_v59 = vadd.f32 %v6467_v37, %v11652_v11  ;;  %17323 = vst [vmem:[#allocation183_spill] sm:$0xff] %v12406_v44  ;;  %v17335_v10 = vld [vmem:[#allocation21_spill] sm:$0xff] }
 0x34b   :  { %4928 = vperm.xlu0 %7233, %v12189_v63   ;;  %v12402_v14 = vadd.f32 %v6468_v46, %v17321_v21  ;;  %vm2578_vm6 = vcmp.eq.s32.totalorder %v8289_v28, %v17322_v39  ;;  %v12409_v58 = vadd.f32 %v6491_v9, %v12003_v12  ;;  %v12412_v26 = vadd.f32 %v6492_v5, %v12013_v50  ;;  %v7427_v21 = vld [vmem:[%s15998_s0 + $0x78] sm:$0xff]  ;;  %v12434_v50 = vpop.permute.xlu1 %3562  ;;  %v17333_v5 = vld [vmem:[#allocation63_spill] sm:$0xff] }
 0x34c   :  { %v12415_v52 = vadd.f32 %v6469_v17, %v11791_v22  ;;  %v6473_v11 = vsel %vm2552_vm4, 1.0, %v16602_v47  ;;  %v12422_v30 = vadd.f32 %v6470_v3, %v11801_v23  ;;  %v12425_v37 = vadd.f32 %v6495_v6, %v12077_v16  ;;  %17328 = vst [vmem:[#allocation14_spill] sm:$0xff] %v12434_v50  ;;  %v17329_v23 = vld [vmem:[#allocation54_spill] sm:$0xff]  ;;  %v17330_v16 = vld [vmem:[#allocation131_spill] sm:$0xff]  ;;  %v17332_v9 = vld [vmem:[#allocation56_spill] sm:$0xff] }
 0x34d   :  { %17324 = vst [vmem:[#allocation112_spill] sm:$0xff] %v12409_v58  ;;  %17325 = vst [vmem:[#allocation6_spill] sm:$0xff] %v12412_v26  ;;  %4254 = vperm.xlu1 %7229, %v7427_v21   ;;  %v12428_v12 = vadd.f32 %v6496_v19, %v12080_v4  ;;  %v6474_v22 = vsel %vm2553_vm5, 1.0, %v16602_v47  ;;  %vm2579_vm7 = vcmp.eq.s32.totalorder %v8298_v0, %v17322_v39  ;;  %v6499_v46 = vsel %vm2578_vm6, 1.0, %v16602_v47  ;;  %v17331_v4 = vld [vmem:[#allocation85_spill] sm:$0xff]  ;;  %v12453_v17 = vpop.permute.xlu0 %3878  ;;  %v17336_v6 = vld [vmem:[#allocation64_spill] sm:$0xff] }
 0x34e   :  { %17326 = vst [vmem:[#allocation190_spill] sm:$0xff] %v12425_v37  ;;  %vm2556_vm8 = vcmp.eq.s32.totalorder %v8289_v28, %v17329_v23  ;;  %vm2557_vm9 = vcmp.eq.s32.totalorder %v8298_v0, %v17329_v23  ;;  %v12445_v19 = vadd.f32 %v6473_v11, %v17331_v4  ;;  %vm2582_vm10 = vcmp.eq.s32.totalorder %v8289_v28, %v17332_v9  ;;  %v12467_v11 = vld [vmem:[%s15998_s0 + $0x88] sm:$0xff]  ;;  %v12523_v58 = vld [vmem:[%s15998_s0 + $0x98] sm:$0xff] }
 0x34f   :  { %17327 = vst [vmem:[#allocation194_spill] sm:$0xff] %v12428_v12  ;;  %4931 = vperm.xlu0 %7233, %v17330_v16   ;;  %vm2583_vm11 = vcmp.eq.s32.totalorder %v8298_v0, %v17332_v9  ;;  %vm2560_vm12 = vcmp.eq.s32.totalorder %v8289_v28, %v17333_v5  ;;  %17334 = vst [vmem:[#allocation114_spill] sm:$0xff] %v12453_v17  ;;  %v12456_v3 = vadd.f32 %v6474_v22, %v17335_v10  ;;  %v12485_v9 = vpop.permute.xlu1 %3568  ;;  %v17341_v12 = vld [vmem:[#allocation146_spill] sm:$0xff] }
 0x350   :  { %vm2561_vm13 = vcmp.eq.s32.totalorder %v8298_v0, %v17333_v5  ;;  %vm2586_vm14 = vcmp.eq.s32.totalorder %v8289_v28, %v17336_v6  ;;  %vm2587_vm15 = vcmp.eq.s32.totalorder %v8298_v0, %v17336_v6  ;;  %v6500_v21 = vsel %vm2579_vm7, 1.0, %v16602_v47  ;;  %17338 = vst [vmem:[#allocation15_spill] sm:$0xff] %v12485_v9  ;;  %v17342_v5 = vld [vmem:[#allocation148_spill] sm:$0xff] }
 0x351   :  { %4260 = vperm.xlu1 %7229, %v12467_v11   ;;  %v12475_v22 = vadd.f32 %v6499_v46, %v12098_v49  ;;  %v6477_v16 = vsel %vm2556_vm8, 1.0, %v16602_v47  ;;  %v6478_v4 = vsel %vm2557_vm9, 1.0, %v16602_v47  ;;  %v6503_v10 = vsel %vm2582_vm10, 1.0, %v16602_v47  ;;  %v17339_v49 = vld [vmem:[#allocation38_spill] sm:$0xff]  ;;  %v7429_v46 = vld [vmem:[%s15998_s0 + $0xb8] sm:$0xff]  ;;  %v12507_v44 = vpop.permute.xlu0 %3884 }
 0x352   :  { %v6504_v39 = vsel %vm2583_vm11, 1.0, %v16602_v47  ;;  %v6481_v17 = vsel %vm2560_vm12, 1.0, %v16602_v47  ;;  %vm2564_vm0 = vcmp.eq.s32.totalorder %v8289_v28, %v17339_v49  ;;  %v6482_v23 = vsel %vm2561_vm13, 1.0, %v16602_v47  ;;  %17340 = vst [vmem:[#allocation117_spill] sm:$0xff] %v12507_v44 }
 0x353   :  { %17337 = vst [vmem:[#allocation115_spill] sm:$0xff] %v12475_v22  ;;  %4982 = vperm.xlu0 %7233, %v7429_v46   ;;  %v6507_v9 = vsel %vm2586_vm14, 1.0, %v16602_v47  ;;  %v6508_v50 = vsel %vm2587_vm15, 1.0, %v16602_v47  ;;  %v12510_v22 = vadd.f32 %v6500_v21, %v12105_v53  ;;  %v12513_v37 = vadd.f32 %v6477_v16, %v17341_v12  ;;  %v12539_v16 = vpop.permute.xlu1 %3574 }
 0x354   :  { %v12516_v26 = vadd.f32 %v6478_v4, %v17342_v5  ;;  %vm2565_vm1 = vcmp.eq.s32.totalorder %v8298_v0, %v17339_v49  ;;  %v12527_v6 = vadd.f32 %v6503_v10, %v12118_v38  ;;  %v12530_v53 = vadd.f32 %v6504_v39, %v12126_v41  ;;  %17343 = vst [vmem:[#allocation119_spill] sm:$0xff] %v12539_v16  ;;  %v17346_v41 = vld [vmem:[#allocation203_spill] sm:$0xff]  ;;  %v17347_v10 = vld [vmem:[#allocation208_spill] sm:$0xff] }
 0x355   :  { %4266 = vperm.xlu1 %7229, %v12523_v58   ;;  %v12533_v12 = vadd.f32 %v6481_v17, %v11759_v24  ;;  %v6485_v21 = vsel %vm2564_vm0, 1.0, %v16602_v47  ;;  %v12542_v4 = vadd.f32 %v6482_v23, %v11762_v43  ;;  %v12545_v5 = vadd.f32 %v6507_v9, %v12196_v54  ;;  %v12561_v43 = vpop.permute.xlu0 %3890  ;;  %v17349_v54 = vld [vmem:[#allocation5_spill] sm:$0xff]  ;;  %v12575_v9 = vld [vmem:[%s15998_s0 + $0xa8] sm:$0xff] }
 0x356   :  { %v12548_v38 = vadd.f32 %v6508_v50, %v12199_v27  ;;  %vm2590_vm2 = vcmp.eq.s32.totalorder %v8289_v28, %v17346_v41  ;;  %v16355_v24 = vmov 15   ;;  %v6486_v17 = vsel %vm2565_vm1, 1.0, %v16602_v47  ;;  %17348 = vst [vmem:[#allocation19_spill] sm:$0xff] %v12561_v43  ;;  %v17350_v50 = vld [vmem:[#allocation35_spill] sm:$0xff] }
 0x357   :  { %17344 = vst [vmem:[#allocation201_spill] sm:$0xff] %v12545_v5  ;;  %7243 = vset.pattern.permute.xlu0 %v16355_v24  ;;  %vm2591_vm3 = vcmp.eq.s32.totalorder %v8298_v0, %v17346_v41  ;;  %vm2568_vm4 = vcmp.eq.s32.totalorder %v8289_v28, %v17347_v10  ;;  %vm2569_vm5 = vcmp.eq.s32.totalorder %v8298_v0, %v17347_v10  ;;  %v6511_v39 = vsel %vm2590_vm2, 1.0, %v16602_v47  ;;  %v12585_v49 = vpop.permute.xlu1 %3580  ;;  %v17353_v24 = vld [vmem:[#allocation66_spill] sm:$0xff] }
 0x358   :  { %17345 = vst [vmem:[#allocation202_spill] sm:$0xff] %v12548_v38  ;;  %5265 = vperm.xlu0 %7243, %v12032_v7   ;;  %v12564_v27 = vadd.f32 %v6485_v21, %v11777_v20  ;;  %vm2594_vm6 = vcmp.eq.s32.totalorder %v8289_v28, %v17349_v54  ;;  %vm2595_vm7 = vcmp.eq.s32.totalorder %v8298_v0, %v17349_v54  ;;  %v17351_v20 = vld [vmem:[#allocation174_spill] sm:$0xff]  ;;  %17352 = vst [vmem:[#allocation20_spill] sm:$0xff] %v12585_v49 }
 0x359   :  { %vm2572_vm8 = vcmp.eq.s32.totalorder %v8289_v28, %v17350_v50  ;;  %4272 = vperm.xlu1 %7229, %v12575_v9   ;;  %vm2573_vm9 = vcmp.eq.s32.totalorder %v8298_v0, %v17350_v50  ;;  %vm2598_vm10 = vcmp.eq.s32.totalorder %v8289_v28, %v17351_v20  ;;  %vm2599_vm11 = vcmp.eq.s32.totalorder %v8298_v0, %v17351_v20  ;;  %v12608_v41 = vpop.permute.xlu0 %3896 }
 0x35a   :  { %v12588_v23 = vadd.f32 %v6486_v17, %v11780_v36  ;;  %v6512_v21 = vsel %vm2591_vm3, 1.0, %v16602_v47  ;;  %v6489_v54 = vsel %vm2568_vm4, 1.0, %v16602_v47  ;;  %v6490_v50 = vsel %vm2569_vm5, 1.0, %v16602_v47  ;;  %17354 = vst [vmem:[#allocation22_spill] sm:$0xff] %v12608_v41 }
 0x35b   :  { %v6515_v20 = vsel %vm2594_vm6, 1.0, %v16602_v47  ;;  %v6516_v36 = vsel %vm2595_vm7, 1.0, %v16602_v47  ;;  %v6493_v17 = vsel %vm2572_vm8, 1.0, %v16602_v47  ;;  %vm2576_vm12 = vcmp.eq.s32.totalorder %v8289_v28, %v17353_v24 }
 0x35c   :  { %5316 = vperm.xlu0 %7243, %v12467_v11   ;;  %v12611_v43 = vadd.f32 %v6511_v39, %v12213_v33  ;;  %v6494_v49 = vsel %vm2573_vm9, 1.0, %v16602_v47  ;;  %v6519_v10 = vsel %vm2598_vm10, 1.0, %v16602_v47  ;;  %v6520_v44 = vsel %vm2599_vm11, 1.0, %v16602_v47  ;;  %v12627_v33 = vpop.permute.xlu1 %3586 }
 0x35d   :  { %4278 = vperm.xlu1 %7229, %v7429_v46   ;;  %v12617_v16 = vadd.f32 %v6512_v21, %v12222_v40  ;;  %v12620_v38 = vadd.f32 %v6489_v54, %v11820_v8  ;;  %v12623_v5 = vadd.f32 %v6490_v50, %v11840_v34  ;;  %vm2577_vm13 = vcmp.eq.s32.totalorder %v8298_v0, %v17353_v24  ;;  %v17358_v21 = vld [vmem:[#allocation67_spill] sm:$0xff]  ;;  %v17362_v24 = vld [vmem:[#allocation185_spill] sm:$0xff] }
 0x35e   :  { %17355 = vst [vmem:[#allocation23_spill] sm:$0xff] %v12627_v33  ;;  %v12630_v39 = vadd.f32 %v6515_v20, %v12231_v42  ;;  %v12633_v41 = vadd.f32 %v6516_v36, %v12247_v32  ;;  %v12636_v40 = vadd.f32 %v6493_v17, %v11867_v15  ;;  %v6497_v8 = vsel %vm2576_vm12, 1.0, %v16602_v47  ;;  %v12654_v15 = vpop.permute.xlu0 %3902  ;;  %v17364_v50 = vld [vmem:[#allocation69_spill] sm:$0xff] }
 0x35f   :  { %v12643_v34 = vadd.f32 %v6494_v49, %v11870_v29  ;;  %v12646_v46 = vadd.f32 %v6519_v10, %v12301_v35  ;;  %v12649_v42 = vadd.f32 %v6520_v44, %v12304_v55  ;;  %vm2602_vm14 = vcmp.eq.s32.totalorder %v8289_v28, %v17358_v21  ;;  %17359 = vst [vmem:[#allocation25_spill] sm:$0xff] %v12654_v15  ;;  %v17360_v29 = vld [vmem:[#allocation172_spill] sm:$0xff]  ;;  %v12666_v55 = vld [vmem:[%s15998_s0 + $0xc8] sm:$0xff]  ;;  %v12696_v10 = vld [vmem:[%s15998_s0 + $0x20] sm:$0xff] }
 0x360   :  { %5274 = vperm.xlu0 %7243, %v12137_v13   ;;  %v6498_v32 = vsel %vm2577_vm13, 1.0, %v16602_v47  ;;  %vm2603_vm15 = vcmp.eq.s32.totalorder %v8298_v0, %v17358_v21  ;;  %vm2580_vm0 = vcmp.eq.s32.totalorder %v8289_v28, %v17360_v29  ;;  %vm2581_vm1 = vcmp.eq.s32.totalorder %v8298_v0, %v17360_v29  ;;  %v17361_v44 = vld [vmem:[#allocation184_spill] sm:$0xff]  ;;  %v12678_v49 = vpop.permute.xlu1 %3592  ;;  %17365 = vst [vmem:[#allocation27_spill] sm:$0xff] %v12696_v10  ;;  %v17367_v29 = vld [vmem:[#allocation70_spill] sm:$0xff] }
 0x361   :  { %17356 = vst [vmem:[#allocation206_spill] sm:$0xff] %v12646_v46  ;;  %17357 = vst [vmem:[#allocation24_spill] sm:$0xff] %v12649_v42  ;;  %4284 = vperm.xlu1 %7229, %v12666_v55   ;;  %v12670_v35 = vadd.f32 %v6497_v8, %v11886_v62  ;;  %vm2606_vm2 = vcmp.eq.s32.totalorder %v8289_v28, %v17361_v44  ;;  %vm2607_vm3 = vcmp.eq.s32.totalorder %v8298_v0, %v17361_v44  ;;  %v12709_v44 = vld [vmem:[%s15998_s0 + $0xd8] sm:$0xff] }
 0x362   :  { %vm2584_vm4 = vcmp.eq.s32.totalorder %v8289_v28, %v17362_v24  ;;  %17363 = vst [vmem:[#allocation26_spill] sm:$0xff] %v12678_v49  ;;  %v6523_v54 = vsel %vm2602_vm14, 1.0, %v16602_v47  ;;  %vm2585_vm5 = vcmp.eq.s32.totalorder %v8298_v0, %v17362_v24  ;;  %vm2898_vm6 = vcmp.eq.s32.totalorder %v8289_v28, %v17364_v50  ;;  %v12699_v8 = vpop.permute.xlu0 %3908  ;;  %17368 = vst [vmem:[#allocation31_spill] sm:$0xff] %v12709_v44  ;;  %v17372_v24 = vld [vmem:[#allocation155_spill] sm:$0xff]  ;;  %v17375_v46 = vld [vmem:[#allocation48_spill] sm:$0xff] }
 0x363   :  { %vm2899_vm7 = vcmp.eq.s32.totalorder %v8298_v0, %v17364_v50  ;;  %v12688_v62 = vadd.f32 %v6498_v32, %v11889_v48  ;;  %v6524_v20 = vsel %vm2603_vm15, 1.0, %v16602_v47  ;;  %v6501_v36 = vsel %vm2580_vm0, 1.0, %v16602_v47  ;;  %17366 = vst [vmem:[#allocation207_spill] sm:$0xff] %v12699_v8 }
 0x364   :  { %v6502_v17 = vsel %vm2581_vm1, 1.0, %v16602_v47  ;;  %5277 = vperm.xlu0 %7243, %v12696_v10   ;;  %v6527_v21 = vsel %vm2606_vm2, 1.0, %v16602_v47  ;;  %v6528_v48 = vsel %vm2607_vm3, 1.0, %v16602_v47  ;;  %v6505_v32 = vsel %vm2584_vm4, 1.0, %v16602_v47  ;;  %v12727_v42 = vpop.permute.xlu1 %3598 }
 0x365   :  { %vm2588_vm8 = vcmp.eq.s32.totalorder %v8289_v28, %v17367_v29  ;;  %4290 = vperm.xlu1 %7229, %v12709_v44   ;;  %v12713_v15 = vadd.f32 %v6523_v54, %v12316_v45  ;;  %v6506_v49 = vsel %vm2585_vm5, 1.0, %v16602_v47  ;;  %v6531_v33 = vsel %vm2898_vm6, 1.0, %v16602_v47  ;;  %17370 = vst [vmem:[#allocation32_spill] sm:$0xff] %v12727_v42 }
 0x366   :  { %v6532_v8 = vsel %vm2899_vm7, 1.0, %v16602_v47  ;;  %v12730_v45 = vadd.f32 %v6524_v20, %v12325_v18  ;;  %v12733_v54 = vadd.f32 %v6501_v36, %v11929_v31  ;;  %v12736_v44 = vadd.f32 %v6502_v17, %v17372_v24  ;;  %v12751_v31 = vpop.permute.xlu0 %3914  ;;  %v17377_v20 = vld [vmem:[#allocation60_spill] sm:$0xff]  ;;  %v17388_v24 = vld [vmem:[#allocation157_spill] sm:$0xff] }
 0x367   :  { %17369 = vst [vmem:[#allocation178_spill] sm:$0xff] %v12713_v15  ;;  %vm2589_vm9 = vcmp.eq.s32.totalorder %v8298_v0, %v17367_v29  ;;  %v12741_v15 = vadd.f32 %v6527_v21, %v12353_v61  ;;  %v12744_v50 = vadd.f32 %v6528_v48, %v12363_v25  ;;  %v12747_v42 = vadd.f32 %v6505_v32, %v17375_v46  ;;  %v17380_v25 = vld [vmem:[#allocation176_spill] sm:$0xff]  ;;  %v12767_v46 = vld [vmem:[%s15998_s0 + $0xe8] sm:$0xff] }
 0x368   :  { %17371 = vst [vmem:[#allocation209_spill] sm:$0xff] %v12730_v45  ;;  %v6509_v18 = vsel %vm2588_vm8, 1.0, %v16602_v47  ;;  %5328 = vperm.xlu0 %7243, %v12575_v9   ;;  %17376 = vst [vmem:[#allocation36_spill] sm:$0xff] %v12751_v31  ;;  %v12754_v36 = vadd.f32 %v6506_v49, %v17377_v20  ;;  %v12757_v17 = vadd.f32 %v6531_v33, %v12399_v59  ;;  %v6510_v9 = vsel %vm2589_vm9, 1.0, %v16602_v47  ;;  %v17381_v59 = vld [vmem:[#allocation179_spill] sm:$0xff]  ;;  %v17386_v32 = vld [vmem:[#allocation40_spill] sm:$0xff] }
 0x369   :  { %17373 = vst [vmem:[#allocation210_spill] sm:$0xff] %v12741_v15  ;;  %17374 = vst [vmem:[#allocation37_spill] sm:$0xff] %v12744_v50  ;;  %v12760_v61 = vadd.f32 %v6532_v8, %v12402_v14  ;;  %vm2904_vm10 = vcmp.eq.s32.totalorder %v8289_v28, %v17380_v25  ;;  %4296 = vperm.xlu1 %7229, %v12767_v46   ;;  %vm2905_vm11 = vcmp.eq.s32.totalorder %v8298_v0, %v17380_v25  ;;  %v17382_v14 = vld [vmem:[#allocation156_spill] sm:$0xff]  ;;  %v17383_v49 = vld [vmem:[#allocation7_spill] sm:$0xff]  ;;  %v12786_v21 = vpop.permute.xlu1 %3860 }
 0x36a   :  { %17378 = vst [vmem:[#allocation127_spill] sm:$0xff] %v12757_v17  ;;  %vm2592_vm12 = vcmp.eq.s32.totalorder %v8289_v28, %v17381_v59  ;;  %vm2593_vm13 = vcmp.eq.s32.totalorder %v8298_v0, %v17381_v59  ;;  %v12778_v33 = vadd.f32 %v6509_v18, %v17382_v14  ;;  %vm2908_vm14 = vcmp.eq.s32.totalorder %v8289_v28, %v17383_v49  ;;  %v17384_v8 = vld [vmem:[#allocation188_spill] sm:$0xff]  ;;  %v12796_v29 = vpop.permute.xlu0 %3920  ;;  %v17394_v15 = vld [vmem:[#allocation73_spill] sm:$0xff] }
 0x36b   :  { %17379 = vst [vmem:[#allocation182_spill] sm:$0xff] %v12760_v61  ;;  %vm2909_vm15 = vcmp.eq.s32.totalorder %v8298_v0, %v17383_v49  ;;  %vm2596_vm0 = vcmp.eq.s32.totalorder %v8289_v28, %v17384_v8  ;;  %17385 = vst [vmem:[#allocation41_spill] sm:$0xff] %v12786_v21  ;;  %v6537_v48 = vsel %vm2904_vm10, 1.0, %v16602_v47  ;;  %vm2597_vm1 = vcmp.eq.s32.totalorder %v8298_v0, %v17384_v8  ;;  %v7436_v14 = vld [vmem:[%s15998_s0 + $0xf8] sm:$0xff]  ;;  %v17392_v49 = vld [vmem:[#allocation159_spill] sm:$0xff] }
 0x36c   :  { %vm2912_vm2 = vcmp.eq.s32.totalorder %v8289_v28, %v17386_v32  ;;  %vm2913_vm3 = vcmp.eq.s32.totalorder %v8298_v0, %v17386_v32  ;;  %5286 = vperm.xlu0 %7243, %v12243_v2   ;;  %17387 = vst [vmem:[#allocation128_spill] sm:$0xff] %v12796_v29  ;;  %v12799_v18 = vadd.f32 %v6510_v9, %v17388_v24  ;;  %v6538_v20 = vsel %vm2905_vm11, 1.0, %v16602_v47  ;;  %v17393_v50 = vld [vmem:[#allocation96_spill] sm:$0xff] }
 0x36d   :  { %v6513_v25 = vsel %vm2592_vm12, 1.0, %v16602_v47  ;;  %v6514_v59 = vsel %vm2593_vm13, 1.0, %v16602_v47  ;;  %4302 = vperm.xlu1 %7229, %v7436_v14   ;;  %v6541_v2 = vsel %vm2908_vm14, 1.0, %v16602_v47  ;;  %v6542_v9 = vsel %vm2909_vm15, 1.0, %v16602_v47  ;;  %v12825_v31 = vpop.permute.xlu1 %3863 }
 0x36e   :  { %v6517_v32 = vsel %vm2596_vm0, 1.0, %v16602_v47  ;;  %v12820_v24 = vadd.f32 %v6537_v48, %v12445_v19  ;;  %v6518_v14 = vsel %vm2597_vm1, 1.0, %v16602_v47  ;;  %v6545_v29 = vsel %vm2912_vm2, 1.0, %v16602_v47  ;;  %17390 = vst [vmem:[#allocation199_spill] sm:$0xff] %v12825_v31  ;;  %v12841_v19 = vld [vmem:[%s15998_s0 + $0x40] sm:$0xff]  ;;  %v12844_v48 = vpop.permute.xlu0 %3926 }
 0x36f   :  { %v6546_v21 = vsel %vm2913_vm3, 1.0, %v16602_v47  ;;  %v12828_v61 = vadd.f32 %v6538_v20, %v12456_v3  ;;  %v12831_v17 = vadd.f32 %v6513_v25, %v17392_v49  ;;  %v12834_v8 = vadd.f32 %v6514_v59, %v17393_v50  ;;  %17395 = vst [vmem:[#allocation189_spill] sm:$0xff] %v12844_v48  ;;  %v17398_v50 = vld [vmem:[#allocation98_spill] sm:$0xff]  ;;  %v17399_v49 = vld [vmem:[#allocation101_spill] sm:$0xff] }
 0x370   :  { %17389 = vst [vmem:[#allocation81_spill] sm:$0xff] %v12820_v24  ;;  %vm2600_vm4 = vcmp.eq.s32.totalorder %v8289_v28, %v17394_v15  ;;  %5289 = vperm.xlu0 %7243, %v12841_v19   ;;  %v12847_v3 = vadd.f32 %v6541_v2, %v12513_v37  ;;  %v12850_v20 = vadd.f32 %v6542_v9, %v12516_v26  ;;  %v16373_v59 = vmov 13   ;;  %v17402_v26 = vld [vmem:[#allocation74_spill] sm:$0xff] }
 0x371   :  { %17391 = vst [vmem:[#allocation39_spill] sm:$0xff] %v12828_v61  ;;  %v12853_v25 = vadd.f32 %v6517_v32, %v17398_v50  ;;  %vm2601_vm5 = vcmp.eq.s32.totalorder %v8298_v0, %v17394_v15  ;;  %7231 = vset.pattern.permute.xlu1 %v16373_v59  ;;  %v12859_v31 = vadd.f32 %v6518_v14, %v17399_v49  ;;  %v12872_v2 = vld [vmem:[%s15998_s0 + $0x8] sm:$0xff]  ;;  %v6521_v9 = vsel %vm2600_vm4, 1.0, %v16602_v47  ;;  %v17406_v15 = vld [vmem:[#allocation9_spill] sm:$0xff]  ;;  %v17408_v50 = vld [vmem:[#allocation79_spill] sm:$0xff] }
 0x372   :  { %17396 = vst [vmem:[#allocation191_spill] sm:$0xff] %v12847_v3  ;;  %17397 = vst [vmem:[#allocation195_spill] sm:$0xff] %v12850_v20  ;;  %v12862_v48 = vadd.f32 %v6545_v29, %v12533_v12  ;;  %v12865_v37 = vadd.f32 %v6546_v21, %v12542_v4  ;;  %vm2916_vm6 = vcmp.eq.s32.totalorder %v8289_v28, %v17402_v26  ;;  %4564 = vperm.xlu1 %7231, %v12872_v2   ;;  %v17403_v12 = vld [vmem:[#allocation186_spill] sm:$0xff]  ;;  %v12885_v4 = vpop.permute.xlu1 %3869  ;;  %v17405_v29 = vld [vmem:[#allocation8_spill] sm:$0xff]  ;;  %v12895_v32 = vpop.permute.xlu0 %3932 }
 0x373   :  { %vm2917_vm7 = vcmp.eq.s32.totalorder %v8298_v0, %v17402_v26  ;;  %vm2604_vm8 = vcmp.eq.s32.totalorder %v8289_v28, %v17403_v12  ;;  %vm2605_vm9 = vcmp.eq.s32.totalorder %v8298_v0, %v17403_v12  ;;  %17404 = vst [vmem:[#allocation187_spill] sm:$0xff] %v12885_v4  ;;  %v6522_v21 = vsel %vm2601_vm5, 1.0, %v16602_v47  ;;  %17407 = vst [vmem:[#allocation42_spill] sm:$0xff] %v12895_v32  ;;  %v17409_v49 = vld [vmem:[#allocation162_spill] sm:$0xff]  ;;  %v17410_v4 = vld [vmem:[#allocation97_spill] sm:$0xff] }
 0x374   :  { %17400 = vst [vmem:[#allocation196_spill] sm:$0xff] %v12862_v48  ;;  %17401 = vst [vmem:[#allocation18_spill] sm:$0xff] %v12865_v37  ;;  %vm2920_vm10 = vcmp.eq.s32.totalorder %v8289_v28, %v17405_v29  ;;  %vm2921_vm11 = vcmp.eq.s32.totalorder %v8298_v0, %v17405_v29  ;;  %vm2896_vm12 = vcmp.eq.s32.totalorder %v8289_v28, %v17406_v15  ;;  %5340 = vperm.xlu0 %7243, %v12666_v55   ;;  %v7260_v37 = vld [vmem:[%s15999_s1 + $0x40] sm:$0xff]   ;;  %v17411_v48 = vld [vmem:[#allocation163_spill] sm:$0xff] }
 0x375   :  { %v6549_v14 = vsel %vm2916_vm6, 1.0, %v16602_v47  ;;  %vm2897_vm13 = vcmp.eq.s32.totalorder %v8298_v0, %v17406_v15  ;;  %vm2924_vm14 = vcmp.eq.s32.totalorder %v8289_v28, %v17408_v50  ;;  %vm2925_vm15 = vcmp.eq.s32.totalorder %v8298_v0, %v17408_v50  ;;  %7057 = vmatprep.subr.bf16.mxu0 %v7260_v37  ;;  %v17416_v15 = vld [vmem:[#allocation165_spill] sm:$0xff]  ;;  %7169 = vmatprep.subr.bf16.mxu1 %v7260_v37 }
 0x376   :  { %v12905_v26 = vadd.f32 %v6521_v9, %v17409_v49  ;;  %v6550_v12 = vsel %vm2917_vm7, 1.0, %v16602_v47  ;;  %v6525_v59 = vsel %vm2604_vm8, 1.0, %v16602_v47  ;;  %v6526_v32 = vsel %vm2605_vm9, 1.0, %v16602_v47  ;;  %4567 = vperm.xlu1 %7231, %v17410_v4   ;;  %v12929_v3 = vpop.permute.xlu1 %3875  ;;  %v12950_v24 = vpop.permute.xlu0 %3938 }
 0x377   :  { %v12915_v20 = vadd.f32 %v6522_v21, %v17411_v48  ;;  %v6553_v9 = vsel %vm2920_vm10, 1.0, %v16602_v47  ;;  %v6554_v49 = vsel %vm2921_vm11, 1.0, %v16602_v47  ;;  %v6529_v4 = vsel %vm2896_vm12, 1.0, %v16602_v47  ;;  %17412 = vst [vmem:[#allocation10_spill] sm:$0xff] %v12929_v3  ;;  %v7261_v48 = vld [vmem:[%s15999_s1] sm:$0xff]   ;;  %17414 = vst [vmem:[#allocation76_spill] sm:$0xff] %v12950_v24 }
 0x378   :  { %v12935_v21 = vadd.f32 %v6549_v14, %v12564_v27  ;;  %v6530_v29 = vsel %vm2897_vm13, 1.0, %v16602_v47  ;;  %v6557_v61 = vsel %vm2924_vm14, 1.0, %v16602_v47  ;;  %v6558_v3 = vsel %vm2925_vm15, 1.0, %v16602_v47  ;;  %5298 = vperm.xlu0 %7243, %v12340_v1   ;;  %7058 = vmatpush3.bf16.msra.mxu0 %v7261_v48  ;;  %v17419_v1 = vld [vmem:[#allocation62_spill] sm:$0xff] }
 0x379   :  { %v12953_v27 = vadd.f32 %v6550_v12, %v12588_v23  ;;  %v12956_v14 = vadd.f32 %v6525_v59, %v17416_v15  ;;  %v12962_v45 = vadd.f32 %v6553_v9, %v12620_v38  ;;  %v12965_v50 = vadd.f32 %v6554_v49, %v12623_v5  ;;  %v7262_v23 = vld [vmem:[%s15999_s1 + $0x48] sm:$0xff]   ;;  %7177 = vmatpush3.bf16.msra.mxu1 %v7261_v48  ;;  %v17423_v5 = vld [vmem:[#allocation84_spill] sm:$0xff]  ;;  %v13020_v48 = vld [vmem:[%s15998_s0 + $0x80] sm:$0xff] }
 0x37a   :  { %17413 = vst [vmem:[#allocation75_spill] sm:$0xff] %v12935_v21  ;;  %v12959_v21 = vadd.f32 %v6526_v32, %v12193_v51  ;;  %v12968_v24 = vadd.f32 %v6529_v4, %v17419_v1  ;;  %4573 = vperm.xlu1 %7231, %v12696_v10   ;;  %v17420_v51 = vld [vmem:[#allocation167_spill] sm:$0xff]  ;;  %v12978_v37 = vadd.f32 %v6557_v61, %v12636_v40  ;;  %v12985_v32 = vpop.permute.xlu1 %3881  ;;  %v7263_v12 = vld [vmem:[%s15999_s1 + $0x8] sm:$0xff]   ;;  %v12999_v40 = vld [vmem:[%s15998_s0 + $0x60] sm:$0xff] }
 0x37b   :  { %17415 = vst [vmem:[#allocation43_spill] sm:$0xff] %v12953_v27  ;;  %17417 = vst [vmem:[#allocation136_spill] sm:$0xff] %v12962_v45  ;;  %v12975_v59 = vadd.f32 %v6530_v29, %v17420_v51  ;;  %v12981_v38 = vadd.f32 %v6558_v3, %v12643_v34  ;;  %vm2900_vm0 = vcmp.eq.s32.totalorder %v8289_v28, %v17423_v5  ;;  %v17425_v9 = vld [vmem:[#allocation86_spill] sm:$0xff]  ;;  %v13002_v34 = vpop.permute.xlu0 %3944  ;;  %7059 = vmatprep.subr.bf16.mxu0 %v7262_v23  ;;  %v17427_v61 = vld [vmem:[#allocation87_spill] sm:$0xff] }
 0x37c   :  { %17418 = vst [vmem:[#allocation192_spill] sm:$0xff] %v12965_v50  ;;  %17421 = vst [vmem:[#allocation193_spill] sm:$0xff] %v12978_v37  ;;  %vm2901_vm1 = vcmp.eq.s32.totalorder %v8298_v0, %v17423_v5  ;;  %vm2928_vm2 = vcmp.eq.s32.totalorder %v8289_v28, %v17425_v9  ;;  %vm2929_vm3 = vcmp.eq.s32.totalorder %v8298_v0, %v17425_v9  ;;  %5301 = vperm.xlu0 %7243, %v12999_v40   ;;  %v17428_v3 = vld [vmem:[#allocation88_spill] sm:$0xff]  ;;  %v17429_v4 = vld [vmem:[#allocation205_spill] sm:$0xff] }
 0x37d   :  { %17422 = vst [vmem:[#allocation44_spill] sm:$0xff] %v12981_v38  ;;  %17424 = vst [vmem:[#allocation45_spill] sm:$0xff] %v12985_v32  ;;  %vm2902_vm4 = vcmp.eq.s32.totalorder %v8289_v28, %v17427_v61  ;;  %vm2903_vm5 = vcmp.eq.s32.totalorder %v8298_v0, %v17427_v61  ;;  %vm2932_vm6 = vcmp.eq.s32.totalorder %v8289_v28, %v17428_v3  ;;  %7060 = vmatpush3.bf16.msra.mxu0 %v7263_v12  ;;  %v7264_v29 = vld [vmem:[%s15999_s1 + $0x50] sm:$0xff]   ;;  %v17457_v27 = vld [vmem:[#allocation29_spill] sm:$0xff] }
 0x37e   :  { %17426 = vst [vmem:[#allocation137_spill] sm:$0xff] %v13002_v34  ;;  %7170 = vmatprep.subr.bf16.mxu1 %v7262_v23  ;;  %v6533_v49 = vsel %vm2900_vm0, 1.0, %v16602_v47  ;;  %vm2933_vm7 = vcmp.eq.s32.totalorder %v8298_v0, %v17428_v3  ;;  %vm2906_vm8 = vcmp.eq.s32.totalorder %v8289_v28, %v17429_v4  ;;  %vm2907_vm9 = vcmp.eq.s32.totalorder %v8298_v0, %v17429_v4  ;;  %v17430_v23 = vld [vmem:[#allocation47_spill] sm:$0xff]  ;;  %v13038_v51 = vpop.permute.xlu1 %3887 }
 0x37f   :  { %4609 = vperm.xlu1 %7231, %v13020_v48   ;;  %7178 = vmatpush3.bf16.msra.mxu1 %v7263_v12  ;;  %v6534_v15 = vsel %vm2901_vm1, 1.0, %v16602_v47  ;;  %v6561_v1 = vsel %vm2928_vm2, 1.0, %v16602_v47  ;;  %vm2936_vm10 = vcmp.eq.s32.totalorder %v8289_v28, %v17430_v23  ;;  %vm2937_vm11 = vcmp.eq.s32.totalorder %v8298_v0, %v17430_v23  ;;  %17431 = vst [vmem:[#allocation16_spill] sm:$0xff] %v13038_v51  ;;  %v7265_v12 = vld [vmem:[%s15999_s1 + $0x10] sm:$0xff]   ;;  %v13060_v38 = vpop.permute.xlu0 %3950 }
 0x380   :  { %v6562_v5 = vsel %vm2929_vm3, 1.0, %v16602_v47  ;;  %v6535_v34 = vsel %vm2902_vm4, 1.0, %v16602_v47  ;;  %v6536_v32 = vsel %vm2903_vm5, 1.0, %v16602_v47  ;;  %v6565_v51 = vsel %vm2932_vm6, 1.0, %v16602_v47  ;;  %5352 = vperm.xlu0 %7243, %v12767_v46   ;;  %17432 = vst [vmem:[#allocation46_spill] sm:$0xff] %v13060_v38  ;;  %7061 = vmatprep.subr.bf16.mxu0 %v7264_v29 }
 0x381   :  { %v13063_v9 = vadd.f32 %v6533_v49, %v12415_v52  ;;  %v6566_v37 = vsel %vm2933_vm7, 1.0, %v16602_v47  ;;  %v6539_v61 = vsel %vm2906_vm8, 1.0, %v16602_v47  ;;  %v6540_v50 = vsel %vm2907_vm9, 1.0, %v16602_v47  ;;  %7062 = vmatpush3.bf16.msra.mxu0 %v7265_v12  ;;  %7171 = vmatprep.subr.bf16.mxu1 %v7264_v29  ;;  %v17436_v29 = vld [vmem:[#allocation104_spill] sm:$0xff] }
 0x382   :  { %v13078_v52 = vadd.f32 %v6534_v15, %v12422_v30  ;;  %v13081_v49 = vadd.f32 %v6561_v1, %v12670_v35  ;;  %v6569_v3 = vsel %vm2936_vm10, 1.0, %v16602_v47  ;;  %v6570_v38 = vsel %vm2937_vm11, 1.0, %v16602_v47  ;;  %v7266_v30 = vld [vmem:[%s15999_s1 + $0x58] sm:$0xff]   ;;  %v17437_v1 = vld [vmem:[#allocation106_spill] sm:$0xff]  ;;  %v13108_v23 = vpop.permute.xlu1 %3893 }
 0x383   :  { %v17434_v4 = vmov 14   ;;  %7179 = vmatpush3.bf16.msra.mxu1 %v7265_v12  ;;  %v13096_v35 = vadd.f32 %v6562_v5, %v12688_v62  ;;  %v13099_v15 = vadd.f32 %v6535_v34, %v17436_v29  ;;  %v13105_v45 = vadd.f32 %v6565_v51, %v12733_v54  ;;  %17439 = vst [vmem:[#allocation200_spill] sm:$0xff] %v13108_v23  ;;  %v7267_v12 = vld [vmem:[%s15999_s1 + $0x18] sm:$0xff]   ;;  %v17441_v5 = vld [vmem:[#allocation170_spill] sm:$0xff] }
 0x384   :  { %17433 = vst [vmem:[#allocation82_spill] sm:$0xff] %v13081_v49  ;;  %7232 = vset.pattern.permute.xlu1 %v17434_v4  ;;  %v13102_v49 = vadd.f32 %v6536_v32, %v17437_v1  ;;  %v13114_v62 = vadd.f32 %v6566_v37, %v12736_v44  ;;  %v13117_v34 = vadd.f32 %v6539_v61, %v17441_v5  ;;  %v17442_v29 = vmov 13   ;;  %v17445_v1 = vld [vmem:[#allocation90_spill] sm:$0xff]  ;;  %v13132_v44 = vpop.permute.xlu0 %4212  ;;  %v7269_v37 = vld [vmem:[%s15999_s1 + $0x20] sm:$0xff]  }
 0x385   :  { %17435 = vst [vmem:[#allocation78_spill] sm:$0xff] %v13096_v35  ;;  %17438 = vst [vmem:[#allocation80_spill] sm:$0xff] %v13105_v45  ;;  %4913 = vperm.xlu1 %7232, %v12032_v7   ;;  %v13120_v32 = vadd.f32 %v6540_v50, %v12298_v60  ;;  %7254 = vset.pattern.permute.xlu0 %v17442_v29  ;;  %v13124_v54 = vadd.f32 %v6569_v3, %v12747_v42  ;;  %v17447_v60 = vld [vmem:[#allocation92_spill] sm:$0xff]  ;;  %v17448_v42 = vld [vmem:[#allocation93_spill] sm:$0xff] }
 0x386   :  { %17440 = vst [vmem:[#allocation17_spill] sm:$0xff] %v13114_v62  ;;  %7063 = vmatprep.subr.bf16.mxu0 %v7266_v30  ;;  %v13127_v51 = vadd.f32 %v6570_v38, %v12754_v36  ;;  %vm2910_vm12 = vcmp.eq.s32.totalorder %v8289_v28, %v17445_v1  ;;  %4561 = vperm.xlu0 %7254, %v12032_v7   ;;  %17446 = vst [vmem:[#allocation141_spill] sm:$0xff] %v13132_v44  ;;  %v7268_v7 = vld [vmem:[%s15999_s1 + $0x60] sm:$0xff]   ;;  %v17449_v36 = vld [vmem:[#allocation94_spill] sm:$0xff]  ;;  %v13152_v50 = vpop.permute.xlu1 %3899 }
 0x387   :  { %17443 = vst [vmem:[#allocation12_spill] sm:$0xff] %v13124_v54  ;;  %7064 = vmatpush3.bf16.msra.mxu0 %v7267_v12  ;;  %vm2911_vm13 = vcmp.eq.s32.totalorder %v8298_v0, %v17445_v1  ;;  %vm2940_vm14 = vcmp.eq.s32.totalorder %v8289_v28, %v17447_v60  ;;  %vm2941_vm15 = vcmp.eq.s32.totalorder %v8298_v0, %v17447_v60  ;;  %17450 = vst [vmem:[#allocation49_spill] sm:$0xff] %v13152_v50  ;;  %v17451_v61 = vld [vmem:[#allocation57_spill] sm:$0xff]  ;;  %v17452_v3 = vld [vmem:[#allocation198_spill] sm:$0xff] }
 0x388   :  { %17444 = vst [vmem:[#allocation197_spill] sm:$0xff] %v13127_v51  ;;  %vm2914_vm0 = vcmp.eq.s32.totalorder %v8289_v28, %v17448_v42  ;;  %7172 = vmatprep.subr.bf16.mxu1 %v7266_v30  ;;  %vm2915_vm1 = vcmp.eq.s32.totalorder %v8298_v0, %v17448_v42  ;;  %vm2944_vm2 = vcmp.eq.s32.totalorder %v8289_v28, %v17449_v36  ;;  %v6543_v38 = vsel %vm2910_vm12, 1.0, %v16602_v47  ;;  %v13184_v44 = vpop.permute.xlu0 %4221  ;;  %v17456_v45 = vld [vmem:[#allocation28_spill] sm:$0xff] }
 0x389   :  { %vm2945_vm3 = vcmp.eq.s32.totalorder %v8298_v0, %v17449_v36  ;;  %4961 = vperm.xlu1 %7232, %v13020_v48   ;;  %7180 = vmatpush3.bf16.msra.mxu1 %v7267_v12  ;;  %vm2918_vm4 = vcmp.eq.s32.totalorder %v8289_v28, %v17451_v61  ;;  %vm2919_vm5 = vcmp.eq.s32.totalorder %v8298_v0, %v17451_v61  ;;  %v6544_v30 = vsel %vm2911_vm13, 1.0, %v16602_v47 }
 0x38a   :  { %vm2948_vm6 = vcmp.eq.s32.totalorder %v8289_v28, %v17452_v3  ;;  %7065 = vmatprep.subr.bf16.mxu0 %v7268_v7  ;;  %v6573_v12 = vsel %vm2940_vm14, 1.0, %v16602_v47  ;;  %v6574_v5 = vsel %vm2941_vm15, 1.0, %v16602_v47  ;;  %v6547_v50 = vsel %vm2914_vm0, 1.0, %v16602_v47  ;;  %4570 = vperm.xlu0 %7254, %v12137_v13   ;;  %17453 = vst [vmem:[#allocation52_spill] sm:$0xff] %v13184_v44  ;;  %v7270_v13 = vld [vmem:[%s15999_s1 + $0x68] sm:$0xff]   ;;  %v13219_v51 = vpop.permute.xlu1 %3905 }
 0x38b   :  { %7066 = vmatpush3.bf16.msra.mxu0 %v7269_v37  ;;  %v6548_v1 = vsel %vm2915_vm1, 1.0, %v16602_v47  ;;  %v6577_v60 = vsel %vm2944_vm2, 1.0, %v16602_v47  ;;  %v6578_v23 = vsel %vm2945_vm3, 1.0, %v16602_v47  ;;  %vm2949_vm7 = vcmp.eq.s32.totalorder %v8298_v0, %v17452_v3  ;;  %7173 = vmatprep.subr.bf16.mxu1 %v7268_v7  ;;  %17454 = vst [vmem:[#allocation143_spill] sm:$0xff] %v13219_v51 }
 0x38c   :  { %v13204_v42 = vadd.f32 %v6543_v38, %v12310_v56  ;;  %v6551_v44 = vsel %vm2918_vm4, 1.0, %v16602_v47  ;;  %v6552_v36 = vsel %vm2919_vm5, 1.0, %v16602_v47  ;;  %v6581_v7 = vsel %vm2948_vm6, 1.0, %v16602_v47  ;;  %v7271_v56 = vld [vmem:[%s15999_s1 + $0x28] sm:$0xff]   ;;  %v17455_v38 = vld [vmem:[#allocation173_spill] sm:$0xff]  ;;  %7067 = vmatprep.subr.bf16.mxu0 %v7270_v13 }
 0x38d   :  { %4964 = vperm.xlu1 %7232, %v12467_v11   ;;  %7181 = vmatpush3.bf16.msra.mxu1 %v7269_v37  ;;  %v13225_v54 = vadd.f32 %v6544_v30, %v17455_v38  ;;  %v13228_v61 = vadd.f32 %v6573_v12, %v12778_v33  ;;  %v13231_v62 = vadd.f32 %v6574_v5, %v12799_v18  ;;  %v6582_v33 = vsel %vm2949_vm7, 1.0, %v16602_v47  ;;  %v13250_v18 = vpop.permute.xlu0 %4227  ;;  %v17464_v30 = vld [vmem:[#allocation99_spill] sm:$0xff]  ;;  %v17465_v12 = vld [vmem:[#allocation100_spill] sm:$0xff] }
 0x38e   :  { %v13234_v35 = vadd.f32 %v6547_v50, %v17456_v45  ;;  %v13237_v51 = vadd.f32 %v6548_v1, %v17457_v27  ;;  %v13240_v37 = vadd.f32 %v6577_v60, %v12831_v17  ;;  %v13243_v10 = vadd.f32 %v6578_v23, %v12834_v8  ;;  %4576 = vperm.xlu0 %7254, %v12189_v63   ;;  %v17459_v45 = vld [vmem:[#allocation109_spill] sm:$0xff]  ;;  %v7272_v63 = vld [vmem:[%s15999_s1 + $0x70] sm:$0xff]   ;;  %v17466_v1 = vld [vmem:[#allocation204_spill] sm:$0xff] }
 0x38f   :  { %17458 = vst [vmem:[#allocation53_spill] sm:$0xff] %v13250_v18  ;;  %7068 = vmatpush3.bf16.msra.mxu0 %v7271_v56  ;;  %v13253_v50 = vadd.f32 %v6551_v44, %v17459_v45  ;;  %v13256_v27 = vadd.f32 %v6552_v36, %v12396_v57  ;;  %v13259_v17 = vadd.f32 %v6581_v7, %v12853_v25  ;;  %v17460_v8 = vld [vmem:[#allocation61_spill] sm:$0xff]  ;;  %v17461_v23 = vld [vmem:[#allocation51_spill] sm:$0xff]  ;;  %v17462_v57 = vmov 15   ;;  %v13273_v25 = vpop.permute.xlu1 %3911  ;;  %v7275_v45 = vld [vmem:[%s15999_s1 + $0x38] sm:$0xff]  }
 0x390   :  { %vm2922_vm8 = vcmp.eq.s32.totalorder %v8289_v28, %v17460_v8  ;;  %7174 = vmatprep.subr.bf16.mxu1 %v7270_v13  ;;  %vm2923_vm9 = vcmp.eq.s32.totalorder %v8298_v0, %v17460_v8  ;;  %vm2952_vm10 = vcmp.eq.s32.totalorder %v8289_v28, %v17461_v23  ;;  %vm2953_vm11 = vcmp.eq.s32.totalorder %v8298_v0, %v17461_v23  ;;  %v7273_v44 = vld [vmem:[%s15999_s1 + $0x30] sm:$0xff]   ;;  %v17470_v8 = vld [vmem:[#allocation112_spill] sm:$0xff]  ;;  %v17471_v18 = vld [vmem:[#allocation6_spill] sm:$0xff] }
 0x391   :  { %7234 = vset.pattern.permute.xlu1 %v17462_v57  ;;  %17463 = vst [vmem:[#allocation54_spill] sm:$0xff] %v13273_v25  ;;  %7182 = vmatpush3.bf16.msra.mxu1 %v7271_v56  ;;  %v13279_v3 = vadd.f32 %v6582_v33, %v12859_v31  ;;  %vm2926_vm12 = vcmp.eq.s32.totalorder %v8289_v28, %v17464_v30  ;;  %v6555_v5 = vsel %vm2922_vm8, 1.0, %v16602_v47  ;;  %v13296_v31 = vpop.permute.xlu0 %4233  ;;  %v6585_v60 = vsel %vm2952_vm10, 1.0, %v16602_v47  ;;  %v17468_v36 = vld [vmem:[#allocation59_spill] sm:$0xff] }
 0x392   :  { %vm2927_vm13 = vcmp.eq.s32.totalorder %v8298_v0, %v17464_v30  ;;  %vm2956_vm14 = vcmp.eq.s32.totalorder %v8289_v28, %v17465_v12  ;;  %5268 = vperm.xlu1 %7234, %v12872_v2   ;;  %vm2957_vm15 = vcmp.eq.s32.totalorder %v8298_v0, %v17465_v12  ;;  %vm2930_vm0 = vcmp.eq.s32.totalorder %v8289_v28, %v17466_v1 }
 0x393   :  { %vm2931_vm1 = vcmp.eq.s32.totalorder %v8298_v0, %v17466_v1  ;;  %4612 = vperm.xlu0 %7254, %v12467_v11   ;;  %17467 = vst [vmem:[#allocation131_spill] sm:$0xff] %v13296_v31  ;;  %7069 = vmatprep.subr.bf16.mxu0 %v7272_v63  ;;  %v6556_v2 = vsel %vm2923_vm9, 1.0, %v16602_v47  ;;  %v6586_v13 = vsel %vm2953_vm11, 1.0, %v16602_v47  ;;  %vm3248_vm2 = vcmp.eq.s32.totalorder %v8289_v28, %v17468_v36  ;;  %v7274_v11 = vld [vmem:[%s15999_s1 + $0x78] sm:$0xff]   ;;  %v13329_v33 = vpop.permute.xlu1 %3917 }
 0x394   :  { %7070 = vmatpush3.bf16.msra.mxu0 %v7273_v44  ;;  %v6559_v7 = vsel %vm2926_vm12, 1.0, %v16602_v47  ;;  %v6560_v56 = vsel %vm2927_vm13, 1.0, %v16602_v47  ;;  %v6589_v38 = vsel %vm2956_vm14, 1.0, %v16602_v47  ;;  %vm3249_vm3 = vcmp.eq.s32.totalorder %v8298_v0, %v17468_v36  ;;  %17469 = vst [vmem:[#allocation85_spill] sm:$0xff] %v13329_v33  ;;  %7175 = vmatprep.subr.bf16.mxu1 %v7272_v63  ;;  %v17483_v36 = vld [vmem:[#allocation107_spill] sm:$0xff] }
 0x395   :  { %v13335_v23 = vadd.f32 %v6555_v5, %v17470_v8  ;;  %v6590_v30 = vsel %vm2957_vm15, 1.0, %v16602_v47  ;;  %v6563_v31 = vsel %vm2930_vm0, 1.0, %v16602_v47  ;;  %v6564_v63 = vsel %vm2931_vm1, 1.0, %v16602_v47  ;;  %v13364_v1 = vpop.permute.xlu0 %4239  ;;  %7071 = vmatprep.subr.bf16.mxu0 %v7274_v11  ;;  %7183 = vmatpush3.bf16.msra.mxu1 %v7273_v44  ;;  %v17481_v44 = vld [vmem:[#allocation105_spill] sm:$0xff] }
 0x396   :  { %5313 = vperm.xlu1 %7234, %v13020_v48   ;;  %v13351_v5 = vadd.f32 %v6556_v2, %v17471_v18  ;;  %v13354_v8 = vadd.f32 %v6585_v60, %v12905_v26  ;;  %v13357_v12 = vadd.f32 %v6586_v13, %v12915_v20  ;;  %v6593_v33 = vsel %vm3248_vm2, 1.0, %v16602_v47  ;;  %17472 = vst [vmem:[#allocation56_spill] sm:$0xff] %v13364_v1  ;;  %v17473_v48 = vld [vmem:[#allocation190_spill] sm:$0xff]  ;;  %v17476_v13 = vld [vmem:[#allocation115_spill] sm:$0xff] }
 0x397   :  { %4618 = vperm.xlu0 %7254, %v12523_v58   ;;  %v13367_v25 = vadd.f32 %v6559_v7, %v17473_v48  ;;  %v17474_v18 = vld [vmem:[#allocation194_spill] sm:$0xff]  ;;  %v13373_v26 = vadd.f32 %v6589_v38, %v12956_v14  ;;  %v6594_v20 = vsel %vm3249_vm3, 1.0, %v16602_v47  ;;  %v13380_v60 = vadd.f32 %v6590_v30, %v12959_v21  ;;  %7176 = vmatprep.subr.bf16.mxu1 %v7274_v11  ;;  %v17478_v38 = vld [vmem:[#allocation169_spill] sm:$0xff]  ;;  %v17479_v21 = vld [vmem:[#allocation103_spill] sm:$0xff] }
 0x398   :  { %v13370_v2 = vadd.f32 %v6560_v56, %v17474_v18  ;;  %v13383_v1 = vadd.f32 %v6563_v31, %v17476_v13  ;;  %v13386_v7 = vadd.f32 %v6564_v63, %v12510_v22  ;;  %v13388_v56 = vpop.permute.xlu1 %3923  ;;  %7072 = vmatpush3.bf16.msra.mxu0 %v7275_v45  ;;  %v13391_v14 = vadd.f32 %v6593_v33, %v12968_v24  ;;  %v13410_v24 = vld [vmem:[%s15998_s0 + $0xa0] sm:$0xff] }
 0x399   :  { %17475 = vst [vmem:[#allocation63_spill] sm:$0xff] %v13380_v60  ;;  %17477 = vst [vmem:[#allocation21_spill] sm:$0xff] %v13388_v56  ;;  %vm2934_vm4 = vcmp.eq.s32.totalorder %v8289_v28, %v17478_v38  ;;  %vm2935_vm5 = vcmp.eq.s32.totalorder %v8298_v0, %v17478_v38  ;;  %vm3254_vm6 = vcmp.eq.s32.totalorder %v8289_v28, %v17479_v21  ;;  %v13413_v31 = vpop.permute.xlu0 %4245  ;;  %v17484_v11 = vld [vmem:[#allocation33_spill] sm:$0xff]  ;;  %7184 = vmatpush3.bf16.msra.mxu1 %v7275_v45  ;;  %v13464_v60 = vld [vmem:[%s15998_s0 + $0x38] sm:$0xff] }
 0x39a   :  { %7235 = vset.pattern.permute.xlu1 %v17442_v29  ;;  %v13401_v22 = vadd.f32 %v6594_v20, %v12975_v59  ;;  %vm3255_vm7 = vcmp.eq.s32.totalorder %v8298_v0, %v17479_v21  ;;  %vm2938_vm8 = vcmp.eq.s32.totalorder %v8289_v28, %v17481_v44  ;;  %17482 = vst [vmem:[#allocation38_spill] sm:$0xff] %v13413_v31  ;;  %v13418_v59 = vld [vmem:[%s15998_s0 + $0x90] sm:$0xff]  ;;  %v6567_v33 = vsel %vm2934_vm4, 1.0, %v16602_v47  ;;  %v17486_v20 = vld [vmem:[#allocation30_spill] sm:$0xff] }
 0x39b   :  { %4621 = vperm.xlu0 %7254, %v13410_v24   ;;  %4615 = vperm.xlu1 %7235, %v13418_v59   ;;  %vm2939_vm9 = vcmp.eq.s32.totalorder %v8298_v0, %v17481_v44  ;;  %vm3258_vm10 = vcmp.eq.s32.totalorder %v8289_v28, %v17483_v36  ;;  %vm3259_vm11 = vcmp.eq.s32.totalorder %v8298_v0, %v17483_v36  ;;  %v6568_v30 = vsel %vm2935_vm5, 1.0, %v16602_v47 }
 0x39c   :  { %17480 = vst [vmem:[#allocation64_spill] sm:$0xff] %v13401_v22  ;;  %vm2942_vm12 = vcmp.eq.s32.totalorder %v8289_v28, %v17484_v11  ;;  %v6599_v63 = vsel %vm3254_vm6, 1.0, %v16602_v47  ;;  %vm2943_vm13 = vcmp.eq.s32.totalorder %v8298_v0, %v17484_v11  ;;  %v13443_v48 = vpop.permute.xlu1 %3929  ;;  %v6600_v45 = vsel %vm3255_vm7, 1.0, %v16602_v47 }
 0x39d   :  { %17485 = vst [vmem:[#allocation146_spill] sm:$0xff] %v13443_v48  ;;  %v6571_v18 = vsel %vm2938_vm8, 1.0, %v16602_v47  ;;  %vm3262_vm14 = vcmp.eq.s32.totalorder %v8289_v28, %v17486_v20  ;;  %vm3263_vm15 = vcmp.eq.s32.totalorder %v8298_v0, %v17486_v20  ;;  %v6572_v13 = vsel %vm2939_vm9, 1.0, %v16602_v47  ;;  %v13467_v44 = vpop.permute.xlu0 %4251  ;;  %v17494_v20 = vld [vmem:[#allocation110_spill] sm:$0xff] }
 0x39e   :  { %v6603_v38 = vsel %vm3258_vm10, 1.0, %v16602_v47  ;;  %v6604_v36 = vsel %vm3259_vm11, 1.0, %v16602_v47  ;;  %v6575_v21 = vsel %vm2942_vm12, 1.0, %v16602_v47  ;;  %17487 = vst [vmem:[#allocation148_spill] sm:$0xff] %v13467_v44  ;;  %v13471_v48 = vadd.f32 %v6567_v33, %v12527_v6  ;;  %v13486_v44 = vld [vmem:[%s15998_s0 + $0x10] sm:$0xff] }
 0x39f   :  { %4582 = vperm.xlu0 %7254, %v13464_v60   ;;  %7236 = vset.pattern.permute.xlu1 %v17434_v4  ;;  %v13474_v56 = vadd.f32 %v6568_v30, %v12530_v53  ;;  %v13477_v31 = vadd.f32 %v6599_v63, %v13099_v15  ;;  %v6576_v22 = vsel %vm2943_vm13, 1.0, %v16602_v47  ;;  %v13490_v6 = vadd.f32 %v6600_v45, %v13102_v49  ;;  %v17490_v53 = vld [vmem:[#allocation201_spill] sm:$0xff]  ;;  %v17492_v63 = vld [vmem:[#allocation202_spill] sm:$0xff] }
 0x3a0   :  { %4919 = vperm.xlu1 %7236, %v13486_v44   ;;  %v13493_v33 = vadd.f32 %v6571_v18, %v17490_v53  ;;  %v6607_v15 = vsel %vm3262_vm14, 1.0, %v16602_v47  ;;  %v6608_v11 = vsel %vm3263_vm15, 1.0, %v16602_v47  ;;  %v13503_v30 = vpop.permute.xlu1 %3935  ;;  %v13509_v49 = vadd.f32 %v6603_v38, %v13117_v34 }
 0x3a1   :  { %17488 = vst [vmem:[#allocation203_spill] sm:$0xff] %v13477_v31  ;;  %17489 = vst [vmem:[#allocation208_spill] sm:$0xff] %v13490_v6  ;;  %v13506_v31 = vadd.f32 %v6572_v13, %v17492_v63  ;;  %v13512_v45 = vadd.f32 %v6604_v36, %v13120_v32  ;;  %v13515_v18 = vadd.f32 %v6575_v21, %v12611_v43  ;;  %v17493_v6 = vld [vmem:[#allocation108_spill] sm:$0xff]  ;;  %v13527_v34 = vpop.permute.xlu0 %4257 }
 0x3a2   :  { %17491 = vst [vmem:[#allocation5_spill] sm:$0xff] %v13503_v30  ;;  %v13518_v53 = vadd.f32 %v6576_v22, %v12617_v16  ;;  %vm2946_vm0 = vcmp.eq.s32.totalorder %v8289_v28, %v17493_v6  ;;  %vm2947_vm1 = vcmp.eq.s32.totalorder %v8298_v0, %v17493_v6  ;;  %vm3266_vm2 = vcmp.eq.s32.totalorder %v8289_v28, %v17494_v20  ;;  %v17498_v16 = vld [vmem:[#allocation113_spill] sm:$0xff]  ;;  %v7445_v22 = vld [vmem:[%s15998_s0 + $0x18] sm:$0xff] }
 0x3a3   :  { %4585 = vperm.xlu0 %7254, %v12841_v19   ;;  %17495 = vst [vmem:[#allocation35_spill] sm:$0xff] %v13527_v34  ;;  %v13530_v32 = vadd.f32 %v6607_v15, %v13204_v42  ;;  %v13533_v43 = vadd.f32 %v6608_v11, %v13225_v54  ;;  %vm3267_vm3 = vcmp.eq.s32.totalorder %v8298_v0, %v17494_v20  ;;  %v17499_v19 = vld [vmem:[#allocation116_spill] sm:$0xff]  ;;  %v17500_v54 = vld [vmem:[#allocation118_spill] sm:$0xff]  ;;  %v6579_v13 = vsel %vm2946_vm0, 1.0, %v16602_v47  ;;  %v17568_v34 = vld [vmem:[#allocation31_spill] sm:$0xff] }
 0x3a4   :  { %vm2950_vm4 = vcmp.eq.s32.totalorder %v8289_v28, %v17498_v16  ;;  %4922 = vperm.xlu1 %7236, %v7445_v22   ;;  %vm2951_vm5 = vcmp.eq.s32.totalorder %v8298_v0, %v17498_v16  ;;  %vm3270_vm6 = vcmp.eq.s32.totalorder %v8289_v28, %v17499_v19  ;;  %vm3271_vm7 = vcmp.eq.s32.totalorder %v8298_v0, %v17499_v19  ;;  %v13550_v42 = vpop.permute.xlu1 %3941  ;;  %v17502_v11 = vld [vmem:[#allocation120_spill] sm:$0xff] }
 0x3a5   :  { %17496 = vst [vmem:[#allocation174_spill] sm:$0xff] %v13530_v32  ;;  %17497 = vst [vmem:[#allocation66_spill] sm:$0xff] %v13533_v43  ;;  %vm2954_vm8 = vcmp.eq.s32.totalorder %v8289_v28, %v17500_v54  ;;  %v6580_v38 = vsel %vm2947_vm1, 1.0, %v16602_v47  ;;  %v6611_v36 = vsel %vm3266_vm2, 1.0, %v16602_v47  ;;  %vm2955_vm9 = vcmp.eq.s32.totalorder %v8298_v0, %v17500_v54  ;;  %v13573_v6 = vpop.permute.xlu0 %4263  ;;  %v17507_v32 = vld [vmem:[#allocation206_spill] sm:$0xff] }
 0x3a6   :  { %17501 = vst [vmem:[#allocation67_spill] sm:$0xff] %v13550_v42  ;;  %v6612_v21 = vsel %vm3267_vm3, 1.0, %v16602_v47  ;;  %v6583_v15 = vsel %vm2950_vm4, 1.0, %v16602_v47  ;;  %vm3274_vm10 = vcmp.eq.s32.totalorder %v8289_v28, %v17502_v11  ;;  %vm3275_vm11 = vcmp.eq.s32.totalorder %v8298_v0, %v17502_v11  ;;  %17503 = vst [vmem:[#allocation172_spill] sm:$0xff] %v13573_v6 }
 0x3a7   :  { %4636 = vperm.xlu0 %7254, %v12666_v55   ;;  %v6584_v63 = vsel %vm2951_vm5, 1.0, %v16602_v47  ;;  %v6615_v20 = vsel %vm3270_vm6, 1.0, %v16602_v47  ;;  %v6616_v16 = vsel %vm3271_vm7, 1.0, %v16602_v47  ;;  %v6587_v22 = vsel %vm2954_vm8, 1.0, %v16602_v47 }
 0x3a8   :  { %4970 = vperm.xlu1 %7236, %v12523_v58   ;;  %v13581_v19 = vadd.f32 %v6579_v13, %v12630_v39  ;;  %v13584_v54 = vadd.f32 %v6580_v38, %v12633_v41  ;;  %v13587_v55 = vadd.f32 %v6611_v36, %v13234_v35  ;;  %v6588_v42 = vsel %vm2955_vm9, 1.0, %v16602_v47  ;;  %v13590_v30 = vpop.permute.xlu1 %3947  ;;  %v17508_v39 = vld [vmem:[#allocation24_spill] sm:$0xff] }
 0x3a9   :  { %17505 = vst [vmem:[#allocation185_spill] sm:$0xff] %v13590_v30  ;;  %v13593_v43 = vadd.f32 %v6612_v21, %v13237_v51  ;;  %v13596_v6 = vadd.f32 %v6583_v15, %v17507_v32  ;;  %v6619_v58 = vsel %vm3274_vm10, 1.0, %v16602_v47  ;;  %v6620_v41 = vsel %vm3275_vm11, 1.0, %v16602_v47  ;;  %v17511_v32 = vld [vmem:[#allocation178_spill] sm:$0xff]  ;;  %v7446_v36 = vld [vmem:[%s15998_s0 + $0x58] sm:$0xff]  ;;  %v13621_v21 = vpop.permute.xlu0 %4269  ;;  %v17513_v15 = vld [vmem:[#allocation209_spill] sm:$0xff] }
 0x3aa   :  { %17504 = vst [vmem:[#allocation184_spill] sm:$0xff] %v13587_v55  ;;  %v13607_v35 = vadd.f32 %v6584_v63, %v17508_v39  ;;  %v13610_v13 = vadd.f32 %v6615_v20, %v13253_v50  ;;  %v13613_v51 = vadd.f32 %v6616_v16, %v13256_v27  ;;  %v13616_v38 = vadd.f32 %v6587_v22, %v17511_v32  ;;  %v17514_v63 = vld [vmem:[#allocation121_spill] sm:$0xff]  ;;  %v17515_v50 = vld [vmem:[#allocation122_spill] sm:$0xff]  ;;  %v17519_v16 = vld [vmem:[#allocation124_spill] sm:$0xff] }
 0x3ab   :  { %17506 = vst [vmem:[#allocation69_spill] sm:$0xff] %v13593_v43  ;;  %4594 = vperm.xlu0 %7254, %v7446_v36   ;;  %17512 = vst [vmem:[#allocation48_spill] sm:$0xff] %v13621_v21  ;;  %v13624_v11 = vadd.f32 %v6588_v42, %v17513_v15  ;;  %vm2958_vm12 = vcmp.eq.s32.totalorder %v8289_v28, %v17514_v63  ;;  %vm2959_vm13 = vcmp.eq.s32.totalorder %v8298_v0, %v17514_v63  ;;  %v17518_v42 = vld [vmem:[#allocation123_spill] sm:$0xff] }
 0x3ac   :  { %17509 = vst [vmem:[#allocation70_spill] sm:$0xff] %v13610_v13  ;;  %17510 = vst [vmem:[#allocation155_spill] sm:$0xff] %v13613_v51  ;;  %vm3278_vm14 = vcmp.eq.s32.totalorder %v8289_v28, %v17515_v50  ;;  %7237 = vset.pattern.permute.xlu1 %v17462_v57  ;;  %v13634_v27 = vadd.f32 %v6619_v58, %v13335_v23  ;;  %v13637_v20 = vadd.f32 %v6620_v41, %v13351_v5  ;;  %v17520_v23 = vld [vmem:[#allocation125_spill] sm:$0xff]  ;;  %v13652_v5 = vpop.permute.xlu1 %4209  ;;  %v17523_v36 = vld [vmem:[#allocation71_spill] sm:$0xff] }
 0x3ad   :  { %vm3279_vm15 = vcmp.eq.s32.totalorder %v8298_v0, %v17515_v50  ;;  %vm3250_vm0 = vcmp.eq.s32.totalorder %v8289_v28, %v17518_v42  ;;  %5271 = vperm.xlu1 %7237, %v13486_v44   ;;  %vm3251_vm1 = vcmp.eq.s32.totalorder %v8298_v0, %v17518_v42  ;;  %vm3282_vm2 = vcmp.eq.s32.totalorder %v8289_v28, %v17519_v16  ;;  %v13660_v41 = vpop.permute.xlu0 %4275  ;;  %v17524_v42 = vld [vmem:[#allocation210_spill] sm:$0xff]  ;;  %v17529_v13 = vld [vmem:[#allocation127_spill] sm:$0xff] }
 0x3ae   :  { %17516 = vst [vmem:[#allocation60_spill] sm:$0xff] %v13634_v27  ;;  %17517 = vst [vmem:[#allocation176_spill] sm:$0xff] %v13637_v20  ;;  %vm3283_vm3 = vcmp.eq.s32.totalorder %v8298_v0, %v17519_v16  ;;  %vm3252_vm4 = vcmp.eq.s32.totalorder %v8289_v28, %v17520_v23  ;;  %v6591_v22 = vsel %vm2958_vm12, 1.0, %v16602_v47  ;;  %v6592_v58 = vsel %vm2959_vm13, 1.0, %v16602_v47  ;;  %v17542_v43 = vld [vmem:[#allocation39_spill] sm:$0xff] }
 0x3af   :  { %17521 = vst [vmem:[#allocation179_spill] sm:$0xff] %v13652_v5  ;;  %v6623_v44 = vsel %vm3278_vm14, 1.0, %v16602_v47  ;;  %vm3253_vm5 = vcmp.eq.s32.totalorder %v8298_v0, %v17520_v23  ;;  %4597 = vperm.xlu0 %7254, %v12999_v40   ;;  %17522 = vst [vmem:[#allocation156_spill] sm:$0xff] %v13660_v41  ;;  %v6624_v39 = vsel %vm3279_vm15, 1.0, %v16602_v47  ;;  %v6595_v32 = vsel %vm3250_vm0, 1.0, %v16602_v47  ;;  %v17525_v23 = vld [vmem:[#allocation37_spill] sm:$0xff] }
 0x3b0   :  { %vm3286_vm6 = vcmp.eq.s32.totalorder %v8289_v28, %v17523_v36  ;;  %vm3287_vm7 = vcmp.eq.s32.totalorder %v8298_v0, %v17523_v36  ;;  %v6596_v15 = vsel %vm3251_vm1, 1.0, %v16602_v47  ;;  %v6627_v63 = vsel %vm3282_vm2, 1.0, %v16602_v47  ;;  %v13683_v27 = vpop.permute.xlu1 %4215 }
 0x3b1   :  { %v6628_v50 = vsel %vm3283_vm3, 1.0, %v16602_v47  ;;  %v6597_v40 = vsel %vm3252_vm4, 1.0, %v16602_v47  ;;  %5319 = vperm.xlu1 %7237, %v13418_v59   ;;  %v13674_v16 = vadd.f32 %v6591_v22, %v17524_v42  ;;  %v13677_v30 = vadd.f32 %v6592_v58, %v17525_v23  ;;  %17527 = vst [vmem:[#allocation188_spill] sm:$0xff] %v13683_v27  ;;  %v13694_v58 = vpop.permute.xlu0 %4281  ;;  %v17552_v27 = vld [vmem:[#allocation72_spill] sm:$0xff] }
 0x3b2   :  { %v13680_v20 = vadd.f32 %v6623_v44, %v13367_v25  ;;  %v6598_v36 = vsel %vm3253_vm5, 1.0, %v16602_v47  ;;  %v13686_v51 = vadd.f32 %v6624_v39, %v13370_v2  ;;  %v13689_v41 = vadd.f32 %v6595_v32, %v17529_v13  ;;  %17530 = vst [vmem:[#allocation157_spill] sm:$0xff] %v13694_v58  ;;  %v17531_v25 = vld [vmem:[#allocation182_spill] sm:$0xff]  ;;  %v17532_v32 = vld [vmem:[#allocation11_spill] sm:$0xff] }
 0x3b3   :  { %v6631_v59 = vsel %vm3286_vm6, 1.0, %v16602_v47  ;;  %v6632_v22 = vsel %vm3287_vm7, 1.0, %v16602_v47  ;;  %4648 = vperm.xlu0 %7254, %v12767_v46   ;;  %v13697_v44 = vadd.f32 %v6596_v15, %v17531_v25  ;;  %v13700_v42 = vadd.f32 %v6627_v63, %v13383_v1  ;;  %v17533_v46 = vld [vmem:[#allocation77_spill] sm:$0xff]  ;;  %v7447_v1 = vld [vmem:[%s15998_s0 + $0x98] sm:$0xff]  ;;  %v17536_v63 = vld [vmem:[#allocation126_spill] sm:$0xff] }
 0x3b4   :  { %17526 = vst [vmem:[#allocation7_spill] sm:$0xff] %v13680_v20  ;;  %17528 = vst [vmem:[#allocation40_spill] sm:$0xff] %v13686_v51  ;;  %v13703_v2 = vadd.f32 %v6628_v50, %v13386_v7  ;;  %v13706_v13 = vadd.f32 %v6597_v40, %v13063_v9  ;;  %v13709_v39 = vadd.f32 %v6598_v36, %v13078_v52  ;;  %v17534_v7 = vld [vmem:[#allocation181_spill] sm:$0xff]  ;;  %v13730_v15 = vpop.permute.xlu1 %4218  ;;  %v17539_v25 = vld [vmem:[#allocation130_spill] sm:$0xff] }
 0x3b5   :  { %vm3256_vm8 = vcmp.eq.s32.totalorder %v8289_v28, %v17532_v32  ;;  %vm3257_vm9 = vcmp.eq.s32.totalorder %v8298_v0, %v17532_v32  ;;  %vm3290_vm10 = vcmp.eq.s32.totalorder %v8289_v28, %v17533_v46  ;;  %5322 = vperm.xlu1 %7237, %v7447_v1   ;;  %v13721_v9 = vadd.f32 %v6631_v59, %v13471_v48  ;;  %v17537_v48 = vld [vmem:[#allocation129_spill] sm:$0xff]  ;;  %v13746_v50 = vpop.permute.xlu0 %4287 }
 0x3b6   :  { %v13724_v52 = vadd.f32 %v6632_v22, %v13474_v56  ;;  %vm3291_vm11 = vcmp.eq.s32.totalorder %v8298_v0, %v17533_v46  ;;  %vm3260_vm12 = vcmp.eq.s32.totalorder %v8289_v28, %v17534_v7  ;;  %17535 = vst [vmem:[#allocation159_spill] sm:$0xff] %v13730_v15  ;;  %vm3261_vm13 = vcmp.eq.s32.totalorder %v8298_v0, %v17534_v7  ;;  %v13743_v56 = vld [vmem:[%s15998_s0 + $0x78] sm:$0xff]  ;;  %v13788_v7 = vld [vmem:[%s15998_s0 + $0xa8] sm:$0xff] }
 0x3b7   :  { %vm3294_vm14 = vcmp.eq.s32.totalorder %v8289_v28, %v17536_v63  ;;  %vm3295_vm15 = vcmp.eq.s32.totalorder %v8298_v0, %v17536_v63  ;;  %vm3264_vm0 = vcmp.eq.s32.totalorder %v8289_v28, %v17537_v48  ;;  %4606 = vperm.xlu0 %7254, %v13743_v56   ;;  %17538 = vst [vmem:[#allocation96_spill] sm:$0xff] %v13746_v50  ;;  %v6601_v40 = vsel %vm3256_vm8, 1.0, %v16602_v47  ;;  %v17541_v50 = vld [vmem:[#allocation81_spill] sm:$0xff] }
 0x3b8   :  { %v6602_v23 = vsel %vm3257_vm9, 1.0, %v16602_v47  ;;  %v6635_v36 = vsel %vm3290_vm10, 1.0, %v16602_v47  ;;  %vm3265_vm1 = vcmp.eq.s32.totalorder %v8298_v0, %v17537_v48  ;;  %v6636_v59 = vsel %vm3291_vm11, 1.0, %v16602_v47  ;;  %v13791_v20 = vpop.permute.xlu1 %4224  ;;  %v13826_v48 = vld [vmem:[%s15998_s0 + $0x48] sm:$0xff] }
 0x3b9   :  { %v6605_v22 = vsel %vm3260_vm12, 1.0, %v16602_v47  ;;  %vm3298_vm2 = vcmp.eq.s32.totalorder %v8289_v28, %v17539_v25  ;;  %vm3299_vm3 = vcmp.eq.s32.totalorder %v8298_v0, %v17539_v25  ;;  %7238 = vset.pattern.permute.xlu1 %v17442_v29  ;;  %v6606_v32 = vsel %vm3261_vm13, 1.0, %v16602_v47  ;;  %17540 = vst [vmem:[#allocation73_spill] sm:$0xff] %v13791_v20  ;;  %v13806_v15 = vpop.permute.xlu0 %4293  ;;  %v17551_v25 = vld [vmem:[#allocation18_spill] sm:$0xff] }
 0x3ba   :  { %v6639_v46 = vsel %vm3294_vm14, 1.0, %v16602_v47  ;;  %v6640_v1 = vsel %vm3295_vm15, 1.0, %v16602_v47  ;;  %v6609_v51 = vsel %vm3264_vm0, 1.0, %v16602_v47  ;;  %4624 = vperm.xlu1 %7238, %v13788_v7   ;;  %v13794_v58 = vadd.f32 %v6601_v40, %v17541_v50  ;;  %17544 = vst [vmem:[#allocation101_spill] sm:$0xff] %v13806_v15  ;;  %v17546_v50 = vld [vmem:[#allocation191_spill] sm:$0xff] }
 0x3bb   :  { %v13797_v63 = vadd.f32 %v6602_v23, %v17542_v43  ;;  %v13800_v55 = vadd.f32 %v6635_v36, %v13493_v33  ;;  %v6610_v21 = vsel %vm3265_vm1, 1.0, %v16602_v47  ;;  %7256 = vset.pattern.permute.xlu0 %v17434_v4  ;;  %v13810_v20 = vadd.f32 %v6636_v59, %v13506_v31  ;;  %v17547_v31 = vld [vmem:[#allocation195_spill] sm:$0xff] }
 0x3bc   :  { %v13813_v40 = vadd.f32 %v6605_v22, %v17546_v50  ;;  %v6643_v33 = vsel %vm3298_vm2, 1.0, %v16602_v47  ;;  %v6644_v43 = vsel %vm3299_vm3, 1.0, %v16602_v47  ;;  %4940 = vperm.xlu0 %7256, %v13826_v48   ;;  %v13830_v23 = vadd.f32 %v6606_v32, %v17547_v31  ;;  %v17550_v22 = vld [vmem:[#allocation196_spill] sm:$0xff]  ;;  %v17553_v32 = vld [vmem:[#allocation83_spill] sm:$0xff] }
 0x3bd   :  { %17543 = vst [vmem:[#allocation98_spill] sm:$0xff] %v13800_v55  ;;  %17545 = vst [vmem:[#allocation74_spill] sm:$0xff] %v13810_v20  ;;  %v13833_v36 = vadd.f32 %v6639_v46, %v13515_v18  ;;  %v13836_v59 = vadd.f32 %v6640_v1, %v13518_v53  ;;  %v13839_v50 = vadd.f32 %v6609_v51, %v17550_v22  ;;  %v13851_v18 = vpop.permute.xlu1 %4230  ;;  %v17558_v46 = vld [vmem:[#allocation27_spill] sm:$0xff]  ;;  %v17559_v1 = vld [vmem:[#allocation133_spill] sm:$0xff] }
 0x3be   :  { %v13842_v15 = vadd.f32 %v6610_v21, %v17551_v25  ;;  %vm3268_vm4 = vcmp.eq.s32.totalorder %v8289_v28, %v17552_v27  ;;  %vm3269_vm5 = vcmp.eq.s32.totalorder %v8298_v0, %v17552_v27  ;;  %vm3302_vm6 = vcmp.eq.s32.totalorder %v8289_v28, %v17553_v32  ;;  %7239 = vset.pattern.permute.xlu1 %v17434_v4  ;;  %v17557_v21 = vld [vmem:[#allocation132_spill] sm:$0xff] }
 0x3bf   :  { %17548 = vst [vmem:[#allocation186_spill] sm:$0xff] %v13833_v36  ;;  %17549 = vst [vmem:[#allocation8_spill] sm:$0xff] %v13836_v59  ;;  %v13854_v53 = vadd.f32 %v6643_v33, %v13581_v19  ;;  %v13857_v51 = vadd.f32 %v6644_v43, %v13584_v54  ;;  %vm3303_vm7 = vcmp.eq.s32.totalorder %v8298_v0, %v17553_v32  ;;  %4925 = vperm.xlu1 %7239, %v17558_v46   ;;  %v17560_v19 = vld [vmem:[#allocation134_spill] sm:$0xff]  ;;  %v13872_v54 = vpop.permute.xlu0 %4299  ;;  %v13877_v33 = vld [vmem:[%s15998_s0 + $0x50] sm:$0xff] }
 0x3c0   :  { %17554 = vst [vmem:[#allocation9_spill] sm:$0xff] %v13851_v18  ;;  %vm3272_vm8 = vcmp.eq.s32.totalorder %v8289_v28, %v17557_v21  ;;  %vm3273_vm9 = vcmp.eq.s32.totalorder %v8298_v0, %v17557_v21  ;;  %vm3306_vm10 = vcmp.eq.s32.totalorder %v8289_v28, %v17559_v1  ;;  %vm3307_vm11 = vcmp.eq.s32.totalorder %v8298_v0, %v17559_v1  ;;  %v17565_v59 = vld [vmem:[#allocation75_spill] sm:$0xff]  ;;  %v17570_v20 = vld [vmem:[#allocation136_spill] sm:$0xff] }
 0x3c1   :  { %17555 = vst [vmem:[#allocation79_spill] sm:$0xff] %v13854_v53  ;;  %17556 = vst [vmem:[#allocation162_spill] sm:$0xff] %v13857_v51  ;;  %vm3276_vm12 = vcmp.eq.s32.totalorder %v8289_v28, %v17560_v19  ;;  %4943 = vperm.xlu0 %7256, %v13877_v33   ;;  %v6613_v43 = vsel %vm3268_vm4, 1.0, %v16602_v47  ;;  %v6614_v31 = vsel %vm3269_vm5, 1.0, %v16602_v47  ;;  %v6647_v22 = vsel %vm3302_vm6, 1.0, %v16602_v47  ;;  %v13900_v27 = vpop.permute.xlu1 %4236  ;;  %v17566_v36 = vld [vmem:[#allocation43_spill] sm:$0xff] }
 0x3c2   :  { %17561 = vst [vmem:[#allocation97_spill] sm:$0xff] %v13872_v54  ;;  %17562 = vst [vmem:[#allocation163_spill] sm:$0xff] %v13877_v33  ;;  %vm3277_vm13 = vcmp.eq.s32.totalorder %v8298_v0, %v17560_v19  ;;  %v6648_v25 = vsel %vm3303_vm7, 1.0, %v16602_v47  ;;  %v6617_v46 = vsel %vm3272_vm8, 1.0, %v16602_v47  ;;  %v17563_v54 = vld [vmem:[#allocation135_spill] sm:$0xff]  ;;  %v6618_v32 = vsel %vm3273_vm9, 1.0, %v16602_v47 }
 0x3c3   :  { %vm3310_vm14 = vcmp.eq.s32.totalorder %v8289_v28, %v17563_v54  ;;  %vm3311_vm15 = vcmp.eq.s32.totalorder %v8298_v0, %v17563_v54  ;;  %17564 = vst [vmem:[#allocation165_spill] sm:$0xff] %v13900_v27  ;;  %v6651_v51 = vsel %vm3306_vm10, 1.0, %v16602_v47  ;;  %v6652_v53 = vsel %vm3307_vm11, 1.0, %v16602_v47  ;;  %4973 = vperm.xlu1 %7239, %v13410_v24   ;;  %v13929_v1 = vpop.permute.xlu0 %4916  ;;  %v17578_v54 = vld [vmem:[#allocation138_spill] sm:$0xff] }
 0x3c4   :  { %v6621_v27 = vsel %vm3276_vm12, 1.0, %v16602_v47  ;;  %v13920_v21 = vadd.f32 %v6613_v43, %v17565_v59  ;;  %v13923_v18 = vadd.f32 %v6614_v31, %v17566_v36  ;;  %v13926_v33 = vadd.f32 %v6647_v22, %v13596_v6  ;;  %v17571_v59 = vld [vmem:[#allocation192_spill] sm:$0xff] }
 0x3c5   :  { %v6622_v5 = vsel %vm3277_vm13, 1.0, %v16602_v47  ;;  %4994 = vperm.xlu0 %7256, %v17568_v34   ;;  %v13933_v19 = vadd.f32 %v6648_v25, %v13607_v35  ;;  %v13936_v55 = vadd.f32 %v6617_v46, %v17570_v20  ;;  %v6655_v36 = vsel %vm3310_vm14, 1.0, %v16602_v47  ;;  %v17574_v20 = vld [vmem:[#allocation193_spill] sm:$0xff]  ;;  %v13958_v22 = vpop.permute.xlu1 %4242  ;;  %v17576_v25 = vld [vmem:[#allocation44_spill] sm:$0xff] }
 0x3c6   :  { %17567 = vst [vmem:[#allocation62_spill] sm:$0xff] %v13926_v33  ;;  %v6656_v6 = vsel %vm3311_vm15, 1.0, %v16602_v47  ;;  %v13947_v43 = vadd.f32 %v6618_v32, %v17571_v59  ;;  %v13950_v34 = vadd.f32 %v6651_v51, %v13616_v38  ;;  %v13953_v35 = vadd.f32 %v6652_v53, %v13624_v11  ;;  %17575 = vst [vmem:[#allocation87_spill] sm:$0xff] %v13958_v22  ;;  %v7452_v51 = vld [vmem:[%s15998_s0 + $0x68] sm:$0xff]  ;;  %v17586_v59 = vld [vmem:[#allocation144_spill] sm:$0xff] }
 0x3c7   :  { %17569 = vst [vmem:[#allocation167_spill] sm:$0xff] %v13933_v19  ;;  %v13956_v31 = vadd.f32 %v6621_v27, %v17574_v20  ;;  %v13961_v46 = vadd.f32 %v6622_v5, %v17576_v25  ;;  %v17577_v19 = vld [vmem:[#allocation13_spill] sm:$0xff]  ;;  %vm3602_vm2 = vcmp.eq.s32.totalorder %v8289_v28, %v17578_v54  ;;  %4976 = vperm.xlu1 %7239, %v13788_v7   ;;  %v17581_v5 = vld [vmem:[#allocation139_spill] sm:$0xff]  ;;  %v13980_v53 = vpop.permute.xlu0 %4967 }
 0x3c8   :  { %17572 = vst [vmem:[#allocation84_spill] sm:$0xff] %v13950_v34  ;;  %17573 = vst [vmem:[#allocation86_spill] sm:$0xff] %v13953_v35  ;;  %vm3280_vm0 = vcmp.eq.s32.totalorder %v8289_v28, %v17577_v19  ;;  %vm3281_vm1 = vcmp.eq.s32.totalorder %v8298_v0, %v17577_v19  ;;  %v13971_v38 = vadd.f32 %v6655_v36, %v13674_v16  ;;  %v17583_v16 = vld [vmem:[#allocation140_spill] sm:$0xff]  ;;  %v6659_v32 = vsel %vm3602_vm2, 1.0, %v16602_v47  ;;  %v17589_v35 = vld [vmem:[#allocation78_spill] sm:$0xff] }
 0x3c9   :  { %v13974_v11 = vadd.f32 %v6656_v6, %v13677_v30  ;;  %vm3603_vm3 = vcmp.eq.s32.totalorder %v8298_v0, %v17578_v54  ;;  %vm3284_vm4 = vcmp.eq.s32.totalorder %v8289_v28, %v17581_v5  ;;  %17582 = vst [vmem:[#allocation47_spill] sm:$0xff] %v13980_v53  ;;  %4952 = vperm.xlu0 %7256, %v7452_v51   ;;  %v17584_v30 = vld [vmem:[#allocation142_spill] sm:$0xff]  ;;  %v6625_v7 = vsel %vm3280_vm0, 1.0, %v16602_v47  ;;  %v13998_v19 = vpop.permute.xlu1 %4248 }
 0x3ca   :  { %17579 = vst [vmem:[#allocation88_spill] sm:$0xff] %v13971_v38  ;;  %vm3285_vm5 = vcmp.eq.s32.totalorder %v8298_v0, %v17581_v5  ;;  %vm3608_vm6 = vcmp.eq.s32.totalorder %v8289_v28, %v17583_v16  ;;  %vm3609_vm7 = vcmp.eq.s32.totalorder %v8298_v0, %v17583_v16  ;;  %vm3288_vm8 = vcmp.eq.s32.totalorder %v8289_v28, %v17584_v30  ;;  %v7453_v51 = vld [vmem:[%s15998_s0 + $0x28] sm:$0xff] }
 0x3cb   :  { %17580 = vst [vmem:[#allocation205_spill] sm:$0xff] %v13974_v11  ;;  %v6626_v27 = vsel %vm3281_vm1, 1.0, %v16602_v47  ;;  %vm3289_vm9 = vcmp.eq.s32.totalorder %v8298_v0, %v17584_v30  ;;  %17585 = vst [vmem:[#allocation104_spill] sm:$0xff] %v13998_v19  ;;  %v6660_v36 = vsel %vm3603_vm3, 1.0, %v16602_v47  ;;  %v6629_v6 = vsel %vm3284_vm4, 1.0, %v16602_v47  ;;  %7240 = vset.pattern.permute.xlu1 %v17462_v57  ;;  %v14014_v16 = vpop.permute.xlu0 %4928  ;;  %v7454_v11 = vld [vmem:[%s15998_s0 + $0x70] sm:$0xff] }
 0x3cc   :  { %vm3612_vm10 = vcmp.eq.s32.totalorder %v8289_v28, %v17586_v59  ;;  %vm3613_vm11 = vcmp.eq.s32.totalorder %v8298_v0, %v17586_v59  ;;  %v6630_v20 = vsel %vm3285_vm5, 1.0, %v16602_v47  ;;  %v6665_v25 = vsel %vm3608_vm6, 1.0, %v16602_v47  ;;  %5280 = vperm.xlu1 %7240, %v7453_v51   ;;  %17587 = vst [vmem:[#allocation106_spill] sm:$0xff] %v14014_v16  ;;  %v17588_v38 = vld [vmem:[#allocation82_spill] sm:$0xff]  ;;  %v17590_v16 = vld [vmem:[#allocation80_spill] sm:$0xff] }
 0x3cd   :  { %v6666_v54 = vsel %vm3609_vm7, 1.0, %v16602_v47  ;;  %v6633_v5 = vsel %vm3288_vm8, 1.0, %v16602_v47  ;;  %4955 = vperm.xlu0 %7256, %v7454_v11   ;;  %v14020_v19 = vadd.f32 %v6625_v7, %v17588_v38  ;;  %v14023_v34 = vadd.f32 %v6626_v27, %v17589_v35  ;;  %v14046_v38 = vpop.permute.xlu1 %4254  ;;  %v17592_v11 = vld [vmem:[#allocation17_spill] sm:$0xff]  ;;  %v17593_v27 = vld [vmem:[#allocation12_spill] sm:$0xff] }
 0x3ce   :  { %v14026_v22 = vadd.f32 %v6659_v32, %v13689_v41  ;;  %v6634_v51 = vsel %vm3289_vm9, 1.0, %v16602_v47  ;;  %v14033_v33 = vadd.f32 %v6660_v36, %v13697_v44  ;;  %v14036_v53 = vadd.f32 %v6629_v6, %v17590_v16  ;;  %17591 = vst [vmem:[#allocation170_spill] sm:$0xff] %v14046_v38  ;;  %v17594_v36 = vld [vmem:[#allocation197_spill] sm:$0xff]  ;;  %v14128_v38 = vld [vmem:[%s15998_s0 + $0x30] sm:$0xff] }
 0x3cf   :  { %v6669_v35 = vsel %vm3612_vm10, 1.0, %v16602_v47  ;;  %v6670_v41 = vsel %vm3613_vm11, 1.0, %v16602_v47  ;;  %v14049_v30 = vadd.f32 %v6630_v20, %v17592_v11  ;;  %v14052_v44 = vadd.f32 %v6665_v25, %v13794_v58  ;;  %v17595_v16 = vld [vmem:[#allocation145_spill] sm:$0xff]  ;;  %v14068_v59 = vpop.permute.xlu0 %4931  ;;  %v7455_v58 = vld [vmem:[%s15998_s0 + $0xf8] sm:$0xff]  ;;  %v17599_v25 = vld [vmem:[#allocation147_spill] sm:$0xff] }
 0x3d0   :  { %v14055_v7 = vadd.f32 %v6666_v54, %v13797_v63  ;;  %v14058_v32 = vadd.f32 %v6633_v5, %v17593_v27  ;;  %v14061_v6 = vadd.f32 %v6634_v51, %v17594_v36  ;;  %vm3292_vm12 = vcmp.eq.s32.totalorder %v8289_v28, %v17595_v16  ;;  %5325 = vperm.xlu1 %7240, %v13410_v24   ;;  %v17600_v24 = vld [vmem:[#allocation149_spill] sm:$0xff]  ;;  %v17601_v54 = vld [vmem:[#allocation91_spill] sm:$0xff]  ;;  %v17602_v51 = vld [vmem:[#allocation150_spill] sm:$0xff] }
 0x3d1   :  { %vm3293_vm13 = vcmp.eq.s32.totalorder %v8298_v0, %v17595_v16  ;;  %17596 = vst [vmem:[#allocation90_spill] sm:$0xff] %v14068_v59  ;;  %5006 = vperm.xlu0 %7256, %v7455_v58   ;;  %v14074_v63 = vadd.f32 %v6669_v35, %v13813_v40  ;;  %v14077_v20 = vadd.f32 %v6670_v41, %v13830_v23  ;;  %v14091_v40 = vpop.permute.xlu1 %4260  ;;  %v6637_v23 = vsel %vm3292_vm12, 1.0, %v16602_v47  ;;  %v17603_v11 = vld [vmem:[#allocation151_spill] sm:$0xff] }
 0x3d2   :  { %vm3616_vm14 = vcmp.eq.s32.totalorder %v8289_v28, %v17599_v25  ;;  %vm3617_vm15 = vcmp.eq.s32.totalorder %v8298_v0, %v17599_v25  ;;  %vm3296_vm0 = vcmp.eq.s32.totalorder %v8289_v28, %v17600_v24  ;;  %vm3297_vm1 = vcmp.eq.s32.totalorder %v8298_v0, %v17600_v24 }
 0x3d3   :  { %17597 = vst [vmem:[#allocation92_spill] sm:$0xff] %v14074_v63  ;;  %17598 = vst [vmem:[#allocation93_spill] sm:$0xff] %v14077_v20  ;;  %vm3620_vm2 = vcmp.eq.s32.totalorder %v8289_v28, %v17601_v54  ;;  %vm3621_vm3 = vcmp.eq.s32.totalorder %v8298_v0, %v17601_v54  ;;  %v6638_v5 = vsel %vm3293_vm13, 1.0, %v16602_v47  ;;  %vm3300_vm4 = vcmp.eq.s32.totalorder %v8289_v28, %v17602_v51  ;;  %v14106_v27 = vpop.permute.xlu0 %4982 }
 0x3d4   :  { %vm3301_vm5 = vcmp.eq.s32.totalorder %v8298_v0, %v17602_v51  ;;  %v6673_v35 = vsel %vm3616_vm14, 1.0, %v16602_v47  ;;  %v6674_v41 = vsel %vm3617_vm15, 1.0, %v16602_v47  ;;  %vm3624_vm6 = vcmp.eq.s32.totalorder %v8289_v28, %v17603_v11  ;;  %7241 = vset.pattern.permute.xlu1 %v17442_v29  ;;  %17604 = vst [vmem:[#allocation94_spill] sm:$0xff] %v14106_v27 }
 0x3d5   :  { %vm3625_vm7 = vcmp.eq.s32.totalorder %v8298_v0, %v17603_v11  ;;  %7259 = vset.pattern.permute.xlu0 %v17462_v57  ;;  %v6641_v36 = vsel %vm3296_vm0, 1.0, %v16602_v47  ;;  %v6642_v16 = vsel %vm3297_vm1, 1.0, %v16602_v47  ;;  %v6677_v58 = vsel %vm3620_vm2, 1.0, %v16602_v47  ;;  %4579 = vperm.xlu1 %7241, %v14128_v38   ;;  %v14145_v20 = vpop.permute.xlu1 %4266  ;;  %v17611_v11 = vld [vmem:[#allocation68_spill] sm:$0xff] }
 0x3d6   :  { %v6678_v25 = vsel %vm3621_vm3, 1.0, %v16602_v47  ;;  %v14132_v24 = vadd.f32 %v6637_v23, %v13228_v61  ;;  %v14135_v27 = vadd.f32 %v6638_v5, %v13231_v62  ;;  %v6645_v59 = vsel %vm3300_vm4, 1.0, %v16602_v47  ;;  %5310 = vperm.xlu0 %7259, %v13743_v56  }
 0x3d7   :  { %v6646_v54 = vsel %vm3301_vm5, 1.0, %v16602_v47  ;;  %v14149_v61 = vadd.f32 %v6673_v35, %v13839_v50  ;;  %v14152_v62 = vadd.f32 %v6674_v41, %v13842_v15  ;;  %v6681_v23 = vsel %vm3624_vm6, 1.0, %v16602_v47 }
 0x3d8   :  { %v6682_v5 = vsel %vm3625_vm7, 1.0, %v16602_v47  ;;  %v14163_v51 = vadd.f32 %v6641_v36, %v13240_v37  ;;  %v14166_v56 = vadd.f32 %v6642_v16, %v13243_v10  ;;  %v14169_v50 = vadd.f32 %v6677_v58, %v13920_v21  ;;  %v14187_v10 = vld [vmem:[%s15998_s0 + $0xb0] sm:$0xff]  ;;  %v14190_v37 = vpop.permute.xlu0 %5265  ;;  %v17614_v36 = vld [vmem:[#allocation154_spill] sm:$0xff] }
 0x3d9   :  { %17605 = vst [vmem:[#allocation57_spill] sm:$0xff] %v14149_v61  ;;  %17606 = vst [vmem:[#allocation198_spill] sm:$0xff] %v14152_v62  ;;  %v14172_v15 = vadd.f32 %v6678_v25, %v13923_v18  ;;  %v14175_v35 = vadd.f32 %v6645_v59, %v13259_v17  ;;  %v14178_v41 = vadd.f32 %v6646_v54, %v13279_v3  ;;  %4627 = vperm.xlu1 %7241, %v14187_v10   ;;  %v17612_v18 = vld [vmem:[#allocation152_spill] sm:$0xff]  ;;  %v14202_v21 = vpop.permute.xlu1 %4272  ;;  %v17613_v59 = vld [vmem:[#allocation153_spill] sm:$0xff] }
 0x3da   :  { %17607 = vst [vmem:[#allocation173_spill] sm:$0xff] %v14169_v50  ;;  %vm3304_vm8 = vcmp.eq.s32.totalorder %v8289_v28, %v17611_v11  ;;  %vm3305_vm9 = vcmp.eq.s32.totalorder %v8298_v0, %v17611_v11  ;;  %v14193_v17 = vadd.f32 %v6681_v23, %v13936_v55  ;;  %v14196_v3 = vadd.f32 %v6682_v5, %v13947_v43  ;;  %v17615_v55 = vld [vmem:[#allocation89_spill] sm:$0xff]  ;;  %v17616_v58 = vld [vmem:[#allocation95_spill] sm:$0xff]  ;;  %v14227_v23 = vld [vmem:[%s15998_s0 + $0xb8] sm:$0xff] }
 0x3db   :  { %17608 = vst [vmem:[#allocation28_spill] sm:$0xff] %v14172_v15  ;;  %17609 = vst [vmem:[#allocation29_spill] sm:$0xff] %v14175_v35  ;;  %vm3628_vm10 = vcmp.eq.s32.totalorder %v8289_v28, %v17612_v18  ;;  %vm3629_vm11 = vcmp.eq.s32.totalorder %v8298_v0, %v17612_v18  ;;  %vm3308_vm12 = vcmp.eq.s32.totalorder %v8289_v28, %v17613_v59  ;;  %v6649_v43 = vsel %vm3304_vm8, 1.0, %v16602_v47 }
 0x3dc   :  { %17610 = vst [vmem:[#allocation109_spill] sm:$0xff] %v14178_v41  ;;  %vm3632_vm13 = vcmp.eq.s32.totalorder %v8289_v28, %v17614_v36  ;;  %vm3633_vm14 = vcmp.eq.s32.totalorder %v8298_v0, %v17614_v36  ;;  %vm3600_vm15 = vcmp.eq.s32.totalorder %v8289_v28, %v17615_v55  ;;  %v6650_v16 = vsel %vm3305_vm9, 1.0, %v16602_v47  ;;  %v14230_v5 = vpop.permute.xlu0 %5316 }
 0x3dd   :  { %vm3601_vm0 = vcmp.eq.s32.totalorder %v8298_v0, %v17615_v55  ;;  %vm3636_vm1 = vcmp.eq.s32.totalorder %v8289_v28, %v17616_v58  ;;  %v6685_v25 = vsel %vm3628_vm10, 1.0, %v16602_v47  ;;  %v6686_v54 = vsel %vm3629_vm11, 1.0, %v16602_v47  ;;  %4630 = vperm.xlu1 %7241, %v14227_v23   ;;  %v14236_v50 = vpop.permute.xlu1 %4278 }
 0x3de   :  { %vm3309_vm2 = vcmp.eq.s32.totalorder %v8298_v0, %v17613_v59  ;;  %vm3637_vm3 = vcmp.eq.s32.totalorder %v8298_v0, %v17616_v58  ;;  %v6653_v11 = vsel %vm3308_vm12, 1.0, %v16602_v47  ;;  %v6689_v18 = vsel %vm3632_vm13, 1.0, %v16602_v47  ;;  %17617 = vst [vmem:[#allocation61_spill] sm:$0xff] %v14236_v50 }
 0x3df   :  { %v6690_v36 = vsel %vm3633_vm14, 1.0, %v16602_v47  ;;  %v6657_v15 = vsel %vm3600_vm15, 1.0, %v16602_v47  ;;  %v14239_v41 = vadd.f32 %v6649_v43, %v13354_v8  ;;  %v14242_v35 = vadd.f32 %v6650_v16, %v13357_v12  ;;  %v17624_v16 = vld [vmem:[#allocation64_spill] sm:$0xff] }
 0x3e0   :  { %v6658_v62 = vsel %vm3601_vm0, 1.0, %v16602_v47  ;;  %v6693_v61 = vsel %vm3636_vm1, 1.0, %v16602_v47  ;;  %v14253_v63 = vadd.f32 %v6685_v25, %v13956_v31  ;;  %v14256_v50 = vadd.f32 %v6686_v54, %v13961_v46  ;;  %v14281_v59 = vpop.permute.xlu0 %5274 }
 0x3e1   :  { %17618 = vst [vmem:[#allocation51_spill] sm:$0xff] %v14239_v41  ;;  %17619 = vst [vmem:[#allocation99_spill] sm:$0xff] %v14242_v35  ;;  %v14262_v8 = vsel %vm3309_vm2, 1.0, %v16602_v47  ;;  %v6694_v12 = vsel %vm3637_vm3, 1.0, %v16602_v47  ;;  %v14269_v55 = vadd.f32 %v6653_v11, %v13373_v26  ;;  %v14272_v31 = vadd.f32 %v6689_v18, %v14020_v19  ;;  %7242 = vset.pattern.permute.xlu1 %v17434_v4  ;;  %v17625_v26 = vld [vmem:[#allocation50_spill] sm:$0xff] }
 0x3e2   :  { %17620 = vst [vmem:[#allocation100_spill] sm:$0xff] %v14253_v63  ;;  %17621 = vst [vmem:[#allocation204_spill] sm:$0xff] %v14256_v50  ;;  %v14275_v46 = vadd.f32 %v6690_v36, %v14023_v34  ;;  %v14278_v43 = vadd.f32 %v6657_v15, %v13391_v14  ;;  %v14284_v25 = vadd.f32 %v6658_v62, %v17624_v16  ;;  %4934 = vperm.xlu1 %7242, %v13464_v60   ;;  %v14294_v14 = vpop.permute.xlu1 %4284  ;;  %v17627_v19 = vld [vmem:[#allocation158_spill] sm:$0xff]  ;;  %v17630_v60 = vld [vmem:[#allocation55_spill] sm:$0xff] }
 0x3e3   :  { %17622 = vst [vmem:[#allocation59_spill] sm:$0xff] %v14262_v8  ;;  %17623 = vst [vmem:[#allocation112_spill] sm:$0xff] %v14269_v55  ;;  %v14287_v58 = vadd.f32 %v6693_v61, %v14036_v53  ;;  %vm3604_vm4 = vcmp.eq.s32.totalorder %v8289_v28, %v17625_v26  ;;  %vm3605_vm5 = vcmp.eq.s32.totalorder %v8298_v0, %v17625_v26  ;;  %v17628_v53 = vld [vmem:[#allocation160_spill] sm:$0xff]  ;;  %v17629_v61 = vld [vmem:[#allocation161_spill] sm:$0xff] }
 0x3e4   :  { %17626 = vst [vmem:[#allocation6_spill] sm:$0xff] %v14294_v14  ;;  %v14297_v34 = vadd.f32 %v6694_v12, %v14049_v30  ;;  %vm3640_vm6 = vcmp.eq.s32.totalorder %v8289_v28, %v17627_v19  ;;  %vm3641_vm7 = vcmp.eq.s32.totalorder %v8298_v0, %v17627_v19  ;;  %vm3606_vm8 = vcmp.eq.s32.totalorder %v8289_v28, %v17628_v53  ;;  %v17631_v15 = vld [vmem:[#allocation58_spill] sm:$0xff]  ;;  %v14319_v54 = vpop.permute.xlu0 %5277  ;;  %v17633_v8 = vld [vmem:[#allocation203_spill] sm:$0xff] }
 0x3e5   :  { %vm3607_vm9 = vcmp.eq.s32.totalorder %v8298_v0, %v17628_v53  ;;  %vm3644_vm10 = vcmp.eq.s32.totalorder %v8289_v28, %v17629_v61  ;;  %vm3645_vm11 = vcmp.eq.s32.totalorder %v8298_v0, %v17629_v61  ;;  %vm3610_vm12 = vcmp.eq.s32.totalorder %v8289_v28, %v17630_v60 }
 0x3e6   :  { %v6661_v30 = vsel %vm3604_vm4, 1.0, %v16602_v47  ;;  %v6662_v62 = vsel %vm3605_vm5, 1.0, %v16602_v47  ;;  %vm3611_vm13 = vcmp.eq.s32.totalorder %v8298_v0, %v17630_v60  ;;  %vm3648_vm14 = vcmp.eq.s32.totalorder %v8289_v28, %v17631_v15  ;;  %4979 = vperm.xlu1 %7242, %v14187_v10   ;;  %v14327_v12 = vpop.permute.xlu1 %4290 }
 0x3e7   :  { %v6697_v11 = vsel %vm3640_vm6, 1.0, %v16602_v47  ;;  %v6698_v18 = vsel %vm3641_vm7, 1.0, %v16602_v47  ;;  %v6663_v36 = vsel %vm3606_vm8, 1.0, %v16602_v47  ;;  %vm3649_vm15 = vcmp.eq.s32.totalorder %v8298_v0, %v17631_v15  ;;  %17632 = vst [vmem:[#allocation190_spill] sm:$0xff] %v14327_v12 }
 0x3e8   :  { %v6664_v16 = vsel %vm3607_vm9, 1.0, %v16602_v47  ;;  %v6701_v26 = vsel %vm3644_vm10, 1.0, %v16602_v47  ;;  %v6702_v19 = vsel %vm3645_vm11, 1.0, %v16602_v47  ;;  %v6667_v53 = vsel %vm3610_vm12, 1.0, %v16602_v47  ;;  %v14349_v12 = vpop.permute.xlu0 %5328 }
 0x3e9   :  { %v14334_v61 = vadd.f32 %v6661_v30, %v13706_v13  ;;  %v14337_v60 = vadd.f32 %v6662_v62, %v13709_v39  ;;  %v6668_v15 = vsel %vm3611_vm13, 1.0, %v16602_v47  ;;  %v6705_v50 = vsel %vm3648_vm14, 1.0, %v16602_v47  ;;  %17634 = vst [vmem:[#allocation194_spill] sm:$0xff] %v14349_v12  ;;  %v17635_v13 = vld [vmem:[#allocation208_spill] sm:$0xff] }
 0x3ea   :  { %v14342_v63 = vadd.f32 %v6697_v11, %v14058_v32  ;;  %v14345_v55 = vadd.f32 %v6698_v18, %v14061_v6  ;;  %v3798_v35 = vadd.f32 %v6663_v36, %v17633_v8  ;;  %v6706_v41 = vsel %vm3649_vm15, 1.0, %v16602_v47  ;;  %7244 = vset.pattern.permute.xlu1 %v17462_v57  ;;  %v14360_v6 = vpop.permute.xlu1 %4296  ;;  %v17640_v18 = vld [vmem:[#allocation175_spill] sm:$0xff] }
 0x3eb   :  { %v3799_v30 = vadd.f32 %v6664_v16, %v17635_v13  ;;  %v14353_v39 = vadd.f32 %v6701_v26, %v14132_v24  ;;  %v14356_v62 = vadd.f32 %v6702_v19, %v14135_v27  ;;  %v3802_v32 = vadd.f32 %v6667_v53, %v13509_v49  ;;  %17638 = vst [vmem:[#allocation103_spill] sm:$0xff] %v14360_v6  ;;  %v17642_v49 = vld [vmem:[#allocation180_spill] sm:$0xff] }
 0x3ec   :  { %v3803_v8 = vadd.f32 %v6668_v15, %v13512_v45  ;;  %v14364_v11 = vadd.f32 %v6705_v50, %v14163_v51  ;;  %vm3952_vm0 = vcmp.eq.s32.totalorder %v8289_v28, %v17640_v18  ;;  %vm3953_vm1 = vcmp.eq.s32.totalorder %v8298_v0, %v17640_v18  ;;  %5283 = vperm.xlu1 %7244, %v14128_v38   ;;  %v17643_v45 = vld [vmem:[#allocation111_spill] sm:$0xff]  ;;  %v17644_v24 = vld [vmem:[#allocation164_spill] sm:$0xff]  ;;  %v14388_v51 = vpop.permute.xlu0 %5286 }
 0x3ed   :  { %17636 = vst [vmem:[#allocation115_spill] sm:$0xff] %v14353_v39  ;;  %17637 = vst [vmem:[#allocation169_spill] sm:$0xff] %v14356_v62  ;;  %v14372_v27 = vadd.f32 %v6706_v41, %v14166_v56  ;;  %vm3958_vm2 = vcmp.eq.s32.totalorder %v8289_v28, %v17642_v49  ;;  %vm3959_vm3 = vcmp.eq.s32.totalorder %v8298_v0, %v17642_v49  ;;  %v17645_v38 = vld [vmem:[#allocation183_spill] sm:$0xff]  ;;  %v6721_v56 = vsel %vm3952_vm0, 1.0, %v16602_v47  ;;  %v17647_v41 = vld [vmem:[#allocation14_spill] sm:$0xff] }
 0x3ee   :  { %17639 = vst [vmem:[#allocation105_spill] sm:$0xff] %v14364_v11  ;;  %vm3634_vm4 = vcmp.eq.s32.totalorder %v8289_v28, %v17643_v45  ;;  %vm3614_vm5 = vcmp.eq.s32.totalorder %v8289_v28, %v17644_v24  ;;  %vm3615_vm6 = vcmp.eq.s32.totalorder %v8298_v0, %v17644_v24  ;;  %vm3635_vm7 = vcmp.eq.s32.totalorder %v8298_v0, %v17643_v45  ;;  %v14396_v36 = vpop.permute.xlu1 %4302  ;;  %v17670_v39 = vld [vmem:[#allocation172_spill] sm:$0xff] }
 0x3ef   :  { %17641 = vst [vmem:[#allocation107_spill] sm:$0xff] %v14372_v27  ;;  %vm3962_vm8 = vcmp.eq.s32.totalorder %v8289_v28, %v17645_v38  ;;  %17646 = vst [vmem:[#allocation33_spill] sm:$0xff] %v14388_v51  ;;  %v6722_v50 = vsel %vm3953_vm1, 1.0, %v16602_v47  ;;  %vm3963_vm9 = vcmp.eq.s32.totalorder %v8298_v0, %v17645_v38  ;;  %vm3638_vm10 = vcmp.eq.s32.totalorder %v8289_v28, %v17647_v41 }
 0x3f0   :  { %17648 = vst [vmem:[#allocation30_spill] sm:$0xff] %v14396_v36  ;;  %v6727_v16 = vsel %vm3958_vm2, 1.0, %v16602_v47  ;;  %v6728_v26 = vsel %vm3959_vm3, 1.0, %v16602_v47  ;;  %v6691_v19 = vsel %vm3634_vm4, 1.0, %v16602_v47  ;;  %vm3639_vm11 = vcmp.eq.s32.totalorder %v8298_v0, %v17647_v41  ;;  %5331 = vperm.xlu1 %7244, %v14187_v10   ;;  %v14420_v38 = vpop.permute.xlu0 %5289 }
 0x3f1   :  { %v14405_v53 = vsel %vm3614_vm5, 1.0, %v16602_v47  ;;  %v14408_v15 = vsel %vm3615_vm6, 1.0, %v16602_v47  ;;  %v6692_v13 = vsel %vm3635_vm7, 1.0, %v16602_v47  ;;  %v6731_v18 = vsel %vm3962_vm8, 1.0, %v16602_v47  ;;  %17651 = vst [vmem:[#allocation108_spill] sm:$0xff] %v14420_v38 }
 0x3f2   :  { %17649 = vst [vmem:[#allocation201_spill] sm:$0xff] %v14405_v53  ;;  %17650 = vst [vmem:[#allocation202_spill] sm:$0xff] %v14408_v15  ;;  %v14413_v49 = vadd.f32 %v6721_v56, %v14278_v43  ;;  %v14416_v45 = vadd.f32 %v6722_v50, %v14284_v25  ;;  %v6732_v24 = vsel %vm3963_vm9, 1.0, %v16602_v47  ;;  %v6695_v10 = vsel %vm3638_vm10, 1.0, %v16602_v47  ;;  %v17652_v25 = vld [vmem:[#allocation15_spill] sm:$0xff] }
 0x3f3   :  { %v14422_v41 = vadd.f32 %v6727_v16, %v3798_v35  ;;  %v14424_v36 = vadd.f32 %v6728_v26, %v3799_v30  ;;  %v3826_v6 = vadd.f32 %v6691_v19, %v13700_v42  ;;  %v6696_v14 = vsel %vm3639_vm11, 1.0, %v16602_v47  ;;  %v14436_v35 = vpop.permute.xlu1 %4564  ;;  %v17653_v50 = vld [vmem:[#allocation207_spill] sm:$0xff]  ;;  %v17657_v26 = vld [vmem:[#allocation128_spill] sm:$0xff] }
 0x3f4   :  { %v3827_v43 = vadd.f32 %v6692_v13, %v13703_v2  ;;  %v14429_v56 = vadd.f32 %v6731_v18, %v3802_v32  ;;  %vm3642_vm12 = vcmp.eq.s32.totalorder %v8289_v28, %v17652_v25  ;;  %vm3643_vm13 = vcmp.eq.s32.totalorder %v8298_v0, %v17652_v25  ;;  %5334 = vperm.xlu1 %7244, %v14227_v23   ;;  %v17654_v32 = vld [vmem:[#allocation36_spill] sm:$0xff]  ;;  %v17655_v23 = vld [vmem:[#allocation41_spill] sm:$0xff]  ;;  %v17658_v19 = vld [vmem:[#allocation199_spill] sm:$0xff] }
 0x3f5   :  { %v14438_v30 = vadd.f32 %v6732_v24, %v3803_v8  ;;  %v3830_v42 = vadd.f32 %v6695_v10, %v13721_v9  ;;  %vm3986_vm14 = vcmp.eq.s32.totalorder %v8289_v28, %v17653_v50  ;;  %vm3987_vm15 = vcmp.eq.s32.totalorder %v8298_v0, %v17653_v50  ;;  %v14452_v8 = vpop.permute.xlu0 %5340  ;;  %v17659_v25 = vld [vmem:[#allocation98_spill] sm:$0xff] }
 0x3f6   :  { %v3831_v2 = vadd.f32 %v6696_v14, %v13724_v52  ;;  %vm3990_vm0 = vcmp.eq.s32.totalorder %v8289_v28, %v17654_v32  ;;  %vm3991_vm1 = vcmp.eq.s32.totalorder %v8298_v0, %v17654_v32  ;;  %vm3954_vm2 = vcmp.eq.s32.totalorder %v8289_v28, %v17655_v23  ;;  %17656 = vst [vmem:[#allocation110_spill] sm:$0xff] %v14452_v8  ;;  %v17660_v32 = vld [vmem:[#allocation74_spill] sm:$0xff] }
 0x3f7   :  { %v6699_v9 = vsel %vm3642_vm12, 1.0, %v16602_v47  ;;  %v6700_v16 = vsel %vm3643_vm13, 1.0, %v16602_v47  ;;  %vm3955_vm3 = vcmp.eq.s32.totalorder %v8298_v0, %v17655_v23  ;;  %vm3994_vm4 = vcmp.eq.s32.totalorder %v8289_v28, %v17657_v26  ;;  %v14467_v13 = vpop.permute.xlu1 %4567 }
 0x3f8   :  { %v6755_v52 = vsel %vm3986_vm14, 1.0, %v16602_v47  ;;  %v6756_v14 = vsel %vm3987_vm15, 1.0, %v16602_v47  ;;  %vm3995_vm5 = vcmp.eq.s32.totalorder %v8298_v0, %v17657_v26  ;;  %vm3956_vm6 = vcmp.eq.s32.totalorder %v8289_v28, %v17658_v19  ;;  %7245 = vset.pattern.permute.xlu1 %v17442_v29  ;;  %v17662_v26 = vld [vmem:[#allocation200_spill] sm:$0xff] }
 0x3f9   :  { %v6759_v18 = vsel %vm3990_vm0, 1.0, %v16602_v47  ;;  %v6760_v24 = vsel %vm3991_vm1, 1.0, %v16602_v47  ;;  %v6723_v10 = vsel %vm3954_vm2, 1.0, %v16602_v47  ;;  %vm3957_vm7 = vcmp.eq.s32.totalorder %v8298_v0, %v17658_v19  ;;  %4588 = vperm.xlu1 %7245, %v13826_v48   ;;  %v14479_v27 = vpop.permute.xlu0 %5298 }
 0x3fa   :  { %v3834_v50 = vadd.f32 %v6699_v9, %v17659_v25  ;;  %v3835_v23 = vadd.f32 %v6700_v16, %v17660_v32  ;;  %v6724_v8 = vsel %vm3955_vm3, 1.0, %v16602_v47  ;;  %v6763_v38 = vsel %vm3994_vm4, 1.0, %v16602_v47  ;;  %17661 = vst [vmem:[#allocation113_spill] sm:$0xff] %v14479_v27  ;;  %v17663_v27 = vld [vmem:[#allocation141_spill] sm:$0xff] }
 0x3fb   :  { %v14481_v11 = vadd.f32 %v6755_v52, %v3826_v6  ;;  %v14483_v51 = vadd.f32 %v6756_v14, %v3827_v43  ;;  %v6764_v62 = vsel %vm3995_vm5, 1.0, %v16602_v47  ;;  %v6725_v9 = vsel %vm3956_vm6, 1.0, %v16602_v47  ;;  %v14499_v43 = vpop.permute.xlu1 %4573 }
 0x3fc   :  { %v14493_v16 = vadd.f32 %v6759_v18, %v3830_v42  ;;  %v14495_v25 = vadd.f32 %v6760_v24, %v3831_v2  ;;  %v4146_v32 = vadd.f32 %v6723_v10, %v14026_v22  ;;  %v6726_v6 = vsel %vm3957_vm7, 1.0, %v16602_v47  ;;  %v14511_v42 = vld [vmem:[%s15998_s0 + $0xc0] sm:$0xff]  ;;  %v17667_v18 = vld [vmem:[#allocation35_spill] sm:$0xff] }
 0x3fd   :  { %v4147_v52 = vadd.f32 %v6724_v8, %v14033_v33  ;;  %v14502_v14 = vadd.f32 %v6763_v38, %v3834_v50  ;;  %vm3976_vm8 = vcmp.eq.s32.totalorder %v8289_v28, %v17662_v26  ;;  %vm4306_vm9 = vcmp.eq.s32.totalorder %v8289_v28, %v17663_v27  ;;  %4633 = vperm.xlu1 %7245, %v14511_v42   ;;  %v17664_v33 = vld [vmem:[#allocation143_spill] sm:$0xff]  ;;  %v14523_v38 = vpop.permute.xlu0 %5301 }
 0x3fe   :  { %v14514_v22 = vadd.f32 %v6764_v62, %v3835_v23  ;;  %v14517_v2 = vadd.f32 %v6725_v9, %v14334_v61  ;;  %vm3984_vm10 = vcmp.eq.s32.totalorder %v8289_v28, %v17664_v33  ;;  %vm3985_vm11 = vcmp.eq.s32.totalorder %v8298_v0, %v17664_v33  ;;  %17665 = vst [vmem:[#allocation116_spill] sm:$0xff] %v14523_v38  ;;  %v17666_v62 = vld [vmem:[#allocation54_spill] sm:$0xff]  ;;  %v17668_v10 = vld [vmem:[#allocation179_spill] sm:$0xff] }
 0x3ff   :  { %v14526_v8 = vadd.f32 %v6726_v6, %v14337_v60  ;;  %vm3977_vm12 = vcmp.eq.s32.totalorder %v8298_v0, %v17662_v26  ;;  %vm4307_vm13 = vcmp.eq.s32.totalorder %v8298_v0, %v17663_v27  ;;  %vm3988_vm14 = vcmp.eq.s32.totalorder %v8289_v28, %v17666_v62  ;;  %v14542_v60 = vpop.permute.xlu1 %4609  ;;  %v7460_v6 = vld [vmem:[%s15998_s0 + $0x40] sm:$0xff] }
 0x400   :  { %v14535_v61 = vsel %vm3976_vm8, 1.0, %v16602_v47  ;;  %v6787_v19 = vsel %vm4306_vm9, 1.0, %v16602_v47  ;;  %vm4336_vm15 = vcmp.eq.s32.totalorder %v8289_v28, %v17667_v18  ;;  %vm4337_vm0 = vcmp.eq.s32.totalorder %v8298_v0, %v17667_v18 }
 0x401   :  { %v6753_v24 = vsel %vm3984_vm10, 1.0, %v16602_v47  ;;  %v6754_v27 = vsel %vm3985_vm11, 1.0, %v16602_v47  ;;  %vm4304_vm1 = vcmp.eq.s32.totalorder %v8289_v28, %v17668_v10  ;;  %vm4305_vm2 = vcmp.eq.s32.totalorder %v8298_v0, %v17668_v10  ;;  %7246 = vset.pattern.permute.xlu1 %v17434_v4  ;;  %v14561_v26 = vpop.permute.xlu0 %5352 }
 0x402   :  { %v14552_v50 = vsel %vm3977_vm12, 1.0, %v16602_v47  ;;  %v6788_v23 = vsel %vm4307_vm13, 1.0, %v16602_v47  ;;  %vm3989_vm3 = vcmp.eq.s32.totalorder %v8298_v0, %v17666_v62  ;;  %v6757_v9 = vsel %vm3988_vm14, 1.0, %v16602_v47  ;;  %4937 = vperm.xlu1 %7246, %v7460_v6   ;;  %17669 = vst [vmem:[#allocation118_spill] sm:$0xff] %v14561_v26 }
 0x403   :  { %v4498_v33 = vadd.f32 %v6787_v19, %v4146_v32  ;;  %v6817_v38 = vsel %vm4336_vm15, 1.0, %v16602_v47  ;;  %v6818_v62 = vsel %vm4337_vm0, 1.0, %v16602_v47  ;;  %vm4340_vm4 = vcmp.eq.s32.totalorder %v8289_v28, %v17670_v39 }
 0x404   :  { %v4176_v15 = vadd.f32 %v6753_v24, %v14272_v31  ;;  %v4177_v6 = vadd.f32 %v6754_v27, %v14275_v46  ;;  %v6785_v32 = vsel %vm4304_vm1, 1.0, %v16602_v47  ;;  %v6786_v19 = vsel %vm4305_vm2, 1.0, %v16602_v47  ;;  %v4914_v31 = vpop.permute.xlu1 %4913 }
 0x405   :  { %v4499_v26 = vadd.f32 %v6788_v23, %v4147_v52  ;;  %v14584_v18 = vsel %vm3989_vm3, 1.0, %v16602_v47  ;;  %v14587_v53 = vadd.f32 %v6757_v9, %v14287_v58  ;;  %vm5010_vm5 = vcmp.eq.s32.totalorder %v8289_v28, %v13929_v1  ;;  %v4562_v58 = vpop.permute.xlu0 %4561 }
 0x406   :  { %v4528_v46 = vadd.f32 %v6817_v38, %v4176_v15  ;;  %v4529_v24 = vadd.f32 %v6818_v62, %v4177_v6  ;;  %v14592_v27 = vsel %vm4340_vm4, 1.0, %v16602_v47  ;;  %vm4338_vm6 = vcmp.eq.s32.totalorder %v8289_v28, %v14091_v40  ;;  %4985 = vperm.xlu1 %7246, %v14511_v42   ;;  %v7461_v62 = vld [vmem:[%s15998_s0 + $0xc8] sm:$0xff] }
 0x407   :  { %v4496_v52 = vadd.f32 %v6785_v32, %v14413_v49  ;;  %v4497_v10 = vadd.f32 %v6786_v19, %v14416_v45  ;;  %vm4658_vm7 = vcmp.eq.s32.totalorder %v8289_v28, %v14436_v35  ;;  %vm4659_vm8 = vcmp.eq.s32.totalorder %v8298_v0, %v14436_v35 }
 0x408   :  { %vm5011_vm9 = vcmp.eq.s32.totalorder %v8298_v0, %v13929_v1  ;;  %v6915_v15 = vsel %vm5010_vm5, 1.0, %v16602_v47  ;;  %vm4656_vm10 = vcmp.eq.s32.totalorder %v8289_v28, %v4562_v58  ;;  %vm4657_vm11 = vcmp.eq.s32.totalorder %v8298_v0, %v4562_v58  ;;  %v4962_v35 = vpop.permute.xlu1 %4961 }
 0x409   :  { %vm4339_vm12 = vcmp.eq.s32.totalorder %v8298_v0, %v14091_v40  ;;  %v6819_v49 = vsel %vm4338_vm6, 1.0, %v16602_v47  ;;  %v6849_v45 = vsel %vm4656_vm10, 1.0, %v16602_v47  ;;  %v6850_v38 = vsel %vm4657_vm11, 1.0, %v16602_v47  ;;  %v14624_v19 = vpop.permute.xlu0 %4570 }
 0x40a   :  { %v6851_v23 = vsel %vm4658_vm7, 1.0, %v16602_v47  ;;  %v6852_v9 = vsel %vm4659_vm8, 1.0, %v16602_v47  ;;  %vm4688_vm13 = vcmp.eq.s32.totalorder %v8289_v28, %v14542_v60  ;;  %vm4689_vm14 = vcmp.eq.s32.totalorder %v8298_v0, %v14542_v60  ;;  %4988 = vperm.xlu1 %7246, %v7461_v62  }
 0x40b   :  { %vm5008_vm15 = vcmp.eq.s32.totalorder %v8289_v28, %v4914_v31  ;;  %vm5009_vm0 = vcmp.eq.s32.totalorder %v8298_v0, %v4914_v31  ;;  %v4848_v6 = vadd.f32 %v6849_v45, %v4496_v52  ;;  %v4849_v32 = vadd.f32 %v6850_v38, %v4497_v10 }
 0x40c   :  { %v6916_v58 = vsel %vm5011_vm9, 1.0, %v16602_v47  ;;  %v6820_v12 = vsel %vm4339_vm12, 1.0, %v16602_v47  ;;  %v4530_v62 = vadd.f32 %v6819_v49, %v14481_v11  ;;  %vm5360_vm1 = vcmp.eq.s32.totalorder %v8289_v28, %v14190_v37  ;;  %v4965_v1 = vpop.permute.xlu1 %4964 }
 0x40d   :  { %vm5361_vm2 = vcmp.eq.s32.totalorder %v8298_v0, %v14190_v37  ;;  %vm5394_vm3 = vcmp.eq.s32.totalorder %v8289_v28, %v14230_v5  ;;  %v4850_v52 = vadd.f32 %v6851_v23, %v4498_v33  ;;  %v4851_v10 = vadd.f32 %v6852_v9, %v4499_v26  ;;  %v14660_v38 = vpop.permute.xlu0 %4576 }
 0x40e   :  { %vm4341_vm4 = vcmp.eq.s32.totalorder %v8298_v0, %v17670_v39  ;;  %v6881_v40 = vsel %vm4688_vm13, 1.0, %v16602_v47  ;;  %v6882_v11 = vsel %vm4689_vm14, 1.0, %v16602_v47  ;;  %v6913_v49 = vsel %vm5008_vm15, 1.0, %v16602_v47  ;;  %7247 = vset.pattern.permute.xlu1 %v17462_v57 }
 0x40f   :  { %v6914_v26 = vsel %vm5009_vm0, 1.0, %v16602_v47  ;;  %v4531_v33 = vadd.f32 %v6820_v12, %v14483_v51  ;;  %v5200_v45 = vadd.f32 %v6913_v49, %v4848_v6  ;;  %vm5040_vm5 = vcmp.eq.s32.totalorder %v8289_v28, %v4962_v35  ;;  %5292 = vperm.xlu1 %7247, %v13826_v48  }
 0x410   :  { %v5201_v60 = vadd.f32 %v6914_v26, %v4849_v32  ;;  %v6977_v23 = vsel %vm5360_vm1, 1.0, %v16602_v47  ;;  %v6978_v31 = vsel %vm5361_vm2, 1.0, %v16602_v47  ;;  %vm5395_vm6 = vcmp.eq.s32.totalorder %v8298_v0, %v14230_v5 }
 0x411   :  { %v7011_v12 = vsel %vm5394_vm3, 1.0, %v16602_v47  ;;  %v4880_v48 = vadd.f32 %v6881_v40, %v4528_v46  ;;  %v4881_v51 = vadd.f32 %v6882_v11, %v4529_v24  ;;  %v5202_v9 = vadd.f32 %v6915_v15, %v4850_v52  ;;  %v5269_v37 = vpop.permute.xlu1 %5268 }
 0x412   :  { %v5203_v6 = vadd.f32 %v6916_v58, %v4851_v10  ;;  %vm5041_vm7 = vcmp.eq.s32.totalorder %v8298_v0, %v4962_v35  ;;  %v6945_v32 = vsel %vm5040_vm5, 1.0, %v16602_v47  ;;  %vm5042_vm8 = vcmp.eq.s32.totalorder %v8289_v28, %v4965_v1  ;;  %v4613_v49 = vpop.permute.xlu0 %4612 }
 0x413   :  { %vm5043_vm9 = vcmp.eq.s32.totalorder %v8298_v0, %v4965_v1  ;;  %vm5362_vm10 = vcmp.eq.s32.totalorder %v8289_v28, %v5269_v37  ;;  %vm5363_vm11 = vcmp.eq.s32.totalorder %v8298_v0, %v5269_v37  ;;  %5337 = vperm.xlu1 %7247, %v14511_v42   ;;  %v5553_v46 = vadd.f32 %v6978_v31, %v5201_v60  ;;  %v17671_v37 = vld [vmem:[#allocation187_spill] sm:$0xff] }
 0x414   :  { %v5552_v24 = vadd.f32 %v6977_v23, %v5200_v45  ;;  %v6979_v15 = vsel %vm5362_vm10, 1.0, %v16602_v47  ;;  %vm4690_vm12 = vcmp.eq.s32.totalorder %v8289_v28, %v4613_v49  ;;  %vm4691_vm13 = vcmp.eq.s32.totalorder %v8298_v0, %v4613_v49 }
 0x415   :  { %v6980_v58 = vsel %vm5363_vm11, 1.0, %v16602_v47  ;;  %v5554_v52 = vadd.f32 %v6979_v15, %v5202_v9  ;;  %v6883_v10 = vsel %vm4690_vm12, 1.0, %v16602_v47  ;;  %v6884_v40 = vsel %vm4691_vm13, 1.0, %v16602_v47  ;;  %v5314_v23 = vpop.permute.xlu1 %5313 }
 0x416   :  { %v5555_v11 = vadd.f32 %v6980_v58, %v5203_v6  ;;  %v6946_v42 = vsel %vm5041_vm7, 1.0, %v16602_v47  ;;  %v6947_v26 = vsel %vm5042_vm8, 1.0, %v16602_v47  ;;  %v4882_v45 = vadd.f32 %v6883_v10, %v4530_v62  ;;  %v14698_v31 = vpop.permute.xlu0 %4618  ;;  %v17673_v10 = vld [vmem:[#allocation47_spill] sm:$0xff] }
 0x417   :  { %v4883_v60 = vadd.f32 %v6884_v40, %v4531_v33  ;;  %vm5392_vm14 = vcmp.eq.s32.totalorder %v8289_v28, %v5314_v23  ;;  %vm5393_vm15 = vcmp.eq.s32.totalorder %v8298_v0, %v5314_v23  ;;  %7248 = vset.pattern.permute.xlu1 %v17442_v29  ;;  %v5616_v6 = vpack.c.bf16 %v5554_v52, %v5552_v24 }
 0x418   :  { %v5617_v9 = vpack.c.bf16 %v5555_v11, %v5553_v46  ;;  %vm3960_vm0 = vcmp.eq.s32.totalorder %v8289_v28, %v17671_v37  ;;  %vm3961_vm1 = vcmp.eq.s32.totalorder %v8298_v0, %v17671_v37  ;;  %v7012_v35 = vsel %vm5395_vm6, 1.0, %v16602_v47  ;;  %v17672_v46 = vld [vmem:[#allocation163_spill] sm:$0xff] }
 0x419   :  { %v6948_v62 = vsel %vm5043_vm9, 1.0, %v16602_v47  ;;  %v5234_v33 = vadd.f32 %v6947_v26, %v4882_v45  ;;  %v7009_v49 = vsel %vm5392_vm14, 1.0, %v16602_v47  ;;  %4591 = vperm.xlu1 %7248, %v17672_v46   ;;  %v6822_v24 = vsel %vm4341_vm4, 1.0, %v16602_v47  ;;  %v17674_v45 = vld [vmem:[#allocation38_spill] sm:$0xff] }
 0x41a   :  { %v5232_v15 = vadd.f32 %v6945_v32, %v4880_v48  ;;  %5808 = vmatprep.mubr.bf16.mxu0 %v5617_v9  ;;  %v5233_v58 = vadd.f32 %v6946_v42, %v4881_v51  ;;  %v5235_v52 = vadd.f32 %v6948_v62, %v4883_v60  ;;  %v4181_v5 = vadd.f32 %v14584_v18, %v14297_v34  ;;  %v14727_v40 = vpop.permute.xlu0 %4621  ;;  %v4616_v48 = vpop.permute.xlu1 %4615  ;;  %v14736_v42 = vld [vmem:[%s15998_s0 + $0xd0] sm:$0xff]  ;;  %v17675_v9 = vld [vmem:[#allocation188_spill] sm:$0xff] }
 0x41b   :  { %vm5044_vm2 = vcmp.eq.s32.totalorder %v8289_v28, %v17673_v10  ;;  %vm5045_vm3 = vcmp.eq.s32.totalorder %v8298_v0, %v17673_v10  ;;  %5809 = vmatmul.mubr.bf16.vlgmr.msra.gmra.mrb[0].mxu0 %v5616_v6  ;;  %v7010_v1 = vsel %vm5393_vm15, 1.0, %v16602_v47  ;;  %v5586_v11 = vadd.f32 %v7011_v12, %v5234_v33  ;;  %v17676_v33 = vld [vmem:[#allocation159_spill] sm:$0xff] }
 0x41c   :  { %v5584_v39 = vadd.f32 %v7009_v49, %v5232_v15  ;;  %v5585_v51 = vadd.f32 %v7010_v1, %v5233_v58  ;;  %v5587_v32 = vadd.f32 %v7012_v35, %v5235_v52  ;;  %v4532_v34 = vadd.f32 %v14592_v27, %v14587_v53  ;;  %v14766_v49 = vld [vmem:[%s15998_s0 + $0xd8] sm:$0xff] }
 0x41d   :  { %v4533_v18 = vadd.f32 %v6822_v24, %v4181_v5  ;;  %vm4692_vm4 = vcmp.eq.s32.totalorder %v8289_v28, %v4616_v48  ;;  %vm4693_vm5 = vcmp.eq.s32.totalorder %v8298_v0, %v4616_v48  ;;  %4639 = vperm.xlu1 %7248, %v14736_v42   ;;  %v6949_v12 = vsel %vm5044_vm2, 1.0, %v16602_v47 }
 0x41e   :  { %v6950_v53 = vsel %vm5045_vm3, 1.0, %v16602_v47  ;;  %v6885_v27 = vsel %vm4692_vm4, 1.0, %v16602_v47  ;;  %v6886_v26 = vsel %vm4693_vm5, 1.0, %v16602_v47  ;;  %vm4328_vm6 = vcmp.eq.s32.totalorder %v8289_v28, %v17674_v45  ;;  %v14757_v62 = vpop.permute.xlu0 %4582 }
 0x41f   :  { %vm4329_vm7 = vcmp.eq.s32.totalorder %v8298_v0, %v17674_v45  ;;  %v4884_v60 = vadd.f32 %v6885_v27, %v4532_v34  ;;  %v4885_v23 = vadd.f32 %v6886_v26, %v4533_v18  ;;  %vm4308_vm8 = vcmp.eq.s32.totalorder %v8289_v28, %v17675_v9  ;;  %v4920_v46 = vpop.permute.xlu1 %4919 }
 0x420   :  { %vm4309_vm9 = vcmp.eq.s32.totalorder %v8298_v0, %v17675_v9  ;;  %v5633_v6 = vpack.c.bf16 %v5587_v32, %v5585_v51  ;;  %v5632_v35 = vpack.c.bf16 %v5586_v11, %v5584_v39  ;;  %vm4310_vm10 = vcmp.eq.s32.totalorder %v8289_v28, %v17676_v33 }
 0x421   :  { %vm4311_vm11 = vcmp.eq.s32.totalorder %v8298_v0, %v17676_v33  ;;  %4642 = vperm.xlu1 %7248, %v14766_v49   ;;  %v14769_v24 = vadd.f32 %v6949_v12, %v4884_v60  ;;  %v14771_v15 = vadd.f32 %v6950_v53, %v4885_v23  ;;  %v6809_v58 = vsel %vm4328_vm6, 1.0, %v16602_v47  ;;  %v7464_v12 = vld [vmem:[%s15998_s0 + $0x58] sm:$0xff] }
 0x422   :  { %v6810_v52 = vsel %vm4329_vm7, 1.0, %v16602_v47  ;;  %vm4342_vm12 = vcmp.eq.s32.totalorder %v8289_v28, %v14145_v20  ;;  %vm4343_vm13 = vcmp.eq.s32.totalorder %v8298_v0, %v14145_v20  ;;  %5872 = vmatprep.mubr.bf16.mxu1 %v5633_v6  ;;  %v4168_v5 = vadd.f32 %v14535_v61, %v14193_v17 }
 0x423   :  { %v4169_v10 = vadd.f32 %v14552_v50, %v14196_v3  ;;  %v6789_v1 = vsel %vm4308_vm8, 1.0, %v16602_v47  ;;  %v6790_v39 = vsel %vm4309_vm9, 1.0, %v16602_v47  ;;  %5873 = vmatmul.mubr.bf16.vlgmr.msra.gmra.mrb[0].mxu1 %v5632_v35  ;;  %v14801_v20 = vsel %vm3960_vm0, 1.0, %v16602_v47  ;;  %v14817_v50 = vpop.permute.xlu0 %4585  ;;  %v4923_v11 = vpop.permute.xlu1 %4922 }
 0x424   :  { %v14807_v17 = vsel %vm3961_vm1, 1.0, %v16602_v47  ;;  %v6791_v3 = vsel %vm4310_vm10, 1.0, %v16602_v47  ;;  %v6792_v61 = vsel %vm4311_vm11, 1.0, %v16602_v47  ;;  %v14819_v48 = vadd.f32 %v6809_v58, %v4168_v5 }
 0x425   :  { %v14821_v51 = vadd.f32 %v6810_v52, %v4169_v10  ;;  %v6823_v37 = vsel %vm4342_vm12, 1.0, %v16602_v47  ;;  %v6824_v32 = vsel %vm4343_vm13, 1.0, %v16602_v47  ;;  %7249 = vset.pattern.permute.xlu1 %v17434_v4  ;;  %v4500_v34 = vadd.f32 %v6789_v1, %v14517_v2 }
 0x426   :  { %v4501_v18 = vadd.f32 %v6790_v39, %v14526_v8  ;;  %vm4662_vm14 = vcmp.eq.s32.totalorder %v8289_v28, %v14624_v19  ;;  %vm4663_vm15 = vcmp.eq.s32.totalorder %v8298_v0, %v14624_v19  ;;  %4946 = vperm.xlu1 %7249, %v7464_v12   ;;  %v4502_v53 = vadd.f32 %v6791_v3, %v14422_v41 }
 0x427   :  { %v4503_v27 = vadd.f32 %v6792_v61, %v14424_v36  ;;  %vm4660_vm0 = vcmp.eq.s32.totalorder %v8289_v28, %v14467_v13  ;;  %vm4661_vm1 = vcmp.eq.s32.totalorder %v8298_v0, %v14467_v13  ;;  %v14842_v2 = vadd.f32 %v6823_v37, %v14493_v16  ;;  %v14849_v19 = vpop.permute.xlu0 %4636  ;;  %v4971_v13 = vpop.permute.xlu1 %4970  ;;  %v7465_v61 = vld [vmem:[%s15998_s0 + $0x50] sm:$0xff] }
 0x428   :  { %v14845_v8 = vadd.f32 %v6824_v32, %v14495_v25  ;;  %vm5014_vm2 = vcmp.eq.s32.totalorder %v8289_v28, %v4923_v11  ;;  %vm5015_vm3 = vcmp.eq.s32.totalorder %v8298_v0, %v4923_v11  ;;  %v6855_v36 = vsel %vm4662_vm14, 1.0, %v16602_v47 }
 0x429   :  { %v6856_v41 = vsel %vm4663_vm15, 1.0, %v16602_v47  ;;  %vm5012_vm4 = vcmp.eq.s32.totalorder %v8289_v28, %v4920_v46  ;;  %vm5013_vm5 = vcmp.eq.s32.totalorder %v8298_v0, %v4920_v46  ;;  %vm5366_vm6 = vcmp.eq.s32.totalorder %v8289_v28, %v14281_v59 }
 0x42a   :  { %vm5367_vm7 = vcmp.eq.s32.totalorder %v8298_v0, %v14281_v59  ;;  %v6853_v16 = vsel %vm4660_vm0, 1.0, %v16602_v47  ;;  %v6854_v25 = vsel %vm4661_vm1, 1.0, %v16602_v47  ;;  %4991 = vperm.xlu1 %7249, %v14736_v42   ;;  %vm4694_vm8 = vcmp.eq.s32.totalorder %v8289_v28, %v14698_v31 }
 0x42b   :  { %vm4695_vm9 = vcmp.eq.s32.totalorder %v8298_v0, %v14698_v31  ;;  %v6919_v26 = vsel %vm5014_vm2, 1.0, %v16602_v47  ;;  %v6920_v45 = vsel %vm5015_vm3, 1.0, %v16602_v47  ;;  %v4854_v60 = vadd.f32 %v6855_v36, %v4502_v53  ;;  %v14870_v6 = vpop.permute.xlu0 %4594 }
 0x42c   :  { %v4855_v23 = vadd.f32 %v6856_v41, %v4503_v27  ;;  %v6917_v59 = vsel %vm5012_vm4, 1.0, %v16602_v47  ;;  %v6918_v9 = vsel %vm5013_vm5, 1.0, %v16602_v47  ;;  %v6983_v35 = vsel %vm5366_vm6, 1.0, %v16602_v47  ;;  %v5272_v1 = vpop.permute.xlu1 %5271 }
 0x42d   :  { %v6984_v33 = vsel %vm5367_vm7, 1.0, %v16602_v47  ;;  %v4852_v46 = vadd.f32 %v6853_v16, %v4500_v34  ;;  %v4853_v58 = vadd.f32 %v6854_v25, %v4501_v18  ;;  %v6887_v31 = vsel %vm4694_vm8, 1.0, %v16602_v47 }
 0x42e   :  { %v6888_v52 = vsel %vm4695_vm9, 1.0, %v16602_v47  ;;  %v5206_v5 = vadd.f32 %v6919_v26, %v4854_v60  ;;  %v5207_v10 = vadd.f32 %v6920_v45, %v4855_v23  ;;  %7250 = vset.pattern.permute.xlu1 %v17462_v57  ;;  %vm5364_vm10 = vcmp.eq.s32.totalorder %v8289_v28, %v5272_v1 }
 0x42f   :  { %v5204_v39 = vadd.f32 %v6917_v59, %v4852_v46  ;;  %v5205_v3 = vadd.f32 %v6918_v9, %v4853_v58  ;;  %vm5365_vm11 = vcmp.eq.s32.totalorder %v8298_v0, %v5272_v1  ;;  %5295 = vperm.xlu1 %7250, %v7465_v61   ;;  %vm5046_vm12 = vcmp.eq.s32.totalorder %v8289_v28, %v4971_v13  ;;  %v4598_v11 = vpop.permute.xlu0 %4597  ;;  %v17677_v9 = vld [vmem:[#allocation52_spill] sm:$0xff]  ;;  %v17681_v61 = vld [vmem:[#allocation73_spill] sm:$0xff] }
 0x430   :  { %vm5047_vm13 = vcmp.eq.s32.totalorder %v8298_v0, %v4971_v13  ;;  %v6981_v37 = vsel %vm5364_vm10, 1.0, %v16602_v47  ;;  %v6982_v32 = vsel %vm5365_vm11, 1.0, %v16602_v47  ;;  %vm4680_vm14 = vcmp.eq.s32.totalorder %v8289_v28, %v4598_v11  ;;  %v5320_v41 = vpop.permute.xlu1 %5319 }
 0x431   :  { %v5556_v34 = vadd.f32 %v6981_v37, %v5204_v39  ;;  %v5557_v18 = vadd.f32 %v6982_v32, %v5205_v3  ;;  %vm4681_vm15 = vcmp.eq.s32.totalorder %v8298_v0, %v4598_v11  ;;  %v5558_v12 = vadd.f32 %v6983_v35, %v5206_v5  ;;  %v17680_v5 = vld [vmem:[#allocation48_spill] sm:$0xff] }
 0x432   :  { %v5559_v53 = vadd.f32 %v6984_v33, %v5207_v10  ;;  %v6873_v27 = vsel %vm4680_vm14, 1.0, %v16602_v47  ;;  %v6874_v36 = vsel %vm4681_vm15, 1.0, %v16602_v47  ;;  %vm5396_vm0 = vcmp.eq.s32.totalorder %v8289_v28, %v5320_v41 }
 0x433   :  { %v14891_v16 = vadd.f32 %v6873_v27, %v14819_v48  ;;  %v14894_v25 = vadd.f32 %v6874_v36, %v14821_v51  ;;  %vm5397_vm1 = vcmp.eq.s32.totalorder %v8298_v0, %v5320_v41  ;;  %5343 = vperm.xlu1 %7250, %v14736_v42   ;;  %v6951_v26 = vsel %vm5046_vm12, 1.0, %v16602_v47 }
 0x434   :  { %v6952_v45 = vsel %vm5047_vm13, 1.0, %v16602_v47  ;;  %v5619_v60 = vpack.c.bf16 %v5559_v53, %v5557_v18  ;;  %v5618_v48 = vpack.c.bf16 %v5558_v12, %v5556_v34  ;;  %v4152_v51 = vadd.f32 %v14801_v20, %v14052_v44  ;;  %v5323_v33 = vpop.permute.xlu1 %5322  ;;  %v14964_v18 = vld [vmem:[%s15998_s0 + $0x68] sm:$0xff] }
 0x435   :  { %v4153_v23 = vadd.f32 %v14807_v17, %v14055_v7  ;;  %v4886_v59 = vadd.f32 %v6887_v31, %v14842_v2  ;;  %v4887_v42 = vadd.f32 %v6888_v52, %v14845_v8  ;;  %vm4312_vm2 = vcmp.eq.s32.totalorder %v8289_v28, %v17677_v9  ;;  %v17678_v7 = vld [vmem:[#allocation85_spill] sm:$0xff]  ;;  %v17679_v52 = vld [vmem:[#allocation10_spill] sm:$0xff] }
 0x436   :  { %vm4313_vm3 = vcmp.eq.s32.totalorder %v8298_v0, %v17677_v9  ;;  %v7013_v13 = vsel %vm5396_vm0, 1.0, %v16602_v47  ;;  %v7014_v35 = vsel %vm5397_vm1, 1.0, %v16602_v47  ;;  %5816 = vmatprep.mubr.bf16.mxu0 %v5619_v60  ;;  %vm5398_vm4 = vcmp.eq.s32.totalorder %v8289_v28, %v5323_v33 }
 0x437   :  { %v5238_v44 = vadd.f32 %v6951_v26, %v4886_v59  ;;  %v5239_v20 = vadd.f32 %v6952_v45, %v4887_v42  ;;  %vm5399_vm5 = vcmp.eq.s32.totalorder %v8298_v0, %v5323_v33  ;;  %5817 = vmatmul.mubr.bf16.gmra.mrb[4].mxu0 %v5618_v48  ;;  %vm3992_vm6 = vcmp.eq.s32.totalorder %v8289_v28, %v17678_v7  ;;  %v17682_v45 = vld [vmem:[#allocation106_spill] sm:$0xff] }
 0x438   :  { %vm3993_vm7 = vcmp.eq.s32.totalorder %v8298_v0, %v17678_v7  ;;  %v7015_v17 = vsel %vm5398_vm4, 1.0, %v16602_v47  ;;  %v7016_v2 = vsel %vm5399_vm5, 1.0, %v16602_v47  ;;  %5346 = vperm.xlu1 %7250, %v14766_v49   ;;  %v5588_v8 = vadd.f32 %v7013_v13, %v14769_v24 }
 0x439   :  { %v5589_v46 = vadd.f32 %v7014_v35, %v14771_v15  ;;  %v5590_v58 = vadd.f32 %v7015_v17, %v5238_v44  ;;  %v5591_v31 = vadd.f32 %v7016_v2, %v5239_v20  ;;  %vm3964_vm8 = vcmp.eq.s32.totalorder %v8289_v28, %v17679_v52  ;;  %v14938_v10 = vpop.permute.xlu1 %4624  ;;  %v17683_v44 = vld [vmem:[#allocation194_spill] sm:$0xff]  ;;  %v17684_v20 = vld [vmem:[#allocation53_spill] sm:$0xff] }
 0x43a   :  { %vm3965_vm9 = vcmp.eq.s32.totalorder %v8298_v0, %v17679_v52  ;;  %vm4344_vm10 = vcmp.eq.s32.totalorder %v8289_v28, %v17680_v5  ;;  %vm4345_vm11 = vcmp.eq.s32.totalorder %v8298_v0, %v17680_v5  ;;  %v6761_v49 = vsel %vm3992_vm6, 1.0, %v16602_v47 }
 0x43b   :  { %v6762_v24 = vsel %vm3993_vm7, 1.0, %v16602_v47  ;;  %v5635_v15 = vpack.c.bf16 %v5591_v31, %v5589_v46  ;;  %v5634_v1 = vpack.c.bf16 %v5590_v58, %v5588_v8  ;;  %v6793_v39 = vsel %vm4312_vm2, 1.0, %v16602_v47 }
 0x43c   :  { %v6794_v3 = vsel %vm4313_vm3, 1.0, %v16602_v47  ;;  %vm4314_vm12 = vcmp.eq.s32.totalorder %v8289_v28, %v17681_v61  ;;  %vm4315_vm13 = vcmp.eq.s32.totalorder %v8298_v0, %v17681_v61  ;;  %7251 = vset.pattern.permute.xlu1 %v17442_v29  ;;  %v14954_v37 = vsel %vm3964_vm8, 1.0, %v16602_v47 }
 0x43d   :  { %v14957_v32 = vsel %vm3965_vm9, 1.0, %v16602_v47  ;;  %v6825_v11 = vsel %vm4344_vm10, 1.0, %v16602_v47  ;;  %v6826_v34 = vsel %vm4345_vm11, 1.0, %v16602_v47  ;;  %4600 = vperm.xlu1 %7251, %v14964_v18   ;;  %5880 = vmatprep.mubr.bf16.mxu1 %v5635_v15  ;;  %v4184_v12 = vadd.f32 %v6761_v49, %v14342_v63 }
 0x43e   :  { %v4185_v53 = vadd.f32 %v6762_v24, %v14345_v55  ;;  %vm4346_vm14 = vcmp.eq.s32.totalorder %v8289_v28, %v14202_v21  ;;  %vm4347_vm15 = vcmp.eq.s32.totalorder %v8298_v0, %v14202_v21  ;;  %5881 = vmatmul.mubr.bf16.gmra.mrb[4].mxu1 %v5634_v1  ;;  %v4504_v27 = vadd.f32 %v6793_v39, %v4152_v51  ;;  %v4926_v21 = vpop.permute.xlu1 %4925  ;;  %v14994_v51 = vld [vmem:[%s15998_s0 + $0xe0] sm:$0xff] }
 0x43f   :  { %v4505_v36 = vadd.f32 %v6794_v3, %v4153_v23  ;;  %v6795_v41 = vsel %vm4314_vm12, 1.0, %v16602_v47  ;;  %v6796_v63 = vsel %vm4315_vm13, 1.0, %v16602_v47  ;;  %v4536_v55 = vadd.f32 %v6825_v11, %v4184_v12 }
 0x440   :  { %v4537_v26 = vadd.f32 %v6826_v34, %v4185_v53  ;;  %vm5018_vm0 = vcmp.eq.s32.totalorder %v8289_v28, %v17682_v45  ;;  %vm5019_vm1 = vcmp.eq.s32.totalorder %v8298_v0, %v17682_v45  ;;  %v6827_v60 = vsel %vm4346_vm14, 1.0, %v16602_v47 }
 0x441   :  { %v6828_v48 = vsel %vm4347_vm15, 1.0, %v16602_v47  ;;  %vm5368_vm2 = vcmp.eq.s32.totalorder %v8289_v28, %v14319_v54  ;;  %vm5369_vm3 = vcmp.eq.s32.totalorder %v8298_v0, %v14319_v54  ;;  %4645 = vperm.xlu1 %7251, %v14994_v51   ;;  %v4506_v23 = vadd.f32 %v6795_v41, %v14429_v56  ;;  %v7469_v41 = vld [vmem:[%s15998_s0 + $0xe8] sm:$0xff] }
 0x442   :  { %v4507_v59 = vadd.f32 %v6796_v63, %v14438_v30  ;;  %vm4666_vm4 = vcmp.eq.s32.totalorder %v8289_v28, %v14660_v38  ;;  %vm4667_vm5 = vcmp.eq.s32.totalorder %v8298_v0, %v14660_v38  ;;  %v6923_v42 = vsel %vm5018_vm0, 1.0, %v16602_v47  ;;  %v4974_v35 = vpop.permute.xlu1 %4973 }
 0x443   :  { %v6924_v54 = vsel %vm5019_vm1, 1.0, %v16602_v47  ;;  %vm4664_vm6 = vcmp.eq.s32.totalorder %v8289_v28, %v14499_v43  ;;  %vm4665_vm7 = vcmp.eq.s32.totalorder %v8298_v0, %v14499_v43  ;;  %v4538_v56 = vadd.f32 %v6827_v60, %v14502_v14 }
 0x444   :  { %v4539_v30 = vadd.f32 %v6828_v48, %v14514_v22  ;;  %v6985_v9 = vsel %vm5368_vm2, 1.0, %v16602_v47  ;;  %v6986_v13 = vsel %vm5369_vm3, 1.0, %v16602_v47  ;;  %v6859_v38 = vsel %vm4666_vm4, 1.0, %v16602_v47  ;;  %v7468_v22 = vld [vmem:[%s15998_s0 + $0x60] sm:$0xff] }
 0x445   :  { %v6860_v33 = vsel %vm4667_vm5, 1.0, %v16602_v47  ;;  %vm5016_vm8 = vcmp.eq.s32.totalorder %v8289_v28, %v4926_v21  ;;  %vm5017_vm9 = vcmp.eq.s32.totalorder %v8298_v0, %v4926_v21  ;;  %7252 = vset.pattern.permute.xlu1 %v17434_v4  ;;  %v6857_v43 = vsel %vm4664_vm6, 1.0, %v16602_v47 }
 0x446   :  { %v6858_v14 = vsel %vm4665_vm7, 1.0, %v16602_v47  ;;  %vm4696_vm10 = vcmp.eq.s32.totalorder %v8289_v28, %v14727_v40  ;;  %vm4697_vm11 = vcmp.eq.s32.totalorder %v8298_v0, %v14727_v40  ;;  %4949 = vperm.xlu1 %7252, %v7468_v22   ;;  %vm5402_vm12 = vcmp.eq.s32.totalorder %v8289_v28, %v17683_v44  ;;  %v4977_v46 = vpop.permute.xlu1 %4976 }
 0x447   :  { %vm5403_vm13 = vcmp.eq.s32.totalorder %v8298_v0, %v17683_v44  ;;  %vm4698_vm14 = vcmp.eq.s32.totalorder %v8289_v28, %v14938_v10  ;;  %vm4699_vm15 = vcmp.eq.s32.totalorder %v8298_v0, %v14938_v10  ;;  %vm4316_vm0 = vcmp.eq.s32.totalorder %v8289_v28, %v17684_v20 }
 0x448   :  { %vm4317_vm1 = vcmp.eq.s32.totalorder %v8298_v0, %v17684_v20  ;;  %v4858_v7 = vadd.f32 %v6859_v38, %v4506_v23  ;;  %v4859_v17 = vadd.f32 %v6860_v33, %v4507_v59  ;;  %v6921_v2 = vsel %vm5016_vm8, 1.0, %v16602_v47  ;;  %v17688_v20 = vld [vmem:[#allocation34_spill] sm:$0xff] }
 0x449   :  { %v6922_v8 = vsel %vm5017_vm9, 1.0, %v16602_v47  ;;  %v4856_v58 = vadd.f32 %v6857_v43, %v4504_v27  ;;  %v4857_v31 = vadd.f32 %v6858_v14, %v4505_v36  ;;  %v6889_v52 = vsel %vm4696_vm10, 1.0, %v16602_v47 }
 0x44a   :  { %v6890_v5 = vsel %vm4697_vm11, 1.0, %v16602_v47  ;;  %v6891_v49 = vsel %vm4698_vm14, 1.0, %v16602_v47  ;;  %v6892_v24 = vsel %vm4699_vm15, 1.0, %v16602_v47  ;;  %vm5050_vm2 = vcmp.eq.s32.totalorder %v8289_v28, %v4977_v46  ;;  %4997 = vperm.xlu1 %7252, %v14994_v51  }
 0x44b   :  { %vm5051_vm3 = vcmp.eq.s32.totalorder %v8298_v0, %v4977_v46  ;;  %v5208_v10 = vadd.f32 %v6921_v2, %v4856_v58  ;;  %v5209_v15 = vadd.f32 %v6922_v8, %v4857_v31  ;;  %vm5048_vm4 = vcmp.eq.s32.totalorder %v8289_v28, %v4974_v35  ;;  %v5281_v53 = vpop.permute.xlu1 %5280  ;;  %v17686_v8 = vld [vmem:[#allocation93_spill] sm:$0xff]  ;;  %v17687_v58 = vld [vmem:[#allocation90_spill] sm:$0xff] }
 0x44c   :  { %vm5049_vm5 = vcmp.eq.s32.totalorder %v8298_v0, %v4974_v35  ;;  %v4888_v1 = vadd.f32 %v6889_v52, %v4536_v55  ;;  %v4889_v39 = vadd.f32 %v6890_v5, %v4537_v26  ;;  %v5210_v40 = vadd.f32 %v6923_v42, %v4858_v7 }
 0x44d   :  { %v5211_v3 = vadd.f32 %v6924_v54, %v4859_v17  ;;  %v4890_v61 = vadd.f32 %v6891_v49, %v4538_v56  ;;  %v4891_v11 = vadd.f32 %v6892_v24, %v4539_v30  ;;  %v6955_v34 = vsel %vm5050_vm2, 1.0, %v16602_v47  ;;  %v17685_v17 = vld [vmem:[#allocation92_spill] sm:$0xff] }
 0x44e   :  { %v6956_v12 = vsel %vm5051_vm3, 1.0, %v16602_v47  ;;  %v6953_v27 = vsel %vm5048_vm4, 1.0, %v16602_v47  ;;  %v6954_v36 = vsel %vm5049_vm5, 1.0, %v16602_v47  ;;  %5000 = vperm.xlu1 %7252, %v7469_v41   ;;  %vm5370_vm6 = vcmp.eq.s32.totalorder %v8289_v28, %v5281_v53 }
 0x44f   :  { %vm5371_vm7 = vcmp.eq.s32.totalorder %v8298_v0, %v5281_v53  ;;  %v5560_v63 = vadd.f32 %v6985_v9, %v5208_v10  ;;  %v5561_v55 = vadd.f32 %v6986_v13, %v5209_v15  ;;  %v6987_v26 = vsel %vm5370_vm6, 1.0, %v16602_v47  ;;  %v5326_v30 = vpop.permute.xlu1 %5325  ;;  %v17689_v15 = vld [vmem:[#allocation114_spill] sm:$0xff] }
 0x450   :  { %v6988_v45 = vsel %vm5371_vm7, 1.0, %v16602_v47  ;;  %v5242_v21 = vadd.f32 %v6955_v34, %v4890_v61  ;;  %v5243_v60 = vadd.f32 %v6956_v12, %v4891_v11  ;;  %v5562_v48 = vadd.f32 %v6987_v26, %v5210_v40  ;;  %v17691_v40 = vld [vmem:[#allocation201_spill] sm:$0xff]  ;;  %v17692_v61 = vld [vmem:[#allocation66_spill] sm:$0xff] }
 0x451   :  { %v5563_v23 = vadd.f32 %v6988_v45, %v5211_v3  ;;  %v7019_v59 = vsel %vm5402_vm12, 1.0, %v16602_v47  ;;  %v7020_v42 = vsel %vm5403_vm13, 1.0, %v16602_v47  ;;  %v5240_v54 = vadd.f32 %v6953_v27, %v4888_v1  ;;  %v17693_v11 = vld [vmem:[#allocation202_spill] sm:$0xff]  ;;  %v17695_v27 = vld [vmem:[#allocation119_spill] sm:$0xff] }
 0x452   :  { %v5241_v56 = vadd.f32 %v6954_v36, %v4889_v39  ;;  %7253 = vset.pattern.permute.xlu1 %v17462_v57  ;;  %vm5400_vm8 = vcmp.eq.s32.totalorder %v8289_v28, %v5326_v30  ;;  %vm5401_vm9 = vcmp.eq.s32.totalorder %v8298_v0, %v5326_v30  ;;  %v5620_v13 = vpack.c.bf16 %v5562_v48, %v5560_v63  ;;  %v17690_v39 = vld [vmem:[#allocation174_spill] sm:$0xff]  ;;  %v15154_v45 = vld [vmem:[%s15998_s0 + $0x70] sm:$0xff]  ;;  %v17696_v48 = vld [vmem:[#allocation189_spill] sm:$0xff] }
 0x453   :  { %v5621_v9 = vpack.c.bf16 %v5563_v23, %v5561_v55  ;;  %v6797_v35 = vsel %vm4316_vm0, 1.0, %v16602_v47  ;;  %v6798_v38 = vsel %vm4317_vm1, 1.0, %v16602_v47  ;;  %v7017_v33 = vsel %vm5400_vm8, 1.0, %v16602_v47  ;;  %5304 = vperm.xlu1 %7253, %v14964_v18   ;;  %v17694_v12 = vld [vmem:[#allocation166_spill] sm:$0xff] }
 0x454   :  { %v7018_v43 = vsel %vm5401_vm9, 1.0, %v16602_v47  ;;  %v5594_v14 = vadd.f32 %v7019_v59, %v5242_v21  ;;  %v5595_v22 = vadd.f32 %v7020_v42, %v5243_v60  ;;  %v5592_v44 = vadd.f32 %v7017_v33, %v5240_v54  ;;  %v4580_v18 = vpop.permute.xlu1 %4579  ;;  %v17697_v42 = vld [vmem:[#allocation21_spill] sm:$0xff] }
 0x455   :  { %v5593_v7 = vadd.f32 %v7018_v43, %v5241_v56  ;;  %5824 = vmatprep.mubr.bf16.mxu0 %v5621_v9  ;;  %v4156_v2 = vadd.f32 %v14954_v37, %v17685_v17  ;;  %v4157_v46 = vadd.f32 %v14957_v32, %v17686_v8  ;;  %vm5020_vm10 = vcmp.eq.s32.totalorder %v8289_v28, %v17687_v58  ;;  %v17698_v56 = vld [vmem:[#allocation184_spill] sm:$0xff]  ;;  %v17699_v9 = vld [vmem:[#allocation69_spill] sm:$0xff] }
 0x456   :  { %vm5021_vm11 = vcmp.eq.s32.totalorder %v8298_v0, %v17687_v58  ;;  %5825 = vmatmul.mubr.bf16.gmra.mrb[8].mxu0 %v5620_v13  ;;  %vm3618_vm12 = vcmp.eq.s32.totalorder %v8289_v28, %v17688_v20  ;;  %vm3619_vm13 = vcmp.eq.s32.totalorder %v8298_v0, %v17688_v20  ;;  %v5636_v52 = vpack.c.bf16 %v5594_v14, %v5592_v44  ;;  %v17700_v14 = vld [vmem:[#allocation9_spill] sm:$0xff]  ;;  %v17701_v44 = vld [vmem:[#allocation186_spill] sm:$0xff]  ;;  %v17702_v17 = vld [vmem:[#allocation8_spill] sm:$0xff] }
 0x457   :  { %v5637_v31 = vpack.c.bf16 %v5595_v22, %v5593_v7  ;;  %v4508_v37 = vadd.f32 %v6797_v35, %v4156_v2  ;;  %v4509_v5 = vadd.f32 %v6798_v38, %v4157_v46  ;;  %5349 = vperm.xlu1 %7253, %v14994_v51   ;;  %vm4668_vm14 = vcmp.eq.s32.totalorder %v8289_v28, %v4580_v18  ;;  %v15190_v22 = vld [vmem:[%s15998_s0 + $0xf0] sm:$0xff]  ;;  %v17703_v58 = vld [vmem:[#allocation156_spill] sm:$0xff] }
 0x458   :  { %vm4669_vm15 = vcmp.eq.s32.totalorder %v8298_v0, %v4580_v18  ;;  %v6925_v32 = vsel %vm5020_vm10, 1.0, %v16602_v47  ;;  %v6926_v49 = vsel %vm5021_vm11, 1.0, %v16602_v47  ;;  %v6861_v24 = vsel %vm4668_vm14, 1.0, %v16602_v47  ;;  %v15124_v53 = vpop.permute.xlu1 %4627 }
 0x459   :  { %v6862_v10 = vsel %vm4669_vm15, 1.0, %v16602_v47  ;;  %5888 = vmatprep.mubr.bf16.mxu1 %v5637_v31  ;;  %vm3966_vm0 = vcmp.eq.s32.totalorder %v8289_v28, %v17689_v15  ;;  %vm3967_vm1 = vcmp.eq.s32.totalorder %v8298_v0, %v17689_v15  ;;  %v4860_v51 = vadd.f32 %v6861_v24, %v4508_v37 }
 0x45a   :  { %v4861_v1 = vadd.f32 %v6862_v10, %v4509_v5  ;;  %5889 = vmatmul.mubr.bf16.gmra.mrb[8].mxu1 %v5636_v52  ;;  %v3806_v3 = vadd.f32 %v17691_v40, %v17690_v39  ;;  %v3807_v34 = vadd.f32 %v17693_v11, %v17692_v61  ;;  %vm3652_vm2 = vcmp.eq.s32.totalorder %v8289_v28, %v17694_v12  ;;  %v17704_v5 = vld [vmem:[#allocation115_spill] sm:$0xff]  ;;  %v15212_v10 = vld [vmem:[%s15998_s0 + $0xf8] sm:$0xff]  ;;  %v17707_v61 = vld [vmem:[#allocation94_spill] sm:$0xff] }
 0x45b   :  { %vm3653_vm3 = vcmp.eq.s32.totalorder %v8298_v0, %v17694_v12  ;;  %vm3646_vm4 = vcmp.eq.s32.totalorder %v8289_v28, %v17695_v27  ;;  %vm3647_vm5 = vcmp.eq.s32.totalorder %v8298_v0, %v17695_v27  ;;  %7255 = vset.pattern.permute.xlu1 %v17442_v29  ;;  %v15131_v36 = vadd.f32 %v6925_v32, %v4860_v51  ;;  %v17708_v27 = vld [vmem:[#allocation33_spill] sm:$0xff] }
 0x45c   :  { %v15133_v41 = vadd.f32 %v6926_v49, %v4861_v1  ;;  %v6675_v63 = vsel %vm3618_vm12, 1.0, %v16602_v47  ;;  %v6676_v55 = vsel %vm3619_vm13, 1.0, %v16602_v47  ;;  %v6735_v26 = vsel %vm3966_vm0, 1.0, %v16602_v47  ;;  %4603 = vperm.xlu1 %7255, %v15154_v45   ;;  %v15173_v54 = vpop.permute.xlu1 %4630  ;;  %v17705_v49 = vld [vmem:[#allocation169_spill] sm:$0xff] }
 0x45d   :  { %v6736_v29 = vsel %vm3967_vm1, 1.0, %v16602_v47  ;;  %v15158_v21 = vsel %vm3652_vm2, 1.0, %v16602_v47  ;;  %v15161_v60 = vsel %vm3653_vm3, 1.0, %v16602_v47  ;;  %vm3998_vm6 = vcmp.eq.s32.totalorder %v8289_v28, %v17696_v48 }
 0x45e   :  { %vm3999_vm7 = vcmp.eq.s32.totalorder %v8298_v0, %v17696_v48  ;;  %v6703_v23 = vsel %vm3646_vm4, 1.0, %v16602_v47  ;;  %v6704_v59 = vsel %vm3647_vm5, 1.0, %v16602_v47  ;;  %vm3996_vm8 = vcmp.eq.s32.totalorder %v8289_v28, %v17697_v42 }
 0x45f   :  { %vm3997_vm9 = vcmp.eq.s32.totalorder %v8298_v0, %v17697_v42  ;;  %v15176_v30 = vadd.f32 %v6675_v63, %v17698_v56  ;;  %v15179_v13 = vadd.f32 %v6676_v55, %v17699_v9  ;;  %v4158_v35 = vadd.f32 %v6735_v26, %v3806_v3  ;;  %v17706_v3 = vld [vmem:[#allocation61_spill] sm:$0xff] }
 0x460   :  { %v4159_v38 = vadd.f32 %v6736_v29, %v3807_v34  ;;  %v6767_v33 = vsel %vm3998_vm6, 1.0, %v16602_v47  ;;  %v6768_v43 = vsel %vm3999_vm7, 1.0, %v16602_v47  ;;  %vm4318_vm10 = vcmp.eq.s32.totalorder %v8289_v28, %v17700_v14  ;;  %4651 = vperm.xlu1 %7255, %v15190_v22  }
 0x461   :  { %vm4319_vm11 = vcmp.eq.s32.totalorder %v8298_v0, %v17700_v14  ;;  %v3838_v7 = vadd.f32 %v6703_v23, %v17701_v44  ;;  %v3839_v2 = vadd.f32 %v6704_v59, %v17702_v17  ;;  %v6765_v8 = vsel %vm3996_vm8, 1.0, %v16602_v47  ;;  %v4935_v37 = vpop.permute.xlu1 %4934  ;;  %v7473_v59 = vld [vmem:[%s15998_s0 + $0x78] sm:$0xff]  ;;  %s7515_s0 = smov [#allocation2]  }
 0x462   :  { %v6766_v46 = vsel %vm3997_vm9, 1.0, %v16602_v47  ;;  %vm4348_vm12 = vcmp.eq.s32.totalorder %v8289_v28, %v17703_v58  ;;  %vm4349_vm13 = vcmp.eq.s32.totalorder %v8298_v0, %v17703_v58  ;;  %vm4670_vm14 = vcmp.eq.s32.totalorder %v8289_v28, %v14757_v62  ;;  %s6006_s6 = sshll.u32 %s7515_s0, 4  ;;  %s6007_s6 = int_to_ptr.vmem [resolvable:$true] %s6006_s6 }
 0x463   :  { %vm4671_vm15 = vcmp.eq.s32.totalorder %v8298_v0, %v14757_v62  ;;  %v4190_v20 = vadd.f32 %v6767_v33, %v3838_v7  ;;  %v4191_v18 = vadd.f32 %v6768_v43, %v3839_v2  ;;  %v6799_v31 = vsel %vm4318_vm10, 1.0, %v16602_v47  ;;  %s7474_s7 = scalar_lea.vmem %s6007_s6, 4096  ;;  %p7479_p1 = scmp.lt.s32.totalorder %s6007_s6, %s6007_s6 }
 0x464   :  { %v6800_v52 = vsel %vm4319_vm11, 1.0, %v16602_v47  ;;  %v4188_v32 = vadd.f32 %v6765_v8, %v17704_v5  ;;  %v4189_v24 = vadd.f32 %v6766_v46, %v17705_v49  ;;  %4654 = vperm.xlu1 %7255, %v15212_v10   ;;  %vm5022_vm0 = vcmp.eq.s32.totalorder %v8289_v28, %v4935_v37  ;;  %v17709_v46 = vld [vmem:[#allocation117_spill] sm:$0xff]  ;;  %p7475_p0 = scmp.ne.s32.totalorder %s6007_s6, %s7474_s7  ;;  %p7480_p2 = scmp.lt.s32.totalorder %s7474_s7, %s7474_s7 }
 0x465   :  { %vm5023_vm1 = vcmp.eq.s32.totalorder %v8298_v0, %v4935_v37  ;;  %v6829_v62 = vsel %vm4348_vm12, 1.0, %v16602_v47  ;;  %v6830_v15 = vsel %vm4349_vm13, 1.0, %v16602_v47  ;;  %v6863_v51 = vsel %vm4670_vm14, 1.0, %v16602_v47  ;;  %v4980_v12 = vpop.permute.xlu1 %4979  ;;  %v17711_v49 = vld [vmem:[#allocation45_spill] sm:$0xff] }
 0x466   :  { %v6864_v1 = vsel %vm4671_vm15, 1.0, %v16602_v47  ;;  %v4510_v39 = vadd.f32 %v6799_v31, %v4158_v35  ;;  %v4511_v40 = vadd.f32 %v6800_v52, %v4159_v38  ;;  %vm4350_vm2 = vcmp.eq.s32.totalorder %v8289_v28, %v17706_v3  ;;  %p7481_p3 = por %p7480_p2, %p7479_p1 }
 0x467   :  { %vm4351_vm3 = vcmp.eq.s32.totalorder %v8298_v0, %v17706_v3  ;;  %vm5054_vm4 = vcmp.eq.s32.totalorder %v8289_v28, %v17707_v61  ;;  %vm5055_vm5 = vcmp.eq.s32.totalorder %v8298_v0, %v17707_v61  ;;  %v6927_v11 = vsel %vm5022_vm0, 1.0, %v16602_v47 }
 0x468   :  { %v6928_v34 = vsel %vm5023_vm1, 1.0, %v16602_v47  ;;  %vm5374_vm6 = vcmp.eq.s32.totalorder %v8289_v28, %v17708_v27  ;;  %vm5375_vm7 = vcmp.eq.s32.totalorder %v8298_v0, %v17708_v27  ;;  %v4862_v63 = vadd.f32 %v6863_v51, %v4510_v39  ;;  %7257 = vset.pattern.permute.xlu1 %v17434_v4  ;;  %p7482_p4 = pnand %p7481_p3, %p7475_p0 }
 0x469   :  { %v4863_v55 = vadd.f32 %v6864_v1, %v4511_v40  ;;  %v4540_v26 = vadd.f32 %v6829_v62, %v4188_v32  ;;  %v4541_v29 = vadd.f32 %v6830_v15, %v4189_v24  ;;  %v6831_v48 = vsel %vm4350_vm2, 1.0, %v16602_v47  ;;  %4958 = vperm.xlu1 %7257, %v7473_v59   ;;  %v17710_v32 = vld [vmem:[#allocation20_spill] sm:$0xff] }
 0x46a   :  { %v6832_v23 = vsel %vm4351_vm3, 1.0, %v16602_v47  ;;  %vm4702_vm8 = vcmp.eq.s32.totalorder %v8289_v28, %v15173_v54  ;;  %vm4703_vm9 = vcmp.eq.s32.totalorder %v8298_v0, %v15173_v54  ;;  %v5214_v42 = vadd.f32 %v6927_v11, %v4862_v63 }
 0x46b   :  { %v5215_v56 = vadd.f32 %v6928_v34, %v4863_v55  ;;  %v6959_v4 = vsel %vm5054_vm4, 1.0, %v16602_v47  ;;  %v6960_v9 = vsel %vm5055_vm5, 1.0, %v16602_v47  ;;  %v6991_v35 = vsel %vm5374_vm6, 1.0, %v16602_v47  ;;  %v5284_v43 = vpop.permute.xlu1 %5283 }
 0x46c   :  { %v6992_v54 = vsel %vm5375_vm7, 1.0, %v16602_v47  ;;  %v4542_v38 = vadd.f32 %v6831_v48, %v4190_v20  ;;  %v4543_v33 = vadd.f32 %v6832_v23, %v4191_v18  ;;  %vm4700_vm10 = vcmp.eq.s32.totalorder %v8289_v28, %v15124_v53  ;;  %v17713_v23 = vld [vmem:[#allocation131_spill] sm:$0xff] }
 0x46d   :  { %vm4701_vm11 = vcmp.eq.s32.totalorder %v8298_v0, %v15124_v53  ;;  %v6895_v14 = vsel %vm4702_vm8, 1.0, %v16602_v47  ;;  %v6896_v44 = vsel %vm4703_vm9, 1.0, %v16602_v47  ;;  %5003 = vperm.xlu1 %7257, %v15190_v22   ;;  %vm5372_vm12 = vcmp.eq.s32.totalorder %v8289_v28, %v5284_v43 }
 0x46e   :  { %vm5373_vm13 = vcmp.eq.s32.totalorder %v8298_v0, %v5284_v43  ;;  %v5566_v7 = vadd.f32 %v6991_v35, %v5214_v42  ;;  %v5567_v17 = vadd.f32 %v6992_v54, %v5215_v56  ;;  %v6989_v2 = vsel %vm5372_vm12, 1.0, %v16602_v47  ;;  %v17714_v35 = vld [vmem:[#allocation146_spill] sm:$0xff]  ;;  %v17715_v54 = vld [vmem:[#allocation79_spill] sm:$0xff] }
 0x46f   :  { %v6990_v8 = vsel %vm5373_vm13, 1.0, %v16602_v47  ;;  %vm3970_vm14 = vcmp.eq.s32.totalorder %v8289_v28, %v17709_v46  ;;  %vm3971_vm15 = vcmp.eq.s32.totalorder %v8298_v0, %v17709_v46  ;;  %vm5052_vm0 = vcmp.eq.s32.totalorder %v8289_v28, %v4980_v12  ;;  %v5332_v5 = vpop.permute.xlu1 %5331 }
 0x470   :  { %vm5053_vm1 = vcmp.eq.s32.totalorder %v8298_v0, %v4980_v12  ;;  %v5564_v58 = vadd.f32 %v6989_v2, %v15131_v36  ;;  %v5565_v20 = vadd.f32 %v6990_v8, %v15133_v41  ;;  %v6893_v18 = vsel %vm4700_vm10, 1.0, %v16602_v47  ;;  %v17718_v2 = vld [vmem:[#allocation198_spill] sm:$0xff] }
 0x471   :  { %v6894_v31 = vsel %vm4701_vm11, 1.0, %v16602_v47  ;;  %v4894_v52 = vadd.f32 %v6895_v14, %v4542_v38  ;;  %v4895_v37 = vadd.f32 %v6896_v44, %v4543_v33  ;;  %7258 = vset.pattern.permute.xlu1 %v17462_v57  ;;  %vm5404_vm2 = vcmp.eq.s32.totalorder %v8289_v28, %v5332_v5  ;;  %v17716_v33 = vld [vmem:[#allocation162_spill] sm:$0xff] }
 0x472   :  { %vm5405_vm3 = vcmp.eq.s32.totalorder %v8298_v0, %v5332_v5  ;;  %v5623_v36 = vpack.c.bf16 %v5567_v17, %v5565_v20  ;;  %v5622_v41 = vpack.c.bf16 %v5566_v7, %v5564_v58  ;;  %vm3650_vm4 = vcmp.eq.s32.totalorder %v8289_v28, %v17710_v32  ;;  %5307 = vperm.xlu1 %7258, %v15154_v45   ;;  %v17717_v7 = vld [vmem:[#allocation57_spill] sm:$0xff]  ;;  %v15372_v58 = vpop.permute.xlu0 %4648 }
 0x473   :  { %vm3651_vm5 = vcmp.eq.s32.totalorder %v8298_v0, %v17710_v32  ;;  %v6957_v53 = vsel %vm5052_vm0, 1.0, %v16602_v47  ;;  %v6958_v57 = vsel %vm5053_vm1, 1.0, %v16602_v47  ;;  %vm3968_vm6 = vcmp.eq.s32.totalorder %v8289_v28, %v17711_v49  ;;  %v5335_v1 = vpop.permute.xlu1 %5334  ;;  %v17719_v5 = vld [vmem:[#allocation157_spill] sm:$0xff] }
 0x474   :  { %vm3969_vm7 = vcmp.eq.s32.totalorder %v8298_v0, %v17711_v49  ;;  %v4892_v24 = vadd.f32 %v6893_v18, %v4540_v26  ;;  %v4893_v62 = vadd.f32 %v6894_v31, %v4541_v29  ;;  %5832 = vmatprep.mubr.bf16.mxu0 %v5623_v36  ;;  %v7021_v15 = vsel %vm5404_vm2, 1.0, %v16602_v47  ;;  %v17712_v29 = vld [vmem:[#allocation42_spill] sm:$0xff] }
 0x475   :  { %v7022_v51 = vsel %vm5405_vm3, 1.0, %v16602_v47  ;;  %v5246_v39 = vadd.f32 %v6959_v4, %v4894_v52  ;;  %v5247_v40 = vadd.f32 %v6960_v9, %v4895_v37  ;;  %5833 = vmatmul.mubr.bf16.gmra.mrb[12].mxu0 %v5622_v41  ;;  %vm5406_vm8 = vcmp.eq.s32.totalorder %v8289_v28, %v5335_v1 }
 0x476   :  { %v5244_v3 = vadd.f32 %v6957_v53, %v4892_v24  ;;  %v5245_v61 = vadd.f32 %v6958_v57, %v4893_v62  ;;  %vm5407_vm9 = vcmp.eq.s32.totalorder %v8298_v0, %v5335_v1  ;;  %v6707_v45 = vsel %vm3650_vm4, 1.0, %v16602_v47  ;;  %5355 = vperm.xlu1 %7258, %v15190_v22   ;;  %v17720_v57 = vld [vmem:[#allocation105_spill] sm:$0xff]  ;;  %v17721_v24 = vld [vmem:[#allocation107_spill] sm:$0xff]  ;;  %v17723_v1 = vld [vmem:[#allocation6_spill] sm:$0xff] }
 0x477   :  { %v6708_v11 = vsel %vm3651_vm5, 1.0, %v16602_v47  ;;  %v7023_v34 = vsel %vm5406_vm8, 1.0, %v16602_v47  ;;  %v7024_v12 = vsel %vm5407_vm9, 1.0, %v16602_v47  ;;  %vm4002_vm10 = vcmp.eq.s32.totalorder %v8289_v28, %v17712_v29 }
 0x478   :  { %v5596_v27 = vadd.f32 %v7021_v15, %v5244_v3  ;;  %v5597_v63 = vadd.f32 %v7022_v51, %v5245_v61  ;;  %v5598_v55 = vadd.f32 %v7023_v34, %v5246_v39  ;;  %v5599_v26 = vadd.f32 %v7024_v12, %v5247_v40  ;;  %v15337_v59 = vpop.permute.xlu1 %4588  ;;  %v17722_v51 = vld [vmem:[#allocation165_spill] sm:$0xff]  ;;  %v17724_v39 = vld [vmem:[#allocation108_spill] sm:$0xff]  ;;  %v15406_v40 = vpop.permute.xlu0 %4606 }
 0x479   :  { %vm4003_vm11 = vcmp.eq.s32.totalorder %v8298_v0, %v17712_v29  ;;  %v6737_v48 = vsel %vm3968_vm6, 1.0, %v16602_v47  ;;  %v6738_v22 = vsel %vm3969_vm7, 1.0, %v16602_v47  ;;  %vm4320_vm12 = vcmp.eq.s32.totalorder %v8289_v28, %v17713_v23 }
 0x47a   :  { %vm4321_vm13 = vcmp.eq.s32.totalorder %v8298_v0, %v17713_v23  ;;  %v5639_v42 = vpack.c.bf16 %v5599_v26, %v5597_v63  ;;  %v5638_v56 = vpack.c.bf16 %v5598_v55, %v5596_v27  ;;  %v6739_v4 = vsel %vm3970_vm14, 1.0, %v16602_v47  ;;  %5358 = vperm.xlu1 %7258, %v15212_v10  }
 0x47b   :  { %v6740_v9 = vsel %vm3971_vm15, 1.0, %v16602_v47  ;;  %vm4000_vm0 = vcmp.eq.s32.totalorder %v8289_v28, %v17714_v35  ;;  %vm4001_vm1 = vcmp.eq.s32.totalorder %v8298_v0, %v17714_v35  ;;  %v3842_v38 = vadd.f32 %v6707_v45, %v17715_v54 }
 0x47c   :  { %v3843_v43 = vadd.f32 %v6708_v11, %v17716_v33  ;;  %v6771_v14 = vsel %vm4002_vm10, 1.0, %v16602_v47  ;;  %v6772_v44 = vsel %vm4003_vm11, 1.0, %v16602_v47  ;;  %5896 = vmatprep.mubr.bf16.mxu1 %v5639_v42  ;;  %v4160_v17 = vadd.f32 %v6737_v48, %v17717_v7  ;;  %v15380_v31 = vpop.permute.xlu1 %4633  ;;  %v4941_v23 = vpop.permute.xlu0 %4940 }
 0x47d   :  { %v4161_v8 = vadd.f32 %v6738_v22, %v17718_v2  ;;  %v6801_v10 = vsel %vm4320_vm12, 1.0, %v16602_v47  ;;  %v6802_v46 = vsel %vm4321_vm13, 1.0, %v16602_v47  ;;  %5897 = vmatmul.mubr.bf16.gmra.mrb[12].mxu1 %v5638_v56  ;;  %v6769_v20 = vsel %vm4000_vm0, 1.0, %v16602_v47 }
 0x47e   :  { %v6770_v18 = vsel %vm4001_vm1, 1.0, %v16602_v47  ;;  %vm4672_vm14 = vcmp.eq.s32.totalorder %v8289_v28, %v14817_v50  ;;  %vm4673_vm15 = vcmp.eq.s32.totalorder %v8298_v0, %v14817_v50  ;;  %v4162_v52 = vadd.f32 %v6739_v4, %v15176_v30 }
 0x47f   :  { %v4163_v37 = vadd.f32 %v6740_v9, %v15179_v13  ;;  %vm4352_vm2 = vcmp.eq.s32.totalorder %v8289_v28, %v17719_v5  ;;  %vm4353_vm3 = vcmp.eq.s32.totalorder %v8298_v0, %v17719_v5  ;;  %v4194_v36 = vadd.f32 %v6771_v14, %v3842_v38 }
 0x480   :  { %v4195_v41 = vadd.f32 %v6772_v44, %v3843_v43  ;;  %v4512_v32 = vadd.f32 %v6801_v10, %v4160_v17  ;;  %v4513_v53 = vadd.f32 %v6802_v46, %v4161_v8  ;;  %v4192_v49 = vadd.f32 %v6769_v20, %v17720_v57  ;;  %v17726_v20 = vld [vmem:[#allocation110_spill] sm:$0xff] }
 0x481   :  { %v4193_v50 = vadd.f32 %v6770_v18, %v17721_v24  ;;  %v6865_v62 = vsel %vm4672_vm14, 1.0, %v16602_v47  ;;  %v6866_v30 = vsel %vm4673_vm15, 1.0, %v16602_v47  ;;  %v6833_v13 = vsel %vm4352_vm2, 1.0, %v16602_v47  ;;  %v4938_v3 = vpop.permute.xlu1 %4937 }
 0x482   :  { %v6834_v15 = vsel %vm4353_vm3, 1.0, %v16602_v47  ;;  %vm4322_vm4 = vcmp.eq.s32.totalorder %v8289_v28, %v17722_v51  ;;  %vm4323_vm5 = vcmp.eq.s32.totalorder %v8298_v0, %v17722_v51  ;;  %vm4354_vm6 = vcmp.eq.s32.totalorder %v8289_v28, %v17723_v1 }
 0x483   :  { %vm4355_vm7 = vcmp.eq.s32.totalorder %v8298_v0, %v17723_v1  ;;  %vm5376_vm8 = vcmp.eq.s32.totalorder %v8289_v28, %v17724_v39  ;;  %vm5377_vm9 = vcmp.eq.s32.totalorder %v8298_v0, %v17724_v39  ;;  %v4864_v61 = vadd.f32 %v6865_v62, %v4512_v32  ;;  %v17727_v39 = vld [vmem:[#allocation19_spill] sm:$0xff] }
 0x484   :  { %v4865_v45 = vadd.f32 %v6866_v30, %v4513_v53  ;;  %vm5024_vm10 = vcmp.eq.s32.totalorder %v8289_v28, %v4938_v3  ;;  %vm5025_vm11 = vcmp.eq.s32.totalorder %v8298_v0, %v4938_v3  ;;  %v6803_v11 = vsel %vm4322_vm4, 1.0, %v16602_v47 }
 0x485   :  { %v6804_v34 = vsel %vm4323_vm5, 1.0, %v16602_v47  ;;  %v6929_v12 = vsel %vm5024_vm10, 1.0, %v16602_v47  ;;  %v6930_v27 = vsel %vm5025_vm11, 1.0, %v16602_v47  ;;  %vm4674_vm12 = vcmp.eq.s32.totalorder %v8289_v28, %v15337_v59  ;;  %v4986_v42 = vpop.permute.xlu1 %4985 }
 0x486   :  { %vm4675_vm13 = vcmp.eq.s32.totalorder %v8298_v0, %v15337_v59  ;;  %v5216_v63 = vadd.f32 %v6929_v12, %v4864_v61  ;;  %v5217_v55 = vadd.f32 %v6930_v27, %v4865_v45  ;;  %v6835_v26 = vsel %vm4354_vm6, 1.0, %v16602_v47  ;;  %v17725_v59 = vld [vmem:[#allocation168_spill] sm:$0xff] }
 0x487   :  { %v6836_v29 = vsel %vm4355_vm7, 1.0, %v16602_v47  ;;  %v6993_v48 = vsel %vm5376_vm8, 1.0, %v16602_v47  ;;  %v6994_v22 = vsel %vm5377_vm9, 1.0, %v16602_v47  ;;  %vm4706_vm0 = vcmp.eq.s32.totalorder %v8289_v28, %v14849_v19 }
 0x488   :  { %vm4707_vm1 = vcmp.eq.s32.totalorder %v8298_v0, %v14849_v19  ;;  %v15438_v56 = vadd.f32 %v6993_v48, %v5216_v63  ;;  %v15440_v4 = vadd.f32 %v6994_v22, %v5217_v55  ;;  %v4544_v9 = vadd.f32 %v6833_v13, %v4192_v49 }
 0x489   :  { %v4545_v35 = vadd.f32 %v6834_v15, %v4193_v50  ;;  %v6867_v54 = vsel %vm4674_vm12, 1.0, %v16602_v47  ;;  %v6868_v38 = vsel %vm4675_vm13, 1.0, %v16602_v47  ;;  %v4514_v33 = vadd.f32 %v6803_v11, %v4162_v52  ;;  %v4989_v17 = vpop.permute.xlu1 %4988 }
 0x48a   :  { %v4515_v43 = vadd.f32 %v6804_v34, %v4163_v37  ;;  %vm5026_vm14 = vcmp.eq.s32.totalorder %v8289_v28, %v4941_v23  ;;  %vm5027_vm15 = vcmp.eq.s32.totalorder %v8298_v0, %v4941_v23  ;;  %v4546_v19 = vadd.f32 %v6835_v26, %v4194_v36 }
 0x48b   :  { %v4547_v14 = vadd.f32 %v6836_v29, %v4195_v41  ;;  %v6899_v44 = vsel %vm4706_vm0, 1.0, %v16602_v47  ;;  %v6900_v7 = vsel %vm4707_vm1, 1.0, %v16602_v47  ;;  %v4866_v2 = vadd.f32 %v6867_v54, %v4514_v33 }
 0x48c   :  { %v4867_v8 = vadd.f32 %v6868_v38, %v4515_v43  ;;  %vm4704_vm2 = vcmp.eq.s32.totalorder %v8289_v28, %v15380_v31  ;;  %vm4705_vm3 = vcmp.eq.s32.totalorder %v8298_v0, %v15380_v31  ;;  %vm3622_vm4 = vcmp.eq.s32.totalorder %v8289_v28, %v17725_v59  ;;  %v17730_v38 = vld [vmem:[#allocation29_spill] sm:$0xff] }
 0x48d   :  { %vm3623_vm5 = vcmp.eq.s32.totalorder %v8298_v0, %v17725_v59  ;;  %v6931_v10 = vsel %vm5026_vm14, 1.0, %v16602_v47  ;;  %v6932_v46 = vsel %vm5027_vm15, 1.0, %v16602_v47  ;;  %vm5058_vm6 = vcmp.eq.s32.totalorder %v8289_v28, %v4989_v17  ;;  %v17731_v43 = vld [vmem:[#allocation109_spill] sm:$0xff] }
 0x48e   :  { %vm5059_vm7 = vcmp.eq.s32.totalorder %v8298_v0, %v4989_v17  ;;  %vm5410_vm8 = vcmp.eq.s32.totalorder %v8289_v28, %v17726_v20  ;;  %vm5411_vm9 = vcmp.eq.s32.totalorder %v8298_v0, %v17726_v20  ;;  %vm5056_vm10 = vcmp.eq.s32.totalorder %v8289_v28, %v4986_v42  ;;  %v5293_v53 = vpop.permute.xlu1 %5292 }
 0x48f   :  { %vm5057_vm11 = vcmp.eq.s32.totalorder %v8298_v0, %v4986_v42  ;;  %v4898_v18 = vadd.f32 %v6899_v44, %v4546_v19  ;;  %v4899_v31 = vadd.f32 %v6900_v7, %v4547_v14  ;;  %v6897_v52 = vsel %vm4704_vm2, 1.0, %v16602_v47  ;;  %v17732_v7 = vld [vmem:[#allocation70_spill] sm:$0xff] }
 0x490   :  { %v6898_v37 = vsel %vm4705_vm3, 1.0, %v16602_v47  ;;  %v5218_v5 = vadd.f32 %v6931_v10, %v4866_v2  ;;  %v5219_v36 = vadd.f32 %v6932_v46, %v4867_v8  ;;  %v6963_v41 = vsel %vm5058_vm6, 1.0, %v16602_v47  ;;  %v17733_v2 = vld [vmem:[#allocation155_spill] sm:$0xff]  ;;  %v17734_v46 = vld [vmem:[#allocation76_spill] sm:$0xff] }
 0x491   :  { %v6964_v32 = vsel %vm5059_vm7, 1.0, %v16602_v47  ;;  %v6961_v57 = vsel %vm5056_vm10, 1.0, %v16602_v47  ;;  %v6962_v49 = vsel %vm5057_vm11, 1.0, %v16602_v47  ;;  %vm5378_vm12 = vcmp.eq.s32.totalorder %v8289_v28, %v5293_v53 }
 0x492   :  { %vm5379_vm13 = vcmp.eq.s32.totalorder %v8298_v0, %v5293_v53  ;;  %v4896_v24 = vadd.f32 %v6897_v52, %v4544_v9  ;;  %v4897_v50 = vadd.f32 %v6898_v37, %v4545_v35  ;;  %v6995_v62 = vsel %vm5378_vm12, 1.0, %v16602_v47  ;;  %v5338_v45 = vpop.permute.xlu1 %5337  ;;  %v17736_v37 = vld [vmem:[#allocation62_spill] sm:$0xff] }
 0x493   :  { %v6996_v30 = vsel %vm5379_vm13, 1.0, %v16602_v47  ;;  %v5250_v13 = vadd.f32 %v6963_v41, %v4898_v18  ;;  %v5251_v15 = vadd.f32 %v6964_v32, %v4899_v31  ;;  %v5570_v51 = vadd.f32 %v6995_v62, %v5218_v5  ;;  %v17735_v31 = vld [vmem:[#allocation16_spill] sm:$0xff]  ;;  %v17738_v32 = vld [vmem:[#allocation5_spill] sm:$0xff] }
 0x494   :  { %v5571_v1 = vadd.f32 %v6996_v30, %v5219_v36  ;;  %vm3974_vm0 = vcmp.eq.s32.totalorder %v8289_v28, %v17727_v39  ;;  %vm3975_vm1 = vcmp.eq.s32.totalorder %v8298_v0, %v17727_v39  ;;  %v5248_v3 = vadd.f32 %v6961_v57, %v4896_v24  ;;  %v17737_v36 = vld [vmem:[#allocation167_spill] sm:$0xff]  ;;  %v17740_v62 = vld [vmem:[#allocation96_spill] sm:$0xff] }
 0x495   :  { %v5249_v61 = vadd.f32 %v6962_v49, %v4897_v50  ;;  %vm5408_vm14 = vcmp.eq.s32.totalorder %v8289_v28, %v5338_v45  ;;  %vm5409_vm15 = vcmp.eq.s32.totalorder %v8298_v0, %v5338_v45  ;;  %v5624_v34 = vpack.c.bf16 %v5570_v51, %v15438_v56  ;;  %v17728_v56 = vld [vmem:[#allocation23_spill] sm:$0xff]  ;;  %v17739_v49 = vld [vmem:[#allocation56_spill] sm:$0xff]  ;;  %v17742_v45 = vld [vmem:[#allocation173_spill] sm:$0xff] }
 0x496   :  { %v5625_v11 = vpack.c.bf16 %v5571_v1, %v15440_v4  ;;  %v7027_v12 = vsel %vm5410_vm8, 1.0, %v16602_v47  ;;  %v7028_v27 = vsel %vm5411_vm9, 1.0, %v16602_v47  ;;  %v7025_v63 = vsel %vm5408_vm14, 1.0, %v16602_v47  ;;  %v17729_v4 = vld [vmem:[#allocation102_spill] sm:$0xff] }
 0x497   :  { %v7026_v55 = vsel %vm5409_vm15, 1.0, %v16602_v47  ;;  %v5602_v26 = vadd.f32 %v7027_v12, %v5250_v13  ;;  %v5603_v29 = vadd.f32 %v7028_v27, %v5251_v15  ;;  %v5600_v48 = vadd.f32 %v7025_v63, %v5248_v3  ;;  %v17741_v15 = vld [vmem:[#allocation87_spill] sm:$0xff] }
 0x498   :  { %v5601_v22 = vadd.f32 %v7026_v55, %v5249_v61  ;;  %5840 = vmatprep.mubr.bf16.mxu0 %v5625_v11  ;;  %v6679_v23 = vsel %vm3622_vm4, 1.0, %v16602_v47  ;;  %v6680_v42 = vsel %vm3623_vm5, 1.0, %v16602_v47  ;;  %vm3654_vm2 = vcmp.eq.s32.totalorder %v8289_v28, %v17728_v56  ;;  %v15516_v9 = vpop.permute.xlu1 %4591 }
 0x499   :  { %vm3655_vm3 = vcmp.eq.s32.totalorder %v8298_v0, %v17728_v56  ;;  %5841 = vmatmul.mubr.bf16.gmra.mrb[16].mxu0 %v5624_v34  ;;  %vm3656_vm6 = vcmp.eq.s32.totalorder %v8289_v28, %v17729_v4  ;;  %vm3657_vm7 = vcmp.eq.s32.totalorder %v8298_v0, %v17729_v4  ;;  %v5640_v54 = vpack.c.bf16 %v5602_v26, %v5600_v48  ;;  %v17743_v34 = vld [vmem:[#allocation28_spill] sm:$0xff]  ;;  %v4944_v4 = vpop.permute.xlu0 %4943 }
 0x49a   :  { %v5641_v35 = vpack.c.bf16 %v5603_v29, %v5601_v22  ;;  %v3844_v33 = vadd.f32 %v15158_v21, %v17730_v38  ;;  %v3845_v19 = vadd.f32 %v15161_v60, %v17731_v43  ;;  %v6743_v14 = vsel %vm3974_vm0, 1.0, %v16602_v47 }
 0x49b   :  { %v6744_v44 = vsel %vm3975_vm1, 1.0, %v16602_v47  ;;  %v3814_v17 = vadd.f32 %v6679_v23, %v17732_v7  ;;  %v3815_v8 = vadd.f32 %v6680_v42, %v17733_v2  ;;  %v6711_v59 = vsel %vm3654_vm2, 1.0, %v16602_v47  ;;  %v17745_v7 = vld [vmem:[#allocation113_spill] sm:$0xff] }
 0x49c   :  { %v6712_v21 = vsel %vm3655_vm3, 1.0, %v16602_v47  ;;  %5904 = vmatprep.mubr.bf16.mxu1 %v5641_v35  ;;  %v15535_v60 = vsel %vm3656_vm6, 1.0, %v16602_v47  ;;  %v15538_v10 = vsel %vm3657_vm7, 1.0, %v16602_v47  ;;  %vm4006_vm4 = vcmp.eq.s32.totalorder %v8289_v28, %v17734_v46  ;;  %v15548_v52 = vpop.permute.xlu1 %4639 }
 0x49d   :  { %vm4007_vm5 = vcmp.eq.s32.totalorder %v8298_v0, %v17734_v46  ;;  %5905 = vmatmul.mubr.bf16.gmra.mrb[16].mxu1 %v5640_v54  ;;  %v4166_v20 = vadd.f32 %v6743_v14, %v3814_v17  ;;  %v4167_v18 = vadd.f32 %v6744_v44, %v3815_v8  ;;  %vm3972_vm8 = vcmp.eq.s32.totalorder %v8289_v28, %v17735_v31 }
 0x49e   :  { %vm3973_vm9 = vcmp.eq.s32.totalorder %v8298_v0, %v17735_v31  ;;  %v3846_v5 = vadd.f32 %v6711_v59, %v17736_v37  ;;  %v3847_v41 = vadd.f32 %v6712_v21, %v17737_v36  ;;  %vm4004_vm10 = vcmp.eq.s32.totalorder %v8289_v28, %v17738_v32  ;;  %v4995_v37 = vpop.permute.xlu0 %4994 }
 0x49f   :  { %vm4005_vm11 = vcmp.eq.s32.totalorder %v8298_v0, %v17738_v32  ;;  %v6775_v53 = vsel %vm4006_vm4, 1.0, %v16602_v47  ;;  %v6776_v57 = vsel %vm4007_vm5, 1.0, %v16602_v47  ;;  %vm4324_vm12 = vcmp.eq.s32.totalorder %v8289_v28, %v17739_v49 }
 0x4a0   :  { %vm4325_vm13 = vcmp.eq.s32.totalorder %v8298_v0, %v17739_v49  ;;  %v6741_v24 = vsel %vm3972_vm8, 1.0, %v16602_v47  ;;  %v6742_v50 = vsel %vm3973_vm9, 1.0, %v16602_v47  ;;  %vm4356_vm0 = vcmp.eq.s32.totalorder %v8289_v28, %v17740_v62  ;;  %v15574_v51 = vpop.permute.xlu1 %4642 }
 0x4a1   :  { %vm4357_vm1 = vcmp.eq.s32.totalorder %v8298_v0, %v17740_v62  ;;  %v6773_v30 = vsel %vm4004_vm10, 1.0, %v16602_v47  ;;  %v6774_v13 = vsel %vm4005_vm11, 1.0, %v16602_v47  ;;  %vm4326_vm14 = vcmp.eq.s32.totalorder %v8289_v28, %v17741_v15 }
 0x4a2   :  { %vm4327_vm15 = vcmp.eq.s32.totalorder %v8298_v0, %v17741_v15  ;;  %v4198_v1 = vadd.f32 %v6775_v53, %v3846_v5  ;;  %v4199_v39 = vadd.f32 %v6776_v57, %v3847_v41  ;;  %v6805_v3 = vsel %vm4324_vm12, 1.0, %v16602_v47 }
 0x4a3   :  { %v6806_v61 = vsel %vm4325_vm13, 1.0, %v16602_v47  ;;  %v4164_v11 = vadd.f32 %v6741_v24, %v17742_v45  ;;  %v4165_v12 = vadd.f32 %v6742_v50, %v17743_v34  ;;  %v6837_v27 = vsel %vm4356_vm0, 1.0, %v16602_v47 }
 0x4a4   :  { %v6838_v63 = vsel %vm4357_vm1, 1.0, %v16602_v47  ;;  %v4196_v55 = vadd.f32 %v6773_v30, %v3844_v33  ;;  %v4197_v26 = vadd.f32 %v6774_v13, %v3845_v19  ;;  %v6807_v29 = vsel %vm4326_vm14, 1.0, %v16602_v47  ;;  %v17744_v33 = vld [vmem:[#allocation190_spill] sm:$0xff] }
 0x4a5   :  { %v6808_v48 = vsel %vm4327_vm15, 1.0, %v16602_v47  ;;  %v4516_v22 = vadd.f32 %v6805_v3, %v4164_v11  ;;  %v4517_v23 = vadd.f32 %v6806_v61, %v4165_v12  ;;  %vm4676_vm2 = vcmp.eq.s32.totalorder %v8289_v28, %v15516_v9  ;;  %v4947_v35 = vpop.permute.xlu1 %4946 }
 0x4a6   :  { %vm4677_vm3 = vcmp.eq.s32.totalorder %v8298_v0, %v15516_v9  ;;  %v15588_v42 = vadd.f32 %v6837_v27, %v4196_v55  ;;  %v15590_v56 = vadd.f32 %v6838_v63, %v4197_v26  ;;  %vm4678_vm6 = vcmp.eq.s32.totalorder %v8289_v28, %v14870_v6  ;;  %v17746_v26 = vld [vmem:[#allocation51_spill] sm:$0xff] }
 0x4a7   :  { %vm4679_vm7 = vcmp.eq.s32.totalorder %v8298_v0, %v14870_v6  ;;  %v4518_v54 = vadd.f32 %v6807_v29, %v4166_v20  ;;  %v4519_v38 = vadd.f32 %v6808_v48, %v4167_v18  ;;  %vm4358_vm4 = vcmp.eq.s32.totalorder %v8289_v28, %v17744_v33  ;;  %v17747_v48 = vld [vmem:[#allocation99_spill] sm:$0xff] }
 0x4a8   :  { %vm4359_vm5 = vcmp.eq.s32.totalorder %v8298_v0, %v17744_v33  ;;  %v6869_v9 = vsel %vm4676_vm2, 1.0, %v16602_v47  ;;  %v6870_v43 = vsel %vm4677_vm3, 1.0, %v16602_v47  ;;  %vm5030_vm8 = vcmp.eq.s32.totalorder %v8289_v28, %v4947_v35 }
 0x4a9   :  { %vm5031_vm9 = vcmp.eq.s32.totalorder %v8298_v0, %v4947_v35  ;;  %v6871_v6 = vsel %vm4678_vm6, 1.0, %v16602_v47  ;;  %v6872_v19 = vsel %vm4679_vm7, 1.0, %v16602_v47  ;;  %vm5028_vm10 = vcmp.eq.s32.totalorder %v8289_v28, %v4944_v4  ;;  %v4992_v17 = vpop.permute.xlu1 %4991  ;;  %v17748_v35 = vld [vmem:[#allocation171_spill] sm:$0xff] }
 0x4aa   :  { %vm5029_vm11 = vcmp.eq.s32.totalorder %v8298_v0, %v4944_v4  ;;  %v6839_v14 = vsel %vm4358_vm4, 1.0, %v16602_v47  ;;  %v6840_v44 = vsel %vm4359_vm5, 1.0, %v16602_v47  ;;  %vm5382_vm12 = vcmp.eq.s32.totalorder %v8289_v28, %v17745_v7 }
 0x4ab   :  { %vm5383_vm13 = vcmp.eq.s32.totalorder %v8298_v0, %v17745_v7  ;;  %v4868_v2 = vadd.f32 %v6869_v9, %v4516_v22  ;;  %v4869_v8 = vadd.f32 %v6870_v43, %v4517_v23  ;;  %v6935_v59 = vsel %vm5030_vm8, 1.0, %v16602_v47 }
 0x4ac   :  { %v6936_v21 = vsel %vm5031_vm9, 1.0, %v16602_v47  ;;  %v4870_v46 = vadd.f32 %v6871_v6, %v4518_v54  ;;  %v4871_v20 = vadd.f32 %v6872_v19, %v4519_v38  ;;  %v6933_v18 = vsel %vm5028_vm10, 1.0, %v16602_v47 }
 0x4ad   :  { %v6934_v31 = vsel %vm5029_vm11, 1.0, %v16602_v47  ;;  %v4550_v5 = vadd.f32 %v6839_v14, %v4198_v1  ;;  %v4551_v36 = vadd.f32 %v6840_v44, %v4199_v39  ;;  %v6999_v41 = vsel %vm5382_vm12, 1.0, %v16602_v47 }
 0x4ae   :  { %v7000_v32 = vsel %vm5383_vm13, 1.0, %v16602_v47  ;;  %vm4710_vm0 = vcmp.eq.s32.totalorder %v8289_v28, %v15574_v51  ;;  %vm4711_vm1 = vcmp.eq.s32.totalorder %v8298_v0, %v15574_v51  ;;  %v5222_v53 = vadd.f32 %v6935_v59, %v4870_v46  ;;  %v5296_v50 = vpop.permute.xlu1 %5295  ;;  %v17751_v46 = vld [vmem:[#allocation22_spill] sm:$0xff] }
 0x4af   :  { %v5223_v57 = vadd.f32 %v6936_v21, %v4871_v20  ;;  %v5220_v49 = vadd.f32 %v6933_v18, %v4868_v2  ;;  %v5221_v24 = vadd.f32 %v6934_v31, %v4869_v8  ;;  %vm5062_vm14 = vcmp.eq.s32.totalorder %v8289_v28, %v4995_v37  ;;  %v17752_v20 = vld [vmem:[#allocation67_spill] sm:$0xff] }
 0x4b0   :  { %vm5063_vm15 = vcmp.eq.s32.totalorder %v8298_v0, %v4995_v37  ;;  %vm4708_vm2 = vcmp.eq.s32.totalorder %v8289_v28, %v15548_v52  ;;  %vm4709_vm3 = vcmp.eq.s32.totalorder %v8298_v0, %v15548_v52  ;;  %vm5380_vm6 = vcmp.eq.s32.totalorder %v8289_v28, %v5296_v50 }
 0x4b1   :  { %vm5381_vm7 = vcmp.eq.s32.totalorder %v8298_v0, %v5296_v50  ;;  %v6903_v62 = vsel %vm4710_vm0, 1.0, %v16602_v47  ;;  %v6904_v30 = vsel %vm4711_vm1, 1.0, %v16602_v47  ;;  %v6997_v13 = vsel %vm5380_vm6, 1.0, %v16602_v47 }
 0x4b2   :  { %v6998_v15 = vsel %vm5381_vm7, 1.0, %v16602_v47  ;;  %v5574_v51 = vadd.f32 %v6999_v41, %v5222_v53  ;;  %v5575_v1 = vadd.f32 %v7000_v32, %v5223_v57  ;;  %v5572_v39 = vadd.f32 %v6997_v13, %v5220_v49  ;;  %v5344_v45 = vpop.permute.xlu1 %5343  ;;  %v17753_v41 = vld [vmem:[#allocation137_spill] sm:$0xff]  ;;  %v17754_v32 = vld [vmem:[#allocation60_spill] sm:$0xff] }
 0x4b3   :  { %v5573_v3 = vadd.f32 %v6998_v15, %v5221_v24  ;;  %v6901_v61 = vsel %vm4708_vm2, 1.0, %v16602_v47  ;;  %v6902_v52 = vsel %vm4709_vm3, 1.0, %v16602_v47  ;;  %vm5060_vm4 = vcmp.eq.s32.totalorder %v8289_v28, %v4992_v17  ;;  %v17755_v57 = vld [vmem:[#allocation176_spill] sm:$0xff]  ;;  %v17756_v24 = vld [vmem:[#allocation101_spill] sm:$0xff] }
 0x4b4   :  { %vm5061_vm5 = vcmp.eq.s32.totalorder %v8298_v0, %v4992_v17  ;;  %v4902_v11 = vadd.f32 %v6903_v62, %v4550_v5  ;;  %v4903_v34 = vadd.f32 %v6904_v30, %v4551_v36  ;;  %v5626_v27 = vpack.c.bf16 %v5574_v51, %v5572_v39  ;;  %v17757_v15 = vld [vmem:[#allocation84_spill] sm:$0xff] }
 0x4b5   :  { %v5627_v12 = vpack.c.bf16 %v5575_v1, %v5573_v3  ;;  %v6967_v63 = vsel %vm5062_vm14, 1.0, %v16602_v47  ;;  %v6968_v55 = vsel %vm5063_vm15, 1.0, %v16602_v47  ;;  %vm5412_vm8 = vcmp.eq.s32.totalorder %v8289_v28, %v5344_v45  ;;  %v17758_v1 = vld [vmem:[#allocation86_spill] sm:$0xff] }
 0x4b6   :  { %vm5413_vm9 = vcmp.eq.s32.totalorder %v8298_v0, %v5344_v45  ;;  %v3848_v29 = vadd.f32 %v15535_v60, %v17746_v26  ;;  %v3849_v22 = vadd.f32 %v15538_v10, %v17747_v48  ;;  %v6965_v23 = vsel %vm5060_vm4, 1.0, %v16602_v47  ;;  %v17749_v60 = vld [vmem:[#allocation65_spill] sm:$0xff] }
 0x4b7   :  { %v6966_v4 = vsel %vm5061_vm5, 1.0, %v16602_v47  ;;  %5848 = vmatprep.mubr.bf16.mxu0 %v5627_v12  ;;  %vm3626_vm10 = vcmp.eq.s32.totalorder %v8289_v28, %v17748_v35  ;;  %vm3627_vm11 = vcmp.eq.s32.totalorder %v8298_v0, %v17748_v35  ;;  %v4900_v54 = vadd.f32 %v6901_v61, %v15588_v42  ;;  %v5347_v6 = vpop.permute.xlu1 %5346  ;;  %v17750_v42 = vld [vmem:[#allocation26_spill] sm:$0xff]  ;;  %v17760_v12 = vld [vmem:[#allocation63_spill] sm:$0xff] }
 0x4b8   :  { %v4901_v38 = vadd.f32 %v6902_v52, %v15590_v56  ;;  %5849 = vmatmul.mubr.bf16.gmra.mrb[20].mxu0 %v5626_v27  ;;  %vm3660_vm12 = vcmp.eq.s32.totalorder %v8289_v28, %v17749_v60  ;;  %v5254_v10 = vadd.f32 %v6967_v63, %v4902_v11  ;;  %v5255_v33 = vadd.f32 %v6968_v55, %v4903_v34  ;;  %v17759_v34 = vld [vmem:[#allocation104_spill] sm:$0xff]  ;;  %v17761_v27 = vld [vmem:[#allocation59_spill] sm:$0xff] }
 0x4b9   :  { %v7029_v9 = vsel %vm5412_vm8, 1.0, %v16602_v47  ;;  %v7030_v43 = vsel %vm5413_vm9, 1.0, %v16602_v47  ;;  %v5252_v19 = vadd.f32 %v6965_v23, %v4900_v54  ;;  %vm5414_vm13 = vcmp.eq.s32.totalorder %v8289_v28, %v5347_v6 }
 0x4ba   :  { %v5253_v14 = vadd.f32 %v6966_v4, %v4901_v38  ;;  %vm5415_vm0 = vcmp.eq.s32.totalorder %v8298_v0, %v5347_v6  ;;  %vm3658_vm1 = vcmp.eq.s32.totalorder %v8289_v28, %v17750_v42  ;;  %vm3659_vm14 = vcmp.eq.s32.totalorder %v8298_v0, %v17750_v42 }
 0x4bb   :  { %v7031_v56 = vsel %vm5414_vm13, 1.0, %v16602_v47  ;;  %v7032_v44 = vsel %vm5415_vm0, 1.0, %v16602_v47  ;;  %v5604_v7 = vadd.f32 %v7029_v9, %v5252_v19  ;;  %v6683_v59 = vsel %vm3626_vm10, 1.0, %v16602_v47 }
 0x4bc   :  { %v5605_v17 = vadd.f32 %v7030_v43, %v5253_v14  ;;  %v5606_v2 = vadd.f32 %v7031_v56, %v5254_v10  ;;  %v5607_v8 = vadd.f32 %v7032_v44, %v5255_v33  ;;  %v6684_v21 = vsel %vm3627_vm11, 1.0, %v16602_v47  ;;  %v15688_v18 = vpop.permute.xlu1 %4600  ;;  %v17762_v43 = vld [vmem:[#allocation103_spill] sm:$0xff] }
 0x4bd   :  { %vm3978_vm15 = vcmp.eq.s32.totalorder %v8289_v28, %v17751_v46  ;;  %vm3979_vm2 = vcmp.eq.s32.totalorder %v8298_v0, %v17751_v46  ;;  %vm4008_vm3 = vcmp.eq.s32.totalorder %v8289_v28, %v17752_v20  ;;  %vm4009_vm6 = vcmp.eq.s32.totalorder %v8298_v0, %v17752_v20 }
 0x4be   :  { %v5643_v31 = vpack.c.bf16 %v5607_v8, %v5605_v17  ;;  %v5642_v37 = vpack.c.bf16 %v5606_v2, %v5604_v7  ;;  %v6715_v5 = vsel %vm3658_vm1, 1.0, %v16602_v47  ;;  %v6716_v36 = vsel %vm3659_vm14, 1.0, %v16602_v47  ;;  %v4953_v8 = vpop.permute.xlu0 %4952 }
 0x4bf   :  { %vm4010_vm7 = vcmp.eq.s32.totalorder %v8289_v28, %v17753_v41  ;;  %vm4011_vm4 = vcmp.eq.s32.totalorder %v8298_v0, %v17753_v41  ;;  %v3818_v53 = vadd.f32 %v6683_v59, %v17754_v32  ;;  %v3819_v49 = vadd.f32 %v6684_v21, %v17755_v57  ;;  %v17764_v21 = vld [vmem:[#allocation177_spill] sm:$0xff] }
 0x4c0   :  { %vm4360_vm5 = vcmp.eq.s32.totalorder %v8289_v28, %v17756_v24  ;;  %vm4361_vm8 = vcmp.eq.s32.totalorder %v8298_v0, %v17756_v24  ;;  %5912 = vmatprep.mubr.bf16.mxu1 %v5643_v31  ;;  %v6747_v50 = vsel %vm3978_vm15, 1.0, %v16602_v47  ;;  %v6748_v62 = vsel %vm3979_vm2, 1.0, %v16602_v47  ;;  %v15728_v52 = vpop.permute.xlu1 %4645 }
 0x4c1   :  { %v6777_v30 = vsel %vm4008_vm3, 1.0, %v16602_v47  ;;  %v6778_v13 = vsel %vm4009_vm6, 1.0, %v16602_v47  ;;  %5913 = vmatmul.mubr.bf16.gmra.mrb[20].mxu1 %v5642_v37  ;;  %v3850_v51 = vadd.f32 %v6715_v5, %v17757_v15  ;;  %v3851_v39 = vadd.f32 %v6716_v36, %v17758_v1  ;;  %v17765_v36 = vld [vmem:[#allocation118_spill] sm:$0xff] }
 0x4c2   :  { %v6779_v3 = vsel %vm4010_vm7, 1.0, %v16602_v47  ;;  %v6780_v61 = vsel %vm4011_vm4, 1.0, %v16602_v47  ;;  %v6841_v45 = vsel %vm4360_vm5, 1.0, %v16602_v47  ;;  %v6842_v11 = vsel %vm4361_vm8, 1.0, %v16602_v47 }
 0x4c3   :  { %vm4330_vm9 = vcmp.eq.s32.totalorder %v8289_v28, %v17759_v34  ;;  %vm4331_vm10 = vcmp.eq.s32.totalorder %v8298_v0, %v17759_v34  ;;  %v15738_v63 = vadd.f32 %v17761_v27, %v17760_v12  ;;  %v15744_v55 = vsel %vm3660_vm12, 1.0, %v16602_v47 }
 0x4c4   :  { %v4200_v26 = vadd.f32 %v6777_v30, %v3848_v29  ;;  %v4201_v48 = vadd.f32 %v6778_v13, %v3849_v22  ;;  %v4170_v23 = vadd.f32 %v6747_v50, %v3818_v53  ;;  %v4171_v4 = vadd.f32 %v6748_v62, %v3819_v49  ;;  %v17763_v29 = vld [vmem:[#allocation116_spill] sm:$0xff] }
 0x4c5   :  { %v4202_v35 = vadd.f32 %v6779_v3, %v3850_v51  ;;  %v4203_v54 = vadd.f32 %v6780_v61, %v3851_v39  ;;  %v6811_v33 = vsel %vm4330_vm9, 1.0, %v16602_v47  ;;  %v6812_v9 = vsel %vm4331_vm10, 1.0, %v16602_v47  ;;  %v4950_v22 = vpop.permute.xlu1 %4949 }
 0x4c6   :  { %v15746_v38 = vadd.f32 %v6841_v45, %v4200_v26  ;;  %v15748_v10 = vadd.f32 %v6842_v11, %v4201_v48  ;;  %vm4362_vm11 = vcmp.eq.s32.totalorder %v8289_v28, %v17762_v43  ;;  %vm4363_vm12 = vcmp.eq.s32.totalorder %v8298_v0, %v17762_v43 }
 0x4c7   :  { %vm5384_vm13 = vcmp.eq.s32.totalorder %v8289_v28, %v17763_v29  ;;  %vm5385_vm0 = vcmp.eq.s32.totalorder %v8298_v0, %v17763_v29  ;;  %vm4714_vm1 = vcmp.eq.s32.totalorder %v8289_v28, %v15372_v58  ;;  %vm4715_vm14 = vcmp.eq.s32.totalorder %v8298_v0, %v15372_v58 }
 0x4c8   :  { %vm5032_vm15 = vcmp.eq.s32.totalorder %v8289_v28, %v4950_v22  ;;  %vm5033_vm2 = vcmp.eq.s32.totalorder %v8298_v0, %v4950_v22  ;;  %vm4682_vm3 = vcmp.eq.s32.totalorder %v8289_v28, %v15688_v18  ;;  %vm4683_vm6 = vcmp.eq.s32.totalorder %v8298_v0, %v15688_v18 }
 0x4c9   :  { %v6937_v6 = vsel %vm5032_vm15, 1.0, %v16602_v47  ;;  %v6938_v19 = vsel %vm5033_vm2, 1.0, %v16602_v47  ;;  %v6843_v14 = vsel %vm4362_vm11, 1.0, %v16602_v47  ;;  %v6844_v42 = vsel %vm4363_vm12, 1.0, %v16602_v47  ;;  %v4998_v59 = vpop.permute.xlu1 %4997 }
 0x4ca   :  { %v5224_v58 = vadd.f32 %v6937_v6, %v14891_v16  ;;  %v5225_v56 = vadd.f32 %v6938_v19, %v14894_v25  ;;  %v7001_v44 = vsel %vm5384_vm13, 1.0, %v16602_v47  ;;  %v7002_v7 = vsel %vm5385_vm0, 1.0, %v16602_v47 }
 0x4cb   :  { %v6907_v17 = vsel %vm4714_vm1, 1.0, %v16602_v47  ;;  %v6908_v2 = vsel %vm4715_vm14, 1.0, %v16602_v47  ;;  %vm3630_vm7 = vcmp.eq.s32.totalorder %v8289_v28, %v17764_v21  ;;  %v6875_v46 = vsel %vm4682_vm3, 1.0, %v16602_v47 }
 0x4cc   :  { %v6876_v20 = vsel %vm4683_vm6, 1.0, %v16602_v47  ;;  %v15784_v16 = vadd.f32 %v7001_v44, %v5224_v58  ;;  %v15786_v25 = vadd.f32 %v7002_v7, %v5225_v56  ;;  %v4522_v18 = vadd.f32 %v6811_v33, %v4170_v23 }
 0x4cd   :  { %v4523_v31 = vadd.f32 %v6812_v9, %v4171_v4  ;;  %v4554_v37 = vadd.f32 %v6843_v14, %v4202_v35  ;;  %v4555_v5 = vadd.f32 %v6844_v42, %v4203_v54  ;;  %vm5418_vm4 = vcmp.eq.s32.totalorder %v8289_v28, %v17765_v36  ;;  %v5001_v49 = vpop.permute.xlu1 %5000  ;;  %v17766_v9 = vld [vmem:[#allocation25_spill] sm:$0xff]  ;;  %v17768_v14 = vld [vmem:[#allocation112_spill] sm:$0xff] }
 0x4ce   :  { %vm5419_vm5 = vcmp.eq.s32.totalorder %v8298_v0, %v17765_v36  ;;  %vm5034_vm8 = vcmp.eq.s32.totalorder %v8289_v28, %v4953_v8  ;;  %vm5035_vm9 = vcmp.eq.s32.totalorder %v8298_v0, %v4953_v8  ;;  %vm3661_vm10 = vcmp.eq.s32.totalorder %v8298_v0, %v17749_v60  ;;  %v17769_v60 = vld [vmem:[#allocation7_spill] sm:$0xff] }
 0x4cf   :  { %v4906_v41 = vadd.f32 %v6907_v17, %v4554_v37  ;;  %v4907_v32 = vadd.f32 %v6908_v2, %v4555_v5  ;;  %v4874_v53 = vadd.f32 %v6875_v46, %v4522_v18  ;;  %v4875_v57 = vadd.f32 %v6876_v20, %v4523_v31  ;;  %v17771_v18 = vld [vmem:[#allocation49_spill] sm:$0xff]  ;;  %v17772_v31 = vld [vmem:[#allocation40_spill] sm:$0xff] }
 0x4d0   :  { %vm4712_vm11 = vcmp.eq.s32.totalorder %v8289_v28, %v15728_v52  ;;  %vm4713_vm12 = vcmp.eq.s32.totalorder %v8298_v0, %v15728_v52  ;;  %vm5066_vm13 = vcmp.eq.s32.totalorder %v8289_v28, %v5001_v49  ;;  %vm5067_vm0 = vcmp.eq.s32.totalorder %v8298_v0, %v5001_v49  ;;  %v4956_v49 = vpop.permute.xlu0 %4955 }
 0x4d1   :  { %v6939_v24 = vsel %vm5034_vm8, 1.0, %v16602_v47  ;;  %v6940_v50 = vsel %vm5035_vm9, 1.0, %v16602_v47  ;;  %v6971_v62 = vsel %vm5066_vm13, 1.0, %v16602_v47  ;;  %v6972_v30 = vsel %vm5067_vm0, 1.0, %v16602_v47 }
 0x4d2   :  { %vm5064_vm1 = vcmp.eq.s32.totalorder %v8289_v28, %v4998_v59  ;;  %vm5065_vm14 = vcmp.eq.s32.totalorder %v8298_v0, %v4998_v59  ;;  %v5258_v13 = vadd.f32 %v6971_v62, %v4906_v41  ;;  %v5259_v15 = vadd.f32 %v6972_v30, %v4907_v32  ;;  %v5305_v34 = vpop.permute.xlu1 %5304  ;;  %v17770_v59 = vld [vmem:[#allocation46_spill] sm:$0xff]  ;;  %v17773_v41 = vld [vmem:[#allocation185_spill] sm:$0xff]  ;;  %v17774_v32 = vld [vmem:[#allocation88_spill] sm:$0xff] }
 0x4d3   :  { %v7035_v51 = vsel %vm5418_vm4, 1.0, %v16602_v47  ;;  %v7036_v1 = vsel %vm5419_vm5, 1.0, %v16602_v47  ;;  %v6905_v39 = vsel %vm4712_vm11, 1.0, %v16602_v47  ;;  %v6906_v3 = vsel %vm4713_vm12, 1.0, %v16602_v47 }
 0x4d4   :  { %v5226_v61 = vadd.f32 %v6939_v24, %v4874_v53  ;;  %v5227_v52 = vadd.f32 %v6940_v50, %v4875_v57  ;;  %v5610_v45 = vadd.f32 %v7035_v51, %v5258_v13  ;;  %v5611_v11 = vadd.f32 %v7036_v1, %v5259_v15  ;;  %v17775_v24 = vld [vmem:[#allocation205_spill] sm:$0xff]  ;;  %v17776_v13 = vld [vmem:[#allocation148_spill] sm:$0xff] }
 0x4d5   :  { %v6969_v12 = vsel %vm5064_vm1, 1.0, %v16602_v47  ;;  %v6970_v27 = vsel %vm5065_vm14, 1.0, %v16602_v47  ;;  %vm5386_vm15 = vcmp.eq.s32.totalorder %v8289_v28, %v5305_v34  ;;  %vm5387_vm2 = vcmp.eq.s32.totalorder %v8298_v0, %v5305_v34  ;;  %v17779_v34 = vld [vmem:[#allocation204_spill] sm:$0xff] }
 0x4d6   :  { %v4904_v26 = vadd.f32 %v6905_v39, %v15746_v38  ;;  %v4905_v48 = vadd.f32 %v6906_v3, %v15748_v10  ;;  %v7003_v23 = vsel %vm5386_vm15, 1.0, %v16602_v47  ;;  %v7004_v4 = vsel %vm5387_vm2, 1.0, %v16602_v47  ;;  %v17767_v38 = vld [vmem:[#allocation32_spill] sm:$0xff]  ;;  %v5350_v29 = vpop.permute.xlu1 %5349  ;;  %v17777_v39 = vld [vmem:[#allocation97_spill] sm:$0xff] }
 0x4d7   :  { %vm3631_vm3 = vcmp.eq.s32.totalorder %v8298_v0, %v17764_v21  ;;  %v6687_v35 = vsel %vm3630_vm7, 1.0, %v16602_v47  ;;  %v5578_v54 = vadd.f32 %v7003_v23, %v5226_v61  ;;  %v5579_v33 = vadd.f32 %v7004_v4, %v5227_v52 }
 0x4d8   :  { %vm3982_vm6 = vcmp.eq.s32.totalorder %v8289_v28, %v17766_v9  ;;  %vm3662_vm4 = vcmp.eq.s32.totalorder %v8289_v28, %v17767_v38  ;;  %v5256_v10 = vadd.f32 %v6969_v12, %v4904_v26  ;;  %v5257_v43 = vadd.f32 %v6970_v27, %v4905_v48  ;;  %v17780_v26 = vld [vmem:[#allocation170_spill] sm:$0xff] }
 0x4d9   :  { %vm5416_vm5 = vcmp.eq.s32.totalorder %v8289_v28, %v5350_v29  ;;  %vm5417_vm8 = vcmp.eq.s32.totalorder %v8298_v0, %v5350_v29  ;;  %v5629_v22 = vpack.c.bf16 %v5579_v33, %v15786_v25  ;;  %v5628_v6 = vpack.c.bf16 %v5578_v54, %v15784_v16 }
 0x4da   :  { %v6718_v19 = vsel %vm3661_vm10, 1.0, %v16602_v47  ;;  %v3852_v42 = vadd.f32 %v15744_v55, %v17768_v14  ;;  %v7033_v58 = vsel %vm5416_vm5, 1.0, %v16602_v47  ;;  %v7034_v56 = vsel %vm5417_vm8, 1.0, %v16602_v47 }
 0x4db   :  { %v6688_v44 = vsel %vm3631_vm3, 1.0, %v16602_v47  ;;  %vm3663_vm7 = vcmp.eq.s32.totalorder %v8298_v0, %v17767_v38  ;;  %v5608_v7 = vadd.f32 %v7033_v58, %v5256_v10  ;;  %v5609_v17 = vadd.f32 %v7034_v56, %v5257_v43  ;;  %5856 = vmatprep.mubr.bf16.mxu0 %v5629_v22  ;;  %v4604_v21 = vpop.permute.xlu1 %4603  ;;  %v15913_v38 = vpop.permute.xlu0 %5006 }
 0x4dc   :  { %v3822_v2 = vadd.f32 %v6687_v35, %v17769_v60  ;;  %vm3983_vm9 = vcmp.eq.s32.totalorder %v8298_v0, %v17766_v9  ;;  %v6751_v55 = vsel %vm3982_vm6, 1.0, %v16602_v47  ;;  %v6719_v8 = vsel %vm3662_vm4, 1.0, %v16602_v47  ;;  %5857 = vmatmul.mubr.bf16.gmra.mrb[24].mxu0 %v5628_v6  ;;  %v17781_v9 = vld [vmem:[#allocation30_spill] sm:$0xff] }
 0x4dd   :  { %vm4014_vm10 = vcmp.eq.s32.totalorder %v8289_v28, %v17770_v59  ;;  %vm4015_vm11 = vcmp.eq.s32.totalorder %v8298_v0, %v17770_v59  ;;  %v5645_v46 = vpack.c.bf16 %v5611_v11, %v5609_v17  ;;  %v5644_v20 = vpack.c.bf16 %v5610_v45, %v5608_v7  ;;  %v17778_v45 = vld [vmem:[#allocation100_spill] sm:$0xff] }
 0x4de   :  { %v3853_v16 = vadd.f32 %v6718_v19, %v15738_v63  ;;  %v6720_v25 = vsel %vm3663_vm7, 1.0, %v16602_v47  ;;  %vm3980_vm12 = vcmp.eq.s32.totalorder %v8289_v28, %v17771_v18  ;;  %vm3981_vm13 = vcmp.eq.s32.totalorder %v8298_v0, %v17771_v18 }
 0x4df   :  { %v3823_v37 = vadd.f32 %v6688_v44, %v17772_v31  ;;  %v6752_v5 = vsel %vm3983_vm9, 1.0, %v16602_v47  ;;  %v4174_v36 = vadd.f32 %v6751_v55, %v3822_v2  ;;  %vm4012_vm0 = vcmp.eq.s32.totalorder %v8289_v28, %v17773_v41  ;;  %5920 = vmatprep.mubr.bf16.mxu1 %v5645_v46  ;;  %v15889_v15 = vpop.permute.xlu1 %4651  ;;  %v5311_v60 = vpop.permute.xlu0 %5310 }
 0x4e0   :  { %v3854_v53 = vadd.f32 %v6719_v8, %v17774_v32  ;;  %v6783_v63 = vsel %vm4014_vm10, 1.0, %v16602_v47  ;;  %v6784_v57 = vsel %vm4015_vm11, 1.0, %v16602_v47  ;;  %vm4013_vm1 = vcmp.eq.s32.totalorder %v8298_v0, %v17773_v41  ;;  %5921 = vmatmul.mubr.bf16.gmra.mrb[24].mxu1 %v5644_v20 }
 0x4e1   :  { %v3855_v50 = vadd.f32 %v6720_v25, %v17775_v24  ;;  %v6749_v62 = vsel %vm3980_vm12, 1.0, %v16602_v47  ;;  %v6750_v30 = vsel %vm3981_vm13, 1.0, %v16602_v47  ;;  %vm4332_vm14 = vcmp.eq.s32.totalorder %v8289_v28, %v17776_v13 }
 0x4e2   :  { %v4175_v51 = vadd.f32 %v6752_v5, %v3823_v37  ;;  %vm4333_vm15 = vcmp.eq.s32.totalorder %v8298_v0, %v17776_v13  ;;  %v6781_v1 = vsel %vm4012_vm0, 1.0, %v16602_v47  ;;  %vm4364_vm2 = vcmp.eq.s32.totalorder %v8289_v28, %v17777_v39 }
 0x4e3   :  { %v4206_v3 = vadd.f32 %v6783_v63, %v3854_v53  ;;  %v4207_v61 = vadd.f32 %v6784_v57, %v3855_v50  ;;  %v6782_v52 = vsel %vm4013_vm1, 1.0, %v16602_v47  ;;  %vm4365_vm3 = vcmp.eq.s32.totalorder %v8298_v0, %v17777_v39  ;;  %v4655_v35 = vpop.permute.xlu1 %4654 }
 0x4e4   :  { %v4172_v11 = vadd.f32 %v6749_v62, %v17778_v45  ;;  %v4173_v12 = vadd.f32 %v6750_v30, %v17779_v34  ;;  %v6813_v27 = vsel %vm4332_vm14, 1.0, %v16602_v47  ;;  %vm4334_vm6 = vcmp.eq.s32.totalorder %v8289_v28, %v17780_v26 }
 0x4e5   :  { %v6814_v48 = vsel %vm4333_vm15, 1.0, %v16602_v47  ;;  %v4204_v23 = vadd.f32 %v6781_v1, %v3852_v42  ;;  %v6845_v4 = vsel %vm4364_vm2, 1.0, %v16602_v47  ;;  %vm4335_vm4 = vcmp.eq.s32.totalorder %v8298_v0, %v17780_v26 }
 0x4e6   :  { %v4205_v54 = vadd.f32 %v6782_v52, %v3853_v16  ;;  %v6846_v33 = vsel %vm4365_vm3, 1.0, %v16602_v47  ;;  %vm4366_vm5 = vcmp.eq.s32.totalorder %v8289_v28, %v17781_v9  ;;  %vm4367_vm8 = vcmp.eq.s32.totalorder %v8298_v0, %v17781_v9 }
 0x4e7   :  { %v6815_v10 = vsel %vm4334_vm6, 1.0, %v16602_v47  ;;  %vm4686_vm7 = vcmp.eq.s32.totalorder %v8289_v28, %v15406_v40  ;;  %vm4684_vm9 = vcmp.eq.s32.totalorder %v8289_v28, %v4604_v21  ;;  %vm4685_vm10 = vcmp.eq.s32.totalorder %v8298_v0, %v4604_v21 }
 0x4e8   :  { %v4524_v43 = vadd.f32 %v6813_v27, %v4172_v11  ;;  %v4525_v29 = vadd.f32 %v6814_v48, %v4173_v12  ;;  %v15920_v22 = vadd.f32 %v6845_v4, %v4204_v23  ;;  %v6816_v6 = vsel %vm4335_vm4, 1.0, %v16602_v47  ;;  %v4959_v17 = vpop.permute.xlu1 %4958 }
 0x4e9   :  { %v15923_v19 = vadd.f32 %v6846_v33, %v4205_v54  ;;  %v6847_v14 = vsel %vm4366_vm5, 1.0, %v16602_v47  ;;  %v6848_v42 = vsel %vm4367_vm8, 1.0, %v16602_v47  ;;  %vm4687_vm11 = vcmp.eq.s32.totalorder %v8298_v0, %v15406_v40 }
 0x4ea   :  { %v4526_v58 = vadd.f32 %v6815_v10, %v4174_v36  ;;  %v6879_v56 = vsel %vm4686_vm7, 1.0, %v16602_v47  ;;  %v6877_v44 = vsel %vm4684_vm9, 1.0, %v16602_v47  ;;  %v6878_v7 = vsel %vm4685_vm10, 1.0, %v16602_v47 }
 0x4eb   :  { %v4527_v2 = vadd.f32 %v6816_v6, %v4175_v51  ;;  %vm5036_vm12 = vcmp.eq.s32.totalorder %v8289_v28, %v4956_v49  ;;  %vm5037_vm13 = vcmp.eq.s32.totalorder %v8298_v0, %v4956_v49  ;;  %vm5038_vm0 = vcmp.eq.s32.totalorder %v8289_v28, %v4959_v17 }
 0x4ec   :  { %v4558_v55 = vadd.f32 %v6847_v14, %v4206_v3  ;;  %v4559_v8 = vadd.f32 %v6848_v42, %v4207_v61  ;;  %v6880_v40 = vsel %vm4687_vm11, 1.0, %v16602_v47  ;;  %vm5039_vm1 = vcmp.eq.s32.totalorder %v8298_v0, %v4959_v17  ;;  %v5004_v18 = vpop.permute.xlu1 %5003 }
 0x4ed   :  { %v4878_v59 = vadd.f32 %v6879_v56, %v4526_v58  ;;  %v4876_v21 = vadd.f32 %v6877_v44, %v4524_v43  ;;  %v4877_v46 = vadd.f32 %v6878_v7, %v4525_v29  ;;  %vm5390_vm14 = vcmp.eq.s32.totalorder %v8289_v28, %v5311_v60 }
 0x4ee   :  { %v6941_v20 = vsel %vm5036_vm12, 1.0, %v16602_v47  ;;  %v6942_v16 = vsel %vm5037_vm13, 1.0, %v16602_v47  ;;  %v6943_v25 = vsel %vm5038_vm0, 1.0, %v16602_v47  ;;  %vm5391_vm15 = vcmp.eq.s32.totalorder %v8298_v0, %v5311_v60  ;;  %v7073_v36 = vpop.f32.mrb[0].mxu0 }
 0x4ef   :  { %v4879_v31 = vadd.f32 %v6880_v40, %v4527_v2  ;;  %vm4716_vm2 = vcmp.eq.s32.totalorder %v8289_v28, %v15889_v15  ;;  %vm4718_vm3 = vcmp.eq.s32.totalorder %v8289_v28, %v4655_v35  ;;  %v6944_v37 = vsel %vm5039_vm1, 1.0, %v16602_v47  ;;  %v7074_v57 = vpop.f32.mrb[1].mxu0 }
 0x4f0   :  { %vm4717_vm6 = vcmp.eq.s32.totalorder %v8298_v0, %v15889_v15  ;;  %vm5070_vm4 = vcmp.eq.s32.totalorder %v8289_v28, %v15913_v38  ;;  %vm4719_vm5 = vcmp.eq.s32.totalorder %v8298_v0, %v4655_v35  ;;  %v7007_v5 = vsel %vm5390_vm14, 1.0, %v16602_v47  ;;  %v7076_v30 = vpop.f32.mrb[2].mxu0 }
 0x4f1   :  { %v5228_v41 = vadd.f32 %v6941_v20, %v4876_v21  ;;  %v5229_v32 = vadd.f32 %v6942_v16, %v4877_v46  ;;  %v5230_v53 = vadd.f32 %v6943_v25, %v4878_v59  ;;  %v7008_v63 = vsel %vm5391_vm15, 1.0, %v16602_v47  ;;  %v5308_v51 = vpop.permute.xlu1 %5307  ;;  %v7077_v1 = vpop.f32.mrb[3].mxu0 }
 0x4f2   :  { %v6909_v49 = vsel %vm4716_vm2, 1.0, %v16602_v47  ;;  %v6911_v24 = vsel %vm4718_vm3, 1.0, %v16602_v47  ;;  %v5231_v50 = vadd.f32 %v6944_v37, %v4879_v31  ;;  %v7075_v62 = vadd.f32 %v7074_v57, %v7073_v36 }
 0x4f3   :  { %v6910_v13 = vsel %vm4717_vm6, 1.0, %v16602_v47  ;;  %v6912_v15 = vsel %vm4719_vm5, 1.0, %v16602_v47  ;;  %vm5068_vm8 = vcmp.eq.s32.totalorder %v8289_v28, %v5004_v18  ;;  %vm5069_vm7 = vcmp.eq.s32.totalorder %v8298_v0, %v5004_v18 }
 0x4f4   :  { %7276 = vtanh.f32 %v7075_v62  ;;  %vm5388_vm9 = vcmp.eq.s32.totalorder %v8289_v28, %v5308_v51  ;;  %vm5389_vm10 = vcmp.eq.s32.totalorder %v8298_v0, %v5308_v51  ;;  %v7078_v39 = vadd.f32 %v7077_v1, %v7076_v30 }
 0x4f5   :  { %v4910_v3 = vadd.f32 %v6911_v24, %v4558_v55  ;;  %v5582_v61 = vadd.f32 %v7007_v5, %v5230_v53  ;;  %v7005_v52 = vsel %vm5388_vm9, 1.0, %v16602_v47  ;;  %v7006_v45 = vsel %vm5389_vm10, 1.0, %v16602_v47  ;;  %v5356_v23 = vpop.permute.xlu1 %5355 }
 0x4f6   :  { %v5583_v11 = vadd.f32 %v7008_v63, %v5231_v50  ;;  %v5580_v34 = vadd.f32 %v7005_v52, %v5228_v41  ;;  %v5581_v12 = vadd.f32 %v7006_v45, %v5229_v32  ;;  %7278 = vtanh.f32 %v7078_v39  ;;  %v7121_v4 = vpop.f32.mrb[0].mxu1 }
 0x4f7   :  { %vm5071_vm11 = vcmp.eq.s32.totalorder %v8298_v0, %v15913_v38  ;;  %v4911_v27 = vadd.f32 %v6912_v15, %v4559_v8  ;;  %v6973_v26 = vsel %vm5068_vm8, 1.0, %v16602_v47  ;;  %v6974_v48 = vsel %vm5069_vm7, 1.0, %v16602_v47  ;;  %v7122_v43 = vpop.f32.mrb[1].mxu1 }
 0x4f8   :  { %vm5420_vm12 = vcmp.eq.s32.totalorder %v8289_v28, %v5356_v23  ;;  %vm5421_vm13 = vcmp.eq.s32.totalorder %v8298_v0, %v5356_v23  ;;  %v5631_v35 = vpack.c.bf16 %v5583_v11, %v5581_v12  ;;  %v5630_v54 = vpack.c.bf16 %v5582_v61, %v5580_v34  ;;  %v7124_v42 = vpop.f32.mrb[2].mxu1 }
 0x4f9   :  { %v4908_v33 = vadd.f32 %v6909_v49, %v15920_v22  ;;  %v4909_v9 = vadd.f32 %v6910_v13, %v15923_v19  ;;  %v6975_v10 = vsel %vm5070_vm4, 1.0, %v16602_v47  ;;  %v6976_v29 = vsel %vm5071_vm11, 1.0, %v16602_v47  ;;  %v7125_v7 = vpop.f32.mrb[3].mxu1  ;;  %v5359_v19 = vpop.permute.xlu1 %5358 }
 0x4fa   :  { %v7123_v6 = vadd.f32 %v7122_v43, %v7121_v4  ;;  %v7037_v14 = vsel %vm5420_vm12, 1.0, %v16602_v47  ;;  %5864 = vmatprep.mubr.bf16.mxu0 %v5631_v35  ;;  %v5262_v58 = vadd.f32 %v6975_v10, %v4910_v3  ;;  %v7038_v22 = vsel %vm5421_vm13, 1.0, %v16602_v47 }
 0x4fb   :  { %v5260_v56 = vadd.f32 %v6973_v26, %v4908_v33  ;;  %v5261_v44 = vadd.f32 %v6974_v48, %v4909_v9  ;;  %v5263_v17 = vadd.f32 %v6976_v29, %v4911_v27  ;;  %5865 = vmatmul.mubr.bf16.gmra.mrb[28].mxu0 %v5630_v54  ;;  %v7126_v38 = vadd.f32 %v7125_v7, %v7124_v42 }
 0x4fc   :  { %7280 = vtanh.f32 %v7123_v6  ;;  %vm5422_vm0 = vcmp.eq.s32.totalorder %v8289_v28, %v5359_v19  ;;  %vm5423_vm1 = vcmp.eq.s32.totalorder %v8298_v0, %v5359_v19 }
 0x4fd   :  { %v5612_v60 = vadd.f32 %v7037_v14, %v5260_v56  ;;  %v7039_v2 = vsel %vm5422_vm0, 1.0, %v16602_v47  ;;  %v7040_v55 = vsel %vm5423_vm1, 1.0, %v16602_v47  ;;  %v5613_v40 = vadd.f32 %v7038_v22, %v5261_v44 }
 0x4fe   :  { %v7277_v8 = vpop.eup %7276  ;;  %7282 = vtanh.f32 %v7126_v38  ;;  %v5614_v59 = vadd.f32 %v7039_v2, %v5262_v58  ;;  %v5615_v21 = vadd.f32 %v7040_v55, %v5263_v17 }
 0x4ff   :  { %5969 = vst [vmem:[#allocation2] sm:$0xff] %v7277_v8 }
 0x500   :  { %v7279_v46 = vpop.eup %7278  ;;  %v5647_v20 = vpack.c.bf16 %v5615_v21, %v5613_v40  ;;  %v5646_v16 = vpack.c.bf16 %v5614_v59, %v5612_v60 }
 0x501   :  { %5970 = vst [vmem:[#allocation2 + $0x8] sm:$0xff] %v7279_v46 }
 0x502   :  { %5928 = vmatprep.mubr.bf16.mxu1 %v5647_v20 }
 0x503   :  { %5929 = vmatmul.mubr.bf16.gmra.mrb[28].mxu1 %v5646_v16 }
 0x506   :  { %v7281_v28 = vpop.eup %7280 }
 0x507   :  { %5985 = vst [vmem:[#allocation2 + $0x80] sm:$0xff] %v7281_v28 }
 0x508   :  { %v7283_v0 = vpop.eup %7282 }
 0x509   :  { %5986 = vst [vmem:[#allocation2 + $0x88] sm:$0xff] %v7283_v0 }
 0x50a   :  { %v7079_v25 = vpop.f32.mrb[4].mxu0 }
 0x50b   :  { %v7080_v18 = vpop.f32.mrb[5].mxu0 }
 0x50c   :  { %v7081_v31 = vadd.f32 %v7080_v18, %v7079_v25  ;;  %v7082_v47 = vpop.f32.mrb[6].mxu0 }
 0x50d   :  { %v7083_v37 = vpop.f32.mrb[7].mxu0 }
 0x50e   :  { %7284 = vtanh.f32 %v7081_v31  ;;  %v7084_v5 = vadd.f32 %v7083_v37, %v7082_v47 }
 0x510   :  { %7286 = vtanh.f32 %v7084_v5 }
 0x511   :  { %v7127_v36 = vpop.f32.mrb[4].mxu1 }
 0x512   :  { %v7128_v41 = vpop.f32.mrb[5].mxu1 }
 0x513   :  { %v7129_v32 = vadd.f32 %v7128_v41, %v7127_v36  ;;  %v7130_v53 = vpop.f32.mrb[6].mxu1 }
 0x514   :  { %v7131_v63 = vpop.f32.mrb[7].mxu1 }
 0x515   :  { %7288 = vtanh.f32 %v7129_v32  ;;  %v7132_v57 = vadd.f32 %v7131_v63, %v7130_v53 }
 0x517   :  { %7290 = vtanh.f32 %v7132_v57 }
 0x518   :  { %v7285_v49 = vpop.eup %7284 }
 0x519   :  { %5971 = vst [vmem:[#allocation2 + $0x10] sm:$0xff] %v7285_v49 }
 0x51a   :  { %v7287_v24 = vpop.eup %7286 }
 0x51b   :  { %5972 = vst [vmem:[#allocation2 + $0x18] sm:$0xff] %v7287_v24 }
 0x51f   :  { %v7289_v50 = vpop.eup %7288 }
 0x520   :  { %5987 = vst [vmem:[#allocation2 + $0x90] sm:$0xff] %v7289_v50 }
 0x521   :  { %v7291_v62 = vpop.eup %7290 }
 0x522   :  { %5988 = vst [vmem:[#allocation2 + $0x98] sm:$0xff] %v7291_v62 }
 0x529   :  { %v7085_v30 = vpop.f32.mrb[8].mxu0 }
 0x52a   :  { %v7086_v13 = vpop.f32.mrb[9].mxu0 }
 0x52b   :  { %v7087_v15 = vadd.f32 %v7086_v13, %v7085_v30  ;;  %v7088_v51 = vpop.f32.mrb[10].mxu0 }
 0x52c   :  { %v7089_v1 = vpop.f32.mrb[11].mxu0 }
 0x52d   :  { %7292 = vtanh.f32 %v7087_v15  ;;  %v7090_v39 = vadd.f32 %v7089_v1, %v7088_v51  ;;  %v7133_v3 = vpop.f32.mrb[8].mxu1 }
 0x52e   :  { %v7134_v61 = vpop.f32.mrb[9].mxu1 }
 0x52f   :  { %7294 = vtanh.f32 %v7090_v39  ;;  %v7135_v52 = vadd.f32 %v7134_v61, %v7133_v3  ;;  %v7136_v45 = vpop.f32.mrb[10].mxu1 }
 0x530   :  { %v7137_v11 = vpop.f32.mrb[11].mxu1 }
 0x531   :  { %7296 = vtanh.f32 %v7135_v52  ;;  %v7138_v34 = vadd.f32 %v7137_v11, %v7136_v45 }
 0x533   :  { %7298 = vtanh.f32 %v7138_v34 }
 0x537   :  { %v7293_v12 = vpop.eup %7292 }
 0x538   :  { %5973 = vst [vmem:[#allocation2 + $0x20] sm:$0xff] %v7293_v12 }
 0x539   :  { %v7295_v27 = vpop.eup %7294 }
 0x53a   :  { %5974 = vst [vmem:[#allocation2 + $0x28] sm:$0xff] %v7295_v27 }
 0x53b   :  { %v7297_v26 = vpop.eup %7296 }
 0x53c   :  { %5989 = vst [vmem:[#allocation2 + $0xa0] sm:$0xff] %v7297_v26 }
 0x53d   :  { %v7299_v48 = vpop.eup %7298 }
 0x53e   :  { %5990 = vst [vmem:[#allocation2 + $0xa8] sm:$0xff] %v7299_v48 }
 0x548   :  { %v7091_v23 = vpop.f32.mrb[12].mxu0 }
 0x549   :  { %v7092_v4 = vpop.f32.mrb[13].mxu0 }
 0x54a   :  { %v7093_v35 = vadd.f32 %v7092_v4, %v7091_v23  ;;  %v7094_v54 = vpop.f32.mrb[14].mxu0 }
 0x54b   :  { %v7095_v33 = vpop.f32.mrb[15].mxu0 }
 0x54c   :  { %7300 = vtanh.f32 %v7093_v35  ;;  %v7096_v9 = vadd.f32 %v7095_v33, %v7094_v54 }
 0x54e   :  { %7302 = vtanh.f32 %v7096_v9 }
 0x550   :  { %v7139_v10 = vpop.f32.mrb[12].mxu1 }
 0x551   :  { %v7140_v43 = vpop.f32.mrb[13].mxu1 }
 0x552   :  { %v7141_v29 = vadd.f32 %v7140_v43, %v7139_v10  ;;  %v7142_v6 = vpop.f32.mrb[14].mxu1 }
 0x553   :  { %v7143_v14 = vpop.f32.mrb[15].mxu1 }
 0x554   :  { %7304 = vtanh.f32 %v7141_v29  ;;  %v7144_v42 = vadd.f32 %v7143_v14, %v7142_v6 }
 0x556   :  { %v7301_v58 = vpop.eup %7300  ;;  %7306 = vtanh.f32 %v7144_v42 }
 0x557   :  { %5975 = vst [vmem:[#allocation2 + $0x30] sm:$0xff] %v7301_v58 }
 0x558   :  { %v7303_v56 = vpop.eup %7302 }
 0x559   :  { %5976 = vst [vmem:[#allocation2 + $0x38] sm:$0xff] %v7303_v56 }
 0x55e   :  { %v7305_v44 = vpop.eup %7304 }
 0x55f   :  { %5991 = vst [vmem:[#allocation2 + $0xb0] sm:$0xff] %v7305_v44 }
 0x560   :  { %v7307_v22 = vpop.eup %7306 }
 0x561   :  { %5992 = vst [vmem:[#allocation2 + $0xb8] sm:$0xff] %v7307_v22 }
 0x56c   :  { %v7097_v7 = vpop.f32.mrb[16].mxu0 }
 0x56d   :  { %v7098_v19 = vpop.f32.mrb[17].mxu0 }
 0x56e   :  { %v7099_v17 = vadd.f32 %v7098_v19, %v7097_v7  ;;  %v7100_v38 = vpop.f32.mrb[18].mxu0 }
 0x56f   :  { %v7101_v60 = vpop.f32.mrb[19].mxu0 }
 0x570   :  { %7308 = vtanh.f32 %v7099_v17  ;;  %v7102_v2 = vadd.f32 %v7101_v60, %v7100_v38  ;;  %v7145_v55 = vpop.f32.mrb[16].mxu1 }
 0x571   :  { %v7146_v8 = vpop.f32.mrb[17].mxu1 }
 0x572   :  { %7310 = vtanh.f32 %v7102_v2  ;;  %v7147_v40 = vadd.f32 %v7146_v8, %v7145_v55  ;;  %v7148_v59 = vpop.f32.mrb[18].mxu1 }
 0x573   :  { %v7149_v21 = vpop.f32.mrb[19].mxu1 }
 0x574   :  { %7312 = vtanh.f32 %v7147_v40  ;;  %v7150_v46 = vadd.f32 %v7149_v21, %v7148_v59 }
 0x576   :  { %7314 = vtanh.f32 %v7150_v46 }
 0x57a   :  { %v7309_v20 = vpop.eup %7308 }
 0x57b   :  { %5977 = vst [vmem:[#allocation2 + $0x40] sm:$0xff] %v7309_v20 }
 0x57c   :  { %v7311_v16 = vpop.eup %7310 }
 0x57d   :  { %5978 = vst [vmem:[#allocation2 + $0x48] sm:$0xff] %v7311_v16 }
 0x57e   :  { %v7313_v28 = vpop.eup %7312 }
 0x57f   :  { %5993 = vst [vmem:[#allocation2 + $0xc0] sm:$0xff] %v7313_v28 }
 0x580   :  { %v7315_v0 = vpop.eup %7314 }
 0x581   :  { %5994 = vst [vmem:[#allocation2 + $0xc8] sm:$0xff] %v7315_v0 }
 0x58b   :  { %v7103_v25 = vpop.f32.mrb[20].mxu0 }
 0x58c   :  { %v7104_v18 = vpop.f32.mrb[21].mxu0 }
 0x58d   :  { %v7105_v31 = vadd.f32 %v7104_v18, %v7103_v25  ;;  %v7106_v47 = vpop.f32.mrb[22].mxu0 }
 0x58e   :  { %v7107_v37 = vpop.f32.mrb[23].mxu0 }
 0x58f   :  { %7316 = vtanh.f32 %v7105_v31  ;;  %v7108_v5 = vadd.f32 %v7107_v37, %v7106_v47 }
 0x591   :  { %7318 = vtanh.f32 %v7108_v5 }
 0x594   :  { %v7151_v36 = vpop.f32.mrb[20].mxu1 }
 0x595   :  { %v7152_v41 = vpop.f32.mrb[21].mxu1 }
 0x596   :  { %v7153_v32 = vadd.f32 %v7152_v41, %v7151_v36  ;;  %v7154_v53 = vpop.f32.mrb[22].mxu1 }
 0x597   :  { %v7155_v63 = vpop.f32.mrb[23].mxu1 }
 0x598   :  { %7320 = vtanh.f32 %v7153_v32  ;;  %v7156_v57 = vadd.f32 %v7155_v63, %v7154_v53 }
 0x599   :  { %v7317_v49 = vpop.eup %7316 }
 0x59a   :  { %5979 = vst [vmem:[#allocation2 + $0x50] sm:$0xff] %v7317_v49  ;;  %7322 = vtanh.f32 %v7156_v57 }
 0x59b   :  { %v7319_v24 = vpop.eup %7318 }
 0x59c   :  { %5980 = vst [vmem:[#allocation2 + $0x58] sm:$0xff] %v7319_v24 }
 0x5a2   :  { %v7321_v50 = vpop.eup %7320 }
 0x5a3   :  { %5995 = vst [vmem:[#allocation2 + $0xd0] sm:$0xff] %v7321_v50 }
 0x5a4   :  { %v7323_v62 = vpop.eup %7322 }
 0x5a5   :  { %5996 = vst [vmem:[#allocation2 + $0xd8] sm:$0xff] %v7323_v62 }
 0x5af   :  { %v7109_v30 = vpop.f32.mrb[24].mxu0 }
 0x5b0   :  { %v7110_v13 = vpop.f32.mrb[25].mxu0 }
 0x5b1   :  { %v7111_v15 = vadd.f32 %v7110_v13, %v7109_v30  ;;  %v7112_v51 = vpop.f32.mrb[26].mxu0 }
 0x5b2   :  { %v7113_v1 = vpop.f32.mrb[27].mxu0 }
 0x5b3   :  { %7324 = vtanh.f32 %v7111_v15  ;;  %v7114_v39 = vadd.f32 %v7113_v1, %v7112_v51  ;;  %v7157_v3 = vpop.f32.mrb[24].mxu1 }
 0x5b4   :  { %v7158_v61 = vpop.f32.mrb[25].mxu1 }
 0x5b5   :  { %7326 = vtanh.f32 %v7114_v39  ;;  %v7159_v52 = vadd.f32 %v7158_v61, %v7157_v3  ;;  %v7160_v45 = vpop.f32.mrb[26].mxu1 }
 0x5b6   :  { %v7161_v11 = vpop.f32.mrb[27].mxu1 }
 0x5b7   :  { %7328 = vtanh.f32 %v7159_v52  ;;  %v7162_v34 = vadd.f32 %v7161_v11, %v7160_v45 }
 0x5b9   :  { %7330 = vtanh.f32 %v7162_v34 }
 0x5bd   :  { %v7325_v12 = vpop.eup %7324 }
 0x5be   :  { %5981 = vst [vmem:[#allocation2 + $0x60] sm:$0xff] %v7325_v12 }
 0x5bf   :  { %v7327_v27 = vpop.eup %7326 }
 0x5c0   :  { %5982 = vst [vmem:[#allocation2 + $0x68] sm:$0xff] %v7327_v27 }
 0x5c1   :  { %v7329_v26 = vpop.eup %7328 }
 0x5c2   :  { %5997 = vst [vmem:[#allocation2 + $0xe0] sm:$0xff] %v7329_v26 }
 0x5c3   :  { %v7331_v48 = vpop.eup %7330 }
 0x5c4   :  { %5998 = vst [vmem:[#allocation2 + $0xe8] sm:$0xff] %v7331_v48 }
 0x5ce   :  { %v7115_v23 = vpop.f32.mrb[28].mxu0 }
 0x5cf   :  { %v7116_v4 = vpop.f32.mrb[29].mxu0 }
 0x5d0   :  { %v7117_v35 = vadd.f32 %v7116_v4, %v7115_v23  ;;  %v7118_v54 = vpop.f32.mrb[30].mxu0 }
 0x5d1   :  { %v7119_v33 = vpop.f32.mrb[31].mxu0 }
 0x5d2   :  { %7332 = vtanh.f32 %v7117_v35  ;;  %v7120_v9 = vadd.f32 %v7119_v33, %v7118_v54 }
 0x5d4   :  { %7334 = vtanh.f32 %v7120_v9 }
 0x5d6   :  { %v7163_v10 = vpop.f32.mrb[28].mxu1 }
 0x5d7   :  { %v7164_v43 = vpop.f32.mrb[29].mxu1 }
 0x5d8   :  { %v7165_v29 = vadd.f32 %v7164_v43, %v7163_v10  ;;  %v7166_v6 = vpop.f32.mrb[30].mxu1 }
 0x5d9   :  { %v7167_v14 = vpop.f32.mrb[31].mxu1 }
 0x5da   :  { %7336 = vtanh.f32 %v7165_v29  ;;  %v7168_v42 = vadd.f32 %v7167_v14, %v7166_v6 }
 0x5dc   :  { %v7333_v58 = vpop.eup %7332  ;;  %7338 = vtanh.f32 %v7168_v42 }
 0x5dd   :  { %5983 = vst [vmem:[#allocation2 + $0x70] sm:$0xff] %v7333_v58 }
 0x5de   :  { %v7335_v56 = vpop.eup %7334 }
 0x5df   :  { %5984 = vst [vmem:[#allocation2 + $0x78] sm:$0xff] %v7335_v56 }
 0x5e4   :  { %v7337_v44 = vpop.eup %7336 }
 0x5e5   :  { %5999 = vst [vmem:[#allocation2 + $0xf0] sm:$0xff] %v7337_v44 }
 0x5e6   :  { %v7339_v22 = vpop.eup %7338 }
 0x5e7   :  { %6000 = vst [vmem:[#allocation2 + $0xf8] sm:$0xff] %v7339_v22 }
 0x5e8   :  { %7485 = shalt.err (!%p7482_p4)
}
 0x5e9   :  { %s7486_s10 = scalar_lea.hbm %s16000_s2, 4096 }
 0x5ea   :  { %p7487_p5 = scmp.ne.s32.totalorder %s16000_s2, %s7486_s10  ;;  %p7490_p6 = scmp.lt.u32.totalorder %s7486_s10, %s16000_s2 }
 0x5ec   :  { %p7492_p7 = pnand %p7490_p6, %p7487_p5 }
 0x5ee   :  { %7495 = shalt.err (!%p7492_p7)
}
 0x5ef   :  { %s7516_s15 = smov 128   ;;  %s7517_s16 = smov 8  }
 0x5f0   :  { %6012 = dma.vmem_to_hbm [thread:$0]  %s6007_s6, 4096, %s16000_s2, [#allocation3], %s7516_s15, %s7516_s15, %s7517_s16  }
 0x5f1   :  { %7496 = dma.done.wait [#allocation3], 4096  }
 0x5f2   :  { %7497 = vsyncadd [#allocation3], 4294963200 }
 0x5f3   :  { %6016 = vsyncpa [#allocation3], 1 }

</bundles_post_ra>
